<compile_context>
chip_gen: v7x
topology: tpu7x:2x2x1
jax: 0.10.0
libtpu: 0.0.40
codegen_flags: <defaults>
</compile_context>

<pallas_src>
import functools

import jax
import jax.numpy as jnp
from jax import lax
from jax.experimental import pallas as pl
from jax.experimental.pallas import tpu as pltpu

LANE = 128


def _round_up(x, m):
    return (x + m - 1) // m * m


def _fused_convblock_kernel(x_ref, w1_ref, w2_ref, o_ref, xpad1, xpad2,
                            *, H, W, eps, neg_slope):
    """One grid step = one batch sample; both fused layers.

    x_ref  : [1, H, W, CIP]        bf16 channel-padded input (NHWC)
    w1_ref : [9, CIP, COP]         bf16 layer-1 taps (tap = kh*3 + kw), zero-padded
    w2_ref : [9, COP, COP]         bf16 layer-2 taps, zero-padded
    o_ref  : [1, H, W, COP]        f32 output (padded channels are exact zeros)
    xpad1  : VMEM [H+2, W+2, CIP]  bf16 scratch (spatially padded layer-1 input)
    xpad2  : VMEM [H+2, W+2, COP]  bf16 scratch (spatially padded layer-2 input)
    """
    CIP = x_ref.shape[3]
    COP = o_ref.shape[3]
    n_spatial = H * W
    inv_n = 1.0 / float(n_spatial)

    # Zero the halo scratches (they persist across grid steps), then place the
    # sample into the interior. Tiny cost vs. the matmuls.
    xpad1[...] = jnp.zeros_like(xpad1)
    xpad2[...] = jnp.zeros_like(xpad2)
    xpad1[1:H + 1, 1:W + 1, :] = x_ref[0]

    def conv_in_lrelu(xpad, w_ref, cin_p):
        # 3x3 conv as 9 shifted-window matmuls, K = cin_p (lane-dense 128),
        # bf16 MXU inputs, f32 accumulation.
        acc = jnp.zeros((n_spatial, COP), jnp.float32)
        for kh in range(3):
            for kw in range(3):
                win = xpad[kh:kh + H, kw:kw + W, :]            # (H, W, cin_p) bf16
                acc = acc + jnp.dot(
                    win.reshape(n_spatial, cin_p),
                    w_ref[kh * 3 + kw],
                    preferred_element_type=jnp.float32,
                )
        # InstanceNorm2d (affine=False, biased variance, eps): one-pass stats.
        mean = jnp.sum(acc, axis=0, keepdims=True) * inv_n           # (1, COP)
        mean_sq = jnp.sum(acc * acc, axis=0, keepdims=True) * inv_n
        var = jnp.maximum(mean_sq - mean * mean, 0.0)
        yn = (acc - mean) * lax.rsqrt(var + eps)
        # LeakyReLU(0.2); Dropout2d is identity in eval mode.
        return jnp.where(yn >= 0, yn, neg_slope * yn)                # (H*W, COP) f32

    y1 = conv_in_lrelu(xpad1, w1_ref, CIP)
    # Intermediate stays in VMEM (no HBM round trip); bf16 feeds the 2nd conv's MXU.
    xpad2[1:H + 1, 1:W + 1, :] = y1.reshape(H, W, COP).astype(xpad2.dtype)
    y2 = conv_in_lrelu(xpad2, w2_ref, COP)
    o_ref[0] = y2.reshape(H, W, COP).astype(o_ref.dtype)


@jax.jit
def conv_block(x_nchw, w1, w2, drop_prob=0.0):
    """ConvBlock forward (eval mode).

    x_nchw : [B, in_chans, H, W]            (PyTorch NCHW convention)
    w1     : [3, 3, in_chans, out_chans]    (HWIO; transpose of PyTorch OIHW)
    w2     : [3, 3, out_chans, out_chans]
    returns: [B, out_chans, H, W] float32
    """
    del drop_prob  # eval-mode Dropout2d is identity
    B, Ci, H, W = x_nchw.shape
    Co = w2.shape[-1]
    CIP = _round_up(Ci, LANE)
    COP = _round_up(Co, LANE)

    # NCHW -> NHWC once at the block boundary; cast to bf16 and lane-pad channels.
    x = jnp.transpose(x_nchw, (0, 2, 3, 1)).astype(jnp.bfloat16)
    x = jnp.pad(x, ((0, 0), (0, 0), (0, 0), (0, CIP - Ci)))

    w1p = jnp.zeros((9, CIP, COP), jnp.bfloat16).at[:, :Ci, :Co].set(
        w1.reshape(9, Ci, Co).astype(jnp.bfloat16))
    w2p = jnp.zeros((9, COP, COP), jnp.bfloat16).at[:, :Co, :Co].set(
        w2.reshape(9, Co, Co).astype(jnp.bfloat16))

    kernel = functools.partial(
        _fused_convblock_kernel, H=H, W=W, eps=1e-5, neg_slope=0.2)

    out = pl.pallas_call(
        kernel,
        out_shape=jax.ShapeDtypeStruct((B, H, W, COP), jnp.float32),
        grid=(B,),
        in_specs=[
            pl.BlockSpec((1, H, W, CIP), lambda b: (b, 0, 0, 0)),
            pl.BlockSpec((9, CIP, COP), lambda b: (0, 0, 0)),   # weights stay resident
            pl.BlockSpec((9, COP, COP), lambda b: (0, 0, 0)),
        ],
        out_specs=pl.BlockSpec((1, H, W, COP), lambda b: (b, 0, 0, 0)),
        scratch_shapes=[
            pltpu.VMEM((H + 2, W + 2, CIP), jnp.bfloat16),
            pltpu.VMEM((H + 2, W + 2, COP), jnp.bfloat16),
        ],
        compiler_params=pltpu.CompilerParams(
            dimension_semantics=("parallel",),   # batch axis -> both TCs on v7x
            vmem_limit_bytes=32 * 1024 * 1024,   # explicit; fits v5e/v6e/v7x
        ),
    )(x, w1p, w2p)

    out = out[..., :Co]                          # drop channel padding
    return jnp.transpose(out, (0, 3, 1, 2))      # NHWC -> NCHW


def _conv_block_ref(x_nchw, w1, w2):
    """Pure-JAX reference, mimicking the kernel's bf16-input matmuls."""
    def layer(x, w):
        y = lax.conv_general_dilated(
            x, w, window_strides=(1, 1), padding="SAME",
            dimension_numbers=("NCHW", "HWIO", "NCHW"),
            precision=lax.Precision.HIGHEST)
        mean = jnp.mean(y, axis=(2, 3), keepdims=True)
        var = jnp.mean((y - mean) ** 2, axis=(2, 3), keepdims=True)
        yn = (y - mean) * lax.rsqrt(var + 1e-5)
        return jnp.where(yn >= 0, yn, 0.2 * yn)

    bf = lambda a: a.astype(jnp.bfloat16).astype(jnp.float32)
    y1 = layer(bf(x_nchw), bf(w1))
    return layer(bf(y1), bf(w2))


if __name__ == "__main__":
    B, IN_CH, OUT_CH, H, W = 2, 4, 8, 16, 16
    DROP_PROB = 0.1  # unused in eval mode

    key = jax.random.PRNGKey(0)
    kx, kw1, kw2 = jax.random.split(key, 3)

    x = jax.random.normal(kx, (B, IN_CH, H, W), dtype=jnp.float32)
    # Deterministic synthetic conv weights (HWIO layout; PyTorch stores OIHW).
    w1 = jax.random.normal(kw1, (3, 3, IN_CH, OUT_CH), dtype=jnp.float32) * 0.1
    w2 = jax.random.normal(kw2, (3, 3, OUT_CH, OUT_CH), dtype=jnp.float32) * 0.1

    out = conv_block(x, w1, w2, DROP_PROB)
    out = jax.block_until_ready(out)
    assert out.shape == (B, OUT_CH, H, W), out.shape
    assert bool(jnp.isfinite(out).all())

    ref = _conv_block_ref(x, w1, w2)
    max_err = float(jnp.max(jnp.abs(out - ref)))
    assert max_err < 1e-2, f"max |kernel - ref| = {max_err}"

    print("KERNEL_OK")
</pallas_src>

<mosaic_0001>
module attributes {stable_mosaic.version = 11 : i64} {
  func.func @_fused_convblock_kernel(%arg0: i32, %arg1: memref<1x16x16x128xbf16, #tpu.memory_space<vmem>>, %arg2: memref<9x128x128xbf16, #tpu.memory_space<vmem>>, %arg3: memref<9x128x128xbf16, #tpu.memory_space<vmem>>, %arg4: memref<1x16x16x128xf32, #tpu.memory_space<vmem>>, %arg5: memref<18x18x128xbf16, #tpu.memory_space<vmem>>, %arg6: memref<18x18x128xbf16, #tpu.memory_space<vmem>>) attributes {dimension_semantics = [#tpu.dimension_semantics<parallel>], iteration_bounds = array<i64: 2>, scalar_prefetch = 0 : i64, scratch_operands = 2 : i64, tpu.core_type = #tpu.core_type<tc>, window_params = [{transform_indices = @transform_0, window_bounds = array<i64: 1, 16, 16, 128>}, {pipeline_mode = #tpu.pipeline_mode<synchronous>, transform_indices = @transform_1, window_bounds = array<i64: 9, 128, 128>}, {pipeline_mode = #tpu.pipeline_mode<synchronous>, transform_indices = @transform_2, window_bounds = array<i64: 9, 128, 128>}, {transform_indices = @transform_3, window_bounds = array<i64: 1, 16, 16, 128>}]} {
    %cst = arith.constant 0.000000e+00 : bf16
    %0 = vector.broadcast %cst : bf16 to vector<18x18x128xbf16>
    %c0 = arith.constant 0 : index
    %c0_0 = arith.constant 0 : index
    %c0_1 = arith.constant 0 : index
    %1 = vector.load %arg5[%c0, %c0_0, %c0_1] : memref<18x18x128xbf16, #tpu.memory_space<vmem>>, vector<18x18x128xbf16>
    tpu.vector_store %arg5[%c0, %c0_0, %c0_1], %0 {strides = array<i32>} : memref<18x18x128xbf16, #tpu.memory_space<vmem>>, vector<18x18x128xbf16>,
    %cst_2 = arith.constant 0.000000e+00 : bf16
    %2 = vector.broadcast %cst_2 : bf16 to vector<18x18x128xbf16>
    %c0_3 = arith.constant 0 : index
    %c0_4 = arith.constant 0 : index
    %c0_5 = arith.constant 0 : index
    %3 = vector.load %arg6[%c0_3, %c0_4, %c0_5] : memref<18x18x128xbf16, #tpu.memory_space<vmem>>, vector<18x18x128xbf16>
    tpu.vector_store %arg6[%c0_3, %c0_4, %c0_5], %2 {strides = array<i32>} : memref<18x18x128xbf16, #tpu.memory_space<vmem>>, vector<18x18x128xbf16>,
    %c0_6 = arith.constant 0 : index
    %c0_7 = arith.constant 0 : index
    %c0_8 = arith.constant 0 : index
    %c0_9 = arith.constant 0 : index
    %4 = vector.load %arg1[%c0_6, %c0_7, %c0_8, %c0_9] : memref<1x16x16x128xbf16, #tpu.memory_space<vmem>>, vector<1x16x16x128xbf16>
    %5 = vector.shape_cast %4 : vector<1x16x16x128xbf16> to vector<16x16x128xbf16>
    %c1 = arith.constant 1 : index
    %c1_10 = arith.constant 1 : index
    %c0_11 = arith.constant 0 : index
    %6 = vector.load %arg5[%c1, %c1_10, %c0_11] : memref<18x18x128xbf16, #tpu.memory_space<vmem>>, vector<16x16x128xbf16>
    tpu.vector_store %arg5[%c1, %c1_10, %c0_11], %5 {strides = array<i32>} : memref<18x18x128xbf16, #tpu.memory_space<vmem>>, vector<16x16x128xbf16>,
    %cst_12 = arith.constant 0.000000e+00 : f32
    %7 = vector.broadcast %cst_12 : f32 to vector<256x128xf32>
    %c0_13 = arith.constant 0 : index
    %c0_14 = arith.constant 0 : index
    %c0_15 = arith.constant 0 : index
    %8 = vector.load %arg5[%c0_13, %c0_14, %c0_15] : memref<18x18x128xbf16, #tpu.memory_space<vmem>>, vector<16x16x128xbf16>
    %9 = vector.shape_cast %8 : vector<16x16x128xbf16> to vector<256x128xbf16>
    %c0_16 = arith.constant 0 : index
    %c0_17 = arith.constant 0 : index
    %c0_18 = arith.constant 0 : index
    %10 = vector.load %arg2[%c0_16, %c0_17, %c0_18] : memref<9x128x128xbf16, #tpu.memory_space<vmem>>, vector<1x128x128xbf16>
    %11 = vector.shape_cast %10 : vector<1x128x128xbf16> to vector<128x128xbf16>
    %cst_19 = arith.constant dense<0.000000e+00> : vector<256x128xf32>
    %12 = tpu.matmul %9, %11, %cst_19 {dimension_numbers = #tpu.dot_dimension_numbers<[1], [0], [0], [1], [0, 0, 1, 1], [], []>} : vector<256x128xbf16>, vector<128x128xbf16>, vector<256x128xf32> -> vector<256x128xf32>
    %13 = arith.addf %7, %12 : vector<256x128xf32>
    %c0_20 = arith.constant 0 : index
    %c1_21 = arith.constant 1 : index
    %c0_22 = arith.constant 0 : index
    %14 = vector.load %arg5[%c0_20, %c1_21, %c0_22] : memref<18x18x128xbf16, #tpu.memory_space<vmem>>, vector<16x16x128xbf16>
    %15 = vector.shape_cast %14 : vector<16x16x128xbf16> to vector<256x128xbf16>
    %c1_23 = arith.constant 1 : index
    %c0_24 = arith.constant 0 : index
    %c0_25 = arith.constant 0 : index
    %16 = vector.load %arg2[%c1_23, %c0_24, %c0_25] : memref<9x128x128xbf16, #tpu.memory_space<vmem>>, vector<1x128x128xbf16>
    %17 = vector.shape_cast %16 : vector<1x128x128xbf16> to vector<128x128xbf16>
    %cst_26 = arith.constant dense<0.000000e+00> : vector<256x128xf32>
    %18 = tpu.matmul %15, %17, %cst_26 {dimension_numbers = #tpu.dot_dimension_numbers<[1], [0], [0], [1], [0, 0, 1, 1], [], []>} : vector<256x128xbf16>, vector<128x128xbf16>, vector<256x128xf32> -> vector<256x128xf32>
    %19 = arith.addf %13, %18 : vector<256x128xf32>
    %c0_27 = arith.constant 0 : index
    %c2 = arith.constant 2 : index
    %c0_28 = arith.constant 0 : index
    %20 = vector.load %arg5[%c0_27, %c2, %c0_28] : memref<18x18x128xbf16, #tpu.memory_space<vmem>>, vector<16x16x128xbf16>
    %21 = vector.shape_cast %20 : vector<16x16x128xbf16> to vector<256x128xbf16>
    %c2_29 = arith.constant 2 : index
    %c0_30 = arith.constant 0 : index
    %c0_31 = arith.constant 0 : index
    %22 = vector.load %arg2[%c2_29, %c0_30, %c0_31] : memref<9x128x128xbf16, #tpu.memory_space<vmem>>, vector<1x128x128xbf16>
    %23 = vector.shape_cast %22 : vector<1x128x128xbf16> to vector<128x128xbf16>
    %cst_32 = arith.constant dense<0.000000e+00> : vector<256x128xf32>
    %24 = tpu.matmul %21, %23, %cst_32 {dimension_numbers = #tpu.dot_dimension_numbers<[1], [0], [0], [1], [0, 0, 1, 1], [], []>} : vector<256x128xbf16>, vector<128x128xbf16>, vector<256x128xf32> -> vector<256x128xf32>
    %25 = arith.addf %19, %24 : vector<256x128xf32>
    %c1_33 = arith.constant 1 : index
    %c0_34 = arith.constant 0 : index
    %c0_35 = arith.constant 0 : index
    %26 = vector.load %arg5[%c1_33, %c0_34, %c0_35] : memref<18x18x128xbf16, #tpu.memory_space<vmem>>, vector<16x16x128xbf16>
    %27 = vector.shape_cast %26 : vector<16x16x128xbf16> to vector<256x128xbf16>
    %c3 = arith.constant 3 : index
    %c0_36 = arith.constant 0 : index
    %c0_37 = arith.constant 0 : index
    %28 = vector.load %arg2[%c3, %c0_36, %c0_37] : memref<9x128x128xbf16, #tpu.memory_space<vmem>>, vector<1x128x128xbf16>
    %29 = vector.shape_cast %28 : vector<1x128x128xbf16> to vector<128x128xbf16>
    %cst_38 = arith.constant dense<0.000000e+00> : vector<256x128xf32>
    %30 = tpu.matmul %27, %29, %cst_38 {dimension_numbers = #tpu.dot_dimension_numbers<[1], [0], [0], [1], [0, 0, 1, 1], [], []>} : vector<256x128xbf16>, vector<128x128xbf16>, vector<256x128xf32> -> vector<256x128xf32>
    %31 = arith.addf %25, %30 : vector<256x128xf32>
    %c1_39 = arith.constant 1 : index
    %c1_40 = arith.constant 1 : index
    %c0_41 = arith.constant 0 : index
    %32 = vector.load %arg5[%c1_39, %c1_40, %c0_41] : memref<18x18x128xbf16, #tpu.memory_space<vmem>>, vector<16x16x128xbf16>
    %33 = vector.shape_cast %32 : vector<16x16x128xbf16> to vector<256x128xbf16>
    %c4 = arith.constant 4 : index
    %c0_42 = arith.constant 0 : index
    %c0_43 = arith.constant 0 : index
    %34 = vector.load %arg2[%c4, %c0_42, %c0_43] : memref<9x128x128xbf16, #tpu.memory_space<vmem>>, vector<1x128x128xbf16>
    %35 = vector.shape_cast %34 : vector<1x128x128xbf16> to vector<128x128xbf16>
    %cst_44 = arith.constant dense<0.000000e+00> : vector<256x128xf32>
    %36 = tpu.matmul %33, %35, %cst_44 {dimension_numbers = #tpu.dot_dimension_numbers<[1], [0], [0], [1], [0, 0, 1, 1], [], []>} : vector<256x128xbf16>, vector<128x128xbf16>, vector<256x128xf32> -> vector<256x128xf32>
    %37 = arith.addf %31, %36 : vector<256x128xf32>
    %c1_45 = arith.constant 1 : index
    %c2_46 = arith.constant 2 : index
    %c0_47 = arith.constant 0 : index
    %38 = vector.load %arg5[%c1_45, %c2_46, %c0_47] : memref<18x18x128xbf16, #tpu.memory_space<vmem>>, vector<16x16x128xbf16>
    %39 = vector.shape_cast %38 : vector<16x16x128xbf16> to vector<256x128xbf16>
    %c5 = arith.constant 5 : index
    %c0_48 = arith.constant 0 : index
    %c0_49 = arith.constant 0 : index
    %40 = vector.load %arg2[%c5, %c0_48, %c0_49] : memref<9x128x128xbf16, #tpu.memory_space<vmem>>, vector<1x128x128xbf16>
    %41 = vector.shape_cast %40 : vector<1x128x128xbf16> to vector<128x128xbf16>
    %cst_50 = arith.constant dense<0.000000e+00> : vector<256x128xf32>
    %42 = tpu.matmul %39, %41, %cst_50 {dimension_numbers = #tpu.dot_dimension_numbers<[1], [0], [0], [1], [0, 0, 1, 1], [], []>} : vector<256x128xbf16>, vector<128x128xbf16>, vector<256x128xf32> -> vector<256x128xf32>
    %43 = arith.addf %37, %42 : vector<256x128xf32>
    %c2_51 = arith.constant 2 : index
    %c0_52 = arith.constant 0 : index
    %c0_53 = arith.constant 0 : index
    %44 = vector.load %arg5[%c2_51, %c0_52, %c0_53] : memref<18x18x128xbf16, #tpu.memory_space<vmem>>, vector<16x16x128xbf16>
    %45 = vector.shape_cast %44 : vector<16x16x128xbf16> to vector<256x128xbf16>
    %c6 = arith.constant 6 : index
    %c0_54 = arith.constant 0 : index
    %c0_55 = arith.constant 0 : index
    %46 = vector.load %arg2[%c6, %c0_54, %c0_55] : memref<9x128x128xbf16, #tpu.memory_space<vmem>>, vector<1x128x128xbf16>
    %47 = vector.shape_cast %46 : vector<1x128x128xbf16> to vector<128x128xbf16>
    %cst_56 = arith.constant dense<0.000000e+00> : vector<256x128xf32>
    %48 = tpu.matmul %45, %47, %cst_56 {dimension_numbers = #tpu.dot_dimension_numbers<[1], [0], [0], [1], [0, 0, 1, 1], [], []>} : vector<256x128xbf16>, vector<128x128xbf16>, vector<256x128xf32> -> vector<256x128xf32>
    %49 = arith.addf %43, %48 : vector<256x128xf32>
    %c2_57 = arith.constant 2 : index
    %c1_58 = arith.constant 1 : index
    %c0_59 = arith.constant 0 : index
    %50 = vector.load %arg5[%c2_57, %c1_58, %c0_59] : memref<18x18x128xbf16, #tpu.memory_space<vmem>>, vector<16x16x128xbf16>
    %51 = vector.shape_cast %50 : vector<16x16x128xbf16> to vector<256x128xbf16>
    %c7 = arith.constant 7 : index
    %c0_60 = arith.constant 0 : index
    %c0_61 = arith.constant 0 : index
    %52 = vector.load %arg2[%c7, %c0_60, %c0_61] : memref<9x128x128xbf16, #tpu.memory_space<vmem>>, vector<1x128x128xbf16>
    %53 = vector.shape_cast %52 : vector<1x128x128xbf16> to vector<128x128xbf16>
    %cst_62 = arith.constant dense<0.000000e+00> : vector<256x128xf32>
    %54 = tpu.matmul %51, %53, %cst_62 {dimension_numbers = #tpu.dot_dimension_numbers<[1], [0], [0], [1], [0, 0, 1, 1], [], []>} : vector<256x128xbf16>, vector<128x128xbf16>, vector<256x128xf32> -> vector<256x128xf32>
    %55 = arith.addf %49, %54 : vector<256x128xf32>
    %c2_63 = arith.constant 2 : index
    %c2_64 = arith.constant 2 : index
    %c0_65 = arith.constant 0 : index
    %56 = vector.load %arg5[%c2_63, %c2_64, %c0_65] : memref<18x18x128xbf16, #tpu.memory_space<vmem>>, vector<16x16x128xbf16>
    %57 = vector.shape_cast %56 : vector<16x16x128xbf16> to vector<256x128xbf16>
    %c8 = arith.constant 8 : index
    %c0_66 = arith.constant 0 : index
    %c0_67 = arith.constant 0 : index
    %58 = vector.load %arg2[%c8, %c0_66, %c0_67] : memref<9x128x128xbf16, #tpu.memory_space<vmem>>, vector<1x128x128xbf16>
    %59 = vector.shape_cast %58 : vector<1x128x128xbf16> to vector<128x128xbf16>
    %cst_68 = arith.constant dense<0.000000e+00> : vector<256x128xf32>
    %60 = tpu.matmul %57, %59, %cst_68 {dimension_numbers = #tpu.dot_dimension_numbers<[1], [0], [0], [1], [0, 0, 1, 1], [], []>} : vector<256x128xbf16>, vector<128x128xbf16>, vector<256x128xf32> -> vector<256x128xf32>
    %61 = arith.addf %55, %60 : vector<256x128xf32>
    %cst_69 = arith.constant dense<0.000000e+00> : vector<128xf32>
    %62 = vector.multi_reduction <add>, %61, %cst_69 [0] : vector<256x128xf32> to vector<128xf32>
    %63 = vector.shape_cast %62 : vector<128xf32> to vector<1x128xf32>
    %cst_70 = arith.constant 3.906250e-03 : f32
    %64 = vector.broadcast %cst_70 : f32 to vector<1x128xf32>
    %65 = arith.mulf %63, %64 : vector<1x128xf32>
    %66 = arith.mulf %61, %61 : vector<256x128xf32>
    %cst_71 = arith.constant dense<0.000000e+00> : vector<128xf32>
    %67 = vector.multi_reduction <add>, %66, %cst_71 [0] : vector<256x128xf32> to vector<128xf32>
    %68 = vector.shape_cast %67 : vector<128xf32> to vector<1x128xf32>
    %cst_72 = arith.constant 3.906250e-03 : f32
    %69 = vector.broadcast %cst_72 : f32 to vector<1x128xf32>
    %70 = arith.mulf %68, %69 : vector<1x128xf32>
    %71 = arith.mulf %65, %65 : vector<1x128xf32>
    %72 = arith.subf %70, %71 : vector<1x128xf32>
    %cst_73 = arith.constant 0.000000e+00 : f32
    %73 = vector.broadcast %cst_73 : f32 to vector<1x128xf32>
    %74 = arith.maximumf %72, %73 : vector<1x128xf32>
    %75 = vector.broadcast %65 : vector<1x128xf32> to vector<256x128xf32>
    %76 = arith.subf %61, %75 : vector<256x128xf32>
    %cst_74 = arith.constant 9.99999974E-6 : f32
    %77 = vector.broadcast %cst_74 : f32 to vector<1x128xf32>
    %78 = arith.addf %74, %77 : vector<1x128xf32>
    %79 = math.rsqrt %78 : vector<1x128xf32>
    %80 = vector.broadcast %79 : vector<1x128xf32> to vector<256x128xf32>
    %81 = arith.mulf %76, %80 : vector<256x128xf32>
    %cst_75 = arith.constant 0.000000e+00 : f32
    %82 = vector.broadcast %cst_75 : f32 to vector<256x128xf32>
    %83 = arith.cmpf oge, %81, %82 : vector<256x128xf32>
    %cst_76 = arith.constant 2.000000e-01 : f32
    %84 = vector.broadcast %cst_76 : f32 to vector<256x128xf32>
    %85 = arith.mulf %84, %81 : vector<256x128xf32>
    %86 = arith.select %83, %81, %85 : vector<256x128xi1>, vector<256x128xf32>
    %87 = vector.shape_cast %86 : vector<256x128xf32> to vector<16x16x128xf32>
    %88 = arith.truncf %87 : vector<16x16x128xf32> to vector<16x16x128xbf16>
    %c1_77 = arith.constant 1 : index
    %c1_78 = arith.constant 1 : index
    %c0_79 = arith.constant 0 : index
    %89 = vector.load %arg6[%c1_77, %c1_78, %c0_79] : memref<18x18x128xbf16, #tpu.memory_space<vmem>>, vector<16x16x128xbf16>
    tpu.vector_store %arg6[%c1_77, %c1_78, %c0_79], %88 {strides = array<i32>} : memref<18x18x128xbf16, #tpu.memory_space<vmem>>, vector<16x16x128xbf16>,
    %cst_80 = arith.constant 0.000000e+00 : f32
    %90 = vector.broadcast %cst_80 : f32 to vector<256x128xf32>
    %c0_81 = arith.constant 0 : index
    %c0_82 = arith.constant 0 : index
    %c0_83 = arith.constant 0 : index
    %91 = vector.load %arg6[%c0_81, %c0_82, %c0_83] : memref<18x18x128xbf16, #tpu.memory_space<vmem>>, vector<16x16x128xbf16>
    %92 = vector.shape_cast %91 : vector<16x16x128xbf16> to vector<256x128xbf16>
    %c0_84 = arith.constant 0 : index
    %c0_85 = arith.constant 0 : index
    %c0_86 = arith.constant 0 : index
    %93 = vector.load %arg3[%c0_84, %c0_85, %c0_86] : memref<9x128x128xbf16, #tpu.memory_space<vmem>>, vector<1x128x128xbf16>
    %94 = vector.shape_cast %93 : vector<1x128x128xbf16> to vector<128x128xbf16>
    %cst_87 = arith.constant dense<0.000000e+00> : vector<256x128xf32>
    %95 = tpu.matmul %92, %94, %cst_87 {dimension_numbers = #tpu.dot_dimension_numbers<[1], [0], [0], [1], [0, 0, 1, 1], [], []>} : vector<256x128xbf16>, vector<128x128xbf16>, vector<256x128xf32> -> vector<256x128xf32>
    %96 = arith.addf %90, %95 : vector<256x128xf32>
    %c0_88 = arith.constant 0 : index
    %c1_89 = arith.constant 1 : index
    %c0_90 = arith.constant 0 : index
    %97 = vector.load %arg6[%c0_88, %c1_89, %c0_90] : memref<18x18x128xbf16, #tpu.memory_space<vmem>>, vector<16x16x128xbf16>
    %98 = vector.shape_cast %97 : vector<16x16x128xbf16> to vector<256x128xbf16>
    %c1_91 = arith.constant 1 : index
    %c0_92 = arith.constant 0 : index
    %c0_93 = arith.constant 0 : index
    %99 = vector.load %arg3[%c1_91, %c0_92, %c0_93] : memref<9x128x128xbf16, #tpu.memory_space<vmem>>, vector<1x128x128xbf16>
    %100 = vector.shape_cast %99 : vector<1x128x128xbf16> to vector<128x128xbf16>
    %cst_94 = arith.constant dense<0.000000e+00> : vector<256x128xf32>
    %101 = tpu.matmul %98, %100, %cst_94 {dimension_numbers = #tpu.dot_dimension_numbers<[1], [0], [0], [1], [0, 0, 1, 1], [], []>} : vector<256x128xbf16>, vector<128x128xbf16>, vector<256x128xf32> -> vector<256x128xf32>
    %102 = arith.addf %96, %101 : vector<256x128xf32>
    %c0_95 = arith.constant 0 : index
    %c2_96 = arith.constant 2 : index
    %c0_97 = arith.constant 0 : index
    %103 = vector.load %arg6[%c0_95, %c2_96, %c0_97] : memref<18x18x128xbf16, #tpu.memory_space<vmem>>, vector<16x16x128xbf16>
    %104 = vector.shape_cast %103 : vector<16x16x128xbf16> to vector<256x128xbf16>
    %c2_98 = arith.constant 2 : index
    %c0_99 = arith.constant 0 : index
    %c0_100 = arith.constant 0 : index
    %105 = vector.load %arg3[%c2_98, %c0_99, %c0_100] : memref<9x128x128xbf16, #tpu.memory_space<vmem>>, vector<1x128x128xbf16>
    %106 = vector.shape_cast %105 : vector<1x128x128xbf16> to vector<128x128xbf16>
    %cst_101 = arith.constant dense<0.000000e+00> : vector<256x128xf32>
    %107 = tpu.matmul %104, %106, %cst_101 {dimension_numbers = #tpu.dot_dimension_numbers<[1], [0], [0], [1], [0, 0, 1, 1], [], []>} : vector<256x128xbf16>, vector<128x128xbf16>, vector<256x128xf32> -> vector<256x128xf32>
    %108 = arith.addf %102, %107 : vector<256x128xf32>
    %c1_102 = arith.constant 1 : index
    %c0_103 = arith.constant 0 : index
    %c0_104 = arith.constant 0 : index
    %109 = vector.load %arg6[%c1_102, %c0_103, %c0_104] : memref<18x18x128xbf16, #tpu.memory_space<vmem>>, vector<16x16x128xbf16>
    %110 = vector.shape_cast %109 : vector<16x16x128xbf16> to vector<256x128xbf16>
    %c3_105 = arith.constant 3 : index
    %c0_106 = arith.constant 0 : index
    %c0_107 = arith.constant 0 : index
    %111 = vector.load %arg3[%c3_105, %c0_106, %c0_107] : memref<9x128x128xbf16, #tpu.memory_space<vmem>>, vector<1x128x128xbf16>
    %112 = vector.shape_cast %111 : vector<1x128x128xbf16> to vector<128x128xbf16>
    %cst_108 = arith.constant dense<0.000000e+00> : vector<256x128xf32>
    %113 = tpu.matmul %110, %112, %cst_108 {dimension_numbers = #tpu.dot_dimension_numbers<[1], [0], [0], [1], [0, 0, 1, 1], [], []>} : vector<256x128xbf16>, vector<128x128xbf16>, vector<256x128xf32> -> vector<256x128xf32>
    %114 = arith.addf %108, %113 : vector<256x128xf32>
    %c1_109 = arith.constant 1 : index
    %c1_110 = arith.constant 1 : index
    %c0_111 = arith.constant 0 : index
    %115 = vector.load %arg6[%c1_109, %c1_110, %c0_111] : memref<18x18x128xbf16, #tpu.memory_space<vmem>>, vector<16x16x128xbf16>
    %116 = vector.shape_cast %115 : vector<16x16x128xbf16> to vector<256x128xbf16>
    %c4_112 = arith.constant 4 : index
    %c0_113 = arith.constant 0 : index
    %c0_114 = arith.constant 0 : index
    %117 = vector.load %arg3[%c4_112, %c0_113, %c0_114] : memref<9x128x128xbf16, #tpu.memory_space<vmem>>, vector<1x128x128xbf16>
    %118 = vector.shape_cast %117 : vector<1x128x128xbf16> to vector<128x128xbf16>
    %cst_115 = arith.constant dense<0.000000e+00> : vector<256x128xf32>
    %119 = tpu.matmul %116, %118, %cst_115 {dimension_numbers = #tpu.dot_dimension_numbers<[1], [0], [0], [1], [0, 0, 1, 1], [], []>} : vector<256x128xbf16>, vector<128x128xbf16>, vector<256x128xf32> -> vector<256x128xf32>
    %120 = arith.addf %114, %119 : vector<256x128xf32>
    %c1_116 = arith.constant 1 : index
    %c2_117 = arith.constant 2 : index
    %c0_118 = arith.constant 0 : index
    %121 = vector.load %arg6[%c1_116, %c2_117, %c0_118] : memref<18x18x128xbf16, #tpu.memory_space<vmem>>, vector<16x16x128xbf16>
    %122 = vector.shape_cast %121 : vector<16x16x128xbf16> to vector<256x128xbf16>
    %c5_119 = arith.constant 5 : index
    %c0_120 = arith.constant 0 : index
    %c0_121 = arith.constant 0 : index
    %123 = vector.load %arg3[%c5_119, %c0_120, %c0_121] : memref<9x128x128xbf16, #tpu.memory_space<vmem>>, vector<1x128x128xbf16>
    %124 = vector.shape_cast %123 : vector<1x128x128xbf16> to vector<128x128xbf16>
    %cst_122 = arith.constant dense<0.000000e+00> : vector<256x128xf32>
    %125 = tpu.matmul %122, %124, %cst_122 {dimension_numbers = #tpu.dot_dimension_numbers<[1], [0], [0], [1], [0, 0, 1, 1], [], []>} : vector<256x128xbf16>, vector<128x128xbf16>, vector<256x128xf32> -> vector<256x128xf32>
    %126 = arith.addf %120, %125 : vector<256x128xf32>
    %c2_123 = arith.constant 2 : index
    %c0_124 = arith.constant 0 : index
    %c0_125 = arith.constant 0 : index
    %127 = vector.load %arg6[%c2_123, %c0_124, %c0_125] : memref<18x18x128xbf16, #tpu.memory_space<vmem>>, vector<16x16x128xbf16>
    %128 = vector.shape_cast %127 : vector<16x16x128xbf16> to vector<256x128xbf16>
    %c6_126 = arith.constant 6 : index
    %c0_127 = arith.constant 0 : index
    %c0_128 = arith.constant 0 : index
    %129 = vector.load %arg3[%c6_126, %c0_127, %c0_128] : memref<9x128x128xbf16, #tpu.memory_space<vmem>>, vector<1x128x128xbf16>
    %130 = vector.shape_cast %129 : vector<1x128x128xbf16> to vector<128x128xbf16>
    %cst_129 = arith.constant dense<0.000000e+00> : vector<256x128xf32>
    %131 = tpu.matmul %128, %130, %cst_129 {dimension_numbers = #tpu.dot_dimension_numbers<[1], [0], [0], [1], [0, 0, 1, 1], [], []>} : vector<256x128xbf16>, vector<128x128xbf16>, vector<256x128xf32> -> vector<256x128xf32>
    %132 = arith.addf %126, %131 : vector<256x128xf32>
    %c2_130 = arith.constant 2 : index
    %c1_131 = arith.constant 1 : index
    %c0_132 = arith.constant 0 : index
    %133 = vector.load %arg6[%c2_130, %c1_131, %c0_132] : memref<18x18x128xbf16, #tpu.memory_space<vmem>>, vector<16x16x128xbf16>
    %134 = vector.shape_cast %133 : vector<16x16x128xbf16> to vector<256x128xbf16>
    %c7_133 = arith.constant 7 : index
    %c0_134 = arith.constant 0 : index
    %c0_135 = arith.constant 0 : index
    %135 = vector.load %arg3[%c7_133, %c0_134, %c0_135] : memref<9x128x128xbf16, #tpu.memory_space<vmem>>, vector<1x128x128xbf16>
    %136 = vector.shape_cast %135 : vector<1x128x128xbf16> to vector<128x128xbf16>
    %cst_136 = arith.constant dense<0.000000e+00> : vector<256x128xf32>
    %137 = tpu.matmul %134, %136, %cst_136 {dimension_numbers = #tpu.dot_dimension_numbers<[1], [0], [0], [1], [0, 0, 1, 1], [], []>} : vector<256x128xbf16>, vector<128x128xbf16>, vector<256x128xf32> -> vector<256x128xf32>
    %138 = arith.addf %132, %137 : vector<256x128xf32>
    %c2_137 = arith.constant 2 : index
    %c2_138 = arith.constant 2 : index
    %c0_139 = arith.constant 0 : index
    %139 = vector.load %arg6[%c2_137, %c2_138, %c0_139] : memref<18x18x128xbf16, #tpu.memory_space<vmem>>, vector<16x16x128xbf16>
    %140 = vector.shape_cast %139 : vector<16x16x128xbf16> to vector<256x128xbf16>
    %c8_140 = arith.constant 8 : index
    %c0_141 = arith.constant 0 : index
    %c0_142 = arith.constant 0 : index
    %141 = vector.load %arg3[%c8_140, %c0_141, %c0_142] : memref<9x128x128xbf16, #tpu.memory_space<vmem>>, vector<1x128x128xbf16>
    %142 = vector.shape_cast %141 : vector<1x128x128xbf16> to vector<128x128xbf16>
    %cst_143 = arith.constant dense<0.000000e+00> : vector<256x128xf32>
    %143 = tpu.matmul %140, %142, %cst_143 {dimension_numbers = #tpu.dot_dimension_numbers<[1], [0], [0], [1], [0, 0, 1, 1], [], []>} : vector<256x128xbf16>, vector<128x128xbf16>, vector<256x128xf32> -> vector<256x128xf32>
    %144 = arith.addf %138, %143 : vector<256x128xf32>
    %cst_144 = arith.constant dense<0.000000e+00> : vector<128xf32>
    %145 = vector.multi_reduction <add>, %144, %cst_144 [0] : vector<256x128xf32> to vector<128xf32>
    %146 = vector.shape_cast %145 : vector<128xf32> to vector<1x128xf32>
    %cst_145 = arith.constant 3.906250e-03 : f32
    %147 = vector.broadcast %cst_145 : f32 to vector<1x128xf32>
    %148 = arith.mulf %146, %147 : vector<1x128xf32>
    %149 = arith.mulf %144, %144 : vector<256x128xf32>
    %cst_146 = arith.constant dense<0.000000e+00> : vector<128xf32>
    %150 = vector.multi_reduction <add>, %149, %cst_146 [0] : vector<256x128xf32> to vector<128xf32>
    %151 = vector.shape_cast %150 : vector<128xf32> to vector<1x128xf32>
    %cst_147 = arith.constant 3.906250e-03 : f32
    %152 = vector.broadcast %cst_147 : f32 to vector<1x128xf32>
    %153 = arith.mulf %151, %152 : vector<1x128xf32>
    %154 = arith.mulf %148, %148 : vector<1x128xf32>
    %155 = arith.subf %153, %154 : vector<1x128xf32>
    %cst_148 = arith.constant 0.000000e+00 : f32
    %156 = vector.broadcast %cst_148 : f32 to vector<1x128xf32>
    %157 = arith.maximumf %155, %156 : vector<1x128xf32>
    %158 = vector.broadcast %148 : vector<1x128xf32> to vector<256x128xf32>
    %159 = arith.subf %144, %158 : vector<256x128xf32>
    %cst_149 = arith.constant 9.99999974E-6 : f32
    %160 = vector.broadcast %cst_149 : f32 to vector<1x128xf32>
    %161 = arith.addf %157, %160 : vector<1x128xf32>
    %162 = math.rsqrt %161 : vector<1x128xf32>
    %163 = vector.broadcast %162 : vector<1x128xf32> to vector<256x128xf32>
    %164 = arith.mulf %159, %163 : vector<256x128xf32>
    %cst_150 = arith.constant 0.000000e+00 : f32
    %165 = vector.broadcast %cst_150 : f32 to vector<256x128xf32>
    %166 = arith.cmpf oge, %164, %165 : vector<256x128xf32>
    %cst_151 = arith.constant 2.000000e-01 : f32
    %167 = vector.broadcast %cst_151 : f32 to vector<256x128xf32>
    %168 = arith.mulf %167, %164 : vector<256x128xf32>
    %169 = arith.select %166, %164, %168 : vector<256x128xi1>, vector<256x128xf32>
    %170 = vector.shape_cast %169 : vector<256x128xf32> to vector<16x16x128xf32>
    %c0_152 = arith.constant 0 : index
    %c0_153 = arith.constant 0 : index
    %c0_154 = arith.constant 0 : index
    %c0_155 = arith.constant 0 : index
    %171 = vector.load %arg4[%c0_152, %c0_153, %c0_154, %c0_155] : memref<1x16x16x128xf32, #tpu.memory_space<vmem>>, vector<1x16x16x128xf32>
    %172 = vector.shape_cast %171 : vector<1x16x16x128xf32> to vector<16x16x128xf32>
    %173 = vector.shape_cast %170 : vector<16x16x128xf32> to vector<1x16x16x128xf32>
    tpu.vector_store %arg4[%c0_152, %c0_153, %c0_154, %c0_155], %173 {strides = array<i32>} : memref<1x16x16x128xf32, #tpu.memory_space<vmem>>, vector<1x16x16x128xf32>,
    return
  }
  func.func @transform_0(%arg0: i32) -> (i32, i32, i32, i32) {
    %c0_i32 = arith.constant 0 : i32
    %c0_i32_0 = arith.constant 0 : i32
    %c0_i32_1 = arith.constant 0 : i32
    %c0_i32_2 = arith.constant 0 : i32
    return %arg0, %c0_i32, %c0_i32_0, %c0_i32_1 : i32, i32, i32, i32
  }
  func.func @transform_1(%arg0: i32) -> (i32, i32, i32) {
    %c0_i32 = arith.constant 0 : i32
    %c0_i32_0 = arith.constant 0 : i32
    %c0_i32_1 = arith.constant 0 : i32
    %c0_i32_2 = arith.constant 0 : i32
    return %c0_i32, %c0_i32_0, %c0_i32_1 : i32, i32, i32
  }
  func.func @transform_2(%arg0: i32) -> (i32, i32, i32) {
    %c0_i32 = arith.constant 0 : i32
    %c0_i32_0 = arith.constant 0 : i32
    %c0_i32_1 = arith.constant 0 : i32
    %c0_i32_2 = arith.constant 0 : i32
    return %c0_i32, %c0_i32_0, %c0_i32_1 : i32, i32, i32
  }
  func.func @transform_3(%arg0: i32) -> (i32, i32, i32, i32) {
    %c0_i32 = arith.constant 0 : i32
    %c0_i32_0 = arith.constant 0 : i32
    %c0_i32_1 = arith.constant 0 : i32
    %c0_i32_2 = arith.constant 0 : i32
    return %arg0, %c0_i32, %c0_i32_0, %c0_i32_1 : i32, i32, i32, i32
  }
}

</mosaic_0001>

<bundles_post_ra>
// kernel: conv_block.1
= control target key start
LH: loop header
LB: loop body
LE: loop exit
PB: predicated region body
PF: predicated region fallthrough
CT: control target
= control target key end

     0   :  { %s14542_s12 = smov 0   ;;  %s19267_s0 = inlined_call_operand.vmem [shape: bf16[2,16,16,128], index: 0, kind: input, shape index: {}]   ;;  %s19268_s1 = inlined_call_operand.vmem [shape: bf16[9,128,128], index: 1, kind: input, shape index: {}]   ;;  %s19269_s2 = inlined_call_operand.vmem [shape: bf16[9,128,128], index: 2, kind: input, shape index: {}]   ;;  %s19270_s3 = inlined_call_operand.vmem [shape: f32[2,16,16,128], index: 3, kind: output, shape index: {}]  }
   0x1 LB: > { %s11525_s13 = sadd.s32 4294967295, %s14519_s12   ;;  %p11529_p0 = scmp.ge.s32.totalorder %s14519_s12, 1  ;;  %s14519_s12 = sphi %s14542_s12, %s13_s12  }
   0x2   : > { %p137_p1 = scmp.lt.s32.totalorder %s14519_s12, 3 }
   0x4   : > { %p138_p2 = pnand %p11529_p0, %p137_p1 }
   0x6   : > { %141 = sbr.rel (%p138_p2) target bundleno = 1933 (0x78d), region = 32 }
   0xd   : > { %v14553_v0 = vld [vmem:[%s19268_s1 + $0x40] sm:$0xff]   ;;  %v14558_v1 = vld [vmem:[%s19268_s1 + $0x48] sm:$0xff]   ;;  %v14521_v2 = vmov 0   ;;  %p161_p3 = scmp.lt.s32.totalorder %s11525_s13, 1  ;;  %v14205_v3 = vld [vmem:[%s19268_s1 + $0x50] sm:$0xff]   ;;  %vm636_vm1 = vcmask 1043456  }
   0xe   : > { %172 = vst [vmem:[#allocation2] sm:$0xf] %v14521_v2  ;;  %173 = vst [vmem:[#allocation2 + $0x4] sm:$0xf] %v14521_v2  ;;  %12818 = vmatprep.subr.bf16.mxu0 %v14553_v0  ;;  %v14206_v4 = vld [vmem:[%s19268_s1 + $0x58] sm:$0xff]   ;;  %v14207_v10 = vld [vmem:[%s19268_s1 + $0x60] sm:$0xff]  }
   0xf   : > { %174 = vst [vmem:[#allocation2 + $0x8] sm:$0x1] %v14521_v2  ;;  %175 = vst [vmem:[#allocation2 + $0xc] sm:$0xf] %v14521_v2  ;;  %12819 = vmatpush3.bf16.msra.mxu0 %v14553_v0  ;;  %s19725_s13 = smov (!%p161_p3, %s11525_s13), 1  ;;  %vm643_vm2 = vcmask 1040384  }
  0x10   : > { %176 = vst [vmem:[#allocation2 + $0x10] sm:$0xf] %v14521_v2  ;;  %177 = vst [vmem:[#allocation2 + $0x14] sm:$0x1] %v14521_v2  ;;  %12820 = vmatprep.subr.bf16.mxu0 %v14558_v1  ;;  %s12352_s20 = sshll.u32 %s19725_s13, 7  ;;  %v19383_v24 = vmov 0 }
  0x11   : > { %178 = vst [vmem:[#allocation2 + $0x18] sm:$0xf] %v14521_v2  ;;  %179 = vst [vmem:[#allocation2 + $0x1c] sm:$0xf] %v14521_v2  ;;  %s14688_s25 = scalar_lea.vmem %s19267_s0, %s12352_s20  ;;  %vm817_vm0 = vsmask.f32 3328 }
  0x12   : > { %180 = vst [vmem:[#allocation2 + $0x20] sm:$0x1] %v14521_v2  ;;  %181 = vst [vmem:[#allocation2 + $0x24] sm:$0xf] %v14521_v2  ;;  %v280_v14 = vld [vmem:[%s14688_s25] sm:$0xf] }
  0x13   : > { %182 = vst [vmem:[#allocation2 + $0x28] sm:$0xf] %v14521_v2  ;;  %183 = vst [vmem:[#allocation2 + $0x2c] sm:$0x1] %v14521_v2  ;;  %12821 = vmatpush3.bf16.msra.mxu0 %v14558_v1  ;;  %vm818_vm3 = vsmask.f32 7440 }
  0x14   : > { %184 = vst [vmem:[#allocation2 + $0x30] sm:$0xf] %v14521_v2  ;;  %185 = vst [vmem:[#allocation2 + $0x34] sm:$0xf] %v14521_v2  ;;  %12822 = vmatprep.subr.bf16.mxu0 %v14205_v3  ;;  %v281_v17 = vld [vmem:[%s14688_s25 + $0x4] sm:$0xf] }
  0x15   : > { %186 = vst [vmem:[#allocation2 + $0x38] sm:$0x1] %v14521_v2  ;;  %187 = vst [vmem:[#allocation2 + $0x3c] sm:$0xf] %v14521_v2  ;;  %v753_v5 = vld [vmem:[#allocation2] sm:$0xf] }
  0x16   : > { %188 = vst [vmem:[#allocation2 + $0x40] sm:$0xf] %v14521_v2  ;;  %189 = vst [vmem:[#allocation2 + $0x44] sm:$0x1] %v14521_v2  ;;  %v754_v6 = vld [vmem:[#allocation2 + $0x4] sm:$0xf] }
  0x17   : > { %190 = vst [vmem:[#allocation2 + $0x48] sm:$0xf] %v14521_v2  ;;  %191 = vst [vmem:[#allocation2 + $0x4c] sm:$0xf] %v14521_v2  ;;  %v801_v7 = vld [vmem:[#allocation2 + $0x8] sm:$0x1]  ;;  %12823 = vmatpush3.bf16.msra.mxu0 %v14205_v3 }
  0x18   : > { %192 = vst [vmem:[#allocation2 + $0x50] sm:$0x1] %v14521_v2  ;;  %193 = vst [vmem:[#allocation2 + $0x54] sm:$0xf] %v14521_v2  ;;  %v821_v8 = vshrl.u32 %v753_v5, 16  ;;  %v824_v9 = vshll.u32 %v753_v5, 16  ;;  %12824 = vmatprep.subr.bf16.mxu0 %v14206_v4 }
  0x19   : > { %194 = vst [vmem:[#allocation2 + $0x58] sm:$0xf] %v14521_v2  ;;  %195 = vst [vmem:[#allocation2 + $0x5c] sm:$0x1] %v14521_v2  ;;  %v830_v11 = vshll.u32 %v754_v6, 16  ;;  %v834_v12 = vshrl.u32 %v754_v6, 16 }
  0x1a   : > { %196 = vst [vmem:[#allocation2 + $0x60] sm:$0xf] %v14521_v2  ;;  %197 = vst [vmem:[#allocation2 + $0x64] sm:$0xf] %v14521_v2  ;;  %v840_v13 = vshll.u32 %v801_v7, 16  ;;  %v823_v15 = vrot.slane %v821_v8, 4 }
  0x1b   : > { %198 = vst [vmem:[#allocation2 + $0x68] sm:$0x1] %v14521_v2  ;;  %199 = vst [vmem:[#allocation2 + $0x6c] sm:$0xf] %v14521_v2  ;;  %v826_v16 = vrot.slane %v824_v9, 5  ;;  %v832_v18 = vrot.slane %v830_v11, 5  ;;  %12825 = vmatpush3.bf16.msra.mxu0 %v14206_v4 }
  0x1c   : > { %200 = vst [vmem:[#allocation2 + $0x70] sm:$0xf] %v14521_v2  ;;  %201 = vst [vmem:[#allocation2 + $0x74] sm:$0x1] %v14521_v2  ;;  %v836_v19 = vrot.slane %v834_v12, 4  ;;  %v316_v21 = vshrl.u32 %v280_v14, 16  ;;  %12826 = vmatprep.subr.bf16.mxu0 %v14207_v10 }
  0x1d   : > { %202 = vst [vmem:[#allocation2 + $0x78] sm:$0xf] %v14521_v2  ;;  %203 = vst [vmem:[#allocation2 + $0x7c] sm:$0xf] %v14521_v2  ;;  %vm312_vm4 = vsmask.f32 256  ;;  %v827_v20 = vor.u32 %v826_v16, %v823_v15 }
  0x1e   : > { %204 = vst [vmem:[#allocation2 + $0x80] sm:$0x1] %v14521_v2  ;;  %205 = vst [vmem:[#allocation2 + $0x84] sm:$0xf] %v14521_v2  ;;  %vm313_vm5 = vsmask.f32 4368  ;;  %v837_v25 = vor.u32 %v836_v19, %v832_v18 }
  0x1f   : > { %206 = vst [vmem:[#allocation2 + $0x88] sm:$0xf] %v14521_v2  ;;  %207 = vst [vmem:[#allocation2 + $0x8c] sm:$0x1] %v14521_v2  ;;  %v319_v22 = vshll.u32 %v280_v14, 16  ;;  %v324_v23 = vshrl.u32 %v281_v17, 16  ;;  %12827 = vmatpush3.bf16.msra.mxu0 %v14207_v10 }
  0x20   : > { %208 = vst [vmem:[#allocation2 + $0x90] sm:$0xf] %v14521_v2  ;;  %209 = vst [vmem:[#allocation2 + $0x94] sm:$0xf] %v14521_v2  ;;  %v842_v26 = vrot.slane %v840_v13, 5  ;;  %v327_v27 = vshll.u32 %v281_v17, 16 }
  0x21   : > { %210 = vst [vmem:[#allocation2 + $0x98] sm:$0x1] %v14521_v2  ;;  %211 = vst [vmem:[#allocation2 + $0x9c] sm:$0xf] %v14521_v2  ;;  %vm637_vm7 = vsmask.f32 7938 }
  0x22   : > { %212 = vst [vmem:[#allocation2 + $0xa0] sm:$0xf] %v14521_v2  ;;  %213 = vst [vmem:[#allocation2 + $0xa4] sm:$0x1] %v14521_v2  ;;  %v639_v28 = vld [vmem:[#allocation2 + $0xc] sm:$0xf] }
  0x23   : > { %214 = vst [vmem:[#allocation2 + $0xa8] sm:$0xf] %v14521_v2  ;;  %215 = vst [vmem:[#allocation2 + $0xac] sm:$0xf] %v14521_v2  ;;  %v14208_v29 = vld [vmem:[%s19268_s1 + $0x68] sm:$0xff]   ;;  %v828_v30 = vrot.slane %v827_v20, 4 }
  0x24   : > { %216 = vst [vmem:[#allocation2 + $0xb0] sm:$0x1] %v14521_v2  ;;  %217 = vst [vmem:[#allocation2 + $0xb4] sm:$0xf] %v14521_v2  ;;  %v19386_v31 = vmov 0  ;;  %v318_v32 = vrot.slane %v316_v21, 7  ;;  %12828 = vmatprep.subr.bf16.mxu0 %v14208_v29 }
  0x25   : > { %218 = vst [vmem:[#allocation2 + $0xb8] sm:$0xf] %v14521_v2  ;;  %219 = vst [vmem:[#allocation2 + $0xbc] sm:$0x1] %v14521_v2  ;;  %v326_v33 = vrot.slane %v324_v23, 7  ;;  %v838_v34 = vrot.slane %v837_v25, 4  ;;  %12829 = vmatpush3.bf16.msra.mxu0 %v14208_v29 }
  0x26   : > { %220 = vst [vmem:[#allocation2 + $0xc0] sm:$0xf] %v14521_v2  ;;  %221 = vst [vmem:[#allocation2 + $0xc4] sm:$0xf] %v14521_v2  ;;  %v19389_v35 = vmov 0  ;;  %v321_v38 = vor.u32 %v319_v22, %v318_v32  ;;  %v322_v39 = vrot.slane %v318_v32, 4 }
  0x27   : > { %222 = vst [vmem:[#allocation2 + $0xc8] sm:$0x1] %v14521_v2  ;;  %223 = vst [vmem:[#allocation2 + $0xcc] sm:$0xf] %v14521_v2  ;;  %v282_v36 = vld [vmem:[%s14688_s25 + $0x8] sm:$0xf]  ;;  %v329_v40 = vor.u32 %v327_v27, %v326_v33 }
  0x28   : > { %224 = vst [vmem:[#allocation2 + $0xd0] sm:$0xf] %v14521_v2  ;;  %225 = vst [vmem:[#allocation2 + $0xd4] sm:$0x1] %v14521_v2  ;;  %v19392_v41 = vmov 0  ;;  %v331_v45 = vrot.slane %v326_v33, 4 }
  0x29   : > { %226 = vst [vmem:[#allocation3] sm:$0xf] %v14521_v2  ;;  %227 = vst [vmem:[#allocation3 + $0x4] sm:$0xf] %v14521_v2  ;;  %v645_v42 = vld [vmem:[#allocation2 + $0x14] sm:$0x1] }
  0x2a   : > { %228 = vst [vmem:[#allocation3 + $0x8] sm:$0x1] %v14521_v2  ;;  %229 = vst [vmem:[#allocation3 + $0xc] sm:$0xf] %v14521_v2  ;;  %v283_v43 = vld [vmem:[%s14688_s25 + $0xc] sm:$0xf] }
  0x2b   : > { %230 = vst [vmem:[#allocation3 + $0x10] sm:$0xf] %v14521_v2  ;;  %231 = vst [vmem:[#allocation3 + $0x14] sm:$0x1] %v14521_v2  ;;  %v333_v46 = vshrl.u32 %v282_v36, 16  ;;  %v336_v47 = vshll.u32 %v282_v36, 16 }
  0x2c   : > { %232 = vst [vmem:[#allocation3 + $0x18] sm:$0xf] %v14521_v2  ;;  %233 = vst [vmem:[#allocation3 + $0x1c] sm:$0xf] %v14521_v2  ;;  %v341_v51 = vshrl.u32 %v283_v43, 16  ;;  %v14209_v54 = vld [vmem:[%s19268_s1 + $0x70] sm:$0xff]  }
  0x2d   : > { %234 = vst [vmem:[#allocation3 + $0x20] sm:$0x1] %v14521_v2  ;;  %235 = vst [vmem:[#allocation3 + $0x24] sm:$0xf] %v14521_v2  ;;  %v284_v52 = vld [vmem:[%s14688_s25 + $0x10] sm:$0xf]  ;;  %12830 = vmatprep.subr.bf16.mxu0 %v14209_v54 }
  0x2e   : > { %236 = vst [vmem:[#allocation3 + $0x28] sm:$0xf] %v14521_v2  ;;  %237 = vst [vmem:[#allocation3 + $0x2c] sm:$0x1] %v14521_v2  ;;  %v285_v53 = vld [vmem:[%s14688_s25 + $0x14] sm:$0xf]  ;;  %12831 = vmatpush3.bf16.msra.mxu0 %v14209_v54 }
  0x2f   : > { %238 = vst [vmem:[#allocation3 + $0x30] sm:$0xf] %v14521_v2  ;;  %239 = vst [vmem:[#allocation3 + $0x34] sm:$0xf] %v14521_v2  ;;  %v335_v56 = vrot.slane %v333_v46, 7  ;;  %v344_v57 = vshll.u32 %v283_v43, 16 }
  0x30   : > { %240 = vst [vmem:[#allocation3 + $0x38] sm:$0x1] %v14521_v2  ;;  %241 = vst [vmem:[#allocation3 + $0x3c] sm:$0xf] %v14521_v2  ;;  %v648_v58 = vld [vmem:[#allocation2 + $0x18] sm:$0xf] }
  0x31   : > { %242 = vst [vmem:[#allocation3 + $0x40] sm:$0xf] %v14521_v2  ;;  %243 = vst [vmem:[#allocation3 + $0x44] sm:$0x1] %v14521_v2  ;;  %v350_v59 = vshrl.u32 %v284_v52, 16  ;;  %v343_v60 = vrot.slane %v341_v51, 7 }
  0x32   : > { %244 = vst [vmem:[#allocation3 + $0x48] sm:$0xf] %v14521_v2  ;;  %245 = vst [vmem:[#allocation3 + $0x4c] sm:$0xf] %v14521_v2  ;;  %v652_v61 = vld [vmem:[#allocation2 + $0x20] sm:$0x1] }
  0x33   : > { %246 = vst [vmem:[#allocation3 + $0x50] sm:$0x1] %v14521_v2  ;;  %247 = vst [vmem:[#allocation3 + $0x54] sm:$0xf] %v14521_v2  ;;  %v353_v62 = vshll.u32 %v284_v52, 16  ;;  %v358_v63 = vshrl.u32 %v285_v53, 16  ;;  %v346_v5 = vor.u32 %v344_v57, %v343_v60 }
  0x34   : > { %248 = vst [vmem:[#allocation3 + $0x58] sm:$0xf] %v14521_v2  ;;  %249 = vst [vmem:[#allocation3 + $0x5c] sm:$0x1] %v14521_v2  ;;  %v361_v0 = vshll.u32 %v285_v53, 16  ;;  %v14210_v1 = vld [vmem:[%s19268_s1 + $0x78] sm:$0xff]  }
  0x35   : > { %250 = vst [vmem:[#allocation3 + $0x60] sm:$0xf] %v14521_v2  ;;  %251 = vst [vmem:[#allocation3 + $0x64] sm:$0xf] %v14521_v2  ;;  %v339_v3 = vrot.slane %v335_v56, 4  ;;  %v352_v4 = vrot.slane %v350_v59, 7  ;;  %12832 = vmatprep.subr.bf16.mxu0 %v14210_v1 }
  0x36   : > { %252 = vst [vmem:[#allocation3 + $0x68] sm:$0x1] %v14521_v2  ;;  %253 = vst [vmem:[#allocation3 + $0x6c] sm:$0xf] %v14521_v2  ;;  %v348_v6 = vrot.slane %v343_v60, 4  ;;  %v360_v7 = vrot.slane %v358_v63, 7  ;;  %12833 = vmatpush3.bf16.msra.mxu0 %v14210_v1 }
  0x37   : > { %254 = vst [vmem:[#allocation3 + $0x70] sm:$0xf] %v14521_v2  ;;  %255 = vst [vmem:[#allocation3 + $0x74] sm:$0x1] %v14521_v2  ;;  %v655_v8 = vld [vmem:[#allocation2 + $0x24] sm:$0xf]  ;;  %v355_v11 = vor.u32 %v353_v62, %v352_v4 }
  0x38   : > { %256 = vst [vmem:[#allocation3 + $0x78] sm:$0xf] %v14521_v2  ;;  %257 = vst [vmem:[#allocation3 + $0x7c] sm:$0xf] %v14521_v2  ;;  %v286_v9 = vld [vmem:[%s14688_s25 + $0x18] sm:$0xf] }
  0x39   : > { %258 = vst [vmem:[#allocation3 + $0x80] sm:$0x1] %v14521_v2  ;;  %259 = vst [vmem:[#allocation3 + $0x84] sm:$0xf] %v14521_v2  ;;  %v356_v12 = vrot.slane %v352_v4, 4  ;;  %v367_v15 = vshrl.u32 %v286_v9, 16 }
  0x3a   : > { %260 = vst [vmem:[#allocation3 + $0x88] sm:$0xf] %v14521_v2  ;;  %261 = vst [vmem:[#allocation3 + $0x8c] sm:$0x1] %v14521_v2  ;;  %v659_v13 = vld [vmem:[#allocation2 + $0x2c] sm:$0x1] }
  0x3b   : > { %262 = vst [vmem:[#allocation3 + $0x90] sm:$0xf] %v14521_v2  ;;  %263 = vst [vmem:[#allocation3 + $0x94] sm:$0xf] %v14521_v2  ;;  %v287_v14 = vld [vmem:[%s14688_s25 + $0x1c] sm:$0xf] }
  0x3c   : > { %264 = vst [vmem:[#allocation3 + $0x98] sm:$0x1] %v14521_v2  ;;  %265 = vst [vmem:[#allocation3 + $0x9c] sm:$0xf] %v14521_v2  ;;  %v365_v19 = vrot.slane %v360_v7, 4  ;;  %v14753_v21 = vld [vmem:[%s19268_s1] sm:$0xff]  }
  0x3d   : > { %266 = vst [vmem:[#allocation3 + $0xa0] sm:$0xf] %v14521_v2  ;;  %267 = vst [vmem:[#allocation3 + $0xa4] sm:$0x1] %v14521_v2  ;;  %v14748_v20 = vld [vmem:[%s14688_s25 + $0x20] sm:$0xf]  ;;  %12866 = vmatprep.subr.bf16.mxu0 %v14753_v21 }
  0x3e   : > { %268 = vst [vmem:[#allocation3 + $0xa8] sm:$0xf] %v14521_v2  ;;  %269 = vst [vmem:[#allocation3 + $0xac] sm:$0xf] %v14521_v2  ;;  %v14757_v23 = vrot.slane %v367_v15, 7  ;;  %v370_v25 = vshll.u32 %v286_v9, 16 }
  0x3f   : > { %270 = vst [vmem:[#allocation3 + $0xb0] sm:$0x1] %v14521_v2  ;;  %271 = vst [vmem:[#allocation3 + $0xb4] sm:$0xf] %v14521_v2  ;;  %v375_v32 = vshrl.u32 %v287_v14, 16  ;;  %v384_v33 = vshrl.u32 %v14748_v20, 16 }
  0x40   : > { %272 = vst [vmem:[#allocation3 + $0xb8] sm:$0xf] %v14521_v2  ;;  %273 = vst [vmem:[#allocation3 + $0xbc] sm:$0x1] %v14521_v2  ;;  %v373_v43 = vrot.slane %v14757_v23, 4  ;;  %v387_v57 = vshll.u32 %v14748_v20, 16 }
  0x41   : > { %274 = vst [vmem:[#allocation3 + $0xc0] sm:$0xf] %v14521_v2  ;;  %275 = vst [vmem:[#allocation3 + $0xc4] sm:$0xf] %v14521_v2  ;;  %v377_v51 = vrot.slane %v375_v32, 7  ;;  %v14771_v53 = vrot.slane %v384_v33, 7 }
  0x42   : > { %276 = vst [vmem:[#allocation3 + $0xc8] sm:$0x1] %v14521_v2  ;;  %277 = vst [vmem:[#allocation3 + $0xcc] sm:$0xf] %v14521_v2  ;;  %vm1847_vm11 = vcmask 1042432   ;;  %vm1848_vm12 = vcmask 1046532  }
  0x43   : > { %278 = vst [vmem:[#allocation3 + $0xd0] sm:$0xf] %v14521_v2  ;;  %279 = vst [vmem:[#allocation3 + $0xd4] sm:$0x1] %v14521_v2  ;;  %v338_v2 = vor.u32 %v336_v47, %v335_v56  ;;  %s12353_s7 = sshll.u32 %s19725_s13, 8 }
  0x44   : > { %vm14696_vm6 = vmor %vm817_vm0, %vm818_vm3  ;;  %s19080_s9 = scalar_lea.vmem %s19270_s3, %s12353_s7 }
  0x45   : > { %v19384_v24 = vsel %vm14696_vm6, 4294967295, %v19383_v24  ;;  %vm14704_vm8 = vmor %vm312_vm4, %vm313_vm5  ;;  %v833_v37 = vsel %vm14696_vm6, %v828_v30, %v832_v18  ;;  %v843_v44 = vsel %vm14696_vm6, %v838_v34, %v842_v26  ;;  %v363_v18 = vor.u32 %v361_v0, %v360_v7  ;;  %v662_v26 = vld [vmem:[#allocation2 + $0x30] sm:$0xf] }
  0x46   : > { %19385 = vst [vmem:[#allocation4_spill] sm:$0xff] %v19384_v24  ;;  %v19387_v31 = vsel %vm14704_vm8, 4294967295, %v19386_v31  ;;  %vm14709_vm9 = vmand %vm636_vm1, %vm637_vm7  ;;  %v11550_v48 = vcombine.low %v833_v37, %v843_v44  ;;  %v330_v49 = vsel %vm14704_vm8, %v322_v39, %v329_v40  ;;  %v347_v16 = vsel %vm14704_vm8, %v339_v3, %v346_v5 }
  0x47   : > { %19388 = vst [vmem:[#allocation5_spill] sm:$0xff] %v19387_v31  ;;  %v19390_v35 = vsel %vm14709_vm9, 4294967295, %v19389_v35  ;;  %vm14718_vm10 = vmand %vm643_vm2, %vm312_vm4  ;;  %v640_v50 = vsel %vm14709_vm9, %v321_v38, %v639_v28  ;;  %v649_v10 = vsel %vm14709_vm9, %v338_v2, %v648_v58  ;;  %v656_v22 = vsel %vm14709_vm9, %v355_v11, %v655_v8 }
  0x48   : > { %19391 = vst [vmem:[#allocation6_spill] sm:$0xff] %v19390_v35  ;;  %v19393_v41 = vsel %vm14718_vm10, 4294967295, %v19392_v41  ;;  %641 = vst [vmem:[#allocation2 + $0xc] sm:$0xf] %v640_v50  ;;  %v646_v55 = vsel %vm14718_vm10, %v331_v45, %v645_v42  ;;  %12834 = vmatprep.mubr.bf16.mxu0 %v11550_v48  ;;  %v653_v17 = vsel %vm14718_vm10, %v348_v6, %v652_v61  ;;  %v378_v44 = vshll.u32 %v287_v14, 16 }
  0x49   : > { %19394 = vst [vmem:[#allocation7_spill] sm:$0xff] %v19393_v41  ;;  %642 = vst [vmem:[#allocation2 + $0x10] sm:$0xf] %v330_v49  ;;  %v364_v29 = vsel %vm14704_vm8, %v356_v12, %v363_v18  ;;  %v660_v30 = vsel %vm14718_vm10, %v365_v19, %v659_v13  ;;  %v372_v42 = vor.u32 %v370_v25, %v14757_v23  ;;  %v14767_v45 = vld [vmem:[%s14688_s25 + $0x24] sm:$0xf]  ;;  %v14212_v19 = vld [vmem:[%s19268_s1 + $0x8] sm:$0xff]  }
  0x4a   : > { %647 = vst [vmem:[#allocation2 + $0x14] sm:$0x1] %v646_v55  ;;  %650 = vst [vmem:[#allocation2 + $0x18] sm:$0xf] %v649_v10  ;;  %v392_v58 = vshrl.u32 %v14767_v45, 16  ;;  %v380_v63 = vor.u32 %v378_v44, %v377_v51 }
  0x4b   : > { %651 = vst [vmem:[#allocation2 + $0x1c] sm:$0xf] %v347_v16  ;;  %654 = vst [vmem:[#allocation2 + $0x20] sm:$0x1] %v653_v17  ;;  %v663_v52 = vsel %vm14709_vm9, %v372_v42, %v662_v26  ;;  %v666_v26 = vld [vmem:[#allocation2 + $0x38] sm:$0x1] }
  0x4c   : > { %657 = vst [vmem:[#allocation2 + $0x24] sm:$0xf] %v656_v22  ;;  %658 = vst [vmem:[#allocation2 + $0x28] sm:$0xf] %v364_v29  ;;  %v381_v29 = vsel %vm14704_vm8, %v373_v43, %v380_v63  ;;  %v669_v44 = vld [vmem:[#allocation2 + $0x3c] sm:$0xf] }
  0x4d   : > { %661 = vst [vmem:[#allocation2 + $0x2c] sm:$0x1] %v660_v30  ;;  %664 = vst [vmem:[#allocation2 + $0x30] sm:$0xf] %v663_v52  ;;  %v382_v30 = vrot.slane %v377_v51, 4  ;;  %v389_v52 = vor.u32 %v387_v57, %v14771_v53 }
  0x4e   : > { %665 = vst [vmem:[#allocation2 + $0x34] sm:$0xf] %v381_v29  ;;  %vm15076_vm13 = vmor %vm1847_vm11, %vm1848_vm12 }
  0x4f   : > { %v755_v27 = vld [vmem:[#allocation2 + $0xc] sm:$0xf]  ;;  %v667_v42 = vsel %vm14718_vm10, %v382_v30, %v666_v26  ;;  %v670_v63 = vsel %vm14709_vm9, %v389_v52, %v669_v44 }
  0x50   : > { %v756_v28 = vld [vmem:[#allocation2 + $0x10] sm:$0xf]  ;;  %v845_v36 = vshrl.u32 %v755_v27, 16  ;;  %v848_v37 = vshll.u32 %v755_v27, 16  ;;  %668 = vst [vmem:[#allocation2 + $0x38] sm:$0x1] %v667_v42 }
  0x51   : > { %v802_v34 = vld [vmem:[#allocation2 + $0x14] sm:$0x1]  ;;  %v854_v38 = vshll.u32 %v756_v28, 16  ;;  %v858_v39 = vshrl.u32 %v756_v28, 16  ;;  %v757_v56 = vld [vmem:[#allocation2 + $0x18] sm:$0xf] }
  0x52   : > { %v864_v40 = vshll.u32 %v802_v34, 16  ;;  %v847_v46 = vrot.slane %v845_v36, 4  ;;  %v850_v47 = vrot.slane %v848_v37, 5  ;;  %v758_v59 = vld [vmem:[#allocation2 + $0x1c] sm:$0xf]  ;;  %v869_v61 = vshrl.u32 %v757_v56, 16 }
  0x53   : > { %v856_v48 = vrot.slane %v854_v38, 5  ;;  %v860_v49 = vrot.slane %v858_v39, 4  ;;  %v803_v60 = vld [vmem:[#allocation2 + $0x20] sm:$0x1]  ;;  %v872_v62 = vshll.u32 %v757_v56, 16  ;;  %v878_v2 = vshll.u32 %v758_v59, 16 }
  0x54   : > { %v866_v50 = vrot.slane %v864_v40, 5  ;;  %v851_v54 = vor.u32 %v850_v47, %v847_v46  ;;  %v882_v3 = vshrl.u32 %v758_v59, 16  ;;  %v759_v4 = vld [vmem:[#allocation2 + $0x24] sm:$0xf]  ;;  %v871_v5 = vrot.slane %v869_v61, 4  ;;  %v14213_v38 = vld [vmem:[%s19268_s1 + $0x10] sm:$0xff]  }
  0x55   : > { %v861_v55 = vor.u32 %v860_v49, %v856_v48  ;;  %v874_v6 = vrot.slane %v872_v62, 5  ;;  %v888_v7 = vshll.u32 %v803_v60, 16  ;;  %v760_v8 = vld [vmem:[#allocation2 + $0x28] sm:$0xf]  ;;  %v893_v9 = vshrl.u32 %v759_v4, 16 }
  0x56   : > { %v852_v0 = vrot.slane %v851_v54, 4  ;;  %v880_v12 = vrot.slane %v878_v2, 5  ;;  %v884_v13 = vrot.slane %v882_v3, 4  ;;  %v804_v14 = vld [vmem:[#allocation2 + $0x2c] sm:$0x1]  ;;  %v896_v22 = vshll.u32 %v759_v4, 16 }
  0x57   : > { %v862_v1 = vrot.slane %v861_v55, 4  ;;  %v875_v16 = vor.u32 %v874_v6, %v871_v5  ;;  %v890_v17 = vrot.slane %v888_v7, 5  ;;  %v895_v18 = vrot.slane %v893_v9, 4  ;;  %v761_v32 = vld [vmem:[#allocation2 + $0x30] sm:$0xf] }
  0x58   : > { %v857_v10 = vsel %vm14696_vm6, %v852_v0, %v856_v48  ;;  %v885_v20 = vor.u32 %v884_v13, %v880_v12  ;;  %v902_v23 = vshll.u32 %v760_v8, 16  ;;  %v906_v25 = vshrl.u32 %v760_v8, 16  ;;  %v291_v61 = vld [vmem:[%s14688_s25 + $0x2c] sm:$0xf]  ;;  %v673_v0 = vld [vmem:[#allocation2 + $0x44] sm:$0x1] }
  0x59   : > { %v867_v11 = vsel %vm14696_vm6, %v862_v1, %v866_v50  ;;  %v876_v27 = vrot.slane %v875_v16, 4  ;;  %v912_v28 = vshll.u32 %v804_v14, 16  ;;  %v898_v34 = vrot.slane %v896_v22, 5  ;;  %671 = vst [vmem:[#allocation2 + $0x3c] sm:$0xf] %v670_v63 }
  0x5a   : > { %v11551_v15 = vcombine.low %v857_v10, %v867_v11  ;;  %v886_v33 = vrot.slane %v885_v20, 4  ;;  %v904_v36 = vrot.slane %v902_v23, 5  ;;  %v908_v37 = vrot.slane %v906_v25, 4  ;;  %v676_v4 = vld [vmem:[#allocation2 + $0x48] sm:$0xf] }
  0x5b   : > { %v881_v39 = vsel %vm14696_vm6, %v876_v27, %v880_v12  ;;  %v914_v40 = vrot.slane %v912_v28, 5  ;;  %v917_v43 = vshrl.u32 %v761_v32, 16  ;;  %v899_v47 = vor.u32 %v898_v34, %v895_v18  ;;  %v762_v6 = vld [vmem:[#allocation2 + $0x34] sm:$0xf]  ;;  %v292_v10 = vld [vmem:[%s14688_s25 + $0x30] sm:$0xf] }
  0x5c   : > { %12835 = vmatmul.mubr.bf16.vlgmr.msra.gmra.mrb[0].mxu0 %v11551_v15  ;;  %v891_v46 = vsel %vm14696_vm6, %v886_v33, %v890_v17  ;;  %v909_v48 = vor.u32 %v908_v37, %v904_v36  ;;  %v920_v49 = vshll.u32 %v761_v32, 16  ;;  %v390_v54 = vrot.slane %v14771_v53, 4  ;;  %v14214_v53 = vld [vmem:[%s19268_s1 + $0x18] sm:$0xff]   ;;  %v680_v15 = vld [vmem:[#allocation2 + $0x50] sm:$0x1]  ;;  %v14215_v17 = vld [vmem:[%s19268_s1 + $0x20] sm:$0xff]  }
  0x5d   : > { %12867 = vmatpush3.bf16.msra.mxu0 %v14753_v21  ;;  %v290_v21 = vld [vmem:[%s14688_s25 + $0x28] sm:$0xf]  ;;  %v11552_v50 = vcombine.low %v881_v39, %v891_v46  ;;  %v919_v51 = vrot.slane %v917_v43, 4  ;;  %v900_v55 = vrot.slane %v899_v47, 4  ;;  %v394_v60 = vrot.slane %v392_v58, 7 }
  0x5e   : > { %12868 = vmatprep.subr.bf16.mxu0 %v14212_v19  ;;  %v910_v56 = vrot.slane %v909_v48, 4  ;;  %v922_v59 = vrot.slane %v920_v49, 5  ;;  %v395_v62 = vshll.u32 %v14767_v45, 16  ;;  %v401_v57 = vshrl.u32 %v290_v21, 16  ;;  %v293_v16 = vld [vmem:[%s14688_s25 + $0x34] sm:$0xf] }
  0x5f   : > { %12838 = vmatprep.mubr.bf16.mxu0 %v11552_v50  ;;  %v404_v1 = vshll.u32 %v290_v21, 16  ;;  %v905_v2 = vsel %vm14696_vm6, %v900_v55, %v904_v36  ;;  %v399_v45 = vrot.slane %v394_v60, 4  ;;  %v409_v9 = vshrl.u32 %v291_v61, 16  ;;  %v805_v18 = vld [vmem:[#allocation2 + $0x38] sm:$0x1]  ;;  %v14216_v46 = vld [vmem:[%s19268_s1 + $0x28] sm:$0xff]  }
  0x60   : > { %v915_v58 = vsel %vm14696_vm6, %v910_v56, %v914_v40  ;;  %v923_v3 = vor.u32 %v922_v59, %v919_v51  ;;  %v397_v7 = vor.u32 %v395_v62, %v394_v60  ;;  %v403_v8 = vrot.slane %v401_v57, 7  ;;  %v294_v39 = vld [vmem:[%s14688_s25 + $0x38] sm:$0xf]  ;;  %v763_v40 = vld [vmem:[#allocation2 + $0x3c] sm:$0xf] }
  0x61   : > { %12869 = vmatpush3.bf16.msra.mxu0 %v14212_v19  ;;  %v11553_v5 = vcombine.low %v905_v2, %v915_v58  ;;  %v926_v12 = vshll.u32 %v762_v6, 16  ;;  %v930_v13 = vshrl.u32 %v762_v6, 16  ;;  %v674_v14 = vsel %vm14718_vm10, %v399_v45, %v673_v0  ;;  %v683_v51 = vld [vmem:[#allocation2 + $0x54] sm:$0xf]  ;;  %v687_v56 = vld [vmem:[#allocation2 + $0x5c] sm:$0x1] }
  0x62   : > { %12870 = vmatprep.subr.bf16.mxu0 %v14213_v38  ;;  %v924_v11 = vrot.slane %v923_v3, 4  ;;  %v398_v19 = vsel %vm14704_vm8, %v390_v54, %v397_v7  ;;  %675 = vst [vmem:[#allocation2 + $0x44] sm:$0x1] %v674_v14  ;;  %v406_v20 = vor.u32 %v404_v1, %v403_v8  ;;  %v407_v22 = vrot.slane %v403_v8, 4  ;;  %v14217_v3 = vld [vmem:[%s19268_s1 + $0x30] sm:$0xff]  }
  0x63   : > { %v411_v23 = vrot.slane %v409_v9, 7  ;;  %v928_v25 = vrot.slane %v926_v12, 5  ;;  %v932_v26 = vrot.slane %v930_v13, 4  ;;  %v936_v27 = vshll.u32 %v805_v18, 16  ;;  %672 = vst [vmem:[#allocation2 + $0x40] sm:$0xf] %v398_v19 }
  0x64   : > { %12839 = vmatmul.mubr.bf16.gmra.mrb[4].mxu0 %v11553_v5  ;;  %v412_v28 = vshll.u32 %v291_v61, 16  ;;  %v677_v30 = vsel %vm14709_vm9, %v406_v20, %v676_v4  ;;  %v418_v32 = vshrl.u32 %v292_v10, 16  ;;  %v421_v33 = vshll.u32 %v292_v10, 16  ;;  %v295_v7 = vld [vmem:[%s14688_s25 + $0x3c] sm:$0xf] }
  0x65   : > { %12871 = vmatpush3.bf16.msra.mxu0 %v14213_v38  ;;  %v416_v29 = vrot.slane %v411_v23, 4  ;;  %v929_v34 = vsel %vm14696_vm6, %v924_v11, %v928_v25  ;;  %v933_v36 = vor.u32 %v932_v26, %v928_v25  ;;  %v938_v37 = vrot.slane %v936_v27, 5  ;;  %678 = vst [vmem:[#allocation2 + $0x48] sm:$0xf] %v677_v30  ;;  %v690_v13 = vld [vmem:[#allocation2 + $0x60] sm:$0xf] }
  0x66   : > { %12872 = vmatprep.subr.bf16.mxu0 %v14214_v53  ;;  %v414_v38 = vor.u32 %v412_v28, %v411_v23  ;;  %v420_v43 = vrot.slane %v418_v32, 7  ;;  %v426_v44 = vshrl.u32 %v293_v16, 16  ;;  %v429_v21 = vshll.u32 %v293_v16, 16  ;;  %v14218_v25 = vld [vmem:[%s19268_s1 + $0x38] sm:$0xff]  }
  0x67   : > { %v681_v42 = vsel %vm14718_vm10, %v416_v29, %v680_v15  ;;  %v934_v47 = vrot.slane %v933_v36, 4  ;;  %v941_v48 = vshrl.u32 %v763_v40, 16  ;;  %v944_v49 = vshll.u32 %v763_v40, 16 }
  0x68   : > { %v415_v50 = vsel %vm14704_vm8, %v407_v22, %v414_v38  ;;  %682 = vst [vmem:[#allocation2 + $0x50] sm:$0x1] %v681_v42  ;;  %v423_v52 = vor.u32 %v421_v33, %v420_v43  ;;  %v424_v54 = vrot.slane %v420_v43, 4  ;;  %v428_v55 = vrot.slane %v426_v44, 7 }
  0x69   : > { %12873 = vmatpush3.bf16.msra.mxu0 %v14214_v53  ;;  %679 = vst [vmem:[#allocation2 + $0x4c] sm:$0xf] %v415_v50  ;;  %v435_v59 = vshrl.u32 %v294_v39, 16  ;;  %v939_v60 = vsel %vm14696_vm6, %v934_v47, %v938_v37  ;;  %v806_v61 = vld [vmem:[#allocation2 + $0x44] sm:$0x1]  ;;  %v943_v62 = vrot.slane %v941_v48, 4 }
  0x6a   : > { %12874 = vmatprep.subr.bf16.mxu0 %v14215_v17  ;;  %v946_v63 = vrot.slane %v944_v49, 5  ;;  %v438_v0 = vshll.u32 %v294_v39, 16  ;;  %v11554_v57 = vcombine.low %v929_v34, %v939_v60  ;;  %v764_v1 = vld [vmem:[#allocation2 + $0x40] sm:$0xf]  ;;  %v960_v53 = vshll.u32 %v806_v61, 16 }
  0x6b   : > { %v431_v2 = vor.u32 %v429_v21, %v428_v55  ;;  %v433_v58 = vrot.slane %v428_v55, 4  ;;  %v950_v4 = vshll.u32 %v764_v1, 16  ;;  %v954_v5 = vshrl.u32 %v764_v1, 16  ;;  %v296_v37 = vld [vmem:[%s14688_s25 + $0x40] sm:$0xf] }
  0x6c   : > { %v947_v45 = vor.u32 %v946_v63, %v943_v62  ;;  %v684_v6 = vsel %vm14709_vm9, %v423_v52, %v683_v51  ;;  %12842 = vmatprep.mubr.bf16.mxu0 %v11554_v57  ;;  %v962_v8 = vrot.slane %v960_v53, 5  ;;  %v765_v9 = vld [vmem:[#allocation2 + $0x48] sm:$0xf]  ;;  %v437_v12 = vrot.slane %v435_v59, 7  ;;  %v14855_v47 = vld [vmem:[%s19268_s1 + $0x80] sm:$0xff]  }
  0x6d   : > { %12875 = vmatpush3.bf16.msra.mxu0 %v14215_v17  ;;  %v432_v10 = vsel %vm14704_vm8, %v424_v54, %v431_v2  ;;  %685 = vst [vmem:[#allocation2 + $0x54] sm:$0xf] %v684_v6  ;;  %v688_v11 = vsel %vm14718_vm10, %v433_v58, %v687_v56  ;;  %v952_v15 = vrot.slane %v950_v4, 5  ;;  %v956_v16 = vrot.slane %v954_v5, 4  ;;  %v694_v51 = vld [vmem:[#allocation2 + $0x68] sm:$0x1] }
  0x6e   : > { %12876 = vmatprep.subr.bf16.mxu0 %v14216_v46  ;;  %v948_v14 = vrot.slane %v947_v45, 4  ;;  %v965_v17 = vshrl.u32 %v765_v9, 16  ;;  %686 = vst [vmem:[#allocation2 + $0x58] sm:$0xf] %v432_v10  ;;  %689 = vst [vmem:[#allocation2 + $0x5c] sm:$0x1] %v688_v11  ;;  %v440_v20 = vor.u32 %v438_v0, %v437_v12 }
  0x6f   : > { %v807_v18 = vld [vmem:[#allocation2 + $0x50] sm:$0x1]  ;;  %v968_v19 = vshll.u32 %v765_v9, 16  ;;  %v441_v22 = vrot.slane %v437_v12, 4  ;;  %v443_v23 = vshrl.u32 %v295_v7, 16  ;;  %v957_v27 = vor.u32 %v956_v16, %v952_v15 }
  0x70   : > { %v953_v26 = vsel %vm14696_vm6, %v948_v14, %v952_v15  ;;  %v766_v28 = vld [vmem:[#allocation2 + $0x4c] sm:$0xf]  ;;  %v967_v29 = vrot.slane %v965_v17, 4  ;;  %v984_v30 = vshll.u32 %v807_v18, 16  ;;  %v446_v40 = vshll.u32 %v295_v7, 16 }
  0x71   : > { %12877 = vmatpush3.bf16.msra.mxu0 %v14216_v46  ;;  %v970_v32 = vrot.slane %v968_v19, 5  ;;  %v974_v33 = vshll.u32 %v766_v28, 16  ;;  %v978_v34 = vshrl.u32 %v766_v28, 16  ;;  %v445_v36 = vrot.slane %v443_v23, 7  ;;  %v297_v53 = vld [vmem:[%s14688_s25 + $0x44] sm:$0xf] }
  0x72   : > { %12878 = vmatprep.subr.bf16.mxu0 %v14217_v3  ;;  %v958_v38 = vrot.slane %v957_v27, 4  ;;  %v986_v39 = vrot.slane %v984_v30, 5  ;;  %v691_v42 = vsel %vm14709_vm9, %v440_v20, %v690_v13  ;;  %v452_v52 = vshrl.u32 %v296_v37, 16  ;;  %v298_v12 = vld [vmem:[%s14688_s25 + $0x48] sm:$0xf] }
  0x73   : > { %v971_v43 = vor.u32 %v970_v32, %v967_v29  ;;  %v976_v44 = vrot.slane %v974_v33, 5  ;;  %v980_v21 = vrot.slane %v978_v34, 4  ;;  %v450_v46 = vrot.slane %v445_v36, 4  ;;  %692 = vst [vmem:[#allocation2 + $0x60] sm:$0xf] %v691_v42 }
  0x74   : > { %v963_v48 = vsel %vm14696_vm6, %v958_v38, %v962_v8  ;;  %v767_v49 = vld [vmem:[#allocation2 + $0x54] sm:$0xf]  ;;  %v448_v50 = vor.u32 %v446_v40, %v445_v36  ;;  %v455_v54 = vshll.u32 %v296_v37, 16  ;;  %v454_v10 = vrot.slane %v452_v52, 7  ;;  %v697_v18 = vld [vmem:[#allocation2 + $0x6c] sm:$0xf] }
  0x75   : > { %12879 = vmatpush3.bf16.msra.mxu0 %v14217_v3  ;;  %v11555_v55 = vcombine.low %v953_v26, %v963_v48  ;;  %v972_v56 = vrot.slane %v971_v43, 4  ;;  %v981_v59 = vor.u32 %v980_v21, %v976_v44  ;;  %v768_v60 = vld [vmem:[#allocation2 + $0x58] sm:$0xf]  ;;  %v808_v61 = vld [vmem:[#allocation2 + $0x5c] sm:$0x1]  ;;  %v989_v62 = vshrl.u32 %v767_v49, 16 }
  0x76   : > { %12880 = vmatprep.subr.bf16.mxu0 %v14218_v25  ;;  %v992_v63 = vshll.u32 %v767_v49, 16  ;;  %v998_v0 = vshll.u32 %v768_v60, 16  ;;  %v1002_v57 = vshrl.u32 %v768_v60, 16  ;;  %v1008_v1 = vshll.u32 %v808_v61, 16  ;;  %v299_v28 = vld [vmem:[%s14688_s25 + $0x4c] sm:$0xf] }
  0x77   : > { %12843 = vmatmul.mubr.bf16.gmra.mrb[8].mxu0 %v11555_v55  ;;  %v977_v2 = vsel %vm14696_vm6, %v972_v56, %v976_v44  ;;  %v982_v58 = vrot.slane %v981_v59, 4  ;;  %v991_v3 = vrot.slane %v989_v62, 4  ;;  %v449_v45 = vsel %vm14704_vm8, %v441_v22, %v448_v50  ;;  %v701_v34 = vld [vmem:[#allocation2 + $0x74] sm:$0x1]  ;;  %v704_v42 = vld [vmem:[#allocation2 + $0x78] sm:$0xf] }
  0x78   : > { %v994_v4 = vrot.slane %v992_v63, 5  ;;  %v1000_v5 = vrot.slane %v998_v0, 5  ;;  %v1004_v6 = vrot.slane %v1002_v57, 4  ;;  %v1010_v7 = vrot.slane %v1008_v1, 5  ;;  %693 = vst [vmem:[#allocation2 + $0x64] sm:$0xf] %v449_v45 }
  0x79   : > { %12881 = vmatpush3.bf16.msra.mxu0 %v14218_v25  ;;  %v987_v8 = vsel %vm14696_vm6, %v982_v58, %v986_v39  ;;  %v695_v9 = vsel %vm14718_vm10, %v450_v46, %v694_v51  ;;  %v460_v11 = vshrl.u32 %v297_v53, 16  ;;  %v463_v17 = vshll.u32 %v297_v53, 16  ;;  %v300_v49 = vld [vmem:[%s14688_s25 + $0x50] sm:$0xf]  ;;  %v708_v55 = vld [vmem:[#allocation2 + $0x80] sm:$0x1] }
  0x7a   : > { %12914 = vmatprep.subr.bf16.mxu0 %v14855_v47  ;;  %v11556_v13 = vcombine.low %v977_v2, %v987_v8  ;;  %v995_v14 = vor.u32 %v994_v4, %v991_v3  ;;  %v1005_v15 = vor.u32 %v1004_v6, %v1000_v5  ;;  %696 = vst [vmem:[#allocation2 + $0x68] sm:$0x1] %v695_v9  ;;  %v14870_v16 = vld [vmem:[#allocation2 + $0x60] sm:$0xf]  ;;  %v458_v23 = vrot.slane %v454_v10, 4 }
  0x7b   : > { %v1013_v19 = vshrl.u32 %v14870_v16, 16  ;;  %v1016_v20 = vshll.u32 %v14870_v16, 16  ;;  %v457_v22 = vor.u32 %v455_v54, %v454_v10  ;;  %v462_v27 = vrot.slane %v460_v11, 7  ;;  %v301_v56 = vld [vmem:[%s14688_s25 + $0x54] sm:$0xf] }
  0x7c   : > { %12846 = vmatprep.mubr.bf16.mxu0 %v11556_v13  ;;  %v996_v25 = vrot.slane %v995_v14, 4  ;;  %v1006_v26 = vrot.slane %v1005_v15, 4  ;;  %v469_v29 = vshrl.u32 %v298_v12, 16  ;;  %v472_v36 = vshll.u32 %v298_v12, 16  ;;  %v14892_v2 = vld [vmem:[%s14688_s25 + $0x58] sm:$0xf] }
  0x7d   : > { %v1015_v30 = vrot.slane %v1013_v19, 4  ;;  %v1018_v32 = vrot.slane %v1016_v20, 5  ;;  %v698_v33 = vsel %vm14709_vm9, %v457_v22, %v697_v18  ;;  %v465_v39 = vor.u32 %v463_v17, %v462_v27  ;;  %v711_v14 = vld [vmem:[#allocation2 + $0x84] sm:$0xf]  ;;  %v2685_v31 = vld [vmem:[#allocation2 + $0x48] sm:$0xf] }
  0x7e   : > { %v1001_v37 = vsel %vm14696_vm6, %v996_v25, %v1000_v5  ;;  %v1011_v38 = vsel %vm14696_vm6, %v1006_v26, %v1010_v7  ;;  %v467_v40 = vrot.slane %v462_v27, 4  ;;  %699 = vst [vmem:[#allocation2 + $0x6c] sm:$0xf] %v698_v33  ;;  %v471_v46 = vrot.slane %v469_v29, 7 }
  0x7f   : > { %v11557_v43 = vcombine.low %v1001_v37, %v1011_v38  ;;  %v14881_v44 = vld [vmem:[#allocation2 + $0x64] sm:$0xf]  ;;  %v1019_v21 = vor.u32 %v1018_v32, %v1015_v30  ;;  %v477_v48 = vshrl.u32 %v299_v28, 16  ;;  %v466_v52 = vsel %vm14704_vm8, %v458_v23, %v465_v39  ;;  %v715_v32 = vld [vmem:[#allocation2 + $0x8c] sm:$0x1] }
  0x80   : > { %v1022_v50 = vshll.u32 %v14881_v44, 16  ;;  %v1026_v51 = vshrl.u32 %v14881_v44, 16  ;;  %v702_v54 = vsel %vm14718_vm10, %v467_v40, %v701_v34  ;;  %700 = vst [vmem:[#allocation2 + $0x70] sm:$0xf] %v466_v52  ;;  %v474_v61 = vor.u32 %v472_v36, %v471_v46 }
  0x81   : > { %12847 = vmatmul.mubr.bf16.gmra.mrb[12].mxu0 %v11557_v43  ;;  %v809_v59 = vld [vmem:[#allocation2 + $0x68] sm:$0x1]  ;;  %v1020_v60 = vrot.slane %v1019_v21, 4  ;;  %703 = vst [vmem:[#allocation2 + $0x74] sm:$0x1] %v702_v54  ;;  %v475_v62 = vrot.slane %v471_v46, 4 }
  0x82   : > { %v479_v63 = vrot.slane %v477_v48, 7  ;;  %v1024_v0 = vrot.slane %v1022_v50, 5  ;;  %v1028_v57 = vrot.slane %v1026_v51, 4  ;;  %v1032_v1 = vshll.u32 %v809_v59, 16 }
  0x83   : > { %v480_v53 = vshll.u32 %v299_v28, 16  ;;  %v705_v3 = vsel %vm14709_vm9, %v474_v61, %v704_v42  ;;  %v486_v45 = vshrl.u32 %v300_v49, 16  ;;  %v489_v4 = vshll.u32 %v300_v49, 16  ;;  %v303_v49 = vld [vmem:[%s14688_s25 + $0x5c] sm:$0xf] }
  0x84   : > { %v484_v58 = vrot.slane %v479_v63, 4  ;;  %v1025_v5 = vsel %vm14696_vm6, %v1020_v60, %v1024_v0  ;;  %v1029_v6 = vor.u32 %v1028_v57, %v1024_v0  ;;  %v1034_v7 = vrot.slane %v1032_v1, 5  ;;  %706 = vst [vmem:[#allocation2 + $0x78] sm:$0xf] %v705_v3  ;;  %v304_v0 = vld [vmem:[%s14688_s25 + $0x60] sm:$0xf] }
  0x85   : > { %v482_v8 = vor.u32 %v480_v53, %v479_v63  ;;  %v14898_v9 = vld [vmem:[#allocation2 + $0x6c] sm:$0xf]  ;;  %v488_v11 = vrot.slane %v486_v45, 7  ;;  %v494_v12 = vshrl.u32 %v301_v56, 16  ;;  %v497_v13 = vshll.u32 %v301_v56, 16 }
  0x86   : > { %v709_v10 = vsel %vm14718_vm10, %v484_v58, %v708_v55  ;;  %v1030_v15 = vrot.slane %v1029_v6, 4  ;;  %v1037_v17 = vshrl.u32 %v14898_v9, 16  ;;  %v1040_v18 = vshll.u32 %v14898_v9, 16  ;;  %v718_v56 = vld [vmem:[#allocation2 + $0x90] sm:$0xf] }
  0x87   : > { %v483_v19 = vsel %vm14704_vm8, %v475_v62, %v482_v8  ;;  %710 = vst [vmem:[#allocation2 + $0x80] sm:$0x1] %v709_v10  ;;  %v491_v20 = vor.u32 %v489_v4, %v488_v11  ;;  %v492_v22 = vrot.slane %v488_v11, 4  ;;  %v496_v23 = vrot.slane %v494_v12, 7  ;;  %v14909_v27 = vld [vmem:[#allocation2 + $0x70] sm:$0xf] }
  0x88   : > { %707 = vst [vmem:[#allocation2 + $0x7c] sm:$0xf] %v483_v19  ;;  %v503_v25 = vshrl.u32 %v14892_v2, 16  ;;  %v1035_v26 = vsel %vm14696_vm6, %v1030_v15, %v1034_v7  ;;  %v14911_v28 = vld [vmem:[#allocation2 + $0x74] sm:$0x1]  ;;  %v1039_v29 = vrot.slane %v1037_v17, 4 }
  0x89   : > { %v1042_v30 = vrot.slane %v1040_v18, 5  ;;  %v11558_v33 = vcombine.low %v1025_v5, %v1035_v26  ;;  %v1046_v34 = vshll.u32 %v14909_v27, 16  ;;  %v1050_v36 = vshrl.u32 %v14909_v27, 16  ;;  %v722_v15 = vld [vmem:[#allocation2 + $0x98] sm:$0x1] }
  0x8a   : > { %v1056_v37 = vshll.u32 %v14911_v28, 16  ;;  %v499_v39 = vor.u32 %v497_v13, %v496_v23  ;;  %v501_v40 = vrot.slane %v496_v23, 4  ;;  %v712_v42 = vsel %vm14709_vm9, %v491_v20, %v711_v14 }
  0x8b   : > { %v1043_v38 = vor.u32 %v1042_v30, %v1039_v29  ;;  %12850 = vmatprep.mubr.bf16.mxu0 %v11558_v33  ;;  %v1048_v43 = vrot.slane %v1046_v34, 5  ;;  %v1052_v21 = vrot.slane %v1050_v36, 4  ;;  %v14918_v48 = vld [vmem:[#allocation2 + $0x78] sm:$0xf]  ;;  %713 = vst [vmem:[#allocation2 + $0x84] sm:$0xf] %v712_v42 }
  0x8c   : > { %v1058_v46 = vrot.slane %v1056_v37, 5  ;;  %v505_v50 = vrot.slane %v503_v25, 7  ;;  %v1061_v52 = vshrl.u32 %v14918_v48, 16  ;;  %v1064_v54 = vshll.u32 %v14918_v48, 16  ;;  %v305_v36 = vld [vmem:[%s14688_s25 + $0x64] sm:$0xf] }
  0x8d   : > { %v1044_v51 = vrot.slane %v1043_v38, 4  ;;  %v500_v55 = vsel %vm14704_vm8, %v492_v22, %v499_v39  ;;  %v1053_v59 = vor.u32 %v1052_v21, %v1048_v43  ;;  %v716_v61 = vsel %vm14718_vm10, %v501_v40, %v715_v32 }
  0x8e   : > { %v14925_v60 = vld [vmem:[#allocation2 + $0x80] sm:$0x1]  ;;  %714 = vst [vmem:[#allocation2 + $0x88] sm:$0xf] %v500_v55  ;;  %v506_v62 = vshll.u32 %v14892_v2, 16  ;;  %v509_v63 = vrot.slane %v505_v50, 4 }
  0x8f   : > { %v1049_v57 = vsel %vm14696_vm6, %v1044_v51, %v1048_v43  ;;  %v14933_v1 = vld [vmem:[#allocation2 + $0x7c] sm:$0xf]  ;;  %v1063_v53 = vrot.slane %v1061_v52, 4  ;;  %v1066_v58 = vrot.slane %v1064_v54, 5  ;;  %v1080_v3 = vshll.u32 %v14925_v60, 16 }
  0x90   : > { %717 = vst [vmem:[#allocation2 + $0x8c] sm:$0x1] %v716_v61  ;;  %v1054_v45 = vrot.slane %v1053_v59, 4  ;;  %v1070_v4 = vshll.u32 %v14933_v1, 16  ;;  %v1074_v5 = vshrl.u32 %v14933_v1, 16  ;;  %v508_v6 = vor.u32 %v506_v62, %v505_v50 }
  0x91   : > { %v1067_v7 = vor.u32 %v1066_v58, %v1063_v53  ;;  %v1082_v2 = vrot.slane %v1080_v3, 5  ;;  %v511_v8 = vshrl.u32 %v303_v49, 16  ;;  %v514_v10 = vshll.u32 %v303_v49, 16  ;;  %v725_v51 = vld [vmem:[#allocation2 + $0x9c] sm:$0xf] }
  0x92   : > { %v1059_v11 = vsel %vm14696_vm6, %v1054_v45, %v1058_v46  ;;  %v1072_v12 = vrot.slane %v1070_v4, 5  ;;  %v1076_v13 = vrot.slane %v1074_v5, 4  ;;  %v719_v14 = vsel %vm14709_vm9, %v508_v6, %v718_v56  ;;  %v14942_v19 = vld [vmem:[#allocation2 + $0x84] sm:$0xf]  ;;  %v306_v59 = vld [vmem:[%s14688_s25 + $0x68] sm:$0xf] }
  0x93   : > { %v11559_v17 = vcombine.low %v1049_v57, %v1059_v11  ;;  %v1068_v18 = vrot.slane %v1067_v7, 4  ;;  %v513_v20 = vrot.slane %v511_v8, 7  ;;  %720 = vst [vmem:[#allocation2 + $0x90] sm:$0xf] %v719_v14  ;;  %v520_v22 = vshrl.u32 %v304_v0, 16 }
  0x94   : > { %v1077_v23 = vor.u32 %v1076_v13, %v1072_v12  ;;  %v1085_v25 = vshrl.u32 %v14942_v19, 16  ;;  %v1088_v26 = vshll.u32 %v14942_v19, 16  ;;  %v523_v29 = vshll.u32 %v304_v0, 16  ;;  %v307_v53 = vld [vmem:[%s14688_s25 + $0x6c] sm:$0xf] }
  0x95   : > { %12851 = vmatmul.mubr.bf16.gmra.mrb[16].mxu0 %v11559_v17  ;;  %v1073_v30 = vsel %vm14696_vm6, %v1068_v18, %v1072_v12  ;;  %v14948_v32 = vld [vmem:[#allocation2 + $0x88] sm:$0xf]  ;;  %v516_v33 = vor.u32 %v514_v10, %v513_v20  ;;  %v518_v34 = vrot.slane %v513_v20, 4  ;;  %v522_v37 = vrot.slane %v520_v22, 7  ;;  %v729_v17 = vld [vmem:[#allocation2 + $0xa4] sm:$0x1] }
  0x96   : > { %v1078_v38 = vrot.slane %v1077_v23, 4  ;;  %v1087_v40 = vrot.slane %v1085_v25, 4  ;;  %v1090_v42 = vrot.slane %v1088_v26, 5  ;;  %v1094_v43 = vshll.u32 %v14948_v32, 16  ;;  %v732_v26 = vld [vmem:[#allocation2 + $0xa8] sm:$0xf] }
  0x97   : > { %v14951_v39 = vld [vmem:[#allocation2 + $0x8c] sm:$0x1]  ;;  %v1098_v21 = vshrl.u32 %v14948_v32, 16  ;;  %v517_v49 = vsel %vm14704_vm8, %v509_v63, %v516_v33  ;;  %v723_v50 = vsel %vm14718_vm10, %v518_v34, %v722_v15  ;;  %v525_v56 = vor.u32 %v523_v29, %v522_v37 }
  0x98   : > { %v1104_v46 = vshll.u32 %v14951_v39, 16  ;;  %v1083_v52 = vsel %vm14696_vm6, %v1078_v38, %v1082_v2  ;;  %v1091_v54 = vor.u32 %v1090_v42, %v1087_v40  ;;  %v1096_v55 = vrot.slane %v1094_v43, 5  ;;  %721 = vst [vmem:[#allocation2 + $0x94] sm:$0xf] %v517_v49  ;;  %724 = vst [vmem:[#allocation2 + $0x98] sm:$0x1] %v723_v50 }
  0x99   : > { %v11560_v61 = vcombine.low %v1073_v30, %v1083_v52  ;;  %v1100_v62 = vrot.slane %v1098_v21, 4  ;;  %v526_v57 = vrot.slane %v522_v37, 4  ;;  %v528_v3 = vshrl.u32 %v305_v36, 16  ;;  %v736_v38 = vld [vmem:[#allocation2 + $0xb0] sm:$0x1] }
  0x9a   : > { %v1106_v0 = vrot.slane %v1104_v46, 5  ;;  %v1092_v58 = vrot.slane %v1091_v54, 4  ;;  %v14964_v63 = vld [vmem:[#allocation2 + $0x90] sm:$0xf]  ;;  %v531_v45 = vshll.u32 %v305_v36, 16  ;;  %v726_v4 = vsel %vm14709_vm9, %v525_v56, %v725_v51 }
  0x9b   : > { %12854 = vmatprep.mubr.bf16.mxu0 %v11560_v61  ;;  %v1101_v5 = vor.u32 %v1100_v62, %v1096_v55  ;;  %v1109_v6 = vshrl.u32 %v14964_v63, 16  ;;  %v1112_v7 = vshll.u32 %v14964_v63, 16  ;;  %727 = vst [vmem:[#allocation2 + $0x9c] sm:$0xf] %v726_v4  ;;  %v537_v2 = vshrl.u32 %v306_v59, 16 }
  0x9c   : > { %v1097_v8 = vsel %vm14696_vm6, %v1092_v58, %v1096_v55  ;;  %v530_v10 = vrot.slane %v528_v3, 7  ;;  %v540_v11 = vshll.u32 %v306_v59, 16  ;;  %v545_v12 = vshrl.u32 %v307_v53, 16  ;;  %v308_v51 = vld [vmem:[%s14688_s25 + $0x70] sm:$0xf] }
  0x9d   : > { %v1102_v13 = vrot.slane %v1101_v5, 4  ;;  %v1111_v14 = vrot.slane %v1109_v6, 4  ;;  %v1114_v15 = vrot.slane %v1112_v7, 5  ;;  %v539_v18 = vrot.slane %v537_v2, 7  ;;  %v309_v52 = vld [vmem:[%s14688_s25 + $0x74] sm:$0xf] }
  0x9e   : > { %v533_v20 = vor.u32 %v531_v45, %v530_v10  ;;  %v535_v22 = vrot.slane %v530_v10, 4  ;;  %v547_v23 = vrot.slane %v545_v12, 7  ;;  %v548_v25 = vshll.u32 %v307_v53, 16 }
  0x9f   : > { %v1107_v29 = vsel %vm14696_vm6, %v1102_v13, %v1106_v0  ;;  %v14974_v30 = vld [vmem:[#allocation2 + $0x94] sm:$0xf]  ;;  %v14976_v33 = vld [vmem:[#allocation2 + $0x98] sm:$0x1]  ;;  %v1115_v34 = vor.u32 %v1114_v15, %v1111_v14  ;;  %v542_v36 = vor.u32 %v540_v11, %v539_v18  ;;  %v543_v37 = vrot.slane %v539_v18, 4 }
  0xa0   : > { %v11561_v40 = vcombine.low %v1097_v8, %v1107_v29  ;;  %v1118_v42 = vshll.u32 %v14974_v30, 16  ;;  %v1122_v43 = vshrl.u32 %v14974_v30, 16  ;;  %v1128_v21 = vshll.u32 %v14976_v33, 16  ;;  %v739_v8 = vld [vmem:[#allocation2 + $0xb4] sm:$0xf] }
  0xa1   : > { %v534_v46 = vsel %vm14704_vm8, %v526_v57, %v533_v20  ;;  %v730_v49 = vsel %vm14718_vm10, %v535_v22, %v729_v17  ;;  %v550_v50 = vor.u32 %v548_v25, %v547_v23  ;;  %v1116_v54 = vrot.slane %v1115_v34, 4  ;;  %v743_v22 = vld [vmem:[#allocation2 + $0xbc] sm:$0x1] }
  0xa2   : > { %12855 = vmatmul.mubr.bf16.gmra.mrb[20].mxu0 %v11561_v40  ;;  %v1120_v55 = vrot.slane %v1118_v42, 5  ;;  %v1124_v56 = vrot.slane %v1122_v43, 4  ;;  %728 = vst [vmem:[#allocation2 + $0xa0] sm:$0xf] %v534_v46  ;;  %731 = vst [vmem:[#allocation2 + $0xa4] sm:$0x1] %v730_v49  ;;  %v733_v53 = vsel %vm14709_vm9, %v542_v36, %v732_v26 }
  0xa3   : > { %v14987_v59 = vld [vmem:[#allocation2 + $0x9c] sm:$0xf]  ;;  %v552_v61 = vrot.slane %v547_v23, 4  ;;  %v551_v57 = vsel %vm14704_vm8, %v543_v37, %v550_v50  ;;  %v1130_v3 = vrot.slane %v1128_v21, 5  ;;  %734 = vst [vmem:[#allocation2 + $0xa8] sm:$0xf] %v733_v53 }
  0xa4   : > { %v1133_v62 = vshrl.u32 %v14987_v59, 16  ;;  %v1136_v0 = vshll.u32 %v14987_v59, 16  ;;  %v1125_v58 = vor.u32 %v1124_v56, %v1120_v55  ;;  %735 = vst [vmem:[#allocation2 + $0xac] sm:$0xf] %v551_v57  ;;  %v554_v4 = vshrl.u32 %v308_v51, 16 }
  0xa5   : > { %v737_v45 = vsel %vm14718_vm10, %v552_v61, %v736_v38  ;;  %v557_v7 = vshll.u32 %v308_v51, 16  ;;  %v562_v2 = vshrl.u32 %v309_v52, 16  ;;  %v1121_v10 = vsel %vm14696_vm6, %v1116_v54, %v1120_v55 }
  0xa6   : > { %v1135_v5 = vrot.slane %v1133_v62, 4  ;;  %v1138_v6 = vrot.slane %v1136_v0, 5  ;;  %738 = vst [vmem:[#allocation2 + $0xb0] sm:$0x1] %v737_v45  ;;  %v1126_v11 = vrot.slane %v1125_v58, 4  ;;  %v556_v12 = vrot.slane %v554_v4, 7 }
  0xa7   : > { %v565_v13 = vshll.u32 %v309_v52, 16  ;;  %v564_v15 = vrot.slane %v562_v2, 7  ;;  %v11584_v2 = vcombine.low %v14918_v48, %v14933_v1 }
  0xa8   : > { %v1139_v14 = vor.u32 %v1138_v6, %v1135_v5  ;;  %v1131_v17 = vsel %vm14696_vm6, %v1126_v11, %v1130_v3  ;;  %v559_v18 = vor.u32 %v557_v7, %v556_v12  ;;  %v560_v20 = vrot.slane %v556_v12, 4 }
  0xa9   : > { %v11562_v23 = vcombine.low %v1121_v10, %v1131_v17  ;;  %v15001_v25 = vld [vmem:[#allocation2 + $0xa0] sm:$0xf]  ;;  %v15003_v26 = vld [vmem:[#allocation2 + $0xa4] sm:$0x1]  ;;  %v567_v34 = vor.u32 %v565_v13, %v564_v15  ;;  %v569_v36 = vrot.slane %v564_v15, 4  ;;  %v11583_v3 = vcombine.low %v14898_v9, %v14909_v27 }
  0xaa   : > { %v1140_v29 = vrot.slane %v1139_v14, 4  ;;  %v1142_v37 = vshll.u32 %v15001_v25, 16  ;;  %v1146_v38 = vshrl.u32 %v15001_v25, 16  ;;  %v1152_v40 = vshll.u32 %v15003_v26, 16  ;;  %v15010_v43 = vld [vmem:[#allocation2 + $0xa8] sm:$0xf] }
  0xab   : > { %v740_v42 = vsel %vm14709_vm9, %v559_v18, %v739_v8  ;;  %12858 = vmatprep.mubr.bf16.mxu0 %v11562_v23  ;;  %v15012_v21 = vld [vmem:[#allocation2 + $0xac] sm:$0xf]  ;;  %v568_v46 = vsel %vm14704_vm8, %v560_v20, %v567_v34  ;;  %v744_v49 = vsel %vm14718_vm10, %v569_v36, %v743_v22  ;;  %v1157_v55 = vshrl.u32 %v15010_v43, 16 }
  0xac   : > { %741 = vst [vmem:[#allocation2 + $0xb4] sm:$0xf] %v740_v42  ;;  %v1144_v50 = vrot.slane %v1142_v37, 5  ;;  %v1148_v51 = vrot.slane %v1146_v38, 4  ;;  %v1154_v52 = vrot.slane %v1152_v40, 5  ;;  %v1160_v56 = vshll.u32 %v15010_v43, 16 }
  0xad   : > { %v15018_v54 = vld [vmem:[#allocation2 + $0xb0] sm:$0x1]  ;;  %742 = vst [vmem:[#allocation2 + $0xb8] sm:$0xf] %v568_v46  ;;  %745 = vst [vmem:[#allocation2 + $0xbc] sm:$0x1] %v744_v49  ;;  %v11585_v8 = vcombine.low %v14942_v19, %v14948_v32  ;;  %v11586_v10 = vcombine.low %v14964_v63, %v14974_v30  ;;  %v11587_v13 = vcombine.low %v14987_v59, %v15001_v25 }
  0xae   : > { %v1166_v61 = vshll.u32 %v15012_v21, 16  ;;  %v1170_v62 = vshrl.u32 %v15012_v21, 16  ;;  %v1176_v0 = vshll.u32 %v15018_v54, 16  ;;  %v1145_v57 = vsel %vm14696_vm6, %v1140_v29, %v1144_v50  ;;  %v1800_v63 = vld [vmem:[#allocation2 + $0xc] sm:$0xe] }
  0xaf   : > { %v1149_v53 = vor.u32 %v1148_v51, %v1144_v50  ;;  %v1159_v58 = vrot.slane %v1157_v55, 4  ;;  %v1162_v45 = vrot.slane %v1160_v56, 5  ;;  %v11588_v14 = vcombine.low %v15010_v43, %v15012_v21 }
  0xb0   : > { %v1168_v4 = vrot.slane %v1166_v61, 5  ;;  %v1172_v5 = vrot.slane %v1170_v62, 4  ;;  %v1178_v6 = vrot.slane %v1176_v0, 5 }
  0xb1   : > { %v1150_v7 = vrot.slane %v1149_v53, 4  ;;  %v1163_v11 = vor.u32 %v1162_v45, %v1159_v58 }
  0xb2   : > { %v1173_v12 = vor.u32 %v1172_v5, %v1168_v4  ;;  %v15062_v5 = vld [vmem:[#allocation2 + $0x4] sm:$0xf] }
  0xb3   : > { %v1155_v15 = vsel %vm14696_vm6, %v1150_v7, %v1154_v52  ;;  %v15041_v17 = vld [vmem:[#allocation2 + $0xb4] sm:$0xf]  ;;  %v1164_v20 = vrot.slane %v1163_v11, 4  ;;  %v1808_v11 = vld [vmem:[#allocation2 + $0x6c] sm:$0xe] }
  0xb4   : > { %v11563_v18 = vcombine.low %v1145_v57, %v1155_v15  ;;  %v1174_v22 = vrot.slane %v1173_v12, 4  ;;  %v15043_v23 = vld [vmem:[#allocation2 + $0xb8] sm:$0xf]  ;;  %v15045_v29 = vld [vmem:[#allocation2 + $0xbc] sm:$0x1]  ;;  %v1181_v34 = vshrl.u32 %v15041_v17, 16 }
  0xb5   : > { %v1184_v36 = vshll.u32 %v15041_v17, 16  ;;  %v1190_v37 = vshll.u32 %v15043_v23, 16  ;;  %v1194_v38 = vshrl.u32 %v15043_v23, 16  ;;  %v1169_v40 = vsel %vm14696_vm6, %v1164_v20, %v1168_v4  ;;  %v14447_v4 = vld [vmem:[#allocation2] sm:$0xf] }
  0xb6   : > { %12859 = vmatmul.mubr.bf16.gmra.mrb[24].mxu0 %v11563_v18  ;;  %v1179_v42 = vsel %vm14696_vm6, %v1174_v22, %v1178_v6  ;;  %v1200_v46 = vshll.u32 %v15045_v29, 16  ;;  %v11589_v49 = vcombine.low %v15041_v17, %v15043_v23  ;;  %v1183_v51 = vrot.slane %v1181_v34, 4  ;;  %v1809_v12 = vld [vmem:[#allocation2 + $0x78] sm:$0xe]  ;;  %v14449_v15 = vld [vmem:[#allocation2 + $0xc] sm:$0xf] }
  0xb7   : > { %v11564_v50 = vcombine.low %v1169_v40, %v1179_v42  ;;  %v1186_v52 = vrot.slane %v1184_v36, 5  ;;  %v1192_v55 = vrot.slane %v1190_v37, 5  ;;  %v1196_v56 = vrot.slane %v1194_v38, 4  ;;  %v15065_v18 = vld [vmem:[#allocation2 + $0x10] sm:$0xf]  ;;  %v14224_v38 = vld [vmem:[%s19268_s1 + $0x88] sm:$0xff]  }
  0xb8   : > { %v1202_v0 = vrot.slane %v1200_v46, 5  ;;  %v11574_v6 = vcombine.low %v14447_v4, %v15062_v5  ;;  %v11575_v20 = vcombine.low %v14449_v15, %v15065_v18  ;;  %v1810_v22 = vld [vmem:[#allocation2 + $0x84] sm:$0xe]  ;;  %v14451_v34 = vld [vmem:[#allocation2 + $0x18] sm:$0xf]  ;;  %v11607_v40 = vrot.slane %v1808_v11, 9 }
  0xb9   : > { %12862 = vmatprep.mubr.bf16.mxu0 %v11564_v50  ;;  %v1187_v61 = vor.u32 %v1186_v52, %v1183_v51  ;;  %v1197_v62 = vor.u32 %v1196_v56, %v1192_v55  ;;  %v15068_v36 = vld [vmem:[#allocation2 + $0x1c] sm:$0xf]  ;;  %v1811_v42 = vld [vmem:[#allocation2 + $0x90] sm:$0xe]  ;;  %v1915_v46 = vrot.slane %v14909_v27, 5  ;;  %v1918_v50 = vrot.slane %v14911_v28, 5 }
  0xba   : > { %v11576_v37 = vcombine.low %v14451_v34, %v15068_v36  ;;  %v11608_v51 = vrot.slane %v1809_v12, 9  ;;  %v19395_v52 = vmov 0  ;;  %v1812_v56 = vld [vmem:[#allocation2 + $0x9c] sm:$0xe]  ;;  %v14455_v11 = vld [vmem:[#allocation2 + $0x30] sm:$0xf] }
  0xbb   : > { %v1188_v57 = vrot.slane %v1187_v61, 4  ;;  %v1198_v53 = vrot.slane %v1197_v62, 4  ;;  %v19396_v52 = vsel %vm15076_vm13, 4294967295, %v19395_v52  ;;  %v14227_v61 = vld [vmem:[%s19268_s1 + $0x90] sm:$0xff]   ;;  %v15087_v62 = vsel %vm15076_vm13, %v11607_v40, %v1915_v46 }
  0xbc   : > { %19397 = vst [vmem:[#allocation8_spill] sm:$0xff] %v19396_v52  ;;  %v1917_v28 = vrot.slane %v1915_v46, 4  ;;  %v15098_v12 = vld [vmem:[#allocation2 + $0x34] sm:$0xf]  ;;  %v6304_v52 = vld [vmem:[#allocation3 + $0x68] sm:$0x1] }
  0xbd   : > { %v1193_v58 = vsel %vm14696_vm6, %v1188_v57, %v1192_v55  ;;  %v1203_v45 = vsel %vm14696_vm6, %v1198_v53, %v1202_v0  ;;  %v1922_v55 = vrot.slane %v14933_v1, 5  ;;  %v1925_v0 = vrot.slane %v14925_v60, 5  ;;  %v1813_v53 = vld [vmem:[#allocation2 + $0xa8] sm:$0xe]  ;;  %v1814_v34 = vld [vmem:[#allocation2 + $0xb4] sm:$0xe] }
  0xbe   : > { %v11565_v7 = vcombine.low %v1193_v58, %v1203_v45  ;;  %v11609_v57 = vrot.slane %v1810_v22, 9  ;;  %v14453_v58 = vld [vmem:[#allocation2 + $0x24] sm:$0xf]  ;;  %v15090_v45 = vld [vmem:[#allocation2 + $0x28] sm:$0xf]  ;;  %v11578_v60 = vcombine.low %v14455_v11, %v15098_v12  ;;  %v15103_v15 = vsel %vm15076_vm13, %v1917_v28, %v1918_v50  ;;  %v14230_v28 = vld [vmem:[%s19268_s1 + $0x98] sm:$0xff]  }
  0xbf   : > { %v11577_v4 = vcombine.low %v14453_v58, %v15090_v45  ;;  %v11610_v22 = vrot.slane %v1811_v42, 9  ;;  %v1939_v42 = vrot.slane %v14976_v33, 5  ;;  %v11612_v58 = vrot.slane %v1813_v53, 9 }
  0xc0   : > { %12863 = vmatmul.mubr.bf16.gmra.mrb[28].mxu0 %v11565_v7  ;;  %v1929_v7 = vrot.slane %v14948_v32, 5  ;;  %v1880_v17 = vrot.slane %v15098_v12, 5 }
  0xc1   : > { %12882 = vmatprep.mubr.bf16.mxu0 %v11574_v6  ;;  %v1924_v6 = vrot.slane %v1922_v55, 4 }
  0xc2   : > { %v15114_v46 = vsel %vm15076_vm13, %v11609_v57, %v1929_v7  ;;  %v1943_v57 = vrot.slane %v15001_v25, 5  ;;  %v11599_v25 = vrot.slane %v1800_v63, 9 }
  0xc3   : > { %v15110_v40 = vsel %vm15076_vm13, %v1924_v6, %v1925_v0 }
  0xc8   : > { %12883 = vmatmul.mubr.bf16.vlgmr.msra.gmra.mrb[0].mxu0 %v11575_v20  ;;  %v1932_v20 = vrot.slane %v14951_v39, 5  ;;  %v1936_v39 = vrot.slane %v14974_v30, 5  ;;  %v1801_v30 = vld [vmem:[#allocation2 + $0x18] sm:$0xe] }
  0xc9   : > { %12915 = vmatpush3.bf16.msra.mxu0 %v14855_v47  ;;  %12886 = vmatprep.mubr.bf16.mxu0 %v11576_v37  ;;  %v15095_v47 = vsel %vm15076_vm13, %v11608_v51, %v1922_v55  ;;  %v11639_v37 = vcombine.low %v15087_v62, %v15103_v15  ;;  %v1931_v51 = vrot.slane %v1929_v7, 4  ;;  %v11611_v55 = vrot.slane %v1812_v56, 9  ;;  %v2671_v15 = vld [vmem:[#allocation2 + $0x10] sm:$0xf] }
  0xca   : > { %12916 = vmatprep.subr.bf16.mxu0 %v14224_v38  ;;  %v11640_v50 = vcombine.low %v15095_v47, %v15110_v40  ;;  %v15133_v33 = vsel %vm15076_vm13, %v11610_v22, %v1936_v39  ;;  %v1938_v56 = vrot.slane %v1936_v39, 4  ;;  %v1950_v7 = vrot.slane %v15012_v21, 5  ;;  %v1802_v21 = vld [vmem:[#allocation2 + $0x24] sm:$0xe]  ;;  %v2670_v47 = vld [vmem:[#allocation2 + $0xc] sm:$0xf] }
  0xcb   : > { %v15125_v0 = vsel %vm15076_vm13, %v1931_v51, %v1932_v20  ;;  %v15138_v11 = vsel %vm15076_vm13, %v11611_v55, %v1943_v57  ;;  %v1945_v20 = vrot.slane %v1943_v57, 4  ;;  %v1953_v51 = vrot.slane %v15018_v54, 5  ;;  %v14233_v55 = vld [vmem:[%s19268_s1 + $0xa0] sm:$0xff]   ;;  %v15190_v54 = vld [vmem:[#allocation2 + $0x58] sm:$0xf] }
  0xcc   : > { %v11641_v6 = vcombine.low %v15114_v46, %v15125_v0  ;;  %v15143_v53 = vsel %vm15076_vm13, %v1938_v56, %v1939_v42  ;;  %v15147_v22 = vsel %vm15076_vm13, %v11612_v58, %v1950_v7  ;;  %v1952_v39 = vrot.slane %v1950_v7, 4  ;;  %v14457_v56 = vld [vmem:[#allocation2 + $0x3c] sm:$0xf]  ;;  %v15170_v7 = vld [vmem:[#allocation2 + $0x40] sm:$0xf]  ;;  %v14251_v46 = vld [vmem:[#allocation2 + $0xc] sm:$0xff]  }
  0xcd   : > { %12917 = vmatpush3.bf16.msra.mxu0 %v14224_v38  ;;  %v1946_v38 = vrot.slane %v15003_v26, 5  ;;  %v11613_v26 = vrot.slane %v1814_v34, 9  ;;  %v14459_v34 = vld [vmem:[#allocation2 + $0x48] sm:$0xf]  ;;  %v1887_v63 = vrot.slane %v15170_v7, 5  ;;  %v2722_v0 = vshll.u32 %v2670_v47, 16 }
  0xce   : > { %12918 = vmatprep.subr.bf16.mxu0 %v14227_v61  ;;  %v15164_v42 = vsel %vm15076_vm13, %v1952_v39, %v1953_v51  ;;  %v15178_v51 = vld [vmem:[#allocation2 + $0x4c] sm:$0xf]  ;;  %v2673_v40 = vld [vmem:[#allocation2 + $0x18] sm:$0xf] }
  0xcf   : > { %v11580_v39 = vcombine.low %v14459_v34, %v15178_v51  ;;  %v11582_v34 = vcombine.low %v14870_v16, %v14881_v44  ;;  %v1799_v16 = vld [vmem:[#allocation2] sm:$0xe]  ;;  %v310_v44 = vld [vmem:[%s14688_s25 + $0x78] sm:$0xf]  ;;  %v19400_v62 = vcombine.low %v15147_v22, %v15164_v42  ;;  %v2674_v22 = vld [vmem:[#allocation2 + $0x1c] sm:$0xf] }
  0xd0   : > { %12887 = vmatmul.mubr.bf16.gmra.mrb[4].mxu0 %v11577_v4  ;;  %v1957_v4 = vrot.slane %v15043_v23, 5  ;;  %v11598_v9 = vrot.slane %v1799_v16, 9  ;;  %v574_v48 = vshll.u32 %v310_v44, 16  ;;  %v2724_v42 = vrot.slane %v2722_v0, 5  ;;  %v15374_v0 = vld [vmem:[#allocation2 + $0x34] sm:$0xf] }
  0xd1   : > { %12890 = vmatprep.mubr.bf16.mxu0 %v11578_v60  ;;  %12919 = vmatpush3.bf16.msra.mxu0 %v14227_v61  ;;  %v15157_v61 = vsel %vm15076_vm13, %v1945_v20, %v1946_v38  ;;  %v1960_v60 = vrot.slane %v15045_v29, 5  ;;  %v11579_v38 = vcombine.low %v14457_v56, %v15170_v7  ;;  %v14236_v29 = vld [vmem:[%s19268_s1 + $0xa8] sm:$0xff]   ;;  %v14239_v56 = vld [vmem:[%s19268_s1 + $0xb0] sm:$0xff]   ;;  %v1889_v7 = vrot.slane %v1887_v63, 4 }
  0xd2   : > { %12920 = vmatprep.subr.bf16.mxu0 %v14230_v28  ;;  %v15168_v57 = vsel %vm15076_vm13, %v11613_v26, %v1957_v4  ;;  %v1959_v58 = vrot.slane %v1957_v4, 4  ;;  %v14461_v20 = vld [vmem:[#allocation2 + $0x54] sm:$0xf] }
  0xd4   : > { %v15183_v26 = vsel %vm15076_vm13, %v1959_v58, %v1960_v60  ;;  %v14242_v60 = vld [vmem:[%s19268_s1 + $0xb8] sm:$0xff]  }
  0xd5   : > { %12921 = vmatpush3.bf16.msra.mxu0 %v14230_v28  ;;  %v11645_v4 = vcombine.low %v15168_v57, %v15183_v26  ;;  %v11581_v28 = vcombine.low %v14461_v20, %v15190_v54  ;;  %v311_v58 = vld [vmem:[%s14688_s25 + $0x7c] sm:$0xf]  ;;  %v2756_v57 = vshrl.u32 %v2674_v22, 16 }
  0xd6   : > { %12922 = vmatprep.subr.bf16.mxu0 %v14233_v55  ;;  %v579_v20 = vshrl.u32 %v311_v58, 16 }
  0xd8   : > { %12891 = vmatmul.mubr.bf16.gmra.mrb[8].mxu0 %v11579_v38  ;;  %v1852_v38 = vrot.slane %v15062_v5, 5  ;;  %v15219_v1 = vrot.slane %v579_v20, 7  ;;  %v11600_v20 = vrot.slane %v1801_v30, 9 }
  0xd9   : > { %12894 = vmatprep.mubr.bf16.mxu0 %v11580_v39  ;;  %12923 = vmatpush3.bf16.msra.mxu0 %v14233_v55  ;;  %v15201_v55 = vld [vmem:[%s19268_s1 + $0xc0] sm:$0xff]   ;;  %v14463_v39 = vld [vmem:[#allocation2 + $0x8] sm:$0x1] }
  0xda   : > { %12924 = vmatprep.subr.bf16.mxu0 %v14236_v29  ;;  %v1853_v16 = vsel %vm15076_vm13, %v11598_v9, %v1852_v38 }
  0xdd   : > { %12925 = vmatpush3.bf16.msra.mxu0 %v14236_v29  ;;  %v571_v29 = vshrl.u32 %v310_v44, 16 }
  0xde   : > { %12926 = vmatprep.subr.bf16.mxu0 %v14239_v56 }
  0xdf   : > { %v573_v27 = vrot.slane %v571_v29, 7 }
  0xe0   : > { %12895 = vmatmul.mubr.bf16.gmra.mrb[12].mxu0 %v11581_v28 }
  0xe1   : > { %12898 = vmatprep.mubr.bf16.mxu0 %v11582_v34  ;;  %12927 = vmatpush3.bf16.msra.mxu0 %v14239_v56  ;;  %v1855_v56 = vrot.slane %v14463_v39, 5  ;;  %v576_v28 = vor.u32 %v574_v48, %v573_v27  ;;  %v577_v19 = vrot.slane %v573_v27, 4  ;;  %v1866_v34 = vrot.slane %v15068_v36, 5  ;;  %v14465_v27 = vld [vmem:[#allocation2 + $0x20] sm:$0x1] }
  0xe2   : > { %12928 = vmatprep.subr.bf16.mxu0 %v14242_v60  ;;  %v1869_v43 = vrot.slane %v14465_v27, 5  ;;  %v14469_v27 = vld [vmem:[#allocation2 + $0x50] sm:$0x1] }
  0xe3   : > { %v1868_v39 = vrot.slane %v1866_v34, 4 }
  0xe5   : > { %12929 = vmatpush3.bf16.msra.mxu0 %v14242_v60  ;;  %v1870_v9 = vsel %vm15076_vm13, %v1868_v39, %v1869_v43  ;;  %v1897_v43 = vrot.slane %v14469_v27, 5 }
  0xe6   : > { %12962 = vmatprep.subr.bf16.mxu0 %v15201_v55 }
  0xe8   : > { %12899 = vmatmul.mubr.bf16.gmra.mrb[16].mxu0 %v11583_v3  ;;  %v582_v3 = vshll.u32 %v311_v58, 16  ;;  %v14464_v58 = vld [vmem:[#allocation2 + $0x14] sm:$0x1] }
  0xe9   : > { %12902 = vmatprep.mubr.bf16.mxu0 %v11584_v2  ;;  %v1854_v2 = vrot.slane %v1852_v38, 4  ;;  %v1862_v29 = vrot.slane %v14464_v58, 5  ;;  %v1873_v38 = vrot.slane %v15090_v45, 5  ;;  %v1882_v45 = vrot.slane %v1880_v17, 4 }
  0xea   : > { %v584_v32 = vor.u32 %v582_v3, %v15219_v1 }
  0xeb   : > { %v1856_v44 = vsel %vm15076_vm13, %v1854_v2, %v1855_v56  ;;  %v1867_v56 = vsel %vm15076_vm13, %v11600_v20, %v1866_v34  ;;  %v1875_v3 = vrot.slane %v1873_v38, 4  ;;  %v14466_v2 = vld [vmem:[#allocation2 + $0x2c] sm:$0x1]  ;;  %v1804_v34 = vld [vmem:[#allocation2 + $0x3c] sm:$0xe] }
  0xec   : > { %v585_v5 = vsel %vm14704_vm8, %v577_v19, %v584_v32  ;;  %v11630_v59 = vcombine.low %v1853_v16, %v1856_v44  ;;  %v11632_v48 = vcombine.low %v1867_v56, %v1870_v9  ;;  %v14244_v19 = vld [vmem:[%s19268_s1 + $0xc8] sm:$0xff]   ;;  %v1894_v16 = vrot.slane %v15178_v51, 5  ;;  %v14470_v9 = vld [vmem:[#allocation2 + $0x64] sm:$0xf] }
  0xed   : > { %749 = vst [vmem:[#allocation2 + $0xc4] sm:$0xf] %v585_v5  ;;  %v1805_v44 = vld [vmem:[#allocation2 + $0x48] sm:$0xe] }
  0xee   : > { %v11604_v20 = vrot.slane %v1805_v44, 9  ;;  %v1896_v39 = vrot.slane %v1894_v16, 4  ;;  %v14250_v44 = vld [vmem:[%s19268_s1 + $0xf8] sm:$0xff]  }
  0xf0   : > { %12903 = vmatmul.mubr.bf16.gmra.mrb[20].mxu0 %v11585_v8  ;;  %v746_v8 = vld [vmem:[#allocation2 + $0xc0] sm:$0xf]  ;;  %v1898_v56 = vsel %vm15076_vm13, %v1896_v39, %v1897_v43 }
  0xf1   : > { %12906 = vmatprep.mubr.bf16.mxu0 %v11586_v10  ;;  %v747_v60 = vsel %vm14709_vm9, %v576_v28, %v746_v8  ;;  %v1859_v10 = vrot.slane %v15065_v18, 5  ;;  %v1876_v28 = vrot.slane %v14466_v2, 5  ;;  %v14467_v8 = vld [vmem:[#allocation2 + $0x38] sm:$0x1] }
  0xf2   : > { %748 = vst [vmem:[#allocation2 + $0xc0] sm:$0xf] %v747_v60  ;;  %v1883_v5 = vrot.slane %v14467_v8, 5  ;;  %v14472_v8 = vld [vmem:[#allocation2 + $0x68] sm:$0x1] }
  0xf3   : > { %v1860_v18 = vsel %vm15076_vm13, %v11599_v25, %v1859_v10  ;;  %v1877_v60 = vsel %vm15076_vm13, %v1875_v3, %v1876_v28  ;;  %v14468_v25 = vld [vmem:[#allocation2 + $0x44] sm:$0x1] }
  0xf8   : > { %12907 = vmatmul.mubr.bf16.gmra.mrb[24].mxu0 %v11587_v13  ;;  %v1861_v13 = vrot.slane %v1859_v10, 4  ;;  %v1884_v10 = vsel %vm15076_vm13, %v1882_v45, %v1883_v5  ;;  %v1911_v5 = vrot.slane %v14472_v8, 5 }
  0xf9   : > { %12910 = vmatprep.mubr.bf16.mxu0 %v11588_v14  ;;  %v1803_v14 = vld [vmem:[#allocation2 + $0x30] sm:$0xe] }
  0xfa   : > { %v1863_v36 = vsel %vm15076_vm13, %v1861_v13, %v1862_v29  ;;  %v11602_v32 = vrot.slane %v1803_v14, 9  ;;  %v1890_v13 = vrot.slane %v14468_v25, 5  ;;  %v19399_v25 = vcombine.low %v15138_v11, %v15157_v61  ;;  %v2672_v11 = vld [vmem:[#allocation2 + $0x14] sm:$0x1] }
  0xfb   : > { %v11631_v23 = vcombine.low %v1860_v18, %v1863_v36  ;;  %v1806_v18 = vld [vmem:[#allocation2 + $0x54] sm:$0xe]  ;;  %v1901_v36 = vrot.slane %v15190_v54, 5  ;;  %v2738_v43 = vshll.u32 %v2672_v11, 16 }
  0xfc   : > { %v1881_v30 = vsel %vm15076_vm13, %v11602_v32, %v1880_v17  ;;  %v1891_v14 = vsel %vm15076_vm13, %v1889_v7, %v1890_v13  ;;  %v1908_v17 = vrot.slane %v14470_v9, 5  ;;  %v11605_v2 = vrot.slane %v1806_v18, 9  ;;  %v750_v7 = vld [vmem:[#allocation2 + $0xc8] sm:$0x1]  ;;  %v2675_v13 = vld [vmem:[#allocation2 + $0x20] sm:$0x1] }
  0xfd   : > { %v11634_v29 = vcombine.low %v1881_v30, %v1884_v10  ;;  %v1903_v28 = vrot.slane %v1901_v36, 4  ;;  %v2752_v18 = vshll.u32 %v2674_v22, 16  ;;  %v2762_v26 = vshll.u32 %v2675_v13, 16  ;;  %v15333_v9 = vld [vmem:[#allocation2 + $0x28] sm:$0xf] }
  0xfe   : > { %v1910_v45 = vrot.slane %v1908_v17, 4  ;;  %v2776_v8 = vshll.u32 %v15333_v9, 16 }
 0x100   : > { %12911 = vmatmul.mubr.bf16.gmra.mrb[28].mxu0 %v11589_v49  ;;  %v11601_v49 = vrot.slane %v1802_v21, 9  ;;  %v14246_v21 = vld [vmem:[%s19268_s1 + $0xd8] sm:$0xff]   ;;  %v1912_v10 = vsel %vm15076_vm13, %v1910_v45, %v1911_v5 }
 0x101   : > { %12930 = vmatprep.mubr.bf16.mxu0 %v11630_v59  ;;  %v11603_v59 = vrot.slane %v1804_v34, 9  ;;  %v14249_v34 = vld [vmem:[%s19268_s1 + $0xf0] sm:$0xff]   ;;  %v14262_v5 = vld [vmem:[%s19268_s1 + $0x118] sm:$0xff]  }
 0x102   : > { %v1874_v12 = vsel %vm15076_vm13, %v11601_v49, %v1873_v38  ;;  %v1895_v38 = vsel %vm15076_vm13, %v11604_v20, %v1894_v16  ;;  %v1807_v49 = vld [vmem:[#allocation2 + $0x60] sm:$0xe]  ;;  %v14252_v20 = vld [vmem:[#allocation2 + $0x18] sm:$0xff]  }
 0x103   : > { %v11633_v58 = vcombine.low %v1874_v12, %v1877_v60  ;;  %v1888_v51 = vsel %vm15076_vm13, %v11603_v59, %v1887_v63  ;;  %v11636_v3 = vcombine.low %v1895_v38, %v1898_v56  ;;  %v11606_v32 = vrot.slane %v1807_v49, 9  ;;  %v14248_v12 = vld [vmem:[%s19268_s1 + $0xe8] sm:$0xff]  }
 0x104   : > { %v1902_v60 = vsel %vm15076_vm13, %v11605_v2, %v1901_v36  ;;  %v586_v59 = vrot.slane %v15219_v1, 4  ;;  %v2746_v1 = vshll.u32 %v2673_v40, 16  ;;  %v14256_v36 = vld [vmem:[%s19268_s1 + $0x108] sm:$0xff]   ;;  %v15340_v49 = vrot.slane %v2752_v18, 5 }
 0x105   : > { %v1909_v30 = vsel %vm15076_vm13, %v11606_v32, %v1908_v17  ;;  %v14259_v17 = vld [vmem:[%s19268_s1 + $0x110] sm:$0xff]   ;;  %v14257_v32 = vld [vmem:[#allocation2 + $0x3c] sm:$0xff]  }
 0x106   : > { %v11638_v16 = vcombine.low %v1909_v30, %v1912_v10 }
 0x108   : > { %12931 = vmatmul.mubr.bf16.vlgmr.msra.gmra.mrb[0].mxu0 %v11631_v23  ;;  %v14247_v23 = vld [vmem:[%s19268_s1 + $0xe0] sm:$0xff]  }
 0x109   : > { %12963 = vmatpush3.bf16.msra.mxu0 %v15201_v55  ;;  %12934 = vmatprep.mubr.bf16.mxu0 %v11632_v48  ;;  %v14245_v55 = vld [vmem:[%s19268_s1 + $0xd0] sm:$0xff]   ;;  %v11635_v48 = vcombine.low %v1888_v51, %v1891_v14  ;;  %v14254_v51 = vld [vmem:[#allocation2 + $0x24] sm:$0xff]   ;;  %v2748_v14 = vrot.slane %v2746_v1, 5 }
 0x10a   : > { %12964 = vmatprep.subr.bf16.mxu0 %v14244_v19  ;;  %v14271_v1 = vld [vmem:[%s19268_s1 + $0x130] sm:$0xff]  }
 0x10d   : > { %12965 = vmatpush3.bf16.msra.mxu0 %v14244_v19  ;;  %v14471_v19 = vld [vmem:[#allocation2 + $0x5c] sm:$0x1] }
 0x10e   : > { %12966 = vmatprep.subr.bf16.mxu0 %v14245_v55  ;;  %v1904_v54 = vrot.slane %v14471_v19, 5  ;;  %v15346_v19 = vrot.slane %v2762_v26, 5 }
 0x110   : > { %12935 = vmatmul.mubr.bf16.gmra.mrb[4].mxu0 %v11633_v58  ;;  %v1905_v63 = vsel %vm15076_vm13, %v1903_v28, %v1904_v54  ;;  %v14253_v58 = vld [vmem:[%s19268_s1 + $0x100] sm:$0xff]  }
 0x111   : > { %12938 = vmatprep.mubr.bf16.mxu0 %v11634_v29  ;;  %12967 = vmatpush3.bf16.msra.mxu0 %v14245_v55  ;;  %v11637_v55 = vcombine.low %v1902_v60, %v1905_v63  ;;  %v19398_v29 = vcombine.low %v15133_v33, %v15143_v53  ;;  %v2732_v33 = vshrl.u32 %v2671_v15, 16  ;;  %v2743_v53 = vshrl.u32 %v2673_v40, 16  ;;  %v14265_v63 = vld [vmem:[%s19268_s1 + $0x120] sm:$0xff]   ;;  %v2679_v40 = vld [vmem:[#allocation2 + $0x30] sm:$0xf] }
 0x112   : > { %12968 = vmatprep.subr.bf16.mxu0 %v14246_v21  ;;  %v2791_v22 = vshrl.u32 %v2679_v40, 16  ;;  %v2794_v13 = vshll.u32 %v2679_v40, 16 }
 0x113   : > { %v2734_v27 = vrot.slane %v2732_v33, 4 }
 0x115   : > { %12969 = vmatpush3.bf16.msra.mxu0 %v14246_v21  ;;  %v2745_v21 = vrot.slane %v2743_v53, 4 }
 0x116   : > { %12970 = vmatprep.subr.bf16.mxu0 %v14247_v23 }
 0x118   : > { %12939 = vmatmul.mubr.bf16.gmra.mrb[8].mxu0 %v11635_v48  ;;  %v2758_v48 = vrot.slane %v2756_v57, 4  ;;  %v2804_v57 = vshrl.u32 %v15374_v0, 16 }
 0x119   : > { %12942 = vmatprep.mubr.bf16.mxu0 %v11636_v3  ;;  %12971 = vmatpush3.bf16.msra.mxu0 %v14247_v23  ;;  %v15338_v23 = vrot.slane %v2738_v43, 5  ;;  %v14255_v3 = vld [vmem:[#allocation2 + $0x30] sm:$0xff]  }
 0x11a   : > { %12972 = vmatprep.subr.bf16.mxu0 %v14248_v12  ;;  %v2759_v60 = vor.u32 %v2758_v48, %v15340_v49  ;;  %v15416_v48 = vld [vmem:[%s19268_s1 + $0x140] sm:$0xff]  }
 0x11d   : > { %12973 = vmatpush3.bf16.msra.mxu0 %v14248_v12  ;;  %v2749_v12 = vor.u32 %v2748_v14, %v2745_v21 }
 0x11e   : > { %12974 = vmatprep.subr.bf16.mxu0 %v14249_v34 }
 0x11f   : > { %v15356_v30 = vrot.slane %v2749_v12, 4  ;;  %v3433_v12 = vld [vmem:[#allocation2 + $0x78] sm:$0xe] }
 0x120   : > { %12943 = vmatmul.mubr.bf16.gmra.mrb[12].mxu0 %v11637_v55  ;;  %v15360_v55 = vld [vmem:[#allocation2 + $0x50] sm:$0x1] }
 0x121   : > { %12946 = vmatprep.mubr.bf16.mxu0 %v11638_v16  ;;  %12975 = vmatpush3.bf16.msra.mxu0 %v14249_v34  ;;  %v15358_v34 = vld [vmem:[#allocation2 + $0x4c] sm:$0xf]  ;;  %v15362_v16 = vrot.slane %v2759_v60, 4 }
 0x122   : > { %12976 = vmatprep.subr.bf16.mxu0 %v14250_v44 }
 0x125   : > { %12977 = vmatpush3.bf16.msra.mxu0 %v14250_v44 }
 0x126   : > { %13010 = vmatprep.subr.bf16.mxu0 %v14253_v58 }
 0x128   : > { %12947 = vmatmul.mubr.bf16.gmra.mrb[16].mxu0 %v11639_v37  ;;  %v751_v37 = vsel %vm14718_vm10, %v586_v59, %v750_v7  ;;  %v3528_v59 = vrot.slane %v15360_v55, 5  ;;  %v14258_v7 = vld [vmem:[#allocation2 + $0x48] sm:$0xff]  }
 0x129   : > { %12950 = vmatprep.mubr.bf16.mxu0 %v11640_v50  ;;  %752 = vst [vmem:[#allocation2 + $0xc8] sm:$0x1] %v751_v37  ;;  %v2719_v50 = vshrl.u32 %v2670_v47, 16  ;;  %v14260_v47 = vld [vmem:[#allocation2 + $0x54] sm:$0xff]   ;;  %v2780_v37 = vshrl.u32 %v15333_v9, 16 }
 0x12b   : > { %v2721_v61 = vrot.slane %v2719_v50, 4  ;;  %v14268_v50 = vld [vmem:[%s19268_s1 + $0x128] sm:$0xff]   ;;  %v15397_v14 = vrot.slane %v2780_v37, 4 }
 0x12d   : > { %v2725_v38 = vor.u32 %v2724_v42, %v2721_v61  ;;  %v15390_v61 = vld [vmem:[#allocation2 + $0x64] sm:$0xf]  ;;  %v15392_v42 = vld [vmem:[#allocation2 + $0x68] sm:$0x1] }
 0x12e   : > { %v3539_v43 = vrot.slane %v15390_v61, 5  ;;  %v3542_v21 = vrot.slane %v15392_v42, 5 }
 0x12f   : > { %v15342_v2 = vrot.slane %v2725_v38, 4 }
 0x130   : > { %12951 = vmatmul.mubr.bf16.gmra.mrb[20].mxu0 %v11641_v6  ;;  %v2728_v6 = vshll.u32 %v2671_v15, 16  ;;  %v15368_v15 = vld [vmem:[#allocation2 + $0x2c] sm:$0x1]  ;;  %v3541_v26 = vrot.slane %v3539_v43, 4 }
 0x131   : > { %12954 = vmatprep.mubr.bf16.mxu0 %v19398_v29  ;;  %v3525_v29 = vrot.slane %v15358_v34, 5  ;;  %v2786_v11 = vshll.u32 %v15368_v15, 16 }
 0x132   : > { %v15327_v39 = vrot.slane %v2728_v6, 5  ;;  %v15409_v9 = vsel %vm15076_vm13, %v3541_v26, %v3542_v21  ;;  %v14267_v21 = vld [vmem:[#allocation2 + $0x90] sm:$0xff]  }
 0x133   : > { %19401 = vst [vmem:[#allocation9_spill] sm:$0xff] %v15409_v9 }
 0x134   : > { %v2735_v56 = vor.u32 %v2734_v27, %v15327_v39  ;;  %v3431_v27 = vld [vmem:[#allocation2 + $0x60] sm:$0xe] }
 0x135   : > { %v11741_v18 = vrot.slane %v3431_v27, 9 }
 0x136   : > { %v15344_v28 = vrot.slane %v2735_v56, 4 }
 0x137   : > { %v15405_v56 = vsel %vm15076_vm13, %v11741_v18, %v3539_v43 }
 0x138   : > { %12955 = vmatmul.mubr.bf16.gmra.mrb[24].mxu0 %v19399_v25  ;;  %v15366_v25 = vrot.slane %v2776_v8, 5  ;;  %v15426_v8 = vrot.slane %v2786_v11, 5  ;;  %v15453_v11 = vld [vmem:[#allocation2 + $0x98] sm:$0x1] }
 0x139   : > { %12958 = vmatprep.mubr.bf16.mxu0 %v19400_v62  ;;  %v3570_v43 = vrot.slane %v15453_v11, 5 }
 0x140   : > { %12959 = vmatmul.mubr.bf16.gmra.mrb[28].mxu0 %v11645_v4  ;;  %v2676_v4 = vld [vmem:[#allocation2 + $0x24] sm:$0xf] }
 0x141   : > { %12978 = vmatprep.mubr.bf16.mxu0 %v14251_v46  ;;  %v2767_v54 = vshrl.u32 %v2676_v4, 16  ;;  %v2770_v45 = vshll.u32 %v2676_v4, 16  ;;  %v3527_v46 = vrot.slane %v3525_v29, 4  ;;  %v14274_v4 = vld [vmem:[%s19268_s1 + $0x138] sm:$0xff]  }
 0x143   : > { %v2769_v10 = vrot.slane %v2767_v54, 4  ;;  %v2772_v44 = vrot.slane %v2770_v45, 5  ;;  %v15382_v33 = vsel %vm15076_vm13, %v3527_v46, %v3528_v59  ;;  %v15420_v54 = vrot.slane %v2791_v22, 4  ;;  %v15424_v45 = vld [vmem:[#allocation2 + $0x80] sm:$0x1]  ;;  %v14270_v46 = vld [vmem:[#allocation2 + $0xa8] sm:$0xff]  }
 0x144   : > { %v15434_v59 = vrot.slane %v2804_v57, 4 }
 0x145   : > { %v2773_v38 = vor.u32 %v2772_v44, %v2769_v10  ;;  %v14264_v10 = vld [vmem:[#allocation2 + $0x78] sm:$0xff]  }
 0x148   : > { %12979 = vmatmul.mubr.bf16.vlgmr.msra.gmra.mrb[0].mxu0 %v14252_v20  ;;  %v2800_v20 = vshll.u32 %v15374_v0, 16 }
 0x149   : > { %13011 = vmatpush3.bf16.msra.mxu0 %v14253_v58  ;;  %12982 = vmatprep.mubr.bf16.mxu0 %v14254_v51  ;;  %v3429_v58 = vld [vmem:[#allocation2 + $0x48] sm:$0xe]  ;;  %v14261_v51 = vld [vmem:[#allocation2 + $0x60] sm:$0xff]  }
 0x14a   : > { %13012 = vmatprep.subr.bf16.mxu0 %v14256_v36  ;;  %v11739_v62 = vrot.slane %v3429_v58, 9  ;;  %v15432_v44 = vrot.slane %v2800_v20, 5  ;;  %v11743_v58 = vrot.slane %v3433_v12, 9  ;;  %v3435_v20 = vld [vmem:[#allocation2 + $0x90] sm:$0xe] }
 0x14b   : > { %v11745_v18 = vrot.slane %v3435_v20, 9  ;;  %v15465_v12 = vld [vmem:[#allocation2 + $0xa4] sm:$0x1] }
 0x14c   : > { %v15378_v6 = vsel %vm15076_vm13, %v11739_v62, %v3525_v29  ;;  %v14266_v29 = vld [vmem:[#allocation2 + $0x84] sm:$0xff]   ;;  %v15436_v62 = vld [vmem:[#allocation2 + $0x38] sm:$0x1]  ;;  %v3577_v20 = vrot.slane %v15465_v12, 5 }
 0x14d   : > { %13013 = vmatpush3.bf16.msra.mxu0 %v14256_v36  ;;  %v14263_v36 = vld [vmem:[#allocation2 + $0x6c] sm:$0xff]   ;;  %v2810_v22 = vshll.u32 %v15436_v62, 16 }
 0x14e   : > { %13014 = vmatprep.subr.bf16.mxu0 %v14259_v17 }
 0x150   : > { %12983 = vmatmul.mubr.bf16.gmra.mrb[4].mxu0 %v14255_v3  ;;  %v15418_v3 = vrot.slane %v2773_v38, 4  ;;  %v15463_v38 = vld [vmem:[#allocation2 + $0xa0] sm:$0xf] }
 0x151   : > { %12986 = vmatprep.mubr.bf16.mxu0 %v14257_v32  ;;  %13015 = vmatpush3.bf16.msra.mxu0 %v14259_v17  ;;  %v15422_v32 = vld [vmem:[#allocation2 + $0x7c] sm:$0xf] }
 0x152   : > { %13016 = vmatprep.subr.bf16.mxu0 %v14262_v5  ;;  %v3553_v60 = vrot.slane %v15422_v32, 5 }
 0x154   : > { %v15440_v37 = vsel %vm15076_vm13, %v11743_v58, %v3553_v60  ;;  %v2783_v58 = vor.u32 %v15397_v14, %v15366_v25 }
 0x155   : > { %13017 = vmatpush3.bf16.msra.mxu0 %v14262_v5  ;;  %v15428_v5 = vrot.slane %v2794_v13, 5  ;;  %19402 = vst [vmem:[#allocation10_spill] sm:$0xff] %v15440_v37 }
 0x156   : > { %13018 = vmatprep.subr.bf16.mxu0 %v14265_v63  ;;  %v15484_v53 = vrot.slane %v2783_v58, 4 }
 0x158   : > { %12987 = vmatmul.mubr.bf16.gmra.mrb[8].mxu0 %v14258_v7  ;;  %v3555_v7 = vrot.slane %v3553_v60, 4 }
 0x159   : > { %12990 = vmatprep.mubr.bf16.mxu0 %v14260_v47  ;;  %13019 = vmatpush3.bf16.msra.mxu0 %v14265_v63  ;;  %v3556_v63 = vrot.slane %v15424_v45, 5  ;;  %v2682_v47 = vld [vmem:[#allocation2 + $0x3c] sm:$0xf] }
 0x15a   : > { %13020 = vmatprep.subr.bf16.mxu0 %v14268_v50  ;;  %v2815_v13 = vshrl.u32 %v2682_v47, 16 }
 0x15b   : > { %v15444_v40 = vsel %vm15076_vm13, %v3555_v7, %v3556_v63  ;;  %v15471_v63 = vld [vmem:[#allocation2 + $0xac] sm:$0xf]  ;;  %v3436_v7 = vld [vmem:[#allocation2 + $0x9c] sm:$0xe] }
 0x15c   : > { %19403 = vst [vmem:[#allocation11_spill] sm:$0xff] %v15444_v40 }
 0x15d   : > { %13021 = vmatpush3.bf16.msra.mxu0 %v14268_v50  ;;  %v15449_v50 = vld [vmem:[#allocation2 + $0x40] sm:$0xf] }
 0x15e   : > { %13022 = vmatprep.subr.bf16.mxu0 %v14271_v1  ;;  %v2824_v57 = vshll.u32 %v15449_v50, 16 }
 0x160   : > { %12991 = vmatmul.mubr.bf16.gmra.mrb[12].mxu0 %v14261_v51  ;;  %v2818_v51 = vshll.u32 %v2682_v47, 16  ;;  %v3574_v47 = vrot.slane %v15463_v38, 5 }
 0x161   : > { %12994 = vmatprep.mubr.bf16.mxu0 %v14263_v36  ;;  %13023 = vmatpush3.bf16.msra.mxu0 %v14271_v1  ;;  %v15451_v1 = vld [vmem:[#allocation2 + $0x94] sm:$0xf]  ;;  %v14269_v36 = vld [vmem:[#allocation2 + $0x9c] sm:$0xff]  }
 0x162   : > { %13024 = vmatprep.subr.bf16.mxu0 %v14274_v4  ;;  %v3567_v27 = vrot.slane %v15451_v1, 5  ;;  %v3576_v17 = vrot.slane %v3574_v47, 4 }
 0x164   : > { %v3569_v26 = vrot.slane %v3567_v27, 4  ;;  %v15500_v58 = vsel %vm15076_vm13, %v3576_v17, %v3577_v20 }
 0x165   : > { %13025 = vmatpush3.bf16.msra.mxu0 %v14274_v4  ;;  %v15461_v4 = vsel %vm15076_vm13, %v11745_v18, %v3567_v27  ;;  %v2828_v27 = vshrl.u32 %v15449_v50, 16  ;;  %v3437_v18 = vld [vmem:[#allocation2 + $0xa8] sm:$0xe]  ;;  %19407 = vst [vmem:[#allocation15_spill] sm:$0xff] %v15500_v58  ;;  %v15550_v58 = vld [vmem:[#allocation2 + $0x58] sm:$0xf] }
 0x166   : > { %13058 = vmatprep.subr.bf16.mxu0 %v15416_v48  ;;  %19404 = vst [vmem:[#allocation12_spill] sm:$0xff] %v15461_v4  ;;  %v15469_v60 = vsel %vm15076_vm13, %v3569_v26, %v3570_v43  ;;  %v11746_v43 = vrot.slane %v3436_v7, 9  ;;  %v3581_v26 = vrot.slane %v15471_v63, 5  ;;  %v11747_v14 = vrot.slane %v3437_v18, 9 }
 0x167   : > { %19405 = vst [vmem:[#allocation13_spill] sm:$0xff] %v15469_v60  ;;  %v2741_v7 = vsel %vm14696_vm6, %v15344_v28, %v15338_v23  ;;  %v2817_v18 = vrot.slane %v2815_v13, 4  ;;  %v15514_v23 = vld [vmem:[#allocation2 + $0x44] sm:$0x1]  ;;  %v2820_v28 = vrot.slane %v2818_v51, 5  ;;  %v15516_v60 = vrot.slane %v2824_v57, 5 }
 0x168   : > { %12995 = vmatmul.mubr.bf16.gmra.mrb[16].mxu0 %v14264_v10  ;;  %v15488_v35 = vsel %vm15076_vm13, %v11746_v43, %v3574_v47  ;;  %v3583_v41 = vrot.slane %v3581_v26, 4  ;;  %v15504_v47 = vsel %vm15076_vm13, %v11747_v14, %v3581_v26  ;;  %v15506_v43 = vrot.slane %v2810_v22, 5  ;;  %v15532_v51 = vld [vmem:[#allocation2 + $0xb8] sm:$0xf]  ;;  %v15534_v57 = vld [vmem:[#allocation2 + $0xbc] sm:$0x1] }
 0x169   : > { %12998 = vmatprep.mubr.bf16.mxu0 %v14266_v29  ;;  %v15477_v29 = vld [vmem:[#allocation2 + $0xb0] sm:$0x1]  ;;  %19406 = vst [vmem:[#allocation14_spill] sm:$0xff] %v15488_v35  ;;  %19408 = vst [vmem:[#allocation16_spill] sm:$0xff] %v15504_v47  ;;  %v2830_v17 = vrot.slane %v2828_v27, 4  ;;  %v2755_v22 = vsel %vm14696_vm6, %v15356_v30, %v15340_v49  ;;  %v2779_v13 = vsel %vm14696_vm6, %v15418_v3, %v15366_v25  ;;  %v3591_v25 = vrot.slane %v15534_v57, 5 }
 0x16a   : > { %v3584_v10 = vrot.slane %v15477_v29, 5  ;;  %v2797_v49 = vor.u32 %v15428_v5, %v15420_v54  ;;  %v2807_v30 = vor.u32 %v15434_v59, %v15432_v44  ;;  %v15542_v27 = vld [vmem:[#allocation2 + $0xc8] sm:$0x1]  ;;  %v2839_v3 = vshrl.u32 %v2685_v31, 16  ;;  %v2688_v5 = vld [vmem:[#allocation2 + $0x54] sm:$0xf] }
 0x16b   : > { %v2821_v20 = vor.u32 %v2820_v28, %v2817_v18  ;;  %v2834_v54 = vshll.u32 %v15514_v23, 16  ;;  %v2842_v47 = vshll.u32 %v2685_v31, 16  ;;  %v14273_v35 = vld [vmem:[#allocation2 + $0xc0] sm:$0xff]   ;;  %v2848_v4 = vshll.u32 %v15358_v34, 16 }
 0x16c   : > { %v2852_v18 = vshrl.u32 %v15358_v34, 16  ;;  %v2863_v31 = vshrl.u32 %v2688_v5, 16  ;;  %v15572_v40 = vrot.slane %v2797_v49, 4  ;;  %v2872_v34 = vshll.u32 %v15550_v58, 16 }
 0x16d   : > { %v2836_v49 = vrot.slane %v2834_v54, 5  ;;  %v2900_v54 = vshrl.u32 %v15390_v61, 16 }
 0x170   : > { %12999 = vmatmul.mubr.bf16.gmra.mrb[20].mxu0 %v14267_v21  ;;  %v14272_v21 = vld [vmem:[#allocation2 + $0xb4] sm:$0xff]  }
 0x171   : > { %13002 = vmatprep.mubr.bf16.mxu0 %v14269_v36  ;;  %v2731_v36 = vsel %vm14696_vm6, %v15342_v2, %v15327_v39  ;;  %v15512_v2 = vsel %vm15076_vm13, %v3583_v41, %v3584_v10  ;;  %v2765_v41 = vsel %vm14696_vm6, %v15362_v16, %v15346_v19  ;;  %v15536_v10 = vld [vmem:[#allocation2 + $0xc4] sm:$0xf]  ;;  %v3438_v19 = vld [vmem:[#allocation2 + $0xb4] sm:$0xe]  ;;  %v3588_v16 = vrot.slane %v15532_v51, 5 }
 0x172   : > { %19409 = vst [vmem:[#allocation17_spill] sm:$0xff] %v15512_v2  ;;  %v11710_v26 = vcombine.low %v2731_v36, %v2741_v7  ;;  %v11748_v14 = vrot.slane %v3438_v19, 9  ;;  %v3439_v36 = vld [vmem:[#allocation2 + $0xc0] sm:$0xe]  ;;  %v3595_v7 = vrot.slane %v15536_v10, 5  ;;  %v2831_v2 = vor.u32 %v2830_v17, %v15516_v60 }
 0x173   : > { %v3590_v59 = vrot.slane %v3588_v16, 4  ;;  %v11749_v39 = vrot.slane %v3439_v36, 9  ;;  %v2866_v36 = vshll.u32 %v2688_v5, 16  ;;  %v15584_v5 = vrot.slane %v2821_v20, 4 }
 0x174   : > { %v3597_v19 = vrot.slane %v3595_v7, 4  ;;  %v2832_v37 = vrot.slane %v2831_v2, 4  ;;  %v11711_v9 = vcombine.low %v2755_v22, %v2765_v41  ;;  %v15591_v20 = vrot.slane %v2872_v34, 5 }
 0x175   : > { %v15560_v28 = vsel %vm15076_vm13, %v3590_v59, %v3591_v25  ;;  %v15564_v17 = vsel %vm15076_vm13, %v11749_v39, %v3595_v7  ;;  %v2876_v25 = vshrl.u32 %v15550_v58, 16  ;;  %v2789_v39 = vsel %vm14696_vm6, %v15484_v53, %v15426_v8  ;;  %v15589_v8 = vld [vmem:[#allocation2 + $0x5c] sm:$0x1] }
 0x176   : > { %19411 = vst [vmem:[#allocation19_spill] sm:$0xff] %v15560_v28  ;;  %19412 = vst [vmem:[#allocation20_spill] sm:$0xff] %v15564_v17  ;;  %v15582_v7 = vrot.slane %v2807_v30, 4  ;;  %v2854_v28 = vrot.slane %v2852_v18, 4  ;;  %v2858_v59 = vshll.u32 %v15360_v55, 16  ;;  %v2868_v17 = vrot.slane %v2866_v36, 5 }
 0x177   : > { %v11712_v53 = vcombine.low %v2779_v13, %v2789_v39  ;;  %v2878_v30 = vrot.slane %v2876_v25, 4  ;;  %v2803_v55 = vsel %vm14696_vm6, %v15572_v40, %v15432_v44  ;;  %v2882_v13 = vshll.u32 %v15589_v8, 16  ;;  %v2697_v25 = vld [vmem:[#allocation2 + $0x78] sm:$0xf] }
 0x178   : > { %13003 = vmatmul.mubr.bf16.gmra.mrb[24].mxu0 %v14270_v46  ;;  %v3598_v46 = vrot.slane %v15542_v27, 5  ;;  %v2813_v2 = vsel %vm14696_vm6, %v15582_v7, %v15506_v43  ;;  %v2827_v44 = vsel %vm14696_vm6, %v15584_v5, %v15516_v60  ;;  %v2837_v40 = vsel %vm14696_vm6, %v2832_v37, %v2836_v49 }
 0x179   : > { %13006 = vmatprep.mubr.bf16.mxu0 %v14272_v21  ;;  %v15554_v21 = vsel %vm15076_vm13, %v11748_v14, %v3588_v16  ;;  %v15586_v16 = vrot.slane %v2848_v4, 5  ;;  %v2896_v4 = vshll.u32 %v15390_v61, 16  ;;  %v15616_v43 = vrot.slane %v2858_v59, 5 }
 0x17a   : > { %19410 = vst [vmem:[#allocation18_spill] sm:$0xff] %v15554_v21  ;;  %v15570_v14 = vsel %vm15076_vm13, %v3597_v19, %v3598_v46  ;;  %v2841_v46 = vrot.slane %v2839_v3, 4  ;;  %v2844_v19 = vrot.slane %v2842_v47, 5  ;;  %v2691_v21 = vld [vmem:[#allocation2 + $0x60] sm:$0xf]  ;;  %v2902_v34 = vrot.slane %v2900_v54, 4 }
 0x17b   : > { %19413 = vst [vmem:[#allocation21_spill] sm:$0xff] %v15570_v14  ;;  %v2865_v14 = vrot.slane %v2863_v31, 4  ;;  %v2887_v3 = vshrl.u32 %v2691_v21, 16  ;;  %v2890_v47 = vshll.u32 %v2691_v21, 16  ;;  %v2855_v22 = vor.u32 %v2854_v28, %v15586_v16  ;;  %v15605_v21 = vld [vmem:[#allocation2 + $0x70] sm:$0xf] }
 0x17c   : > { %v14276_v31 = vld [vmem:[%s19268_s1 + $0x148] sm:$0xff]   ;;  %v2879_v28 = vor.u32 %v2878_v30, %v15591_v20  ;;  %v2924_v60 = vshrl.u32 %v15605_v21, 16  ;;  %v2884_v59 = vrot.slane %v2882_v13, 5  ;;  %v2935_v30 = vshrl.u32 %v2697_v25, 16 }
 0x17d   : > { %v2869_v41 = vor.u32 %v2868_v17, %v2865_v14  ;;  %v2889_v17 = vrot.slane %v2887_v3, 4  ;;  %v2892_v36 = vrot.slane %v2890_v47, 5  ;;  %v15619_v14 = vrot.slane %v2896_v4, 5 }
 0x17e   : > { %v2856_v7 = vrot.slane %v2855_v22, 4  ;;  %v2948_v3 = vshrl.u32 %v15422_v32, 16  ;;  %v2880_v47 = vrot.slane %v2879_v28, 4  ;;  %v11713_v54 = vcombine.low %v2803_v55, %v2813_v2  ;;  %v15645_v55 = vld [vmem:[#allocation2 + $0x74] sm:$0x1] }
 0x17f   : > { %v2870_v37 = vrot.slane %v2869_v41, 4  ;;  %v2893_v4 = vor.u32 %v2892_v36, %v2889_v17  ;;  %v2926_v41 = vrot.slane %v2924_v60, 4  ;;  %v15649_v28 = vld [vmem:[#allocation2 + $0x88] sm:$0xf] }
 0x180   : > { %13007 = vmatmul.mubr.bf16.gmra.mrb[28].mxu0 %v14273_v35  ;;  %v2694_v35 = vld [vmem:[#allocation2 + $0x6c] sm:$0xf]  ;;  %v2972_v60 = vshrl.u32 %v15649_v28, 16 }
 0x181   : > { %13026 = vmatprep.mubr.bf16.mxu0 %v11710_v26  ;;  %v2845_v26 = vor.u32 %v2844_v19, %v2841_v46  ;;  %v2911_v18 = vshrl.u32 %v2694_v35, 16  ;;  %v2914_v61 = vshll.u32 %v2694_v35, 16  ;;  %v2920_v46 = vshll.u32 %v15605_v21, 16  ;;  %v14277_v19 = vld [vmem:[%s19268_s1 + $0x150] sm:$0xff]  }
 0x182   : > { %v2944_v35 = vshll.u32 %v15422_v32, 16  ;;  %v2861_v32 = vsel %vm14696_vm6, %v2856_v7, %v15616_v43  ;;  %v2885_v43 = vsel %vm14696_vm6, %v2880_v47, %v2884_v59 }
 0x183   : > { %v2846_v39 = vrot.slane %v2845_v26, 4  ;;  %v2913_v5 = vrot.slane %v2911_v18, 4  ;;  %v2916_v49 = vrot.slane %v2914_v61, 5  ;;  %v11714_v26 = vcombine.low %v2827_v44, %v2837_v40  ;;  %v2700_v61 = vld [vmem:[#allocation2 + $0x84] sm:$0xf] }
 0x184   : > { %v15631_v22 = vrot.slane %v2920_v46, 5  ;;  %v2875_v18 = vsel %vm14696_vm6, %v2870_v37, %v15591_v20  ;;  %v2950_v40 = vrot.slane %v2948_v3, 4  ;;  %v2894_v20 = vrot.slane %v2893_v4, 4 }
 0x185   : > { %v2851_v13 = vsel %vm14696_vm6, %v2846_v39, %v15586_v16  ;;  %v2917_v2 = vor.u32 %v2916_v49, %v2913_v5  ;;  %v15647_v16 = vrot.slane %v2944_v35, 5  ;;  %v2959_v39 = vshrl.u32 %v2700_v61, 16 }
 0x186   : > { %v2962_v7 = vshll.u32 %v2700_v61, 16  ;;  %v2968_v46 = vshll.u32 %v15649_v28, 16  ;;  %v2954_v49 = vshll.u32 %v15424_v45, 16  ;;  %v11715_v35 = vcombine.low %v2851_v13, %v2861_v32  ;;  %v15667_v45 = vld [vmem:[#allocation2 + $0x8c] sm:$0x1] }
 0x187   : > { %v2918_v37 = vrot.slane %v2917_v2, 4  ;;  %v2951_v59 = vor.u32 %v2950_v40, %v15647_v16  ;;  %v11716_v3 = vcombine.low %v2875_v18, %v2885_v43  ;;  %v2974_v2 = vrot.slane %v2972_v60, 4 }
 0x188   : > { %13027 = vmatmul.mubr.bf16.vlgmr.msra.gmra.mrb[0].mxu0 %v11711_v9  ;;  %v2938_v9 = vshll.u32 %v2697_v25, 16  ;;  %v2930_v25 = vshll.u32 %v15645_v55, 16  ;;  %v2996_v40 = vshrl.u32 %v15451_v1, 16 }
 0x189   : > { %13059 = vmatpush3.bf16.msra.mxu0 %v15416_v48  ;;  %13030 = vmatprep.mubr.bf16.mxu0 %v11712_v53  ;;  %v2903_v48 = vor.u32 %v2902_v34, %v15619_v14  ;;  %v2906_v53 = vshll.u32 %v15392_v42, 16  ;;  %v14278_v42 = vld [vmem:[%s19268_s1 + $0x158] sm:$0xff]   ;;  %v2927_v34 = vor.u32 %v2926_v41, %v15631_v22  ;;  %v15669_v41 = vrot.slane %v2968_v46, 5 }
 0x18a   : > { %13060 = vmatprep.subr.bf16.mxu0 %v14276_v31  ;;  %v2940_v44 = vrot.slane %v2938_v9, 5  ;;  %v2703_v9 = vld [vmem:[#allocation2 + $0x90] sm:$0xf]  ;;  %v2952_v61 = vrot.slane %v2951_v59, 4  ;;  %v2998_v59 = vrot.slane %v2996_v40, 4 }
 0x18b   : > { %v2904_v17 = vrot.slane %v2903_v48, 4  ;;  %v2908_v36 = vrot.slane %v2906_v53, 5  ;;  %v2928_v4 = vrot.slane %v2927_v34, 4  ;;  %v2932_v48 = vrot.slane %v2930_v25, 5 }
 0x18c   : > { %v2961_v53 = vrot.slane %v2959_v39, 4  ;;  %v2983_v13 = vshrl.u32 %v2703_v9, 16  ;;  %v2986_v32 = vshll.u32 %v2703_v9, 16  ;;  %v3020_v34 = vshrl.u32 %v15463_v38, 16 }
 0x18d   : > { %13061 = vmatpush3.bf16.msra.mxu0 %v14276_v31  ;;  %v2937_v31 = vrot.slane %v2935_v30, 4  ;;  %v14279_v30 = vld [vmem:[%s19268_s1 + $0x160] sm:$0xff]   ;;  %v2909_v47 = vsel %vm14696_vm6, %v2904_v17, %v2908_v36  ;;  %v2933_v17 = vsel %vm14696_vm6, %v2928_v4, %v2932_v48  ;;  %v3016_v36 = vshll.u32 %v15463_v38, 16  ;;  %v14281_v38 = vld [vmem:[%s19268_s1 + $0x170] sm:$0xff]  }
 0x18e   : > { %13062 = vmatprep.subr.bf16.mxu0 %v14277_v19  ;;  %v2975_v39 = vor.u32 %v2974_v2, %v15669_v41  ;;  %v2988_v46 = vrot.slane %v2986_v32, 5  ;;  %v3026_v32 = vshll.u32 %v15465_v12, 16 }
 0x18f   : > { %v2941_v5 = vor.u32 %v2940_v44, %v2937_v31  ;;  %v2956_v31 = vrot.slane %v2954_v49, 5  ;;  %v14280_v44 = vld [vmem:[%s19268_s1 + $0x168] sm:$0xff]  }
 0x190   : > { %13031 = vmatmul.mubr.bf16.gmra.mrb[4].mxu0 %v11713_v54  ;;  %v2964_v54 = vrot.slane %v2962_v7, 5  ;;  %v2985_v7 = vrot.slane %v2983_v13, 4  ;;  %v2976_v4 = vrot.slane %v2975_v39, 4 }
 0x191   : > { %13034 = vmatprep.mubr.bf16.mxu0 %v11714_v26  ;;  %13063 = vmatpush3.bf16.msra.mxu0 %v14277_v19  ;;  %v2899_v19 = vsel %vm14696_vm6, %v2894_v20, %v15619_v14  ;;  %v2706_v26 = vld [vmem:[#allocation2 + $0x9c] sm:$0xf]  ;;  %v2923_v14 = vsel %vm14696_vm6, %v2918_v37, %v15631_v22  ;;  %v2942_v18 = vrot.slane %v2941_v5, 4  ;;  %v2978_v22 = vshll.u32 %v15667_v45, 16 }
 0x192   : > { %13064 = vmatprep.subr.bf16.mxu0 %v14278_v42  ;;  %v3007_v43 = vshrl.u32 %v2706_v26, 16  ;;  %v3010_v20 = vshll.u32 %v2706_v26, 16  ;;  %v2965_v25 = vor.u32 %v2964_v54, %v2961_v53  ;;  %v2957_v37 = vsel %vm14696_vm6, %v2952_v61, %v2956_v31  ;;  %v14282_v26 = vld [vmem:[%s19268_s1 + $0x178] sm:$0xff]  }
 0x193   : > { %v2947_v60 = vsel %vm14696_vm6, %v2942_v18, %v15647_v16  ;;  %v11718_v9 = vcombine.low %v2923_v14, %v2933_v17  ;;  %v2989_v48 = vor.u32 %v2988_v46, %v2985_v7  ;;  %v3002_v53 = vshll.u32 %v15453_v11, 16  ;;  %v2712_v18 = vld [vmem:[#allocation2 + $0xb4] sm:$0xf] }
 0x194   : > { %v3009_v49 = vrot.slane %v3007_v43, 4  ;;  %v2966_v16 = vrot.slane %v2965_v25, 4  ;;  %v11719_v54 = vcombine.low %v2947_v60, %v2957_v37  ;;  %v3040_v11 = vshll.u32 %v15471_v63, 16 }
 0x195   : > { %13065 = vmatpush3.bf16.msra.mxu0 %v14278_v42  ;;  %v2992_v42 = vshll.u32 %v15451_v1, 16  ;;  %v11717_v1 = vcombine.low %v2899_v19, %v2909_v47  ;;  %v3022_v19 = vrot.slane %v3020_v34, 4  ;;  %v2709_v47 = vld [vmem:[#allocation2 + $0xa8] sm:$0xf]  ;;  %v2990_v43 = vrot.slane %v2989_v48, 4 }
 0x196   : > { %13066 = vmatprep.subr.bf16.mxu0 %v14279_v30  ;;  %v3031_v14 = vshrl.u32 %v2709_v47, 16  ;;  %v3034_v31 = vshll.u32 %v2709_v47, 16  ;;  %v3004_v12 = vrot.slane %v3002_v53, 5  ;;  %v3058_v17 = vshll.u32 %v2712_v18, 16 }
 0x197   : > { %v15693_v5 = vrot.slane %v2992_v42, 5  ;;  %v2971_v42 = vsel %vm14696_vm6, %v2966_v16, %v15669_v41  ;;  %v3028_v25 = vrot.slane %v3026_v32, 5 }
 0x198   : > { %13035 = vmatmul.mubr.bf16.gmra.mrb[8].mxu0 %v11715_v35  ;;  %v2980_v35 = vrot.slane %v2978_v22, 5  ;;  %v3064_v22 = vshll.u32 %v15532_v51, 16  ;;  %v3033_v39 = vrot.slane %v3031_v14, 4  ;;  %v3036_v46 = vrot.slane %v3034_v31, 5 }
 0x199   : > { %13038 = vmatprep.mubr.bf16.mxu0 %v11716_v3  ;;  %13067 = vmatpush3.bf16.msra.mxu0 %v14279_v30  ;;  %v3012_v30 = vrot.slane %v3010_v20, 5  ;;  %v15695_v3 = vrot.slane %v3016_v36, 5  ;;  %v2999_v2 = vor.u32 %v2998_v59, %v15693_v5  ;;  %v3055_v20 = vshrl.u32 %v2712_v18, 16 }
 0x19a   : > { %13068 = vmatprep.subr.bf16.mxu0 %v14280_v44  ;;  %v2981_v40 = vsel %vm14696_vm6, %v2976_v4, %v2980_v35  ;;  %v3068_v36 = vshrl.u32 %v15532_v51, 16  ;;  %v3060_v59 = vrot.slane %v3058_v17, 5  ;;  %v3037_v4 = vor.u32 %v3036_v46, %v3033_v39  ;;  %v3424_v39 = vld [vmem:[#allocation2 + $0xc] sm:$0xe] }
 0x19b   : > { %v3013_v13 = vor.u32 %v3012_v30, %v3009_v49  ;;  %v3023_v61 = vor.u32 %v3022_v19, %v15695_v3  ;;  %v3000_v34 = vrot.slane %v2999_v2, 4  ;;  %v11720_v37 = vcombine.low %v2971_v42, %v2981_v40  ;;  %v2715_v30 = vld [vmem:[#allocation2 + $0xc0] sm:$0xf] }
 0x19c   : > { %v3066_v49 = vrot.slane %v3064_v22, 5  ;;  %v3070_v51 = vrot.slane %v3068_v36, 4  ;;  %v3050_v19 = vshll.u32 %v15477_v29, 16  ;;  %v3079_v53 = vshrl.u32 %v2715_v30, 16 }
 0x19d   : > { %13069 = vmatpush3.bf16.msra.mxu0 %v14280_v44  ;;  %v3044_v44 = vshrl.u32 %v15471_v63, 16  ;;  %v15716_v63 = vld [vmem:[%s19268_s1 + $0x180] sm:$0xff]   ;;  %v3014_v41 = vrot.slane %v3013_v13, 4  ;;  %v3024_v7 = vrot.slane %v3023_v61, 4  ;;  %v3005_v35 = vsel %vm14696_vm6, %v3000_v34, %v3004_v12 }
 0x19e   : > { %13070 = vmatprep.subr.bf16.mxu0 %v14281_v38  ;;  %v3092_v2 = vshrl.u32 %v15536_v10, 16  ;;  %v3071_v32 = vor.u32 %v3070_v51, %v3066_v49  ;;  %v3074_v29 = vshll.u32 %v15534_v57, 16  ;;  %v3038_v18 = vrot.slane %v3037_v4, 4  ;;  %v14474_v51 = vld [vmem:[#allocation2 + $0x14] sm:$0x1] }
 0x19f   : > { %v3046_v60 = vrot.slane %v3044_v44, 4  ;;  %v3019_v47 = vsel %vm14696_vm6, %v3014_v41, %v15695_v3  ;;  %v3029_v16 = vsel %vm14696_vm6, %v3024_v7, %v3028_v25  ;;  %v3052_v61 = vrot.slane %v3050_v19, 5  ;;  %v14473_v41 = vld [vmem:[#allocation2 + $0x10] sm:$0xf]  ;;  %v14476_v4 = vld [vmem:[#allocation2 + $0x28] sm:$0xf] }
 0x1a0   : > { %13039 = vmatmul.mubr.bf16.gmra.mrb[12].mxu0 %v11717_v1  ;;  %v3042_v1 = vrot.slane %v3040_v11, 5  ;;  %v11722_v14 = vcombine.low %v3019_v47, %v3029_v16  ;;  %v3081_v31 = vrot.slane %v3079_v53, 4  ;;  %v3094_v42 = vrot.slane %v3092_v2, 4  ;;  %v3425_v16 = vld [vmem:[#allocation2 + $0x18] sm:$0xe] }
 0x1a1   : > { %13042 = vmatprep.mubr.bf16.mxu0 %v11718_v9  ;;  %13071 = vmatpush3.bf16.msra.mxu0 %v14281_v38  ;;  %v3057_v38 = vrot.slane %v3055_v20, 4  ;;  %v2995_v9 = vsel %vm14696_vm6, %v2990_v43, %v15693_v5  ;;  %v3088_v5 = vshll.u32 %v15536_v10, 16  ;;  %v3072_v43 = vrot.slane %v3071_v32, 4  ;;  %v3426_v53 = vld [vmem:[#allocation2 + $0x24] sm:$0xe] }
 0x1a2   : > { %13072 = vmatprep.subr.bf16.mxu0 %v14282_v26  ;;  %v3047_v48 = vor.u32 %v3046_v60, %v3042_v1  ;;  %v3076_v12 = vrot.slane %v3074_v29, 5  ;;  %v3043_v10 = vsel %vm14696_vm6, %v3038_v18, %v3042_v1  ;;  %v3098_v22 = vshll.u32 %v15542_v27, 16  ;;  %v14477_v32 = vld [vmem:[#allocation2 + $0x20] sm:$0x1] }
 0x1a3   : > { %v3061_v13 = vor.u32 %v3060_v59, %v3057_v38  ;;  %v3090_v44 = vrot.slane %v3088_v5, 5  ;;  %v3490_v25 = vrot.slane %v14473_v41, 5  ;;  %v11734_v38 = vrot.slane %v3424_v39, 9 }
 0x1a4   : > { %v3048_v3 = vrot.slane %v3047_v48, 4  ;;  %v3077_v34 = vsel %vm14696_vm6, %v3072_v43, %v3076_v12  ;;  %v3504_v48 = vrot.slane %v14476_v4, 5  ;;  %v11735_v2 = vrot.slane %v3425_v16, 9  ;;  %v3434_v4 = vld [vmem:[#allocation2 + $0x84] sm:$0xe] }
 0x1a5   : > { %13073 = vmatpush3.bf16.msra.mxu0 %v14282_v26  ;;  %v3082_v26 = vshll.u32 %v2715_v30, 16  ;;  %v3062_v40 = vrot.slane %v3061_v13, 4  ;;  %v3095_v17 = vor.u32 %v3094_v42, %v3090_v44  ;;  %v3492_v59 = vrot.slane %v3490_v25, 4  ;;  %v3427_v42 = vld [vmem:[#allocation2 + $0x30] sm:$0xe] }
 0x1a6   : > { %13106 = vmatprep.subr.bf16.mxu0 %v15716_v63  ;;  %v3053_v57 = vsel %vm14696_vm6, %v3048_v3, %v3052_v61  ;;  %v3493_v30 = vrot.slane %v14474_v51, 5  ;;  %v3491_v19 = vsel %vm15076_vm13, %v11734_v38, %v3490_v25  ;;  %v3500_v29 = vrot.slane %v14477_v32, 5  ;;  %v3430_v25 = vld [vmem:[#allocation2 + $0x54] sm:$0xe]  ;;  %v3432_v51 = vld [vmem:[#allocation2 + $0x6c] sm:$0xe] }
 0x1a7   : > { %v3084_v11 = vrot.slane %v3082_v26, 5  ;;  %v3067_v36 = vsel %vm14696_vm6, %v3062_v40, %v3066_v49  ;;  %v11723_v7 = vcombine.low %v3043_v10, %v3053_v57  ;;  %v3096_v60 = vrot.slane %v3095_v17, 4 }
 0x1a8   : > { %13043 = vmatmul.mubr.bf16.gmra.mrb[16].mxu0 %v11719_v54  ;;  %v11721_v54 = vcombine.low %v2995_v9, %v3005_v35  ;;  %v11724_v46 = vcombine.low %v3067_v36, %v3077_v34  ;;  %v14475_v9 = vld [vmem:[#allocation2 + $0x1c] sm:$0xf]  ;;  %v3494_v47 = vsel %vm15076_vm13, %v3492_v59, %v3493_v30  ;;  %v3507_v18 = vrot.slane %v15368_v15, 5 }
 0x1a9   : > { %13046 = vmatprep.mubr.bf16.mxu0 %v11720_v37  ;;  %v3085_v20 = vor.u32 %v3084_v11, %v3081_v31  ;;  %v3100_v37 = vrot.slane %v3098_v22, 5  ;;  %v3497_v35 = vrot.slane %v14475_v9, 5  ;;  %v11766_v5 = vcombine.low %v3491_v19, %v3494_v47  ;;  %v3428_v15 = vld [vmem:[#allocation2 + $0x3c] sm:$0xe] }
 0x1aa   : > { %v3511_v31 = vrot.slane %v15374_v0, 5  ;;  %v3518_v40 = vrot.slane %v15449_v50, 5  ;;  %v11737_v10 = vrot.slane %v3427_v42, 9  ;;  %v14284_v0 = vld [vmem:[%s19268_s1 + $0x188] sm:$0xff]   ;;  %v11738_v17 = vrot.slane %v3428_v15, 9  ;;  %v19427_v42 = vld [vmem:[#allocation17_spill] sm:$0xff] }
 0x1ab   : > { %v3086_v1 = vrot.slane %v3085_v20, 4  ;;  %v3101_v49 = vsel %vm14696_vm6, %v3096_v60, %v3100_v37  ;;  %v3499_v13 = vrot.slane %v3497_v35, 4  ;;  %v3498_v3 = vsel %vm15076_vm13, %v11735_v2, %v3497_v35  ;;  %v14286_v37 = vld [vmem:[%s19268_s1 + $0x198] sm:$0xff]   ;;  %v14288_v35 = vld [vmem:[%s19268_s1 + $0x1a8] sm:$0xff]   ;;  %v19429_v15 = vld [vmem:[#allocation18_spill] sm:$0xff] }
 0x1ac   : > { %v3513_v57 = vrot.slane %v3511_v31, 4  ;;  %v3514_v20 = vrot.slane %v15436_v62, 5  ;;  %v3520_v22 = vrot.slane %v3518_v40, 4  ;;  %v3521_v36 = vrot.slane %v15514_v23, 5  ;;  %v14285_v23 = vld [vmem:[%s19268_s1 + $0x190] sm:$0xff]  }
 0x1ad   : > { %v3091_v27 = vsel %vm14696_vm6, %v3086_v1, %v3090_v44  ;;  %v3501_v61 = vsel %vm15076_vm13, %v3499_v13, %v3500_v29  ;;  %v3512_v50 = vsel %vm15076_vm13, %v11737_v10, %v3511_v31  ;;  %v3519_v62 = vsel %vm15076_vm13, %v11738_v17, %v3518_v40  ;;  %v19417_v29 = vld [vmem:[#allocation10_spill] sm:$0xff]  ;;  %v19424_v31 = vld [vmem:[#allocation15_spill] sm:$0xff]  ;;  %v14291_v10 = vld [vmem:[#allocation2 + $0x18] sm:$0xff]  }
 0x1ae   : > { %v11725_v26 = vcombine.low %v3091_v27, %v3101_v49  ;;  %v11767_v43 = vcombine.low %v3498_v3, %v3501_v61  ;;  %v3515_v34 = vsel %vm15076_vm13, %v3513_v57, %v3514_v20  ;;  %v3522_v41 = vsel %vm15076_vm13, %v3520_v22, %v3521_v36  ;;  %v19423_v61 = vld [vmem:[#allocation14_spill] sm:$0xff]  ;;  %v19432_v57 = vld [vmem:[#allocation20_spill] sm:$0xff]  ;;  %v19433_v20 = vld [vmem:[#allocation21_spill] sm:$0xff] }
 0x1af   : > { %v11769_v39 = vcombine.low %v3512_v50, %v3515_v34  ;;  %v3535_v60 = vrot.slane %v15589_v8, 5  ;;  %v3546_v59 = vrot.slane %v15605_v21, 5  ;;  %v14287_v8 = vld [vmem:[%s19268_s1 + $0x1a0] sm:$0xff]   ;;  %v11742_v27 = vrot.slane %v3432_v51, 9  ;;  %v14294_v22 = vld [vmem:[#allocation2 + $0x30] sm:$0xff]   ;;  %v14296_v36 = vld [vmem:[%s19268_s1 + $0x1c8] sm:$0xff]  }
 0x1b0   : > { %13047 = vmatmul.mubr.bf16.gmra.mrb[20].mxu0 %v11721_v54  ;;  %v11736_v54 = vrot.slane %v3426_v53, 9  ;;  %v3549_v9 = vrot.slane %v15645_v55, 5  ;;  %v19414_v19 = vcombine.low %v15378_v6, %v15382_v33  ;;  %v3560_v16 = vrot.slane %v15649_v28, 5  ;;  %v14289_v55 = vld [vmem:[%s19268_s1 + $0x1b0] sm:$0xff]   ;;  %v14292_v17 = vld [vmem:[#allocation2 + $0x24] sm:$0xff]   ;;  %v14295_v34 = vld [vmem:[#allocation2 + $0x3c] sm:$0xff]  }
 0x1b1   : > { %13050 = vmatprep.mubr.bf16.mxu0 %v11722_v14  ;;  %v3506_v14 = vrot.slane %v3504_v48, 4  ;;  %v3548_v49 = vrot.slane %v3546_v59, 4  ;;  %v3547_v21 = vsel %vm15076_vm13, %v11742_v27, %v3546_v59  ;;  %v11744_v6 = vrot.slane %v3434_v4, 9  ;;  %v14299_v50 = vld [vmem:[%s19268_s1 + $0x1d0] sm:$0xff]   ;;  %v4312_v51 = vld [vmem:[#allocation2 + $0x24] sm:$0xf] }
 0x1b2   : > { %v3505_v11 = vsel %vm15076_vm13, %v11736_v54, %v3504_v48  ;;  %v3562_v33 = vrot.slane %v3560_v16, 4  ;;  %v3563_v53 = vrot.slane %v15667_v45, 5  ;;  %v14293_v45 = vld [vmem:[%s19268_s1 + $0x1c0] sm:$0xff]   ;;  %v19418_v54 = vld [vmem:[#allocation11_spill] sm:$0xff]  ;;  %v15875_v4 = vld [vmem:[#allocation2 + $0x70] sm:$0xf] }
 0x1b3   : > { %v3508_v44 = vsel %vm15076_vm13, %v3506_v14, %v3507_v18  ;;  %v3550_v47 = vsel %vm15076_vm13, %v3548_v49, %v3549_v9  ;;  %v3561_v2 = vsel %vm15076_vm13, %v11744_v6, %v3560_v16  ;;  %v19420_v14 = vld [vmem:[#allocation12_spill] sm:$0xff]  ;;  %v19421_v18 = vld [vmem:[#allocation13_spill] sm:$0xff]  ;;  %v14308_v27 = vld [vmem:[%s19268_s1 + $0x1e8] sm:$0xff]   ;;  %v4382_v16 = vshrl.u32 %v4312_v51, 16 }
 0x1b4   : > { %v11768_v12 = vcombine.low %v3505_v11, %v3508_v44  ;;  %v11774_v48 = vcombine.low %v3547_v21, %v3550_v47  ;;  %v3564_v13 = vsel %vm15076_vm13, %v3562_v33, %v3563_v53  ;;  %v19422_v3 = vcombine.low %v19420_v14, %v19421_v18  ;;  %v19426_v44 = vld [vmem:[#allocation16_spill] sm:$0xff]  ;;  %v15869_v9 = vld [vmem:[#allocation2 + $0x28] sm:$0xf]  ;;  %v5070_v53 = vld [vmem:[#allocation2 + $0x6c] sm:$0xe] }
 0x1b5   : > { %v11776_v32 = vcombine.low %v3561_v2, %v3564_v13  ;;  %v19425_v11 = vcombine.low %v19423_v61, %v19424_v31  ;;  %v19428_v40 = vcombine.low %v19426_v44, %v19427_v42  ;;  %v4391_v6 = vshll.u32 %v15869_v9, 16  ;;  %v15888_v14 = vld [vmem:[#allocation2 + $0x20] sm:$0x1]  ;;  %v14303_v31 = vld [vmem:[#allocation2 + $0x78] sm:$0xff]  }
 0x1b6   : > { %v4395_v33 = vshrl.u32 %v15869_v9, 16  ;;  %v11877_v13 = vrot.slane %v5070_v53, 9  ;;  %v4384_v18 = vrot.slane %v4382_v16, 4 }
 0x1b7   : > { %v15896_v44 = vrot.slane %v4391_v6, 5 }
 0x1b8   : > { %13051 = vmatmul.mubr.bf16.gmra.mrb[24].mxu0 %v11723_v7  ;;  %v11770_v7 = vcombine.low %v3519_v62, %v3522_v41  ;;  %v14297_v62 = vld [vmem:[#allocation2 + $0x48] sm:$0xff]   ;;  %v14302_v41 = vld [vmem:[%s19268_s1 + $0x1d8] sm:$0xff]   ;;  %v4397_v42 = vrot.slane %v4395_v33, 4 }
 0x1b9   : > { %13054 = vmatprep.mubr.bf16.mxu0 %v11724_v46  ;;  %v11740_v46 = vrot.slane %v3430_v25, 9  ;;  %v5068_v25 = vld [vmem:[#allocation2 + $0x54] sm:$0xe] }
 0x1c0   : > { %13055 = vmatmul.mubr.bf16.gmra.mrb[28].mxu0 %v11725_v26  ;;  %v14290_v26 = vld [vmem:[%s19268_s1 + $0x1b8] sm:$0xff]  }
 0x1c1   : > { %13074 = vmatprep.mubr.bf16.mxu0 %v11766_v5  ;;  %v19415_v5 = vld [vmem:[#allocation9_spill] sm:$0xff] }
 0x1c2   : > { %v19416_v28 = vcombine.low %v15405_v56, %v19415_v5  ;;  %v19419_v56 = vcombine.low %v19417_v29, %v19418_v54 }
 0x1c8   : > { %13075 = vmatmul.mubr.bf16.vlgmr.msra.gmra.mrb[0].mxu0 %v11767_v43  ;;  %v19430_v43 = vld [vmem:[#allocation19_spill] sm:$0xff] }
 0x1c9   : > { %13107 = vmatpush3.bf16.msra.mxu0 %v15716_v63  ;;  %13078 = vmatprep.mubr.bf16.mxu0 %v11768_v12  ;;  %v3532_v63 = vrot.slane %v15550_v58, 5  ;;  %v19431_v12 = vcombine.low %v19429_v15, %v19430_v43  ;;  %v14314_v15 = vld [vmem:[%s19268_s1 + $0x1f8] sm:$0xff]   ;;  %v4315_v43 = vld [vmem:[#allocation2 + $0x30] sm:$0xf] }
 0x1ca   : > { %13108 = vmatprep.subr.bf16.mxu0 %v14284_v0 }
 0x1cb   : > { %v3534_v1 = vrot.slane %v3532_v63, 4  ;;  %v3533_v38 = vsel %vm15076_vm13, %v11740_v46, %v3532_v63  ;;  %v15849_v63 = vld [vmem:[#allocation2 + $0x5c] sm:$0x1]  ;;  %v14305_v46 = vld [vmem:[%s19268_s1 + $0x1e0] sm:$0xff]  }
 0x1cd   : > { %13109 = vmatpush3.bf16.msra.mxu0 %v14284_v0  ;;  %v3536_v58 = vsel %vm15076_vm13, %v3534_v1, %v3535_v60  ;;  %v19434_v0 = vcombine.low %v19432_v57, %v19433_v20  ;;  %v11875_v1 = vrot.slane %v5068_v25, 9  ;;  %v4309_v60 = vld [vmem:[#allocation2 + $0x18] sm:$0xf]  ;;  %v4377_v20 = vshll.u32 %v15888_v14, 16 }
 0x1ce   : > { %13110 = vmatprep.subr.bf16.mxu0 %v14285_v23  ;;  %v11772_v30 = vcombine.low %v3533_v38, %v3536_v58  ;;  %v14298_v38 = vld [vmem:[#allocation2 + $0x54] sm:$0xff]   ;;  %v15856_v58 = vld [vmem:[#allocation2 + $0x1c] sm:$0xf]  ;;  %v4358_v49 = vshrl.u32 %v4309_v60, 16 }
 0x1cf   : > { %v4367_v21 = vshll.u32 %v15856_v58, 16  ;;  %v4371_v47 = vshrl.u32 %v15856_v58, 16 }
 0x1d0   : > { %13079 = vmatmul.mubr.bf16.gmra.mrb[4].mxu0 %v11769_v39  ;;  %v4360_v2 = vrot.slane %v4358_v49, 4 }
 0x1d1   : > { %13082 = vmatprep.mubr.bf16.mxu0 %v11770_v7  ;;  %13111 = vmatpush3.bf16.msra.mxu0 %v14285_v23  ;;  %v15847_v23 = vld [vmem:[#allocation2 + $0x58] sm:$0xf]  ;;  %v5167_v7 = vrot.slane %v15849_v63, 5  ;;  %v4373_v29 = vrot.slane %v4371_v47, 4  ;;  %v14306_v47 = vld [vmem:[#allocation2 + $0x90] sm:$0xff]  }
 0x1d2   : > { %13112 = vmatprep.subr.bf16.mxu0 %v14286_v37  ;;  %v5164_v39 = vrot.slane %v15847_v23, 5 }
 0x1d4   : > { %v15860_v59 = vsel %vm15076_vm13, %v11875_v1, %v5164_v39 }
 0x1d5   : > { %13113 = vmatpush3.bf16.msra.mxu0 %v14286_v37  ;;  %v5166_v37 = vrot.slane %v5164_v39, 4  ;;  %19435 = vst [vmem:[#allocation9_spill] sm:$0xff] %v15860_v59  ;;  %v15920_v39 = vld [vmem:[%s19268_s1 + $0x200] sm:$0xff]   ;;  %v14313_v59 = vld [vmem:[#allocation2 + $0xcc] sm:$0xff]  }
 0x1d6   : > { %13114 = vmatprep.subr.bf16.mxu0 %v14287_v8 }
 0x1d8   : > { %13083 = vmatmul.mubr.bf16.gmra.mrb[8].mxu0 %v19414_v19  ;;  %v4361_v19 = vshll.u32 %v4309_v60, 16 }
 0x1d9   : > { %13086 = vmatprep.mubr.bf16.mxu0 %v11772_v30  ;;  %13115 = vmatpush3.bf16.msra.mxu0 %v14287_v8  ;;  %v14300_v8 = vld [vmem:[#allocation2 + $0x60] sm:$0xff]   ;;  %v15864_v30 = vsel %vm15076_vm13, %v5166_v37, %v5167_v7  ;;  %v15922_v7 = vld [vmem:[#allocation2 + $0x34] sm:$0xf]  ;;  %v15928_v37 = vrot.slane %v4377_v20, 5 }
 0x1da   : > { %13116 = vmatprep.subr.bf16.mxu0 %v14288_v35  ;;  %19436 = vst [vmem:[#allocation10_spill] sm:$0xff] %v15864_v30  ;;  %v4415_v6 = vshll.u32 %v15922_v7, 16  ;;  %v4419_v53 = vshrl.u32 %v15922_v7, 16  ;;  %v4324_v30 = vld [vmem:[#allocation2 + $0x54] sm:$0xf] }
 0x1dd   : > { %13117 = vmatpush3.bf16.msra.mxu0 %v14288_v35  ;;  %v5076_v35 = vld [vmem:[#allocation2 + $0xb4] sm:$0xe] }
 0x1de   : > { %13118 = vmatprep.subr.bf16.mxu0 %v14289_v55 }
 0x1e0   : > { %13087 = vmatmul.mubr.bf16.gmra.mrb[12].mxu0 %v19416_v28  ;;  %v14311_v28 = vld [vmem:[%s19268_s1 + $0x1f0] sm:$0xff]  }
 0x1e1   : > { %13090 = vmatprep.mubr.bf16.mxu0 %v11774_v48  ;;  %13119 = vmatpush3.bf16.msra.mxu0 %v14289_v55  ;;  %v4385_v55 = vshll.u32 %v4312_v51, 16  ;;  %v15877_v48 = vld [vmem:[#allocation2 + $0x74] sm:$0x1]  ;;  %v14304_v51 = vld [vmem:[#allocation2 + $0x84] sm:$0xff]  }
 0x1e2   : > { %13120 = vmatprep.subr.bf16.mxu0 %v14290_v26  ;;  %v5181_v5 = vrot.slane %v15877_v48, 5 }
 0x1e5   : > { %13121 = vmatpush3.bf16.msra.mxu0 %v14290_v26  ;;  %v5178_v26 = vrot.slane %v15875_v4, 5 }
 0x1e6   : > { %13154 = vmatprep.subr.bf16.mxu0 %v14293_v45 }
 0x1e7   : > { %v5180_v54 = vrot.slane %v5178_v26, 4  ;;  %v15892_v61 = vsel %vm15076_vm13, %v11877_v13, %v5178_v26  ;;  %v15949_v26 = vld [vmem:[#allocation2 + $0x40] sm:$0xf]  ;;  %v15953_v13 = vld [vmem:[#allocation2 + $0x38] sm:$0x1] }
 0x1e8   : > { %13091 = vmatmul.mubr.bf16.gmra.mrb[16].mxu0 %v19419_v56  ;;  %v14301_v56 = vld [vmem:[#allocation2 + $0x6c] sm:$0xff]   ;;  %19437 = vst [vmem:[#allocation11_spill] sm:$0xff] %v15892_v61 }
 0x1e9   : > { %13094 = vmatprep.mubr.bf16.mxu0 %v11776_v32  ;;  %v15886_v32 = vrot.slane %v4367_v21, 5 }
 0x1eb   : > { %v4374_v57 = vor.u32 %v4373_v29, %v15886_v32  ;;  %v15957_v29 = vld [vmem:[#allocation2 + $0x98] sm:$0x1] }
 0x1ed   : > { %v15926_v60 = vrot.slane %v4374_v57, 4 }
 0x1f0   : > { %13095 = vmatmul.mubr.bf16.gmra.mrb[20].mxu0 %v19422_v3  ;;  %v4387_v3 = vrot.slane %v4385_v55, 5 }
 0x1f1   : > { %13098 = vmatprep.mubr.bf16.mxu0 %v19425_v11  ;;  %v15894_v11 = vld [vmem:[#allocation2 + $0x2c] sm:$0x1] }
 0x1f8   : > { %13099 = vmatmul.mubr.bf16.gmra.mrb[24].mxu0 %v19428_v40  ;;  %v15900_v40 = vsel %vm15076_vm13, %v5180_v54, %v5181_v5  ;;  %v15959_v54 = vld [vmem:[#allocation2 + $0xa0] sm:$0xf] }
 0x1f9   : > { %13102 = vmatprep.mubr.bf16.mxu0 %v19431_v12  ;;  %19438 = vst [vmem:[#allocation12_spill] sm:$0xff] %v15900_v40  ;;  %v5075_v12 = vld [vmem:[#allocation2 + $0xa8] sm:$0xe] }
 0x200   : > { %13103 = vmatmul.mubr.bf16.gmra.mrb[28].mxu0 %v19434_v0  ;;  %v4388_v0 = vor.u32 %v4387_v3, %v4384_v18  ;;  %v5073_v18 = vld [vmem:[#allocation2 + $0x90] sm:$0xe] }
 0x201   : > { %13122 = vmatprep.mubr.bf16.mxu0 %v14291_v10 }
 0x208   : > { %13123 = vmatmul.mubr.bf16.vlgmr.msra.gmra.mrb[0].mxu0 %v14292_v17  ;;  %v4401_v17 = vshll.u32 %v15894_v11, 16 }
 0x209   : > { %13155 = vmatpush3.bf16.msra.mxu0 %v14293_v45  ;;  %13126 = vmatprep.mubr.bf16.mxu0 %v14294_v22  ;;  %v4363_v45 = vrot.slane %v4361_v19, 5  ;;  %v15910_v22 = vld [vmem:[#allocation2 + $0x88] sm:$0xf]  ;;  %v4409_v19 = vshll.u32 %v4315_v43, 16 }
 0x20a   : > { %13156 = vmatprep.subr.bf16.mxu0 %v14296_v36  ;;  %v15932_v49 = vrot.slane %v4401_v17, 5 }
 0x20b   : > { %v4364_v10 = vor.u32 %v4363_v45, %v4360_v2  ;;  %v15955_v45 = vld [vmem:[#allocation2 + $0x94] sm:$0xf]  ;;  %v4411_v20 = vrot.slane %v4409_v19, 5  ;;  %v16019_v2 = vld [vmem:[#allocation2 + $0xbc] sm:$0x1] }
 0x20c   : > { %v5199_v3 = vrot.slane %v15955_v45, 5 }
 0x20d   : > { %13157 = vmatpush3.bf16.msra.mxu0 %v14296_v36  ;;  %v15912_v36 = vld [vmem:[#allocation2 + $0x8c] sm:$0x1]  ;;  %v15924_v1 = vrot.slane %v4364_v10, 4  ;;  %v5206_v10 = vrot.slane %v15959_v54, 5 }
 0x20e   : > { %13158 = vmatprep.subr.bf16.mxu0 %v14299_v50  ;;  %v5195_v25 = vrot.slane %v15912_v36, 5  ;;  %v5201_v17 = vrot.slane %v5199_v3, 4 }
 0x210   : > { %13127 = vmatmul.mubr.bf16.gmra.mrb[4].mxu0 %v14295_v34  ;;  %v4406_v34 = vshrl.u32 %v4315_v43, 16  ;;  %v5074_v43 = vld [vmem:[#allocation2 + $0x9c] sm:$0xe] }
 0x211   : > { %13130 = vmatprep.mubr.bf16.mxu0 %v14297_v62  ;;  %13159 = vmatpush3.bf16.msra.mxu0 %v14299_v50  ;;  %v4398_v50 = vor.u32 %v4397_v42, %v15896_v44  ;;  %v5072_v62 = vld [vmem:[#allocation2 + $0x84] sm:$0xe]  ;;  %v4439_v42 = vshll.u32 %v15949_v26, 16 }
 0x212   : > { %13160 = vmatprep.subr.bf16.mxu0 %v14302_v41  ;;  %v15940_v55 = vrot.slane %v4406_v34, 4  ;;  %v4421_v34 = vrot.slane %v4419_v53, 4 }
 0x213   : > { %v15938_v16 = vrot.slane %v4398_v50, 4  ;;  %v11881_v50 = vrot.slane %v5074_v43, 9  ;;  %v15999_v43 = vld [vmem:[#allocation2 + $0x4c] sm:$0xf] }
 0x214   : > { %19446 = vst [vmem:[#allocation20_spill] sm:$0xff] %v15999_v43 }
 0x215   : > { %13161 = vmatpush3.bf16.msra.mxu0 %v14302_v41  ;;  %v5192_v41 = vrot.slane %v15910_v22, 5 }
 0x216   : > { %13162 = vmatprep.subr.bf16.mxu0 %v14305_v46 }
 0x218   : > { %13131 = vmatmul.mubr.bf16.gmra.mrb[8].mxu0 %v14298_v38  ;;  %v4318_v38 = vld [vmem:[#allocation2 + $0x3c] sm:$0xf] }
 0x219   : > { %13134 = vmatprep.mubr.bf16.mxu0 %v14300_v8  ;;  %13163 = vmatpush3.bf16.msra.mxu0 %v14305_v46  ;;  %v11879_v46 = vrot.slane %v5072_v62, 9  ;;  %v5194_v8 = vrot.slane %v5192_v41, 4  ;;  %v4430_v5 = vshrl.u32 %v4318_v38, 16  ;;  %v15970_v62 = vld [vmem:[#allocation2 + $0x44] sm:$0x1] }
 0x21a   : > { %13164 = vmatprep.subr.bf16.mxu0 %v14308_v27  ;;  %19441 = vst [vmem:[#allocation15_spill] sm:$0xff] %v15970_v62 }
 0x21b   : > { %v15936_v21 = vsel %vm15076_vm13, %v11879_v46, %v5192_v41  ;;  %v15945_v33 = vsel %vm15076_vm13, %v5194_v8, %v5195_v25  ;;  %v4321_v41 = vld [vmem:[#allocation2 + $0x48] sm:$0xf]  ;;  %v5208_v46 = vrot.slane %v5206_v10, 4  ;;  %v4425_v8 = vshll.u32 %v15953_v13, 16 }
 0x21c   : > { %19439 = vst [vmem:[#allocation13_spill] sm:$0xff] %v15936_v21  ;;  %19440 = vst [vmem:[#allocation14_spill] sm:$0xff] %v15945_v33 }
 0x21d   : > { %13165 = vmatpush3.bf16.msra.mxu0 %v14308_v27  ;;  %v15930_v27 = vrot.slane %v4388_v0, 4  ;;  %v15968_v0 = vrot.slane %v4415_v6, 5  ;;  %v14309_v6 = vld [vmem:[#allocation2 + $0xa8] sm:$0xff]  }
 0x21e   : > { %13166 = vmatprep.subr.bf16.mxu0 %v14311_v28 }
 0x220   : > { %13135 = vmatmul.mubr.bf16.gmra.mrb[12].mxu0 %v14301_v56  ;;  %v15961_v56 = vld [vmem:[#allocation2 + $0xa4] sm:$0x1] }
 0x221   : > { %13138 = vmatprep.mubr.bf16.mxu0 %v14303_v31  ;;  %13167 = vmatpush3.bf16.msra.mxu0 %v14311_v28  ;;  %v4433_v28 = vshll.u32 %v4318_v38, 16  ;;  %v5202_v31 = vrot.slane %v15957_v29, 5  ;;  %v5209_v57 = vrot.slane %v15961_v56, 5  ;;  %v14307_v38 = vld [vmem:[#allocation2 + $0x9c] sm:$0xff]  }
 0x222   : > { %13168 = vmatprep.subr.bf16.mxu0 %v14314_v15 }
 0x223   : > { %v15981_v19 = vsel %vm15076_vm13, %v5201_v17, %v5202_v31  ;;  %v15987_v53 = vrot.slane %v4433_v28, 5  ;;  %v4449_v31 = vshll.u32 %v15970_v62, 16  ;;  %v4412_v17 = vor.u32 %v4411_v20, %v15940_v55 }
 0x224   : > { %19443 = vst [vmem:[#allocation17_spill] sm:$0xff] %v15981_v19  ;;  %v4422_v28 = vor.u32 %v4421_v34, %v15968_v0  ;;  %v4457_v55 = vshll.u32 %v4321_v41, 16  ;;  %v11882_v20 = vrot.slane %v5075_v12, 9  ;;  %v11883_v34 = vrot.slane %v5076_v35, 9 }
 0x225   : > { %13169 = vmatpush3.bf16.msra.mxu0 %v14314_v15  ;;  %v11880_v15 = vrot.slane %v5073_v18, 9  ;;  %v15989_v18 = vrot.slane %v4439_v42, 5  ;;  %v4370_v42 = vsel %vm14696_vm6, %v15924_v1, %v15886_v32  ;;  %v16027_v19 = vrot.slane %v4412_v17, 4  ;;  %v14312_v17 = vld [vmem:[#allocation2 + $0xc0] sm:$0xff]  }
 0x226   : > { %13202 = vmatprep.subr.bf16.mxu0 %v15920_v39  ;;  %v16035_v33 = vrot.slane %v4422_v28, 4  ;;  %v4487_v62 = vshll.u32 %v15847_v23, 16 }
 0x227   : > { %v15974_v25 = vsel %vm15076_vm13, %v11880_v15, %v5199_v3  ;;  %v4443_v15 = vshrl.u32 %v15949_v26, 16  ;;  %v4380_v3 = vsel %vm14696_vm6, %v15926_v60, %v15928_v37  ;;  %v4467_v60 = vshrl.u32 %v15999_v43, 16 }
 0x228   : > { %13139 = vmatmul.mubr.bf16.gmra.mrb[16].mxu0 %v14304_v51  ;;  %19442 = vst [vmem:[#allocation16_spill] sm:$0xff] %v15974_v25  ;;  %v15977_v51 = vrot.slane %v4430_v5, 4  ;;  %v15995_v5 = vsel %vm15076_vm13, %v5208_v46, %v5209_v57  ;;  %v16010_v57 = vld [vmem:[#allocation2 + $0xb0] sm:$0x1]  ;;  %v16012_v46 = vld [vmem:[#allocation2 + $0xb8] sm:$0xf] }
 0x229   : > { %13142 = vmatprep.mubr.bf16.mxu0 %v14306_v47  ;;  %v15985_v47 = vsel %vm15076_vm13, %v11881_v50, %v5206_v10  ;;  %19445 = vst [vmem:[#allocation19_spill] sm:$0xff] %v15995_v5  ;;  %v4454_v10 = vshrl.u32 %v4321_v41, 16  ;;  %v16008_v50 = vld [vmem:[#allocation2 + $0xac] sm:$0xf]  ;;  %v5216_v1 = vrot.slane %v16010_v57, 5  ;;  %v5223_v5 = vrot.slane %v16019_v2, 5 }
 0x22a   : > { %19444 = vst [vmem:[#allocation18_spill] sm:$0xff] %v15985_v47  ;;  %v5213_v32 = vrot.slane %v16008_v50, 5  ;;  %v4463_v47 = vshll.u32 %v15999_v43, 16  ;;  %v16029_v25 = vrot.slane %v4425_v8, 5  ;;  %v14310_v41 = vld [vmem:[#allocation2 + $0xb4] sm:$0xff]   ;;  %v4445_v21 = vrot.slane %v4443_v15, 4 }
 0x22b   : > { %v16045_v8 = vrot.slane %v4449_v31, 5  ;;  %v4456_v61 = vrot.slane %v4454_v10, 4  ;;  %v16053_v15 = vld [vmem:[#allocation2 + $0x50] sm:$0x1]  ;;  %v11846_v31 = vcombine.low %v4370_v42, %v4380_v3  ;;  %v4394_v10 = vsel %vm14696_vm6, %v15930_v27, %v15896_v44  ;;  %v16080_v3 = vld [vmem:[#allocation2 + $0xd4] sm:$0x1] }
 0x22c   : > { %v5215_v37 = vrot.slane %v5213_v32, 4  ;;  %19451 = vst [vmem:[#allocation25_spill] sm:$0xff] %v16053_v15  ;;  %v4418_v44 = vsel %vm14696_vm6, %v16027_v19, %v15968_v0  ;;  %v4446_v27 = vor.u32 %v4445_v21, %v15989_v18  ;;  %v4473_v0 = vshll.u32 %v16053_v15, 16  ;;  %v4327_v19 = vld [vmem:[#allocation2 + $0x60] sm:$0xf] }
 0x22d   : > { %v16124_v15 = vrot.slane %v4487_v62, 5  ;;  %v4539_v62 = vshrl.u32 %v15875_v4, 16 }
 0x22e   : > { %v16039_v40 = vsel %vm15076_vm13, %v5215_v37, %v5216_v1  ;;  %v4459_v1 = vrot.slane %v4457_v55, 5  ;;  %v4469_v37 = vrot.slane %v4467_v60, 4  ;;  %v4436_v55 = vor.u32 %v15987_v53, %v15977_v51  ;;  %v16071_v60 = vld [vmem:[#allocation2 + $0xc8] sm:$0x1] }
 0x22f   : > { %19448 = vst [vmem:[#allocation22_spill] sm:$0xff] %v16039_v40  ;;  %v5230_v51 = vrot.slane %v16071_v60, 5  ;;  %v4478_v53 = vshrl.u32 %v4324_v30, 16  ;;  %v4481_v40 = vshll.u32 %v4324_v30, 16  ;;  %v4502_v30 = vshrl.u32 %v4327_v19, 16 }
 0x230   : > { %13143 = vmatmul.mubr.bf16.gmra.mrb[20].mxu0 %v14307_v38  ;;  %v5220_v38 = vrot.slane %v16012_v46, 5 }
 0x231   : > { %13146 = vmatprep.mubr.bf16.mxu0 %v14309_v6  ;;  %v16033_v6 = vsel %vm15076_vm13, %v11882_v20, %v5213_v32  ;;  %v16055_v20 = vrot.slane %v4463_v47, 5  ;;  %v16069_v47 = vld [vmem:[#allocation2 + $0xc4] sm:$0xf]  ;;  %v4460_v32 = vor.u32 %v4459_v1, %v4456_v61  ;;  %v4491_v61 = vshrl.u32 %v15847_v23, 16 }
 0x232   : > { %19447 = vst [vmem:[#allocation21_spill] sm:$0xff] %v16033_v6  ;;  %v5222_v12 = vrot.slane %v5220_v38, 4  ;;  %v16043_v35 = vsel %vm15076_vm13, %v11883_v34, %v5220_v38  ;;  %v16073_v34 = vld [vmem:[#allocation2 + $0xd0] sm:$0xf]  ;;  %v5237_v38 = vrot.slane %v16080_v3, 5  ;;  %v4428_v23 = vsel %vm14696_vm6, %v16035_v33, %v16029_v25 }
 0x233   : > { %19449 = vst [vmem:[#allocation23_spill] sm:$0xff] %v16043_v35  ;;  %v4470_v35 = vor.u32 %v4469_v37, %v16055_v20  ;;  %v16088_v6 = vld [vmem:[#allocation2 + $0x64] sm:$0xf]  ;;  %v4493_v33 = vrot.slane %v4491_v61, 4  ;;  %v4504_v43 = vrot.slane %v4502_v30, 4 }
 0x234   : > { %v16051_v28 = vsel %vm15076_vm13, %v5222_v12, %v5223_v5  ;;  %v4404_v5 = vsel %vm14696_vm6, %v15938_v16, %v15932_v49  ;;  %v5077_v49 = vld [vmem:[#allocation2 + $0xc0] sm:$0xe]  ;;  %v5227_v16 = vrot.slane %v16069_v47, 5  ;;  %v5078_v12 = vld [vmem:[#allocation2 + $0xcc] sm:$0xe]  ;;  %19452 = vst [vmem:[#allocation26_spill] sm:$0xff] %v16088_v6 }
 0x235   : > { %19450 = vst [vmem:[#allocation24_spill] sm:$0xff] %v16051_v28  ;;  %v11884_v42 = vrot.slane %v5077_v49, 9  ;;  %v11885_v28 = vrot.slane %v5078_v12, 9  ;;  %v4505_v12 = vshll.u32 %v4327_v19, 16  ;;  %v16121_v19 = vrot.slane %v4473_v0, 5 }
 0x236   : > { %v5229_v21 = vrot.slane %v5227_v16, 4  ;;  %v4471_v25 = vrot.slane %v4470_v35, 4  ;;  %v16127_v0 = vld [vmem:[#allocation2 + $0x68] sm:$0x1]  ;;  %v16143_v61 = vld [vmem:[#allocation2 + $0x7c] sm:$0xf] }
 0x238   : > { %13147 = vmatmul.mubr.bf16.gmra.mrb[24].mxu0 %v14310_v41  ;;  %v5234_v41 = vrot.slane %v16073_v34, 5  ;;  %v16098_v1 = vsel %vm15076_vm13, %v5229_v21, %v5230_v51  ;;  %v16114_v51 = vrot.slane %v4436_v55, 4  ;;  %v4511_v21 = vshll.u32 %v16088_v6, 16 }
 0x239   : > { %13150 = vmatprep.mubr.bf16.mxu0 %v14312_v17  ;;  %v16092_v17 = vsel %vm15076_vm13, %v11884_v42, %v5227_v16  ;;  %19454 = vst [vmem:[#allocation28_spill] sm:$0xff] %v16098_v1  ;;  %v4480_v16 = vrot.slane %v4478_v53, 4  ;;  %v4461_v1 = vrot.slane %v4460_v32, 4  ;;  %v4497_v55 = vshll.u32 %v15849_v63, 16 }
 0x23a   : > { %19453 = vst [vmem:[#allocation27_spill] sm:$0xff] %v16092_v17  ;;  %v5236_v49 = vrot.slane %v5234_v41, 4  ;;  %v16102_v37 = vsel %vm15076_vm13, %v11885_v28, %v5234_v41  ;;  %v16119_v41 = vrot.slane %v4446_v27, 4  ;;  %v4483_v17 = vrot.slane %v4481_v40, 5 }
 0x23b   : > { %19455 = vst [vmem:[#allocation29_spill] sm:$0xff] %v16102_v37  ;;  %v4507_v28 = vrot.slane %v4505_v12, 5  ;;  %v11847_v27 = vcombine.low %v4394_v10, %v4404_v5  ;;  %v16129_v53 = vrot.slane %v4511_v21, 5  ;;  %v4535_v40 = vshll.u32 %v15875_v4, 16  ;;  %v14316_v12 = vld [vmem:[%s19268_s1 + $0x208] sm:$0xff]  }
 0x23c   : > { %v16108_v42 = vsel %vm15076_vm13, %v5236_v49, %v5237_v38  ;;  %v4515_v38 = vshrl.u32 %v16088_v6, 16  ;;  %v4330_v49 = vld [vmem:[#allocation2 + $0x6c] sm:$0xf]  ;;  %v4333_v6 = vld [vmem:[#allocation2 + $0x78] sm:$0xf]  ;;  %v4442_v63 = vsel %vm14696_vm6, %v16114_v51, %v15989_v18  ;;  %v4452_v35 = vsel %vm14696_vm6, %v16119_v41, %v16045_v8 }
 0x23d   : > { %19456 = vst [vmem:[#allocation30_spill] sm:$0xff] %v16108_v42  ;;  %v11848_v42 = vcombine.low %v4418_v44, %v4428_v23  ;;  %v4526_v37 = vshrl.u32 %v4330_v49, 16  ;;  %v4529_v32 = vshll.u32 %v4330_v49, 16  ;;  %v4494_v10 = vor.u32 %v4493_v33, %v16124_v15  ;;  %v4336_v21 = vld [vmem:[#allocation2 + $0x84] sm:$0xf]  ;;  %v14317_v33 = vld [vmem:[%s19268_s1 + $0x210] sm:$0xff]  }
 0x23e   : > { %v4508_v5 = vor.u32 %v4507_v28, %v4504_v43  ;;  %v4521_v44 = vshll.u32 %v16127_v0, 16  ;;  %v4550_v30 = vshrl.u32 %v4333_v6, 16  ;;  %v4553_v4 = vshll.u32 %v4333_v6, 16 }
 0x23f   : > { %v4466_v18 = vsel %vm14696_vm6, %v4461_v1, %v16055_v20  ;;  %v4476_v8 = vsel %vm14696_vm6, %v4471_v25, %v16121_v19  ;;  %v4528_v43 = vrot.slane %v4526_v37, 4  ;;  %v4531_v23 = vrot.slane %v4529_v32, 5 }
 0x240   : > { %13151 = vmatmul.mubr.bf16.gmra.mrb[28].mxu0 %v14313_v59  ;;  %v4517_v59 = vrot.slane %v4515_v38, 4  ;;  %v16157_v51 = vrot.slane %v4535_v40, 5  ;;  %v4541_v6 = vrot.slane %v4539_v62, 4  ;;  %v4495_v41 = vrot.slane %v4494_v10, 4 }
 0x241   : > { %13170 = vmatprep.mubr.bf16.mxu0 %v11846_v31  ;;  %v4484_v31 = vor.u32 %v4483_v17, %v4480_v16  ;;  %v16154_v17 = vrot.slane %v4497_v55, 5  ;;  %v4559_v38 = vshll.u32 %v16143_v61, 16  ;;  %v4563_v20 = vshrl.u32 %v16143_v61, 16 }
 0x242   : > { %v4518_v16 = vor.u32 %v4517_v59, %v16129_v53  ;;  %v4509_v1 = vrot.slane %v4508_v5, 4  ;;  %v4523_v19 = vrot.slane %v4521_v44, 5  ;;  %v4552_v37 = vrot.slane %v4550_v30, 4 }
 0x243   : > { %v4485_v28 = vrot.slane %v4484_v31, 4  ;;  %v4555_v49 = vrot.slane %v4553_v4, 5  ;;  %v4574_v25 = vshrl.u32 %v4336_v21, 16  ;;  %v4577_v55 = vshll.u32 %v4336_v21, 16  ;;  %v16180_v4 = vld [vmem:[#allocation2 + $0x80] sm:$0x1] }
 0x244   : > { %v4587_v59 = vshrl.u32 %v15910_v22, 16  ;;  %v4519_v32 = vrot.slane %v4518_v16, 4  ;;  %v4532_v40 = vor.u32 %v4531_v23, %v4528_v43  ;;  %v11849_v62 = vcombine.low %v4442_v63, %v4452_v35  ;;  %v4339_v63 = vld [vmem:[#allocation2 + $0x90] sm:$0xf]  ;;  %v14318_v35 = vld [vmem:[%s19268_s1 + $0x218] sm:$0xff]  }
 0x245   : > { %v11850_v31 = vcombine.low %v4466_v18, %v4476_v8  ;;  %v16169_v10 = vrot.slane %v4559_v38, 5  ;;  %v4565_v5 = vrot.slane %v4563_v20, 4  ;;  %v4490_v44 = vsel %vm14696_vm6, %v4485_v28, %v16124_v15 }
 0x246   : > { %v4514_v30 = vsel %vm14696_vm6, %v4509_v1, %v16129_v53  ;;  %v4579_v18 = vrot.slane %v4577_v55, 5  ;;  %v4589_v8 = vrot.slane %v4587_v59, 4  ;;  %v4533_v43 = vrot.slane %v4532_v40, 4 }
 0x247   : > { %v4566_v23 = vor.u32 %v4565_v5, %v16169_v10  ;;  %v4598_v21 = vshrl.u32 %v4339_v63, 16  ;;  %v4601_v28 = vshll.u32 %v4339_v63, 16  ;;  %v4611_v38 = vshrl.u32 %v15955_v45, 16 }
 0x248   : > { %13171 = vmatmul.mubr.bf16.vlgmr.msra.gmra.mrb[0].mxu0 %v11847_v27  ;;  %v4583_v27 = vshll.u32 %v15910_v22, 16  ;;  %v4500_v22 = vsel %vm14696_vm6, %v4495_v41, %v16154_v17  ;;  %v4524_v17 = vsel %vm14696_vm6, %v4519_v32, %v4523_v19  ;;  %v4607_v41 = vshll.u32 %v15955_v45, 16 }
 0x249   : > { %13203 = vmatpush3.bf16.msra.mxu0 %v15920_v39  ;;  %13174 = vmatprep.mubr.bf16.mxu0 %v11848_v42  ;;  %v4542_v39 = vor.u32 %v4541_v6, %v16157_v51  ;;  %v4545_v42 = vshll.u32 %v15877_v48, 16  ;;  %v4556_v48 = vor.u32 %v4555_v49, %v4552_v37  ;;  %v4569_v6 = vshll.u32 %v16180_v4, 16  ;;  %v14319_v49 = vld [vmem:[%s19268_s1 + $0x220] sm:$0xff]  }
 0x24a   : > { %13204 = vmatprep.subr.bf16.mxu0 %v14316_v12  ;;  %v16185_v15 = vrot.slane %v4583_v27, 5  ;;  %v4593_v37 = vshll.u32 %v15912_v36, 16  ;;  %v11851_v55 = vcombine.low %v4490_v44, %v4500_v22  ;;  %v11852_v27 = vcombine.low %v4514_v30, %v4524_v17 }
 0x24b   : > { %v4543_v16 = vrot.slane %v4542_v39, 4  ;;  %v4547_v53 = vrot.slane %v4545_v42, 5  ;;  %v4557_v20 = vrot.slane %v4556_v48, 4  ;;  %v4567_v59 = vrot.slane %v4566_v23, 4  ;;  %v4345_v42 = vld [vmem:[#allocation2 + $0xa8] sm:$0xf] }
 0x24c   : > { %v4590_v19 = vor.u32 %v4589_v8, %v16185_v15  ;;  %v4571_v32 = vrot.slane %v4569_v6, 5  ;;  %v4600_v40 = vrot.slane %v4598_v21, 4  ;;  %v4603_v39 = vrot.slane %v4601_v28, 5  ;;  %v14320_v48 = vld [vmem:[%s19268_s1 + $0x228] sm:$0xff]  }
 0x24d   : > { %13205 = vmatpush3.bf16.msra.mxu0 %v14316_v12  ;;  %v4576_v12 = vrot.slane %v4574_v25, 4  ;;  %v4342_v25 = vld [vmem:[#allocation2 + $0x9c] sm:$0xf]  ;;  %v4548_v45 = vsel %vm14696_vm6, %v4543_v16, %v4547_v53  ;;  %v16203_v36 = vrot.slane %v4607_v41, 5  ;;  %v4562_v44 = vsel %vm14696_vm6, %v4557_v20, %v16169_v10 }
 0x24e   : > { %13206 = vmatprep.subr.bf16.mxu0 %v14317_v33  ;;  %v4625_v5 = vshll.u32 %v4342_v25, 16  ;;  %v4595_v30 = vrot.slane %v4593_v37, 5  ;;  %v4631_v63 = vshll.u32 %v15959_v54, 16  ;;  %v4572_v8 = vsel %vm14696_vm6, %v4567_v59, %v4571_v32  ;;  %v14322_v59 = vld [vmem:[%s19268_s1 + $0x238] sm:$0xff]  }
 0x24f   : > { %v4580_v1 = vor.u32 %v4579_v18, %v4576_v12  ;;  %v4646_v12 = vshrl.u32 %v4345_v42, 16  ;;  %v4649_v18 = vshll.u32 %v4345_v42, 16  ;;  %v4617_v10 = vshll.u32 %v15957_v29, 16  ;;  %v14321_v29 = vld [vmem:[%s19268_s1 + $0x230] sm:$0xff]  }
 0x250   : > { %13175 = vmatmul.mubr.bf16.gmra.mrb[4].mxu0 %v11849_v62  ;;  %v4613_v62 = vrot.slane %v4611_v38, 4  ;;  %v4655_v17 = vshll.u32 %v16008_v50, 16  ;;  %v4604_v16 = vor.u32 %v4603_v39, %v4600_v40  ;;  %v4627_v6 = vrot.slane %v4625_v5, 5 }
 0x251   : > { %13178 = vmatprep.mubr.bf16.mxu0 %v11850_v31  ;;  %13207 = vmatpush3.bf16.msra.mxu0 %v14317_v33  ;;  %v4538_v33 = vsel %vm14696_vm6, %v4533_v43, %v16157_v51  ;;  %v4622_v31 = vshrl.u32 %v4342_v25, 16  ;;  %v4581_v22 = vrot.slane %v4580_v1, 4  ;;  %v4591_v51 = vrot.slane %v4590_v19, 4  ;;  %v4348_v25 = vld [vmem:[#allocation2 + $0xb4] sm:$0xf] }
 0x252   : > { %13208 = vmatprep.subr.bf16.mxu0 %v14318_v35  ;;  %v4659_v43 = vshrl.u32 %v16008_v50, 16  ;;  %v4614_v53 = vor.u32 %v4613_v62, %v16203_v36  ;;  %v16227_v50 = vrot.slane %v4631_v63, 5  ;;  %v4648_v38 = vrot.slane %v4646_v12, 4  ;;  %v4351_v62 = vld [vmem:[#allocation2 + $0xc0] sm:$0xf] }
 0x253   : > { %v4624_v23 = vrot.slane %v4622_v31, 4  ;;  %v4586_v21 = vsel %vm14696_vm6, %v4581_v22, %v16185_v15  ;;  %v4596_v28 = vsel %vm14696_vm6, %v4591_v51, %v4595_v30  ;;  %v4651_v20 = vrot.slane %v4649_v18, 5 }
 0x254   : > { %v11854_v1 = vcombine.low %v4562_v44, %v4572_v8  ;;  %v4619_v19 = vrot.slane %v4617_v10, 5  ;;  %v16229_v37 = vrot.slane %v4655_v17, 5  ;;  %v4605_v15 = vrot.slane %v4604_v16, 4 }
 0x255   : > { %13209 = vmatpush3.bf16.msra.mxu0 %v14318_v35  ;;  %v4635_v35 = vshrl.u32 %v15959_v54, 16  ;;  %v11853_v54 = vcombine.low %v4538_v33, %v4548_v45  ;;  %v4641_v33 = vshll.u32 %v15961_v56, 16  ;;  %v11855_v45 = vcombine.low %v4586_v21, %v4596_v28  ;;  %v4354_v28 = vld [vmem:[#allocation2 + $0xcc] sm:$0xf] }
 0x256   : > { %13210 = vmatprep.subr.bf16.mxu0 %v14319_v49  ;;  %v4652_v40 = vor.u32 %v4651_v20, %v4648_v38  ;;  %v4665_v39 = vshll.u32 %v16010_v57, 16  ;;  %v4670_v42 = vshrl.u32 %v4348_v25, 16  ;;  %v4673_v5 = vshll.u32 %v4348_v25, 16 }
 0x257   : > { %v4637_v41 = vrot.slane %v4635_v35, 4  ;;  %v4679_v56 = vshll.u32 %v16012_v46, 16  ;;  %v4683_v44 = vshrl.u32 %v16012_v46, 16  ;;  %v4610_v22 = vsel %vm14696_vm6, %v4605_v15, %v16203_v36 }
 0x258   : > { %13179 = vmatmul.mubr.bf16.gmra.mrb[8].mxu0 %v11851_v55  ;;  %v4615_v55 = vrot.slane %v4614_v53, 4  ;;  %v4643_v57 = vrot.slane %v4641_v33, 5  ;;  %v4697_v63 = vshll.u32 %v4351_v62, 16  ;;  %v4703_v35 = vshll.u32 %v16069_v47, 16 }
 0x259   : > { %13182 = vmatprep.mubr.bf16.mxu0 %v11852_v27  ;;  %13211 = vmatpush3.bf16.msra.mxu0 %v14319_v49  ;;  %v4661_v49 = vrot.slane %v4659_v43, 4  ;;  %v4628_v27 = vor.u32 %v4627_v6, %v4624_v23  ;;  %v4638_v32 = vor.u32 %v4637_v41, %v16227_v50  ;;  %v4707_v12 = vshrl.u32 %v16069_v47, 16 }
 0x25a   : > { %13212 = vmatprep.subr.bf16.mxu0 %v14320_v48  ;;  %v4620_v51 = vsel %vm14696_vm6, %v4615_v55, %v4619_v19  ;;  %v4653_v46 = vrot.slane %v4652_v40, 4  ;;  %v4667_v8 = vrot.slane %v4665_v39, 5  ;;  %v4672_v10 = vrot.slane %v4670_v42, 4 }
 0x25b   : > { %v4662_v31 = vor.u32 %v4661_v49, %v16229_v37  ;;  %v4629_v30 = vrot.slane %v4628_v27, 4  ;;  %v4639_v18 = vrot.slane %v4638_v32, 4  ;;  %v4675_v43 = vrot.slane %v4673_v5, 5 }
 0x25c   : > { %v4681_v36 = vrot.slane %v4679_v56, 5  ;;  %v4685_v16 = vrot.slane %v4683_v44, 4  ;;  %v11856_v53 = vcombine.low %v4610_v22, %v4620_v51  ;;  %v4699_v6 = vrot.slane %v4697_v63, 5  ;;  %v5063_v63 = vld [vmem:[#allocation2 + $0x18] sm:$0xe] }
 0x25d   : > { %13213 = vmatpush3.bf16.msra.mxu0 %v14320_v48  ;;  %v4694_v48 = vshrl.u32 %v4351_v62, 16  ;;  %v4663_v17 = vrot.slane %v4662_v31, 4  ;;  %v4709_v21 = vrot.slane %v4707_v12, 4  ;;  %v4634_v47 = vsel %vm14696_vm6, %v4629_v30, %v16227_v50 }
 0x25e   : > { %13214 = vmatprep.subr.bf16.mxu0 %v14321_v29  ;;  %v4689_v41 = vshll.u32 %v16019_v2, 16  ;;  %v4658_v38 = vsel %vm14696_vm6, %v4653_v46, %v16229_v37  ;;  %v4686_v19 = vor.u32 %v4685_v16, %v4681_v36  ;;  %v4718_v49 = vshrl.u32 %v4354_v28, 16 }
 0x25f   : > { %v4696_v23 = vrot.slane %v4694_v48, 4  ;;  %v4668_v20 = vsel %vm14696_vm6, %v4663_v17, %v4667_v8  ;;  %v4721_v25 = vshll.u32 %v4354_v28, 16  ;;  %v4727_v50 = vshll.u32 %v16073_v34, 16 }
 0x260   : > { %13183 = vmatmul.mubr.bf16.gmra.mrb[12].mxu0 %v11853_v54  ;;  %v4705_v54 = vrot.slane %v4703_v35, 5  ;;  %v4731_v15 = vshrl.u32 %v16073_v34, 16  ;;  %v4713_v2 = vshll.u32 %v16071_v60, 16  ;;  %v4687_v37 = vrot.slane %v4686_v19, 4 }
 0x261   : > { %13186 = vmatprep.mubr.bf16.mxu0 %v11854_v1  ;;  %13215 = vmatpush3.bf16.msra.mxu0 %v14321_v29  ;;  %v4644_v29 = vsel %vm14696_vm6, %v4639_v18, %v4643_v57  ;;  %v4676_v1 = vor.u32 %v4675_v43, %v4672_v10  ;;  %v4700_v55 = vor.u32 %v4699_v6, %v4696_v23  ;;  %v4691_v32 = vrot.slane %v4689_v41, 5  ;;  %v5064_v23 = vld [vmem:[#allocation2 + $0x24] sm:$0xe] }
 0x262   : > { %13216 = vmatprep.subr.bf16.mxu0 %v14322_v59  ;;  %v4710_v27 = vor.u32 %v4709_v21, %v4705_v54  ;;  %v11857_v33 = vcombine.low %v4634_v47, %v4644_v29  ;;  %v4720_v40 = vrot.slane %v4718_v49, 4  ;;  %v4723_v39 = vrot.slane %v4721_v25, 5  ;;  %v5066_v49 = vld [vmem:[#allocation2 + $0x3c] sm:$0xe]  ;;  %v19457_v25 = vld [vmem:[#allocation20_spill] sm:$0xff] }
 0x263   : > { %v4729_v42 = vrot.slane %v4727_v50, 5  ;;  %v4733_v62 = vrot.slane %v4731_v15, 4  ;;  %v4701_v31 = vrot.slane %v4700_v55, 4  ;;  %v4715_v56 = vrot.slane %v4713_v2, 5 }
 0x264   : > { %v4711_v5 = vrot.slane %v4710_v27, 4  ;;  %v4692_v60 = vsel %vm14696_vm6, %v4687_v37, %v4691_v32  ;;  %v4724_v44 = vor.u32 %v4723_v39, %v4720_v40  ;;  %v4737_v51 = vshll.u32 %v16080_v3, 16  ;;  %v19459_v32 = vld [vmem:[#allocation25_spill] sm:$0xff] }
 0x265   : > { %13217 = vmatpush3.bf16.msra.mxu0 %v14322_v59  ;;  %v4677_v59 = vrot.slane %v4676_v1, 4  ;;  %v4734_v22 = vor.u32 %v4733_v62, %v4729_v42  ;;  %v4706_v30 = vsel %vm14696_vm6, %v4701_v31, %v4705_v54  ;;  %v5129_v48 = vrot.slane %v15856_v58, 5  ;;  %v19460_v31 = vld [vmem:[#allocation26_spill] sm:$0xff] }
 0x266   : > { %v4716_v57 = vsel %vm14696_vm6, %v4711_v5, %v4715_v56  ;;  %v4725_v18 = vrot.slane %v4724_v44, 4  ;;  %v4739_v8 = vrot.slane %v4737_v51, 5  ;;  %v11870_v10 = vrot.slane %v5063_v63, 9  ;;  %v5069_v56 = vld [vmem:[#allocation2 + $0x60] sm:$0xe] }
 0x267   : > { %v4682_v34 = vsel %vm14696_vm6, %v4677_v59, %v4681_v36  ;;  %v11860_v12 = vcombine.low %v4706_v30, %v4716_v57  ;;  %v4735_v46 = vrot.slane %v4734_v22, 4  ;;  %v5131_v17 = vrot.slane %v5129_v48, 4  ;;  %v5071_v63 = vld [vmem:[#allocation2 + $0x78] sm:$0xe] }
 0x268   : > { %13187 = vmatmul.mubr.bf16.gmra.mrb[16].mxu0 %v11855_v45  ;;  %v11858_v45 = vcombine.low %v4658_v38, %v4668_v20  ;;  %v11859_v35 = vcombine.low %v4682_v34, %v4692_v60  ;;  %v5132_v43 = vrot.slane %v15888_v14, 5  ;;  %v4730_v3 = vsel %vm14696_vm6, %v4725_v18, %v4729_v42  ;;  %v5065_v14 = vld [vmem:[#allocation2 + $0x30] sm:$0xe] }
 0x269   : > { %13190 = vmatprep.mubr.bf16.mxu0 %v11856_v53  ;;  %v4740_v36 = vsel %vm14696_vm6, %v4735_v46, %v4739_v8  ;;  %v5136_v58 = vrot.slane %v15869_v9, 5  ;;  %v5130_v16 = vsel %vm15076_vm13, %v11870_v10, %v5129_v48  ;;  %v5143_v6 = vrot.slane %v15922_v7, 5  ;;  %v19461_v8 = vld [vmem:[#allocation9_spill] sm:$0xff]  ;;  %v19462_v10 = vld [vmem:[#allocation10_spill] sm:$0xff] }
 0x26a   : > { %v5133_v53 = vsel %vm15076_vm13, %v5131_v17, %v5132_v43  ;;  %v11861_v54 = vcombine.low %v4730_v3, %v4740_v36  ;;  %v11871_v28 = vrot.slane %v5064_v23, 9  ;;  %v5139_v29 = vrot.slane %v15894_v11, 5  ;;  %v19464_v36 = vld [vmem:[#allocation11_spill] sm:$0xff]  ;;  %v19470_v23 = vld [vmem:[#allocation16_spill] sm:$0xff] }
 0x26b   : > { %v11902_v21 = vcombine.low %v5130_v16, %v5133_v53  ;;  %v5138_v47 = vrot.slane %v5136_v58, 4  ;;  %v11872_v41 = vrot.slane %v5065_v14, 9  ;;  %v5145_v38 = vrot.slane %v5143_v6, 4  ;;  %v19467_v16 = vld [vmem:[#allocation13_spill] sm:$0xff]  ;;  %v19468_v53 = vld [vmem:[#allocation14_spill] sm:$0xff] }
 0x26c   : > { %v5146_v9 = vrot.slane %v15953_v13, 5  ;;  %v5137_v20 = vsel %vm15076_vm13, %v11871_v28, %v5136_v58  ;;  %v5150_v7 = vrot.slane %v15949_v26, 5  ;;  %v5157_v50 = vrot.slane %v19457_v25, 5  ;;  %v5067_v13 = vld [vmem:[#allocation2 + $0x48] sm:$0xe] }
 0x26d   : > { %v5140_v1 = vsel %vm15076_vm13, %v5138_v47, %v5139_v29  ;;  %v5144_v19 = vsel %vm15076_vm13, %v11872_v41, %v5143_v6  ;;  %v11873_v27 = vrot.slane %v5066_v49, 9  ;;  %v11874_v59 = vrot.slane %v5067_v13, 9  ;;  %v19471_v6 = vld [vmem:[#allocation17_spill] sm:$0xff]  ;;  %v19477_v29 = vld [vmem:[#allocation22_spill] sm:$0xff] }
 0x26e   : > { %v5147_v11 = vsel %vm15076_vm13, %v5145_v38, %v5146_v9  ;;  %v11903_v15 = vcombine.low %v5137_v20, %v5140_v1  ;;  %v5152_v2 = vrot.slane %v5150_v7, 4  ;;  %v5159_v37 = vrot.slane %v5157_v50, 4  ;;  %v19476_v47 = vld [vmem:[#allocation21_spill] sm:$0xff]  ;;  %v19479_v38 = vld [vmem:[#allocation23_spill] sm:$0xff]  ;;  %v19480_v9 = vld [vmem:[#allocation24_spill] sm:$0xff] }
 0x26f   : > { %v11904_v55 = vcombine.low %v5144_v19, %v5147_v11  ;;  %v5160_v26 = vrot.slane %v19459_v32, 5  ;;  %v5151_v40 = vsel %vm15076_vm13, %v11873_v27, %v5150_v7  ;;  %v5158_v42 = vsel %vm15076_vm13, %v11874_v59, %v5157_v50  ;;  %v19482_v1 = vld [vmem:[#allocation27_spill] sm:$0xff]  ;;  %v19483_v7 = vld [vmem:[#allocation28_spill] sm:$0xff]  ;;  %v19485_v11 = vld [vmem:[#allocation29_spill] sm:$0xff] }
 0x270   : > { %13191 = vmatmul.mubr.bf16.gmra.mrb[20].mxu0 %v11857_v33  ;;  %v19458_v33 = vld [vmem:[#allocation15_spill] sm:$0xff]  ;;  %v5171_v5 = vrot.slane %v19460_v31, 5  ;;  %v11876_v44 = vrot.slane %v5069_v56, 9  ;;  %v5174_v51 = vrot.slane %v16127_v0, 5  ;;  %v5185_v48 = vrot.slane %v16143_v61, 5  ;;  %v19465_v61 = vld [vmem:[#allocation12_spill] sm:$0xff] }
 0x271   : > { %13194 = vmatprep.mubr.bf16.mxu0 %v11858_v45  ;;  %v5153_v45 = vrot.slane %v19458_v33, 5  ;;  %v5161_v62 = vsel %vm15076_vm13, %v5159_v37, %v5160_v26  ;;  %v5188_v46 = vrot.slane %v16180_v4, 5  ;;  %v19463_v17 = vcombine.low %v19461_v8, %v19462_v10  ;;  %v19486_v49 = vld [vmem:[#allocation30_spill] sm:$0xff] }
 0x272   : > { %v11906_v60 = vcombine.low %v5158_v42, %v5161_v62  ;;  %v5173_v22 = vrot.slane %v5171_v5, 4  ;;  %v5172_v30 = vsel %vm15076_vm13, %v11876_v44, %v5171_v5  ;;  %v5187_v18 = vrot.slane %v5185_v48, 4 }
 0x273   : > { %v5154_v39 = vsel %vm15076_vm13, %v5152_v2, %v5153_v45  ;;  %v19466_v58 = vcombine.low %v19464_v36, %v19465_v61  ;;  %v19469_v4 = vcombine.low %v19467_v16, %v19468_v53  ;;  %v19472_v14 = vcombine.low %v19470_v23, %v19471_v6 }
 0x274   : > { %v11905_v34 = vcombine.low %v5151_v40, %v5154_v39  ;;  %v5175_v57 = vsel %vm15076_vm13, %v5173_v22, %v5174_v51  ;;  %v5189_v43 = vsel %vm15076_vm13, %v5187_v18, %v5188_v46  ;;  %v19478_v41 = vcombine.low %v19476_v47, %v19477_v29 }
 0x275   : > { %v19481_v20 = vcombine.low %v19479_v38, %v19480_v9  ;;  %v19484_v19 = vcombine.low %v19482_v1, %v19483_v7  ;;  %v19487_v25 = vcombine.low %v19485_v11, %v19486_v49 }
 0x278   : > { %13195 = vmatmul.mubr.bf16.gmra.mrb[24].mxu0 %v11859_v35  ;;  %v11908_v35 = vcombine.low %v5172_v30, %v5175_v57 }
 0x279   : > { %13198 = vmatprep.mubr.bf16.mxu0 %v11860_v12  ;;  %v11878_v12 = vrot.slane %v5071_v63, 9 }
 0x27b   : > { %v5186_v0 = vsel %vm15076_vm13, %v11878_v12, %v5185_v48 }
 0x27c   : > { %v11910_v3 = vcombine.low %v5186_v0, %v5189_v43 }
 0x280   : > { %13199 = vmatmul.mubr.bf16.gmra.mrb[28].mxu0 %v11861_v54  ;;  %v19473_v54 = vld [vmem:[#allocation18_spill] sm:$0xff] }
 0x281   : > { %13218 = vmatprep.mubr.bf16.mxu0 %v11902_v21  ;;  %v19474_v21 = vld [vmem:[#allocation19_spill] sm:$0xff] }
 0x282   : > { %v19475_v28 = vcombine.low %v19473_v54, %v19474_v21 }
 0x288   : > { %13219 = vmatmul.mubr.bf16.vlgmr.msra.gmra.mrb[0].mxu0 %v11903_v15 }
 0x289   : > { %13222 = vmatprep.mubr.bf16.mxu0 %v11904_v55 }
 0x290   : > { %13223 = vmatmul.mubr.bf16.gmra.mrb[4].mxu0 %v11905_v34 }
 0x291   : > { %13226 = vmatprep.mubr.bf16.mxu0 %v11906_v60 }
 0x298   : > { %13227 = vmatmul.mubr.bf16.gmra.mrb[8].mxu0 %v19463_v17 }
 0x299   : > { %13230 = vmatprep.mubr.bf16.mxu0 %v11908_v35 }
 0x2a0   : > { %13231 = vmatmul.mubr.bf16.gmra.mrb[12].mxu0 %v19466_v58 }
 0x2a1   : > { %13234 = vmatprep.mubr.bf16.mxu0 %v11910_v3 }
 0x2a8   : > { %13235 = vmatmul.mubr.bf16.gmra.mrb[16].mxu0 %v19469_v4 }
 0x2a9   : > { %13238 = vmatprep.mubr.bf16.mxu0 %v19472_v14 }
 0x2b0   : > { %13239 = vmatmul.mubr.bf16.gmra.mrb[20].mxu0 %v19475_v28 }
 0x2b1   : > { %13242 = vmatprep.mubr.bf16.mxu0 %v19478_v41 }
 0x2b8   : > { %13243 = vmatmul.mubr.bf16.gmra.mrb[24].mxu0 %v19481_v20 }
 0x2b9   : > { %13246 = vmatprep.mubr.bf16.mxu0 %v19484_v19 }
 0x2c0   : > { %13247 = vmatmul.mubr.bf16.gmra.mrb[28].mxu0 %v19487_v25 }
 0x35b   : > { %v16343_v50 = vpop.f32.mrb[0].mxu0 }
 0x35c   : > { %v16345_v13 = vpop.f32.mrb[1].mxu0  ;;  %v5601_v45 = vmul.f32 %v16343_v50, %v16343_v50 }
 0x35d   : > { %v16347_v15 = vpop.f32.mrb[2].mxu0  ;;  %v5599_v27 = vmul.f32 %v16345_v13, %v16345_v13 }
 0x35e   : > { %v16349_v55 = vpop.f32.mrb[3].mxu0  ;;  %v5602_v32 = vmul.f32 %v16347_v15, %v16347_v15 }
 0x35f   : > { %v5561_v2 = vadd.f32 %v16349_v55, %v16345_v13  ;;  %v5600_v33 = vmul.f32 %v16349_v55, %v16349_v55 }
 0x361   : > { %v5562_v59 = vadd.f32 %v16343_v50, %v5561_v2  ;;  %v5631_v37 = vadd.f32 %v5600_v33, %v5599_v27 }
 0x363   : > { %v5632_v26 = vadd.f32 %v5631_v37, %v5601_v45  ;;  %v16362_v40 = vpop.f32.mrb[4].mxu0  ;;  %v5563_v39 = vadd.f32 %v16347_v15, %v5562_v59 }
 0x364   : > { %v16365_v42 = vpop.f32.mrb[5].mxu0  ;;  %v5605_v51 = vmul.f32 %v16362_v40, %v16362_v40 }
 0x365   : > { %v5564_v62 = vadd.f32 %v5563_v39, %v16365_v42  ;;  %v5603_v31 = vmul.f32 %v16365_v42, %v16365_v42  ;;  %v5633_v5 = vadd.f32 %v5632_v26, %v5602_v32  ;;  %v16370_v56 = vpop.f32.mrb[6].mxu0 }
 0x366   : > { %v16372_v34 = vpop.f32.mrb[7].mxu0  ;;  %v5606_v48 = vmul.f32 %v16370_v56, %v16370_v56 }
 0x367   : > { %v5634_v60 = vadd.f32 %v5633_v5, %v5603_v31  ;;  %v5565_v44 = vadd.f32 %v5564_v62, %v16372_v34  ;;  %v5604_v22 = vmul.f32 %v16372_v34, %v16372_v34 }
 0x369   : > { %v5566_v30 = vadd.f32 %v16362_v40, %v5565_v44  ;;  %v5635_v57 = vadd.f32 %v5634_v60, %v5604_v22 }
 0x36b   : > { %v5636_v63 = vadd.f32 %v5635_v57, %v5605_v51  ;;  %v16382_v35 = vpop.f32.mrb[8].mxu0  ;;  %v5567_v12 = vadd.f32 %v16370_v56, %v5566_v30 }
 0x36c   : > { %v16385_v18 = vpop.f32.mrb[9].mxu0  ;;  %v5609_v61 = vmul.f32 %v16382_v35, %v16382_v35 }
 0x36d   : > { %v5568_v46 = vadd.f32 %v5567_v12, %v16385_v18  ;;  %v5607_v8 = vmul.f32 %v16385_v18, %v16385_v18  ;;  %v5637_v10 = vadd.f32 %v5636_v63, %v5606_v48  ;;  %v16390_v17 = vpop.f32.mrb[10].mxu0 }
 0x36e   : > { %v16392_v0 = vpop.f32.mrb[11].mxu0  ;;  %v5610_v53 = vmul.f32 %v16390_v17, %v16390_v17 }
 0x36f   : > { %v5638_v43 = vadd.f32 %v5637_v10, %v5607_v8  ;;  %v5569_v3 = vadd.f32 %v5568_v46, %v16392_v0  ;;  %v5608_v36 = vmul.f32 %v16392_v0, %v16392_v0 }
 0x371   : > { %v5570_v58 = vadd.f32 %v16382_v35, %v5569_v3  ;;  %v5639_v16 = vadd.f32 %v5638_v43, %v5608_v36 }
 0x373   : > { %v5640_v4 = vadd.f32 %v5639_v16, %v5609_v61  ;;  %v16402_v23 = vpop.f32.mrb[12].mxu0  ;;  %v5571_v6 = vadd.f32 %v16390_v17, %v5570_v58 }
 0x374   : > { %v16405_v14 = vpop.f32.mrb[13].mxu0  ;;  %v5613_v20 = vmul.f32 %v16402_v23, %v16402_v23 }
 0x375   : > { %v5572_v54 = vadd.f32 %v5571_v6, %v16405_v14  ;;  %v5611_v21 = vmul.f32 %v16405_v14, %v16405_v14  ;;  %v5641_v28 = vadd.f32 %v5640_v4, %v5610_v53  ;;  %v16410_v47 = vpop.f32.mrb[14].mxu0 }
 0x376   : > { %v16412_v29 = vpop.f32.mrb[15].mxu0  ;;  %v5614_v19 = vmul.f32 %v16410_v47, %v16410_v47 }
 0x377   : > { %v5642_v41 = vadd.f32 %v5641_v28, %v5611_v21  ;;  %v5573_v38 = vadd.f32 %v5572_v54, %v16412_v29  ;;  %v5612_v9 = vmul.f32 %v16412_v29, %v16412_v29  ;;  %v14323_v54 = vld [vmem:[%s19269_s2 + $0x40] sm:$0xff]  }
 0x378   : > { %13250 = vmatprep.subr.bf16.mxu1 %v14323_v54 }
 0x379   : > { %v5574_v1 = vadd.f32 %v16402_v23, %v5573_v38  ;;  %v5643_v7 = vadd.f32 %v5642_v41, %v5612_v9  ;;  %13251 = vmatpush3.bf16.msra.mxu1 %v14323_v54  ;;  %v6363_v54 = vld [vmem:[#allocation3] sm:$0xf] }
 0x37b   : > { %v5644_v11 = vadd.f32 %v5643_v7, %v5613_v20  ;;  %v16422_v49 = vpop.f32.mrb[16].mxu0  ;;  %v5575_v25 = vadd.f32 %v16410_v47, %v5574_v1 }
 0x37c   : > { %v16425_v27 = vpop.f32.mrb[17].mxu0  ;;  %v5617_v62 = vmul.f32 %v16422_v49, %v16422_v49 }
 0x37d   : > { %v5576_v2 = vadd.f32 %v5575_v25, %v16425_v27  ;;  %v5615_v33 = vmul.f32 %v16425_v27, %v16425_v27  ;;  %v5645_v45 = vadd.f32 %v5644_v11, %v5614_v19  ;;  %v16430_v59 = vpop.f32.mrb[18].mxu0  ;;  %v14324_v19 = vld [vmem:[%s19269_s2 + $0x48] sm:$0xff]  }
 0x37e   : > { %v16432_v37 = vpop.f32.mrb[19].mxu0  ;;  %v5618_v60 = vmul.f32 %v16430_v59, %v16430_v59  ;;  %13252 = vmatprep.subr.bf16.mxu1 %v14324_v19 }
 0x37f   : > { %v5646_v32 = vadd.f32 %v5645_v45, %v5615_v33  ;;  %v5577_v26 = vadd.f32 %v5576_v2, %v16432_v37  ;;  %v5616_v39 = vmul.f32 %v16432_v37, %v16432_v37  ;;  %13253 = vmatpush3.bf16.msra.mxu1 %v14324_v19 }
 0x381   : > { %v5578_v31 = vadd.f32 %v16422_v49, %v5577_v26  ;;  %v5647_v5 = vadd.f32 %v5646_v32, %v5616_v39 }
 0x383   : > { %v5648_v44 = vadd.f32 %v5647_v5, %v5617_v62  ;;  %v16442_v22 = vpop.f32.mrb[20].mxu0  ;;  %v5579_v51 = vadd.f32 %v16430_v59, %v5578_v31  ;;  %v14325_v62 = vld [vmem:[%s19269_s2 + $0x50] sm:$0xff]  }
 0x384   : > { %v16445_v30 = vpop.f32.mrb[21].mxu0  ;;  %v5621_v3 = vmul.f32 %v16442_v22, %v16442_v22  ;;  %13254 = vmatprep.subr.bf16.mxu1 %v14325_v62 }
 0x385   : > { %v5580_v57 = vadd.f32 %v5579_v51, %v16445_v30  ;;  %v5619_v48 = vmul.f32 %v16445_v30, %v16445_v30  ;;  %v5649_v63 = vadd.f32 %v5648_v44, %v5618_v60  ;;  %v16450_v12 = vpop.f32.mrb[22].mxu0  ;;  %13255 = vmatpush3.bf16.msra.mxu1 %v14325_v62  ;;  %v14329_v62 = vld [vmem:[%s19269_s2 + $0x70] sm:$0xff]  }
 0x386   : > { %v16452_v46 = vpop.f32.mrb[23].mxu0  ;;  %v5622_v58 = vmul.f32 %v16450_v12, %v16450_v12 }
 0x387   : > { %v5650_v8 = vadd.f32 %v5649_v63, %v5619_v48  ;;  %v5581_v10 = vadd.f32 %v5580_v57, %v16452_v46  ;;  %v5620_v43 = vmul.f32 %v16452_v46, %v16452_v46 }
 0x389   : > { %v5582_v36 = vadd.f32 %v16442_v22, %v5581_v10  ;;  %v5651_v61 = vadd.f32 %v5650_v8, %v5620_v43  ;;  %v14326_v8 = vld [vmem:[%s19269_s2 + $0x58] sm:$0xff]  }
 0x38a   : > { %13256 = vmatprep.subr.bf16.mxu1 %v14326_v8 }
 0x38b   : > { %v5652_v16 = vadd.f32 %v5651_v61, %v5621_v3  ;;  %v16462_v53 = vpop.f32.mrb[24].mxu0  ;;  %v5583_v4 = vadd.f32 %v16450_v12, %v5582_v36  ;;  %13257 = vmatpush3.bf16.msra.mxu1 %v14326_v8 }
 0x38c   : > { %v16465_v6 = vpop.f32.mrb[25].mxu0  ;;  %v5625_v11 = vmul.f32 %v16462_v53, %v16462_v53 }
 0x38d   : > { %v5584_v21 = vadd.f32 %v5583_v4, %v16465_v6  ;;  %v5623_v28 = vmul.f32 %v16465_v6, %v16465_v6  ;;  %v5653_v41 = vadd.f32 %v5652_v16, %v5622_v58  ;;  %v16473_v38 = vpop.f32.mrb[26].mxu0  ;;  %v14327_v16 = vld [vmem:[%s19269_s2 + $0x60] sm:$0xff]   ;;  %v14328_v4 = vld [vmem:[%s19269_s2 + $0x68] sm:$0xff]  }
 0x38e   : > { %v16475_v9 = vpop.f32.mrb[27].mxu0  ;;  %v5626_v33 = vmul.f32 %v16473_v38, %v16473_v38  ;;  %13258 = vmatprep.subr.bf16.mxu1 %v14327_v16 }
 0x38f   : > { %v5654_v20 = vadd.f32 %v5653_v41, %v5623_v28  ;;  %v5585_v1 = vadd.f32 %v5584_v21, %v16475_v9  ;;  %v5624_v7 = vmul.f32 %v16475_v9, %v16475_v9  ;;  %v6364_v21 = vld [vmem:[#allocation3 + $0x4] sm:$0xf]  ;;  %13259 = vmatpush3.bf16.msra.mxu1 %v14327_v16 }
 0x390   : > { %v6437_v19 = vshll.u32 %v6364_v21, 16  ;;  %13260 = vmatprep.subr.bf16.mxu1 %v14328_v4 }
 0x391   : > { %v5586_v25 = vadd.f32 %v16462_v53, %v5585_v1  ;;  %v5655_v2 = vadd.f32 %v5654_v20, %v5624_v7  ;;  %v6411_v20 = vld [vmem:[#allocation3 + $0x8] sm:$0x1]  ;;  %v6428_v1 = vshrl.u32 %v6363_v54, 16  ;;  %v6431_v7 = vshll.u32 %v6363_v54, 16 }
 0x393   : > { %v5656_v45 = vadd.f32 %v5655_v2, %v5625_v11  ;;  %v16488_v32 = vpop.f32.mrb[28].mxu0  ;;  %v5587_v26 = vadd.f32 %v16473_v38, %v5586_v25  ;;  %v6441_v11 = vshrl.u32 %v6364_v21, 16  ;;  %v6447_v25 = vshll.u32 %v6411_v20, 16  ;;  %13261 = vmatpush3.bf16.msra.mxu1 %v14328_v4  ;;  %v14331_v4 = vld [vmem:[%s19269_s2] sm:$0xff]  }
 0x394   : > { %v16491_v39 = vpop.f32.mrb[29].mxu0  ;;  %v5629_v10 = vmul.f32 %v16488_v32, %v16488_v32  ;;  %13262 = vmatprep.subr.bf16.mxu1 %v14329_v62 }
 0x395   : > { %v5588_v31 = vadd.f32 %v5587_v26, %v16491_v39  ;;  %v5627_v5 = vmul.f32 %v16491_v39, %v16491_v39  ;;  %v5657_v60 = vadd.f32 %v5656_v45, %v5626_v33  ;;  %v16499_v44 = vpop.f32.mrb[30].mxu0  ;;  %v6430_v45 = vrot.slane %v6428_v1, 4 }
 0x396   : > { %v16501_v51 = vpop.f32.mrb[31].mxu0  ;;  %v5630_v36 = vmul.f32 %v16499_v44, %v16499_v44  ;;  %v6433_v26 = vrot.slane %v6431_v7, 5  ;;  %v6449_v8 = vrot.slane %v6447_v25, 5 }
 0x397   : > { %v5658_v57 = vadd.f32 %v5657_v60, %v5627_v5  ;;  %v5589_v48 = vadd.f32 %v5588_v31, %v16501_v51  ;;  %v5628_v63 = vmul.f32 %v16501_v51, %v16501_v51  ;;  %v6439_v31 = vrot.slane %v6437_v19, 5  ;;  %13263 = vmatpush3.bf16.msra.mxu1 %v14329_v62 }
 0x398   : > { %v6443_v5 = vrot.slane %v6441_v11, 4 }
 0x399   : > { %v5590_v43 = vadd.f32 %v16488_v32, %v5589_v48  ;;  %v5659_v3 = vadd.f32 %v5658_v57, %v5628_v63  ;;  %v6434_v48 = vor.u32 %v6433_v26, %v6430_v45 }
 0x39a   : > { %v6444_v63 = vor.u32 %v6443_v5, %v6439_v31 }
 0x39b   : > { %v5591_v61 = vadd.f32 %v16499_v44, %v5590_v43  ;;  %v5660_v58 = vadd.f32 %v5659_v3, %v5629_v10  ;;  %v6435_v3 = vrot.slane %v6434_v48, 4 }
 0x39d   : > { %v5592_v28 = vrot.slane %v5591_v61, 4  ;;  %v5661_v41 = vadd.f32 %v5660_v58, %v5630_v36  ;;  %v14330_v36 = vld [vmem:[%s19269_s2 + $0x78] sm:$0xff]   ;;  %v6440_v54 = vsel %vm14696_vm6, %v6435_v3, %v6439_v31 }
 0x39e   : > { %13264 = vmatprep.subr.bf16.mxu1 %v14330_v36 }
 0x39f   : > { %v5593_v2 = vadd.f32 %v5592_v28, %v5591_v61  ;;  %v5662_v33 = vrot.slane %v5661_v41, 4  ;;  %v6445_v61 = vrot.slane %v6444_v63, 4  ;;  %13265 = vmatpush3.bf16.msra.mxu1 %v14330_v36 }
 0x3a0   : > { %13298 = vmatprep.subr.bf16.mxu1 %v14331_v4 }
 0x3a1   : > { %v5594_v60 = vrot.slane %v5593_v2, 2  ;;  %v5663_v57 = vadd.f32 %v5662_v33, %v5661_v41  ;;  %v6450_v21 = vsel %vm14696_vm6, %v6445_v61, %v6449_v8 }
 0x3a2   : > { %v11974_v20 = vcombine.low %v6440_v54, %v6450_v21 }
 0x3a3   : > { %v5595_v10 = vadd.f32 %v5594_v60, %v5593_v2  ;;  %v5664_v43 = vrot.slane %v5663_v57, 2 }
 0x3a4   : > { %13266 = vmatprep.mubr.bf16.mxu1 %v11974_v20 }
 0x3a5   : > { %v5596_v58 = vrot.slane %v5595_v10, 1  ;;  %v5665_v16 = vadd.f32 %v5664_v43, %v5663_v57 }
 0x3a7   : > { %v5597_v28 = vadd.f32 %v5596_v58, %v5595_v10  ;;  %v5666_v41 = vrot.slane %v5665_v16, 1 }
 0x3a9   : > { %v16534_v1 = vmul.f32 0.00390625, %v5597_v28  ;;  %v5667_v7 = vadd.f32 %v5666_v41, %v5665_v16 }
 0x3ab   : > { %v5668_v19 = vmul.f32 0.00390625, %v5667_v7  ;;  %v5669_v11 = vmul.f32 %v16534_v1, %v16534_v1  ;;  %v5700_v25 = vsub.f32 %v16491_v39, %v16534_v1  ;;  %v5701_v2 = vsub.f32 %v16501_v51, %v16534_v1 }
 0x3ac   : > { %v5672_v33 = vsub.f32 %v16345_v13, %v16534_v1  ;;  %v5673_v45 = vsub.f32 %v16349_v55, %v16534_v1  ;;  %v5674_v26 = vsub.f32 %v16343_v50, %v16534_v1  ;;  %v5675_v62 = vsub.f32 %v16347_v15, %v16534_v1 }
 0x3ad   : > { %v5670_v31 = vsub.f32 %v5668_v19, %v5669_v11  ;;  %v5676_v39 = vsub.f32 %v16365_v42, %v16534_v1  ;;  %v5677_v51 = vsub.f32 %v16372_v34, %v16534_v1  ;;  %v5678_v13 = vsub.f32 %v16362_v40, %v16534_v1 }
 0x3ae   : > { %v5679_v55 = vsub.f32 %v16370_v56, %v16534_v1  ;;  %v5680_v50 = vsub.f32 %v16385_v18, %v16534_v1  ;;  %v5681_v15 = vsub.f32 %v16392_v0, %v16534_v1  ;;  %v5682_v5 = vsub.f32 %v16382_v35, %v16534_v1 }
 0x3af   : > { %v5671_v60 = vmax.f32 %v5670_v31, 0.0  ;;  %v5683_v42 = vsub.f32 %v16390_v17, %v16534_v1  ;;  %v5684_v34 = vsub.f32 %v16405_v14, %v16534_v1  ;;  %v5685_v40 = vsub.f32 %v16412_v29, %v16534_v1 }
 0x3b0   : > { %v5686_v56 = vsub.f32 %v16402_v23, %v16534_v1  ;;  %v5687_v18 = vsub.f32 %v16410_v47, %v16534_v1  ;;  %v5688_v0 = vsub.f32 %v16425_v27, %v16534_v1  ;;  %v5689_v35 = vsub.f32 %v16432_v37, %v16534_v1 }
 0x3b1   : > { %v5704_v57 = vadd.f32 1e-05, %v5671_v60  ;;  %v5690_v17 = vsub.f32 %v16422_v49, %v16534_v1  ;;  %v5691_v14 = vsub.f32 %v16430_v59, %v16534_v1  ;;  %v5692_v29 = vsub.f32 %v16445_v30, %v16534_v1 }
 0x3b2   : > { %v5693_v23 = vsub.f32 %v16452_v46, %v16534_v1  ;;  %v5694_v47 = vsub.f32 %v16442_v22, %v16534_v1  ;;  %v5695_v27 = vsub.f32 %v16450_v12, %v16534_v1  ;;  %v5696_v37 = vsub.f32 %v16465_v6, %v16534_v1 }
 0x3b3   : > { %14443 = vrsqrt.f32 %v5704_v57  ;;  %v5697_v49 = vsub.f32 %v16475_v9, %v16534_v1  ;;  %v5698_v59 = vsub.f32 %v16462_v53, %v16534_v1  ;;  %v5699_v30 = vsub.f32 %v16473_v38, %v16534_v1 }
 0x3b4   : > { %v5702_v46 = vsub.f32 %v16488_v32, %v16534_v1  ;;  %v5703_v22 = vsub.f32 %v16499_v44, %v16534_v1 }
 0x3bd   : > { %v14444_v12 = vpop.eup %14443 }
 0x3be   : > { %v5734_v48 = vmul.f32 %v14444_v12, %v5700_v25  ;;  %v5735_v63 = vmul.f32 %v14444_v12, %v5701_v2  ;;  %v16602_v6 = vmul.f32 %v14444_v12, %v5672_v33  ;;  %v16604_v8 = vmul.f32 %v14444_v12, %v5673_v45 }
 0x3bf   : > { %v16606_v9 = vmul.f32 %v14444_v12, %v5674_v26  ;;  %v16608_v10 = vmul.f32 %v14444_v12, %v5675_v62  ;;  %v16610_v53 = vmul.f32 %v14444_v12, %v5676_v39  ;;  %v16612_v38 = vmul.f32 %v14444_v12, %v5677_v51 }
 0x3c0   : > { %vm5766_vm14 = vcmp.ge.f32.partialorder %v5734_v48, 0.0  ;;  %vm5767_vm15 = vcmp.ge.f32.partialorder %v5735_v63, 0.0  ;;  %v5798_v32 = vmul.f32 0.2, %v5734_v48  ;;  %v5799_v43 = vmul.f32 0.2, %v5735_v63 }
 0x3c1   : > { %v16614_v44 = vmul.f32 %v14444_v12, %v5678_v13  ;;  %v16616_v3 = vmul.f32 %v14444_v12, %v5679_v55  ;;  %v16618_v36 = vmul.f32 %v14444_v12, %v5680_v50  ;;  %v16620_v61 = vmul.f32 %v14444_v12, %v5681_v15  ;;  %v6353_v50 = vld [vmem:[#allocation3 + $0xbc] sm:$0x1] }
 0x3c2   : > { %v5830_v58 = vsel %vm5766_vm14, %v5734_v48, %v5798_v32  ;;  %v5831_v16 = vsel %vm5767_vm15, %v5735_v63, %v5799_v43  ;;  %v16622_v54 = vmul.f32 %v14444_v12, %v5682_v5  ;;  %v16624_v21 = vmul.f32 %v14444_v12, %v5683_v42 }
 0x3c3   : > { %v12382_v28 = vpack.c.bf16 %v5830_v58, %v5830_v58  ;;  %v12383_v41 = vpack.c.bf16 %v5831_v16, %v5831_v16  ;;  %v16626_v20 = vmul.f32 %v14444_v12, %v5684_v34  ;;  %v16628_v4 = vmul.f32 %v14444_v12, %v5685_v40 }
 0x3c4   : > { %v16630_v1 = vmul.f32 %v14444_v12, %v5686_v56  ;;  %v16632_v7 = vmul.f32 %v14444_v12, %v5687_v18  ;;  %v16634_v19 = vmul.f32 %v14444_v12, %v5688_v0  ;;  %v16636_v11 = vmul.f32 %v14444_v12, %v5689_v35  ;;  %v6339_v35 = vld [vmem:[#allocation3 + $0xa4] sm:$0x1] }
 0x3c5   : > { %v6169_v25 = vshrl.u32 %v12382_v28, 16  ;;  %v6177_v2 = vshrl.u32 %v12383_v41, 16  ;;  %v6180_v33 = vshll.u32 %v12383_v41, 16  ;;  %v16638_v45 = vmul.f32 %v14444_v12, %v5690_v17 }
 0x3c6   : > { %v16640_v26 = vmul.f32 %v14444_v12, %v5691_v14  ;;  %v16642_v62 = vmul.f32 %v14444_v12, %v5692_v29  ;;  %v16644_v31 = vmul.f32 %v14444_v12, %v5693_v23  ;;  %v16646_v13 = vmul.f32 %v14444_v12, %v5694_v47 }
 0x3c7   : > { %v6171_v39 = vrot.slane %v6169_v25, 7  ;;  %v6179_v51 = vrot.slane %v6177_v2, 7  ;;  %v16648_v55 = vmul.f32 %v14444_v12, %v5695_v27  ;;  %v16650_v15 = vmul.f32 %v14444_v12, %v5696_v37 }
 0x3c8   : > { %v16652_v5 = vmul.f32 %v14444_v12, %v5697_v49  ;;  %v16654_v60 = vmul.f32 %v14444_v12, %v5698_v59  ;;  %v16656_v42 = vmul.f32 %v14444_v12, %v5699_v30  ;;  %v16658_v18 = vmul.f32 %v14444_v12, %v5702_v46 }
 0x3c9   : > { %v6175_v34 = vrot.slane %v6171_v39, 4  ;;  %v6182_v40 = vor.u32 %v6180_v33, %v6179_v51  ;;  %v6184_v56 = vrot.slane %v6179_v51, 4  ;;  %v16660_v0 = vmul.f32 %v14444_v12, %v5703_v22 }
 0x3ca   : > { %v6172_v29 = vshll.u32 %v12382_v28, 16  ;;  %vm5738_vm0 = vcmp.ge.f32.partialorder %v16602_v6, 0.0  ;;  %vm5743_vm5 = vcmp.ge.f32.partialorder %v16612_v38, 0.0  ;;  %vm5744_vm7 = vcmp.ge.f32.partialorder %v16614_v44, 0.0 }
 0x3cb   : > { %v6183_v57 = vsel %vm14704_vm8, %v6175_v34, %v6182_v40  ;;  %v6354_v14 = vsel %vm14718_vm10, %v6184_v56, %v6353_v50  ;;  %vm5745_vm11 = vcmp.ge.f32.partialorder %v16616_v3, 0.0  ;;  %v5770_v23 = vmul.f32 0.2, %v16602_v6 }
 0x3cc   : > { %6352 = vst [vmem:[#allocation3 + $0xb8] sm:$0xf] %v6183_v57  ;;  %6355 = vst [vmem:[#allocation3 + $0xbc] sm:$0x1] %v6354_v14  ;;  %v5771_v47 = vmul.f32 0.2, %v16604_v8  ;;  %v16683_v27 = vor.u32 %v6172_v29, %v6171_v39 }
 0x3cd   : > { %vm5754_vm14 = vcmp.ge.f32.partialorder %v16634_v19, 0.0  ;;  %vm5755_vm15 = vcmp.ge.f32.partialorder %v16636_v11, 0.0  ;;  %v5772_v37 = vmul.f32 0.2, %v16606_v9  ;;  %v5773_v49 = vmul.f32 0.2, %v16608_v10 }
 0x3ce   : > { %19490 = vst [vmem:[#allocation20_spill] sm:$0xff] %v16683_v27  ;;  %v5774_v59 = vmul.f32 0.2, %v16610_v53  ;;  %v5775_v30 = vmul.f32 0.2, %v16612_v38  ;;  %v5802_v12 = vsel %vm5738_vm0, %v16602_v6, %v5770_v23  ;;  %vm5763_vm3 = vcmp.ge.f32.partialorder %v16652_v5, 0.0 }
 0x3cf   : > { %v5776_v46 = vmul.f32 0.2, %v16614_v44  ;;  %v5777_v22 = vmul.f32 0.2, %v16616_v3  ;;  %v5778_v48 = vmul.f32 0.2, %v16618_v36 }
 0x3d0   : > { %v5779_v63 = vmul.f32 0.2, %v16620_v61  ;;  %v5780_v32 = vmul.f32 0.2, %v16622_v54  ;;  %vm19491_vm12 = vcmp.ge.f32.partialorder %v16604_v8, 0.0  ;;  %vm5765_vm0 = vcmp.ge.f32.partialorder %v16656_v42, 0.0 }
 0x3d1   : > { %v5803_v43 = vsel %vm19491_vm12, %v16604_v8, %v5771_v47  ;;  %vm5768_vm1 = vcmp.ge.f32.partialorder %v16658_v18, 0.0  ;;  %v5781_v6 = vmul.f32 0.2, %v16624_v21  ;;  %v5782_v58 = vmul.f32 0.2, %v16626_v20 }
 0x3d2   : > { %v5783_v16 = vmul.f32 0.2, %v16628_v4  ;;  %vm19492_vm2 = vcmp.ge.f32.partialorder %v16606_v9, 0.0  ;;  %v5784_v41 = vmul.f32 0.2, %v16630_v1  ;;  %vm19493_vm12 = vcmp.ge.f32.partialorder %v16608_v10, 0.0 }
 0x3d3   : > { %v5804_v28 = vsel %vm19492_vm2, %v16606_v9, %v5772_v37  ;;  %v5785_v8 = vmul.f32 0.2, %v16632_v7  ;;  %v5786_v25 = vmul.f32 0.2, %v16634_v19  ;;  %v5805_v2 = vsel %vm19493_vm12, %v16608_v10, %v5773_v49  ;;  %v6321_v27 = vld [vmem:[#allocation3 + $0x84] sm:$0xf] }
 0x3d4   : > { %v5787_v33 = vmul.f32 0.2, %v16636_v11  ;;  %v5788_v39 = vmul.f32 0.2, %v16638_v45  ;;  %v5789_v51 = vmul.f32 0.2, %v16640_v26  ;;  %v5807_v10 = vsel %vm5743_vm5, %v16612_v38, %v5775_v30 }
 0x3d5   : > { %vm19494_vm4 = vcmp.ge.f32.partialorder %v16610_v53, 0.0  ;;  %v5790_v50 = vmul.f32 0.2, %v16642_v62  ;;  %v5791_v34 = vmul.f32 0.2, %v16644_v31  ;;  %v5809_v38 = vsel %vm5745_vm11, %v16616_v3, %v5777_v22 }
 0x3d6   : > { %v5806_v9 = vsel %vm19494_vm4, %v16610_v53, %v5774_v59  ;;  %v5792_v40 = vmul.f32 0.2, %v16646_v13  ;;  %v5793_v56 = vmul.f32 0.2, %v16648_v55  ;;  %v5794_v57 = vmul.f32 0.2, %v16650_v15 }
 0x3d7   : > { %v5795_v14 = vmul.f32 0.2, %v16652_v5  ;;  %v5808_v53 = vsel %vm5744_vm7, %v16614_v44, %v5776_v46  ;;  %v5796_v29 = vmul.f32 0.2, %v16654_v60  ;;  %v5797_v23 = vmul.f32 0.2, %v16656_v42 }
 0x3d8   : > { %v5800_v47 = vmul.f32 0.2, %v16658_v18  ;;  %v5801_v37 = vmul.f32 0.2, %v16660_v0  ;;  %vm19495_vm2 = vcmp.ge.f32.partialorder %v16618_v36, 0.0  ;;  %vm19496_vm4 = vcmp.ge.f32.partialorder %v16620_v61, 0.0 }
 0x3d9   : > { %v5810_v49 = vsel %vm19495_vm2, %v16618_v36, %v5778_v48  ;;  %v5811_v44 = vsel %vm19496_vm4, %v16620_v61, %v5779_v63  ;;  %vm19497_vm5 = vcmp.ge.f32.partialorder %v16622_v54, 0.0  ;;  %vm19498_vm7 = vcmp.ge.f32.partialorder %v16624_v21, 0.0 }
 0x3da   : > { %v5812_v59 = vsel %vm19497_vm5, %v16622_v54, %v5780_v32  ;;  %v5813_v30 = vsel %vm19498_vm7, %v16624_v21, %v5781_v6  ;;  %vm19499_vm11 = vcmp.ge.f32.partialorder %v16626_v20, 0.0  ;;  %vm19500_vm12 = vcmp.ge.f32.partialorder %v16628_v4, 0.0 }
 0x3db   : > { %v5814_v3 = vsel %vm19499_vm11, %v16626_v20, %v5782_v58  ;;  %v5815_v36 = vsel %vm19500_vm12, %v16628_v4, %v5783_v16  ;;  %vm19501_vm2 = vcmp.ge.f32.partialorder %v16630_v1, 0.0  ;;  %vm19502_vm4 = vcmp.ge.f32.partialorder %v16632_v7, 0.0 }
 0x3dc   : > { %v5816_v61 = vsel %vm19501_vm2, %v16630_v1, %v5784_v41  ;;  %v5817_v54 = vsel %vm19502_vm4, %v16632_v7, %v5785_v8  ;;  %v5818_v21 = vsel %vm5754_vm14, %v16634_v19, %v5786_v25  ;;  %v5819_v20 = vsel %vm5755_vm15, %v16636_v11, %v5787_v33 }
 0x3dd   : > { %vm19503_vm5 = vcmp.ge.f32.partialorder %v16638_v45, 0.0  ;;  %vm19504_vm7 = vcmp.ge.f32.partialorder %v16640_v26, 0.0  ;;  %vm19505_vm11 = vcmp.ge.f32.partialorder %v16642_v62, 0.0  ;;  %vm19506_vm12 = vcmp.ge.f32.partialorder %v16644_v31, 0.0 }
 0x3de   : > { %v5820_v4 = vsel %vm19503_vm5, %v16638_v45, %v5788_v39  ;;  %v5821_v1 = vsel %vm19504_vm7, %v16640_v26, %v5789_v51  ;;  %v5822_v7 = vsel %vm19505_vm11, %v16642_v62, %v5790_v50  ;;  %v5823_v19 = vsel %vm19506_vm12, %v16644_v31, %v5791_v34 }
 0x3df   : > { %vm19507_vm14 = vcmp.ge.f32.partialorder %v16646_v13, 0.0  ;;  %vm19508_vm15 = vcmp.ge.f32.partialorder %v16648_v55, 0.0  ;;  %vm19509_vm2 = vcmp.ge.f32.partialorder %v16650_v15, 0.0  ;;  %v5827_v62 = vsel %vm5763_vm3, %v16652_v5, %v5795_v14 }
 0x3e0   : > { %v5824_v11 = vsel %vm19507_vm14, %v16646_v13, %v5792_v40  ;;  %v5825_v45 = vsel %vm19508_vm15, %v16648_v55, %v5793_v56  ;;  %v5826_v26 = vsel %vm19509_vm2, %v16650_v15, %v5794_v57  ;;  %vm19510_vm4 = vcmp.ge.f32.partialorder %v16654_v60, 0.0 }
 0x3e1   : > { %v5828_v31 = vsel %vm19510_vm4, %v16654_v60, %v5796_v29  ;;  %v5829_v13 = vsel %vm5765_vm0, %v16656_v42, %v5797_v23  ;;  %v5832_v55 = vsel %vm5768_vm1, %v16658_v18, %v5800_v47  ;;  %vm19511_vm5 = vcmp.ge.f32.partialorder %v16660_v0, 0.0 }
 0x3e2   : > { %v5833_v15 = vsel %vm19511_vm5, %v16660_v0, %v5801_v37  ;;  %v12354_v46 = vpack.c.bf16 %v5802_v12, %v5802_v12  ;;  %v12355_v22 = vpack.c.bf16 %v5803_v43, %v5803_v43  ;;  %v12356_v48 = vpack.c.bf16 %v5804_v28, %v5804_v28 }
 0x3e3   : > { %v12357_v5 = vpack.c.bf16 %v5805_v2, %v5805_v2  ;;  %v12358_v63 = vpack.c.bf16 %v5806_v9, %v5806_v9  ;;  %v12359_v32 = vpack.c.bf16 %v5807_v10, %v5807_v10  ;;  %v16818_v6 = vpack.c.bf16 %v5808_v53, %v5808_v53 }
 0x3e4   : > { %v16820_v60 = vpack.c.bf16 %v5809_v38, %v5809_v38  ;;  %v16822_v58 = vpack.c.bf16 %v5810_v49, %v5810_v49  ;;  %v16824_v42 = vpack.c.bf16 %v5811_v44, %v5811_v44  ;;  %v16826_v16 = vpack.c.bf16 %v5812_v59, %v5812_v59 }
 0x3e5   : > { %v16828_v18 = vpack.c.bf16 %v5813_v30, %v5813_v30  ;;  %v16830_v41 = vpack.c.bf16 %v5814_v3, %v5814_v3  ;;  %v16832_v0 = vpack.c.bf16 %v5815_v36, %v5815_v36  ;;  %v16834_v12 = vpack.c.bf16 %v5816_v61, %v5816_v61 }
 0x3e6   : > { %v16836_v43 = vpack.c.bf16 %v5817_v54, %v5817_v54  ;;  %v16838_v28 = vpack.c.bf16 %v5818_v21, %v5818_v21  ;;  %v16840_v8 = vpack.c.bf16 %v5819_v20, %v5819_v20  ;;  %v16842_v25 = vpack.c.bf16 %v5820_v4, %v5820_v4 }
 0x3e7   : > { %v16844_v2 = vpack.c.bf16 %v5821_v1, %v5821_v1  ;;  %v16846_v33 = vpack.c.bf16 %v5822_v7, %v5822_v7  ;;  %v16848_v39 = vpack.c.bf16 %v5823_v19, %v5823_v19  ;;  %v16850_v51 = vpack.c.bf16 %v5824_v11, %v5824_v11  ;;  %v6300_v1 = vld [vmem:[#allocation3 + $0x60] sm:$0xf] }
 0x3e8   : > { %v16852_v9 = vpack.c.bf16 %v5825_v45, %v5825_v45  ;;  %v16854_v50 = vpack.c.bf16 %v5826_v26, %v5826_v26  ;;  %v16856_v34 = vpack.c.bf16 %v5827_v62, %v5827_v62  ;;  %v16858_v40 = vpack.c.bf16 %v5828_v31, %v5828_v31 }
 0x3e9   : > { %v16860_v10 = vpack.c.bf16 %v5829_v13, %v5829_v13  ;;  %v16862_v56 = vpack.c.bf16 %v5832_v55, %v5832_v55  ;;  %v16864_v57 = vpack.c.bf16 %v5833_v15, %v5833_v15  ;;  %v5931_v14 = vshrl.u32 %v12354_v46, 16 }
 0x3ea   : > { %v5934_v53 = vshll.u32 %v12354_v46, 16  ;;  %v5939_v29 = vshrl.u32 %v12355_v22, 16  ;;  %v5942_v23 = vshll.u32 %v12355_v22, 16  ;;  %v5948_v47 = vshrl.u32 %v12356_v48, 16 }
 0x3eb   : > { %v5951_v38 = vshll.u32 %v12356_v48, 16  ;;  %v5956_v37 = vshrl.u32 %v12357_v5, 16  ;;  %v5933_v49 = vrot.slane %v5931_v14, 7  ;;  %v5959_v59 = vshll.u32 %v12357_v5, 16 }
 0x3ec   : > { %v16866_v44 = vrot.slane %v5939_v29, 7  ;;  %v5965_v30 = vshrl.u32 %v12358_v63, 16  ;;  %v5950_v3 = vrot.slane %v5948_v47, 7  ;;  %v5968_v61 = vshll.u32 %v12358_v63, 16 }
 0x3ed   : > { %v16868_v36 = vrot.slane %v5956_v37, 7  ;;  %v5973_v54 = vshrl.u32 %v12359_v32, 16  ;;  %v16870_v21 = vor.u32 %v5934_v53, %v5933_v49  ;;  %v5937_v20 = vrot.slane %v5933_v49, 4 }
 0x3ee   : > { %v5944_v4 = vor.u32 %v5942_v23, %v16866_v44  ;;  %v16874_v7 = vor.u32 %v5951_v38, %v5950_v3  ;;  %v5954_v19 = vrot.slane %v5950_v3, 4  ;;  %v5967_v62 = vrot.slane %v5965_v30, 7 }
 0x3ef   : > { %v5961_v11 = vor.u32 %v5959_v59, %v16868_v36  ;;  %v16880_v31 = vrot.slane %v5973_v54, 7  ;;  %v5976_v13 = vshll.u32 %v12359_v32, 16  ;;  %v5982_v15 = vshrl.u32 %v16818_v6, 16 }
 0x3f0   : > { %v5945_v26 = vsel %vm14704_vm8, %v5937_v20, %v5944_v4  ;;  %v5985_v46 = vshll.u32 %v16818_v6, 16  ;;  %v5990_v22 = vshrl.u32 %v16820_v60, 16  ;;  %v16887_v48 = vor.u32 %v5968_v61, %v5967_v62 }
 0x3f1   : > { %v5962_v55 = vsel %vm14704_vm8, %v5954_v19, %v5961_v11  ;;  %6254 = vst [vmem:[#allocation3 + $0x10] sm:$0xf] %v5945_v26  ;;  %v5971_v5 = vrot.slane %v5967_v62, 4  ;;  %v5978_v63 = vor.u32 %v5976_v13, %v16880_v31  ;;  %v5984_v53 = vrot.slane %v5982_v15, 7  ;;  %v6297_v13 = vld [vmem:[#allocation3 + $0x5c] sm:$0x1] }
 0x3f2   : > { %6261 = vst [vmem:[#allocation3 + $0x1c] sm:$0xf] %v5962_v55  ;;  %v16891_v32 = vrot.slane %v5990_v22, 7  ;;  %v5993_v29 = vshll.u32 %v16820_v60, 16  ;;  %v5999_v23 = vshrl.u32 %v16822_v58, 16  ;;  %v6002_v47 = vshll.u32 %v16822_v58, 16 }
 0x3f3   : > { %v5979_v6 = vsel %vm14704_vm8, %v5971_v5, %v5978_v63  ;;  %v6007_v38 = vshrl.u32 %v16824_v42, 16  ;;  %v6010_v37 = vshll.u32 %v16824_v42, 16  ;;  %v16900_v49 = vor.u32 %v5985_v46, %v5984_v53 }
 0x3f4   : > { %v5988_v59 = vrot.slane %v5984_v53, 4  ;;  %v5995_v30 = vor.u32 %v5993_v29, %v16891_v32  ;;  %6268 = vst [vmem:[#allocation3 + $0x28] sm:$0xf] %v5979_v6  ;;  %v6001_v60 = vrot.slane %v5999_v23, 7  ;;  %v6016_v54 = vshrl.u32 %v16826_v16, 16 }
 0x3f5   : > { %v16904_v61 = vrot.slane %v6007_v38, 7  ;;  %v6019_v20 = vshll.u32 %v16826_v16, 16  ;;  %v6024_v42 = vshrl.u32 %v16828_v18, 16  ;;  %v6027_v4 = vshll.u32 %v16828_v18, 16  ;;  %v6293_v6 = vld [vmem:[#allocation3 + $0x54] sm:$0xf] }
 0x3f6   : > { %v5996_v58 = vsel %vm14704_vm8, %v5988_v59, %v5995_v30  ;;  %v6033_v19 = vshrl.u32 %v16830_v41, 16  ;;  %v16913_v11 = vor.u32 %v6002_v47, %v6001_v60  ;;  %v6005_v26 = vrot.slane %v6001_v60, 4 }
 0x3f7   : > { %v6012_v62 = vor.u32 %v6010_v37, %v16904_v61  ;;  %6275 = vst [vmem:[#allocation3 + $0x34] sm:$0xf] %v5996_v58  ;;  %v6018_v55 = vrot.slane %v6016_v54, 7  ;;  %v16917_v15 = vrot.slane %v6024_v42, 7  ;;  %v6036_v46 = vshll.u32 %v16830_v41, 16 }
 0x3f8   : > { %v6035_v16 = vrot.slane %v6033_v19, 7  ;;  %v6041_v18 = vshrl.u32 %v16832_v0, 16  ;;  %v6044_v5 = vshll.u32 %v16832_v0, 16  ;;  %v6050_v63 = vshrl.u32 %v16834_v12, 16 }
 0x3f9   : > { %v6013_v22 = vsel %vm14704_vm8, %v6005_v26, %v6012_v62  ;;  %v16925_v53 = vor.u32 %v6019_v20, %v6018_v55  ;;  %v6022_v29 = vrot.slane %v6018_v55, 4  ;;  %v6029_v23 = vor.u32 %v6027_v4, %v16917_v15  ;;  %v6286_v20 = vld [vmem:[#allocation3 + $0x48] sm:$0xf] }
 0x3fa   : > { %6282 = vst [vmem:[#allocation3 + $0x40] sm:$0xf] %v6013_v22  ;;  %v16929_v47 = vor.u32 %v6036_v46, %v6035_v16  ;;  %v6039_v41 = vrot.slane %v6035_v16, 4  ;;  %v16931_v38 = vrot.slane %v6041_v18, 7  ;;  %v6052_v37 = vrot.slane %v6050_v63, 7 }
 0x3fb   : > { %v6030_v59 = vsel %vm14704_vm8, %v6022_v29, %v6029_v23  ;;  %v6053_v0 = vshll.u32 %v16834_v12, 16  ;;  %v6058_v30 = vshrl.u32 %v16836_v43, 16  ;;  %v6061_v60 = vshll.u32 %v16836_v43, 16  ;;  %v6279_v22 = vld [vmem:[#allocation3 + $0x3c] sm:$0xf] }
 0x3fc   : > { %v6046_v54 = vor.u32 %v6044_v5, %v16931_v38  ;;  %v6056_v58 = vrot.slane %v6052_v37, 4  ;;  %v6067_v42 = vshrl.u32 %v16838_v28, 16  ;;  %6289 = vst [vmem:[#allocation3 + $0x4c] sm:$0xf] %v6030_v59  ;;  %v6070_v26 = vshll.u32 %v16838_v28, 16 }
 0x3fd   : > { %v16941_v4 = vor.u32 %v6053_v0, %v6052_v37  ;;  %v16943_v19 = vrot.slane %v6058_v30, 7  ;;  %v6075_v12 = vshrl.u32 %v16840_v8, 16  ;;  %v6078_v55 = vshll.u32 %v16840_v8, 16 }
 0x3fe   : > { %v6047_v62 = vsel %vm14704_vm8, %v6039_v41, %v6046_v54  ;;  %v6069_v43 = vrot.slane %v6067_v42, 7  ;;  %v6084_v16 = vshrl.u32 %v16842_v25, 16  ;;  %v6087_v5 = vshll.u32 %v16842_v25, 16 }
 0x3ff   : > { %v6063_v46 = vor.u32 %v6061_v60, %v16943_v19  ;;  %v16953_v18 = vrot.slane %v6075_v12, 7  ;;  %6296 = vst [vmem:[#allocation3 + $0x58] sm:$0xf] %v6047_v62  ;;  %v6092_v23 = vshrl.u32 %v16844_v2, 16  ;;  %v6095_v59 = vshll.u32 %v16844_v2, 16 }
 0x400   : > { %v16956_v28 = vor.u32 %v6070_v26, %v6069_v43  ;;  %v6073_v63 = vrot.slane %v6069_v43, 4  ;;  %v6086_v29 = vrot.slane %v6084_v16, 7  ;;  %v6101_v60 = vshrl.u32 %v16846_v33, 16  ;;  %v6269_v2 = vld [vmem:[#allocation3 + $0x2c] sm:$0x1] }
 0x401   : > { %v6064_v8 = vsel %vm14704_vm8, %v6056_v58, %v6063_v46  ;;  %v6080_v41 = vor.u32 %v6078_v55, %v16953_v18  ;;  %v16966_v25 = vrot.slane %v6092_v23, 7  ;;  %v6104_v42 = vshll.u32 %v16846_v33, 16 }
 0x402   : > { %v16964_v0 = vor.u32 %v6087_v5, %v6086_v29  ;;  %v6090_v30 = vrot.slane %v6086_v29, 4  ;;  %6303 = vst [vmem:[#allocation3 + $0x64] sm:$0xf] %v6064_v8  ;;  %v6109_v58 = vshrl.u32 %v16848_v39, 16  ;;  %v6112_v26 = vshll.u32 %v16848_v39, 16 }
 0x403   : > { %v6081_v54 = vsel %vm14704_vm8, %v6073_v63, %v6080_v41  ;;  %v6097_v12 = vor.u32 %v6095_v59, %v16966_v25  ;;  %v6103_v62 = vrot.slane %v6101_v60, 7  ;;  %v6118_v43 = vshrl.u32 %v16850_v51, 16  ;;  %v6265_v8 = vld [vmem:[#allocation3 + $0x24] sm:$0xf] }
 0x404   : > { %6310 = vst [vmem:[#allocation3 + $0x70] sm:$0xf] %v6081_v54  ;;  %v16977_v55 = vrot.slane %v6109_v58, 7  ;;  %v6121_v16 = vshll.u32 %v16850_v51, 16  ;;  %v6126_v46 = vshrl.u32 %v16852_v9, 16  ;;  %v6129_v33 = vshll.u32 %v16852_v9, 16 }
 0x405   : > { %v6098_v5 = vsel %vm14704_vm8, %v6090_v30, %v6097_v12  ;;  %v16984_v39 = vor.u32 %v6104_v42, %v6103_v62  ;;  %v6107_v63 = vrot.slane %v6103_v62, 4  ;;  %v6120_v29 = vrot.slane %v6118_v43, 7 }
 0x406   : > { %v6114_v23 = vor.u32 %v6112_v26, %v16977_v55  ;;  %v16988_v41 = vrot.slane %v6126_v46, 7  ;;  %v6135_v59 = vshrl.u32 %v16854_v50, 16  ;;  %6317 = vst [vmem:[#allocation3 + $0x7c] sm:$0xf] %v6098_v5  ;;  %v6138_v9 = vshll.u32 %v16854_v50, 16 }
 0x407   : > { %v16991_v51 = vor.u32 %v6121_v16, %v6120_v29  ;;  %v6124_v60 = vrot.slane %v6120_v29, 4  ;;  %v6143_v30 = vshrl.u32 %v16856_v34, 16  ;;  %v6146_v62 = vshll.u32 %v16856_v34, 16  ;;  %v6258_v50 = vld [vmem:[#allocation3 + $0x18] sm:$0xf] }
 0x408   : > { %v6115_v54 = vsel %vm14704_vm8, %v6107_v63, %v6114_v23  ;;  %v6131_v42 = vor.u32 %v6129_v33, %v16988_v41  ;;  %v6137_v26 = vrot.slane %v6135_v59, 7  ;;  %v6152_v43 = vshrl.u32 %v16858_v40, 16  ;;  %v6251_v46 = vld [vmem:[#allocation3 + $0xc] sm:$0xf]  ;;  %v6262_v5 = vld [vmem:[#allocation3 + $0x20] sm:$0x1] }
 0x409   : > { %v16999_v12 = vrot.slane %v6143_v30, 7  ;;  %v6155_v16 = vshll.u32 %v16858_v40, 16  ;;  %6324 = vst [vmem:[#allocation3 + $0x88] sm:$0xf] %v6115_v54  ;;  %v6255_v29 = vld [vmem:[#allocation3 + $0x14] sm:$0x1] }
 0x40a   : > { %v6132_v63 = vsel %vm14704_vm8, %v6124_v60, %v6131_v42  ;;  %v17006_v33 = vor.u32 %v6138_v9, %v6137_v26  ;;  %v6141_v23 = vrot.slane %v6137_v26, 4  ;;  %v6160_v59 = vshrl.u32 %v16860_v10, 16  ;;  %v6272_v54 = vld [vmem:[#allocation3 + $0x30] sm:$0xf]  ;;  %v6276_v26 = vld [vmem:[#allocation3 + $0x38] sm:$0x1] }
 0x40b   : > { %v6148_v30 = vor.u32 %v6146_v62, %v16999_v12  ;;  %v6154_v58 = vrot.slane %v6152_v43, 7  ;;  %v6163_v40 = vshll.u32 %v16860_v10, 16  ;;  %6331 = vst [vmem:[#allocation3 + $0x94] sm:$0xf] %v6132_v63  ;;  %v6186_v60 = vshrl.u32 %v16862_v56, 16 }
 0x40c   : > { %v17012_v37 = vrot.slane %v6160_v59, 7  ;;  %v6189_v9 = vshll.u32 %v16862_v56, 16  ;;  %v6194_v42 = vshrl.u32 %v16864_v57, 16  ;;  %v6283_v62 = vld [vmem:[#allocation3 + $0x44] sm:$0x1]  ;;  %v6197_v63 = vshll.u32 %v16864_v57, 16 }
 0x40d   : > { %v6149_v43 = vsel %vm14704_vm8, %v6141_v23, %v6148_v30  ;;  %v17019_v34 = vor.u32 %v6155_v16, %v6154_v58  ;;  %v6158_v10 = vrot.slane %v6154_v58, 4  ;;  %v6290_v59 = vld [vmem:[#allocation3 + $0x50] sm:$0x1]  ;;  %v6188_v14 = vrot.slane %v6186_v60, 7  ;;  %v6307_v23 = vld [vmem:[#allocation3 + $0x6c] sm:$0xf] }
 0x40e   : > { %v6165_v3 = vor.u32 %v6163_v40, %v17012_v37  ;;  %v17024_v45 = vrot.slane %v6194_v42, 7  ;;  %6338 = vst [vmem:[#allocation3 + $0xa0] sm:$0xf] %v6149_v43  ;;  %v6311_v16 = vld [vmem:[#allocation3 + $0x74] sm:$0x1]  ;;  %v6252_v57 = vsel %vm14709_vm9, %v16870_v21, %v6251_v46  ;;  %v19513_v30 = vrot.slane %v16866_v44, 4 }
 0x40f   : > { %v6259_v40 = vsel %vm14709_vm9, %v16874_v7, %v6258_v50  ;;  %v19514_v60 = vrot.slane %v16868_v36, 4  ;;  %v6314_v43 = vld [vmem:[#allocation3 + $0x78] sm:$0xf]  ;;  %v6318_v56 = vld [vmem:[#allocation3 + $0x80] sm:$0x1]  ;;  %v17042_v46 = vor.u32 %v6189_v9, %v6188_v14  ;;  %v6192_v44 = vrot.slane %v6188_v14, 4 }
 0x410   : > { %v6256_v24 = vsel %vm14718_vm10, %v19513_v30, %v6255_v29  ;;  %v6166_v21 = vsel %vm14704_vm8, %v6158_v10, %v6165_v3  ;;  %v6199_v29 = vor.u32 %v6197_v63, %v17024_v45  ;;  %6253 = vst [vmem:[#allocation3 + $0xc] sm:$0xf] %v6252_v57  ;;  %6260 = vst [vmem:[#allocation3 + $0x18] sm:$0xf] %v6259_v40  ;;  %v6328_v7 = vld [vmem:[#allocation3 + $0x90] sm:$0xf] }
 0x411   : > { %v6263_v42 = vsel %vm14718_vm10, %v19514_v60, %v6262_v5  ;;  %6257 = vst [vmem:[#allocation3 + $0x14] sm:$0x1] %v6256_v24  ;;  %v6332_v36 = vld [vmem:[#allocation3 + $0x98] sm:$0x1]  ;;  %v6325_v50 = vld [vmem:[#allocation3 + $0x8c] sm:$0x1]  ;;  %v6266_v30 = vsel %vm14709_vm9, %v16887_v48, %v6265_v8  ;;  %v6273_v24 = vsel %vm14709_vm9, %v16900_v49, %v6272_v54  ;;  %v6280_v48 = vsel %vm14709_vm9, %v16913_v11, %v6279_v22 }
 0x412   : > { %6264 = vst [vmem:[#allocation3 + $0x20] sm:$0x1] %v6263_v42  ;;  %v6201_v5 = vrot.slane %v17024_v45, 4  ;;  %v19515_v3 = vrot.slane %v16880_v31, 4  ;;  %6345 = vst [vmem:[#allocation3 + $0xac] sm:$0xf] %v6166_v21  ;;  %v6200_v10 = vsel %vm14704_vm8, %v6192_v44, %v6199_v29 }
 0x413   : > { %v6342_v9 = vld [vmem:[#allocation3 + $0xa8] sm:$0xf]  ;;  %6267 = vst [vmem:[#allocation3 + $0x24] sm:$0xf] %v6266_v30  ;;  %6274 = vst [vmem:[#allocation3 + $0x30] sm:$0xf] %v6273_v24 }
 0x414   : > { %v6270_v14 = vsel %vm14718_vm10, %v19515_v3, %v6269_v2  ;;  %v19516_v63 = vrot.slane %v16891_v32, 4  ;;  %v19517_v2 = vrot.slane %v16904_v61, 4  ;;  %v6335_v8 = vld [vmem:[#allocation3 + $0x9c] sm:$0xf]  ;;  %6281 = vst [vmem:[#allocation3 + $0x3c] sm:$0xf] %v6280_v48  ;;  %v6287_v32 = vsel %vm14709_vm9, %v16925_v53, %v6286_v20 }
 0x415   : > { %6271 = vst [vmem:[#allocation3 + $0x2c] sm:$0x1] %v6270_v14  ;;  %v19518_v54 = vrot.slane %v16917_v15, 4  ;;  %v6294_v61 = vsel %vm14709_vm9, %v16929_v47, %v6293_v6  ;;  %v19519_v11 = vrot.slane %v16931_v38, 4  ;;  %6359 = vst [vmem:[#allocation3 + $0xc4] sm:$0xf] %v6200_v10  ;;  %v6301_v15 = vsel %vm14709_vm9, %v16941_v4, %v6300_v1 }
 0x416   : > { %v6277_v31 = vsel %vm14718_vm10, %v19516_v63, %v6276_v26  ;;  %v6284_v49 = vsel %vm14718_vm10, %v19517_v2, %v6283_v62  ;;  %v6346_v62 = vld [vmem:[#allocation3 + $0xb0] sm:$0x1]  ;;  %v6356_v57 = vld [vmem:[#allocation3 + $0xc0] sm:$0xf]  ;;  %v6349_v40 = vld [vmem:[#allocation3 + $0xb4] sm:$0xf]  ;;  %v6315_v1 = vsel %vm14709_vm9, %v16964_v0, %v6314_v43  ;;  %v6329_v0 = vsel %vm14709_vm9, %v16991_v51, %v6328_v7 }
 0x417   : > { %6278 = vst [vmem:[#allocation3 + $0x38] sm:$0x1] %v6277_v31  ;;  %6285 = vst [vmem:[#allocation3 + $0x44] sm:$0x1] %v6284_v49  ;;  %v6291_v26 = vsel %vm14718_vm10, %v19518_v54, %v6290_v59  ;;  %v6298_v22 = vsel %vm14718_vm10, %v19519_v11, %v6297_v13  ;;  %v19520_v53 = vrot.slane %v16943_v19, 4  ;;  %v6308_v13 = vsel %vm14709_vm9, %v16956_v28, %v6307_v23 }
 0x418   : > { %6288 = vst [vmem:[#allocation3 + $0x48] sm:$0xf] %v6287_v32  ;;  %6292 = vst [vmem:[#allocation3 + $0x50] sm:$0x1] %v6291_v26  ;;  %v19521_v47 = vrot.slane %v16953_v18, 4  ;;  %v6322_v19 = vsel %vm14709_vm9, %v16984_v39, %v6321_v27  ;;  %v19523_v18 = vrot.slane %v16977_v55, 4  ;;  %v6336_v55 = vsel %vm14709_vm9, %v17006_v33, %v6335_v8 }
 0x419   : > { %6295 = vst [vmem:[#allocation3 + $0x54] sm:$0xf] %v6294_v61  ;;  %6299 = vst [vmem:[#allocation3 + $0x5c] sm:$0x1] %v6298_v22  ;;  %v6305_v6 = vsel %vm14718_vm10, %v19520_v53, %v6304_v52  ;;  %v6360_v20 = vld [vmem:[#allocation3 + $0xc8] sm:$0x1]  ;;  %v6357_v33 = vsel %vm14709_vm9, %v17042_v46, %v6356_v57 }
 0x41a   : > { %v6312_v38 = vsel %vm14718_vm10, %v19521_v47, %v6311_v16  ;;  %6302 = vst [vmem:[#allocation3 + $0x60] sm:$0xf] %v6301_v15  ;;  %6306 = vst [vmem:[#allocation3 + $0x68] sm:$0x1] %v6305_v6  ;;  %v19522_v52 = vrot.slane %v16966_v25, 4  ;;  %v6326_v28 = vsel %vm14718_vm10, %v19523_v18, %v6325_v50  ;;  %v19524_v25 = vrot.slane %v16988_v41, 4 }
 0x41b   : > { %6309 = vst [vmem:[#allocation3 + $0x6c] sm:$0xf] %v6308_v13  ;;  %6313 = vst [vmem:[#allocation3 + $0x74] sm:$0x1] %v6312_v38  ;;  %v17111_v59 = vld [vmem:[#allocation3 + $0x10] sm:$0xf]  ;;  %v6343_v41 = vsel %vm14709_vm9, %v17019_v34, %v6342_v9 }
 0x41c   : > { %v6319_v4 = vsel %vm14718_vm10, %v19522_v52, %v6318_v56  ;;  %6316 = vst [vmem:[#allocation3 + $0x78] sm:$0xf] %v6315_v1  ;;  %6323 = vst [vmem:[#allocation3 + $0x84] sm:$0xf] %v6322_v19  ;;  %v6333_v27 = vsel %vm14718_vm10, %v19524_v25, %v6332_v36  ;;  %v19525_v39 = vrot.slane %v16999_v12, 4  ;;  %v19526_v51 = vrot.slane %v17012_v37, 4 }
 0x41d   : > { %6320 = vst [vmem:[#allocation3 + $0x80] sm:$0x1] %v6319_v4  ;;  %6327 = vst [vmem:[#allocation3 + $0x8c] sm:$0x1] %v6326_v28  ;;  %v19527_v16 = vld [vmem:[#allocation20_spill] sm:$0xff]  ;;  %v6361_v37 = vsel %vm14718_vm10, %v6201_v5, %v6360_v20  ;;  %v6461_v58 = vshll.u32 %v17111_v59, 16 }
 0x41e   : > { %v6340_v56 = vsel %vm14718_vm10, %v19525_v39, %v6339_v35  ;;  %6330 = vst [vmem:[#allocation3 + $0x90] sm:$0xf] %v6329_v0  ;;  %6334 = vst [vmem:[#allocation3 + $0x98] sm:$0x1] %v6333_v27  ;;  %v6347_v23 = vsel %vm14718_vm10, %v19526_v51, %v6346_v62  ;;  %v6350_v12 = vsel %vm14709_vm9, %v19527_v16, %v6349_v40  ;;  %v17140_v60 = vld [vmem:[#allocation3 + $0xc] sm:$0xf] }
 0x41f   : > { %6337 = vst [vmem:[#allocation3 + $0x9c] sm:$0xf] %v6336_v55  ;;  %6341 = vst [vmem:[#allocation3 + $0xa4] sm:$0x1] %v6340_v56  ;;  %v6412_v42 = vld [vmem:[#allocation3 + $0x14] sm:$0x1] }
 0x420   : > { %v17142_v43 = vld [vmem:[#allocation3 + $0x18] sm:$0xf]  ;;  %6344 = vst [vmem:[#allocation3 + $0xa8] sm:$0xf] %v6343_v41  ;;  %6348 = vst [vmem:[#allocation3 + $0xb0] sm:$0x1] %v6347_v23 }
 0x421   : > { %6351 = vst [vmem:[#allocation3 + $0xb4] sm:$0xf] %v6350_v12  ;;  %6358 = vst [vmem:[#allocation3 + $0xc0] sm:$0xf] %v6357_v33  ;;  %v6452_v34 = vshrl.u32 %v17140_v60, 16  ;;  %v6455_v21 = vshll.u32 %v17140_v60, 16 }
 0x422   : > { %v17151_v46 = vld [vmem:[#allocation3 + $0x1c] sm:$0xf]  ;;  %6362 = vst [vmem:[#allocation3 + $0xc8] sm:$0x1] %v6361_v37  ;;  %v6465_v44 = vshrl.u32 %v17111_v59, 16  ;;  %v6471_v29 = vshll.u32 %v6412_v42, 16 }
 0x423   : > { %v6413_v7 = vld [vmem:[#allocation3 + $0x20] sm:$0x1]  ;;  %v6476_v36 = vshrl.u32 %v17142_v43, 16  ;;  %v6454_v50 = vrot.slane %v6452_v34, 4  ;;  %v6457_v45 = vrot.slane %v6455_v21, 5  ;;  %v6463_v30 = vrot.slane %v6461_v58, 5 }
 0x424   : > { %v6479_v17 = vshll.u32 %v17142_v43, 16  ;;  %v17156_v5 = vld [vmem:[#allocation3 + $0x24] sm:$0xf]  ;;  %v6467_v3 = vrot.slane %v6465_v44, 4  ;;  %v6473_v14 = vrot.slane %v6471_v29, 5  ;;  %v6485_v9 = vshll.u32 %v17151_v46, 16 }
 0x425   : > { %v6478_v24 = vrot.slane %v6476_v36, 4  ;;  %v6458_v10 = vor.u32 %v6457_v45, %v6454_v50  ;;  %v6489_v31 = vshrl.u32 %v17151_v46, 16  ;;  %v6495_v48 = vshll.u32 %v6413_v7, 16  ;;  %v17160_v2 = vld [vmem:[#allocation3 + $0x28] sm:$0xf]  ;;  %v14332_v55 = vld [vmem:[%s19269_s2 + $0x8] sm:$0xff]  }
 0x426   : > { %v6481_v63 = vrot.slane %v6479_v17, 5  ;;  %v6468_v49 = vor.u32 %v6467_v3, %v6463_v30  ;;  %v6487_v8 = vrot.slane %v6485_v9, 5  ;;  %v6500_v35 = vshrl.u32 %v17156_v5, 16  ;;  %v17164_v22 = vld [vmem:[#allocation3 + $0x2c] sm:$0x1]  ;;  %v14333_v17 = vld [vmem:[%s19269_s2 + $0x10] sm:$0xff]  }
 0x427   : > { %v6503_v32 = vshll.u32 %v17156_v5, 16  ;;  %v6459_v54 = vrot.slane %v6458_v10, 4  ;;  %v6491_v61 = vrot.slane %v6489_v31, 4  ;;  %v6497_v11 = vrot.slane %v6495_v48, 5  ;;  %v17170_v20 = vld [vmem:[#allocation3 + $0x30] sm:$0xf] }
 0x428   : > { %v6482_v26 = vor.u32 %v6481_v63, %v6478_v24  ;;  %v6469_v62 = vrot.slane %v6468_v49, 4  ;;  %v6502_v57 = vrot.slane %v6500_v35, 4  ;;  %v6509_v15 = vshll.u32 %v17160_v2, 16  ;;  %v17175_v18 = vld [vmem:[#allocation3 + $0x34] sm:$0xf]  ;;  %v14478_v58 = vld [vmem:[%s19269_s2] sm:$0xff]  }
 0x429   : > { %v6505_v40 = vrot.slane %v6503_v32, 5  ;;  %v6464_v6 = vsel %vm14696_vm6, %v6459_v54, %v6463_v30  ;;  %v6492_v47 = vor.u32 %v6491_v61, %v6487_v8  ;;  %v6513_v38 = vshrl.u32 %v17160_v2, 16  ;;  %v17182_v41 = vld [vmem:[#allocation3 + $0x38] sm:$0x1]  ;;  %v17190_v37 = vld [vmem:[#allocation3 + $0x3c] sm:$0xf] }
 0x42a   : > { %v6483_v13 = vrot.slane %v6482_v26, 4  ;;  %v6474_v1 = vsel %vm14696_vm6, %v6469_v62, %v6473_v14  ;;  %v6511_v4 = vrot.slane %v6509_v15, 5  ;;  %v6519_v19 = vshll.u32 %v17164_v22, 16  ;;  %v17192_v34 = vld [vmem:[#allocation3 + $0x40] sm:$0xf] }
 0x42b   : > { %v6506_v52 = vor.u32 %v6505_v40, %v6502_v57  ;;  %v11975_v28 = vcombine.low %v6464_v6, %v6474_v1  ;;  %v6493_v25 = vrot.slane %v6492_v47, 4  ;;  %v6515_v27 = vrot.slane %v6513_v38, 4  ;;  %v17203_v14 = vld [vmem:[#allocation3 + $0x44] sm:$0x1]  ;;  %v17213_v61 = vld [vmem:[#allocation3 + $0x4c] sm:$0xf] }
 0x42c   : > { %v6488_v0 = vsel %vm14696_vm6, %v6483_v13, %v6487_v8  ;;  %v6521_v56 = vrot.slane %v6519_v19, 5  ;;  %v6524_v51 = vshrl.u32 %v17170_v20, 16  ;;  %v6527_v23 = vshll.u32 %v17170_v20, 16  ;;  %v17211_v8 = vld [vmem:[#allocation3 + $0x48] sm:$0xf]  ;;  %v14334_v15 = vld [vmem:[%s19269_s2 + $0x18] sm:$0xff]  }
 0x42d   : > { %v6507_v39 = vrot.slane %v6506_v52, 4  ;;  %13267 = vmatmul.mubr.bf16.vlgmr.msra.gmra.mrb[0].mxu1 %v11975_v28  ;;  %v6498_v16 = vsel %vm14696_vm6, %v6493_v25, %v6497_v11  ;;  %v6516_v12 = vor.u32 %v6515_v27, %v6511_v4  ;;  %v6533_v33 = vshll.u32 %v17175_v18, 16  ;;  %v17221_v47 = vld [vmem:[#allocation3 + $0x50] sm:$0x1] }
 0x42e   : > { %v6537_v42 = vshrl.u32 %v17175_v18, 16  ;;  %v11976_v21 = vcombine.low %v6488_v0, %v6498_v16  ;;  %13299 = vmatpush3.bf16.msra.mxu1 %v14478_v58  ;;  %v6526_v29 = vrot.slane %v6524_v51, 4  ;;  %v6529_v7 = vrot.slane %v6527_v23, 5  ;;  %v17228_v0 = vld [vmem:[#allocation3 + $0x54] sm:$0xf] }
 0x42f   : > { %v6512_v44 = vsel %vm14696_vm6, %v6507_v39, %v6511_v4  ;;  %v6517_v36 = vrot.slane %v6516_v12, 4  ;;  %13300 = vmatprep.subr.bf16.mxu1 %v14332_v55  ;;  %v6535_v50 = vrot.slane %v6533_v33, 5  ;;  %v6543_v30 = vshll.u32 %v17182_v41, 16  ;;  %v14335_v33 = vld [vmem:[%s19269_s2 + $0x20] sm:$0xff]   ;;  %v17239_v58 = vld [vmem:[#allocation3 + $0x5c] sm:$0x1] }
 0x430   : > { %v6539_v45 = vrot.slane %v6537_v42, 4  ;;  %13270 = vmatprep.mubr.bf16.mxu1 %v11976_v21  ;;  %v6530_v3 = vor.u32 %v6529_v7, %v6526_v29  ;;  %v6548_v24 = vshrl.u32 %v17190_v37, 16  ;;  %v6551_v9 = vshll.u32 %v17190_v37, 16 }
 0x431   : > { %v6557_v10 = vshll.u32 %v17192_v34, 16  ;;  %v6522_v63 = vsel %vm14696_vm6, %v6517_v36, %v6521_v56  ;;  %v6545_v48 = vrot.slane %v6543_v30, 5  ;;  %v6561_v49 = vshrl.u32 %v17192_v34, 16  ;;  %v17230_v56 = vld [vmem:[#allocation3 + $0x58] sm:$0xf] }
 0x432   : > { %v6540_v31 = vor.u32 %v6539_v45, %v6535_v50  ;;  %v11977_v35 = vcombine.low %v6512_v44, %v6522_v63  ;;  %v6531_v32 = vrot.slane %v6530_v3, 4  ;;  %13301 = vmatpush3.bf16.msra.mxu1 %v14332_v55  ;;  %v6550_v54 = vrot.slane %v6548_v24, 4  ;;  %v17246_v30 = vld [vmem:[#allocation3 + $0x60] sm:$0xf] }
 0x433   : > { %v6553_v26 = vrot.slane %v6551_v9, 5  ;;  %v6559_v62 = vrot.slane %v6557_v10, 5  ;;  %v6563_v57 = vrot.slane %v6561_v49, 4  ;;  %v6567_v40 = vshll.u32 %v17203_v14, 16  ;;  %13302 = vmatprep.subr.bf16.mxu1 %v14333_v17  ;;  %v17248_v10 = vld [vmem:[#allocation3 + $0x64] sm:$0xf] }
 0x434   : > { %v6541_v11 = vrot.slane %v6540_v31, 4  ;;  %v6536_v6 = vsel %vm14696_vm6, %v6531_v32, %v6535_v50  ;;  %v6572_v38 = vshrl.u32 %v17211_v8, 16  ;;  %v6575_v1 = vshll.u32 %v17211_v8, 16 }
 0x435   : > { %v6554_v13 = vor.u32 %v6553_v26, %v6550_v54  ;;  %13271 = vmatmul.mubr.bf16.gmra.mrb[4].mxu1 %v11977_v35  ;;  %v6564_v4 = vor.u32 %v6563_v57, %v6559_v62  ;;  %v6569_v19 = vrot.slane %v6567_v40, 5  ;;  %v6581_v28 = vshll.u32 %v17213_v61, 16  ;;  %v14336_v35 = vld [vmem:[%s19269_s2 + $0x28] sm:$0xff]   ;;  %v17257_v26 = vld [vmem:[#allocation3 + $0x68] sm:$0x1] }
 0x436   : > { %v6546_v52 = vsel %vm14696_vm6, %v6541_v11, %v6545_v48  ;;  %v6574_v55 = vrot.slane %v6572_v38, 4  ;;  %v6577_v39 = vrot.slane %v6575_v1, 5  ;;  %13303 = vmatpush3.bf16.msra.mxu1 %v14333_v17  ;;  %v6585_v16 = vshrl.u32 %v17213_v61, 16 }
 0x437   : > { %v11978_v25 = vcombine.low %v6536_v6, %v6546_v52  ;;  %v6555_v27 = vrot.slane %v6554_v13, 4  ;;  %v6565_v51 = vrot.slane %v6564_v4, 4  ;;  %v6583_v23 = vrot.slane %v6581_v28, 5  ;;  %13304 = vmatprep.subr.bf16.mxu1 %v14334_v15  ;;  %v17263_v4 = vld [vmem:[#allocation3 + $0x6c] sm:$0xf] }
 0x438   : > { %v6591_v12 = vshll.u32 %v17221_v47, 16  ;;  %v6578_v21 = vor.u32 %v6577_v39, %v6574_v55  ;;  %v6596_v44 = vshrl.u32 %v17228_v0, 16  ;;  %v6599_v29 = vshll.u32 %v17228_v0, 16  ;;  %v17268_v55 = vld [vmem:[#allocation3 + $0x70] sm:$0xf]  ;;  %v14337_v39 = vld [vmem:[%s19269_s2 + $0x30] sm:$0xff]  }
 0x439   : > { %13274 = vmatprep.mubr.bf16.mxu1 %v11978_v25  ;;  %v6560_v42 = vsel %vm14696_vm6, %v6555_v27, %v6559_v62  ;;  %v6570_v7 = vsel %vm14696_vm6, %v6565_v51, %v6569_v19  ;;  %v6587_v36 = vrot.slane %v6585_v16, 4  ;;  %v6605_v45 = vshll.u32 %v17230_v56, 16 }
 0x43a   : > { %v6593_v50 = vrot.slane %v6591_v12, 5  ;;  %v11979_v17 = vcombine.low %v6560_v42, %v6570_v7  ;;  %v6579_v3 = vrot.slane %v6578_v21, 4  ;;  %v6598_v24 = vrot.slane %v6596_v44, 4  ;;  %13305 = vmatpush3.bf16.msra.mxu1 %v14334_v15  ;;  %v17277_v42 = vld [vmem:[#allocation3 + $0x78] sm:$0xf] }
 0x43b   : > { %v6601_v9 = vrot.slane %v6599_v29, 5  ;;  %v6588_v63 = vor.u32 %v6587_v36, %v6583_v23  ;;  %v6607_v31 = vrot.slane %v6605_v45, 5  ;;  %v6609_v48 = vshrl.u32 %v17230_v56, 16  ;;  %13306 = vmatprep.subr.bf16.mxu1 %v14335_v33  ;;  %v17281_v36 = vld [vmem:[#allocation3 + $0x7c] sm:$0xf] }
 0x43c   : > { %v6615_v49 = vshll.u32 %v17239_v58, 16  ;;  %v6584_v32 = vsel %vm14696_vm6, %v6579_v3, %v6583_v23  ;;  %v6620_v11 = vshrl.u32 %v17246_v30, 16  ;;  %v6623_v62 = vshll.u32 %v17246_v30, 16 }
 0x43d   : > { %v6602_v54 = vor.u32 %v6601_v9, %v6598_v24  ;;  %13275 = vmatmul.mubr.bf16.gmra.mrb[8].mxu1 %v11979_v17  ;;  %v6589_v57 = vrot.slane %v6588_v63, 4  ;;  %v6611_v40 = vrot.slane %v6609_v48, 4  ;;  %v6629_v6 = vshll.u32 %v17248_v10, 16  ;;  %v17288_v48 = vld [vmem:[#allocation3 + $0x80] sm:$0x1] }
 0x43e   : > { %v6617_v15 = vrot.slane %v6615_v49, 5  ;;  %v6622_v38 = vrot.slane %v6620_v11, 4  ;;  %v6625_v1 = vrot.slane %v6623_v62, 5  ;;  %v6633_v52 = vshrl.u32 %v17248_v10, 16  ;;  %13307 = vmatpush3.bf16.msra.mxu1 %v14335_v33  ;;  %v17275_v33 = vld [vmem:[#allocation3 + $0x74] sm:$0x1] }
 0x43f   : > { %v6603_v13 = vrot.slane %v6602_v54, 4  ;;  %v6594_v19 = vsel %vm14696_vm6, %v6589_v57, %v6593_v50  ;;  %v6612_v28 = vor.u32 %v6611_v40, %v6607_v31  ;;  %v6631_v25 = vrot.slane %v6629_v6, 5  ;;  %13308 = vmatprep.subr.bf16.mxu1 %v14336_v35  ;;  %v14338_v49 = vld [vmem:[%s19269_s2 + $0x38] sm:$0xff]  }
 0x440   : > { %v6639_v27 = vshll.u32 %v17257_v26, 16  ;;  %v11980_v51 = vcombine.low %v6584_v32, %v6594_v19  ;;  %v6626_v16 = vor.u32 %v6625_v1, %v6622_v38  ;;  %v6635_v12 = vrot.slane %v6633_v52, 4  ;;  %v17295_v62 = vld [vmem:[#allocation3 + $0x84] sm:$0xf] }
 0x441   : > { %v6608_v23 = vsel %vm14696_vm6, %v6603_v13, %v6607_v31  ;;  %v6613_v21 = vrot.slane %v6612_v28, 4  ;;  %v6644_v29 = vshrl.u32 %v17263_v4, 16  ;;  %v6647_v7 = vshll.u32 %v17263_v4, 16  ;;  %v17298_v13 = vld [vmem:[#allocation3 + $0x88] sm:$0xf] }
 0x442   : > { %v6641_v44 = vrot.slane %v6639_v27, 5  ;;  %13278 = vmatprep.mubr.bf16.mxu1 %v11980_v51  ;;  %v6627_v50 = vrot.slane %v6626_v16, 4  ;;  %v6636_v45 = vor.u32 %v6635_v12, %v6631_v25  ;;  %v6653_v17 = vshll.u32 %v17268_v55, 16  ;;  %13309 = vmatpush3.bf16.msra.mxu1 %v14336_v35  ;;  %v17308_v28 = vld [vmem:[%s19269_s2 + $0x80] sm:$0xff]  }
 0x443   : > { %v6657_v3 = vshrl.u32 %v17268_v55, 16  ;;  %v6618_v24 = vsel %vm14696_vm6, %v6613_v21, %v6617_v15  ;;  %v6646_v9 = vrot.slane %v6644_v29, 4  ;;  %v6649_v63 = vrot.slane %v6647_v7, 5  ;;  %13310 = vmatprep.subr.bf16.mxu1 %v14337_v39  ;;  %v17311_v29 = vld [vmem:[#allocation3 + $0x8c] sm:$0x1] }
 0x444   : > { %v6663_v31 = vshll.u32 %v17275_v33, 16  ;;  %v11981_v32 = vcombine.low %v6608_v23, %v6618_v24  ;;  %v6632_v54 = vsel %vm14696_vm6, %v6627_v50, %v6631_v25  ;;  %v6637_v11 = vrot.slane %v6636_v45, 4  ;;  %19529 = vst [vmem:[#allocation15_spill] sm:$0xff] %v17311_v29  ;;  %v17313_v7 = vld [vmem:[#allocation3 + $0x90] sm:$0xf] }
 0x445   : > { %v6655_v35 = vrot.slane %v6653_v17, 5  ;;  %v6650_v57 = vor.u32 %v6649_v63, %v6646_v9  ;;  %v6659_v40 = vrot.slane %v6657_v3, 4  ;;  %v6668_v6 = vshrl.u32 %v17277_v42, 16 }
 0x446   : > { %v6665_v15 = vrot.slane %v6663_v31, 5  ;;  %13279 = vmatmul.mubr.bf16.gmra.mrb[12].mxu1 %v11981_v32  ;;  %v6642_v38 = vsel %vm14696_vm6, %v6637_v11, %v6641_v44  ;;  %v6671_v1 = vshll.u32 %v17277_v42, 16  ;;  %v6677_v52 = vshll.u32 %v17281_v36, 16 }
 0x447   : > { %v6681_v19 = vshrl.u32 %v17281_v36, 16  ;;  %v11982_v25 = vcombine.low %v6632_v54, %v6642_v38  ;;  %v6651_v27 = vrot.slane %v6650_v57, 4  ;;  %v6660_v51 = vor.u32 %v6659_v40, %v6655_v35  ;;  %13311 = vmatpush3.bf16.msra.mxu1 %v14337_v39  ;;  %v17319_v39 = vld [vmem:[#allocation3 + $0x94] sm:$0xf] }
 0x448   : > { %v6670_v23 = vrot.slane %v6668_v6, 4  ;;  %v6673_v16 = vrot.slane %v6671_v1, 5  ;;  %v6679_v12 = vrot.slane %v6677_v52, 5  ;;  %v6687_v44 = vshll.u32 %v17288_v48, 16  ;;  %13312 = vmatprep.subr.bf16.mxu1 %v14338_v49  ;;  %v17325_v1 = vld [vmem:[#allocation3 + $0x98] sm:$0x1] }
 0x449   : > { %v6683_v21 = vrot.slane %v6681_v19, 4  ;;  %13282 = vmatprep.mubr.bf16.mxu1 %v11982_v25  ;;  %v6656_v50 = vsel %vm14696_vm6, %v6651_v27, %v6655_v35  ;;  %v6661_v45 = vrot.slane %v6660_v51, 4  ;;  %v6692_v17 = vshrl.u32 %v17295_v62, 16  ;;  %19530 = vst [vmem:[#allocation25_spill] sm:$0xff] %v17325_v1  ;;  %v17327_v52 = vld [vmem:[#allocation3 + $0x9c] sm:$0xf] }
 0x44a   : > { %v6695_v3 = vshll.u32 %v17295_v62, 16  ;;  %v6674_v24 = vor.u32 %v6673_v16, %v6670_v23  ;;  %v6689_v63 = vrot.slane %v6687_v44, 5  ;;  %v6701_v31 = vshll.u32 %v17298_v13, 16 }
 0x44b   : > { %v6684_v9 = vor.u32 %v6683_v21, %v6679_v12  ;;  %v6666_v32 = vsel %vm14696_vm6, %v6661_v45, %v6665_v15  ;;  %v6694_v54 = vrot.slane %v6692_v17, 4  ;;  %v6705_v57 = vshrl.u32 %v17298_v13, 16  ;;  %13313 = vmatpush3.bf16.msra.mxu1 %v14338_v49  ;;  %v17338_v17 = vld [vmem:[#allocation3 + $0xa0] sm:$0xf] }
 0x44c   : > { %v6697_v11 = vrot.slane %v6695_v3, 5  ;;  %v11983_v35 = vcombine.low %v6656_v50, %v6666_v32  ;;  %v6675_v40 = vrot.slane %v6674_v24, 4  ;;  %v6703_v38 = vrot.slane %v6701_v31, 5  ;;  %13346 = vmatprep.subr.bf16.mxu1 %v17308_v28 }
 0x44d   : > { %v6685_v6 = vrot.slane %v6684_v9, 4  ;;  %v6707_v25 = vrot.slane %v6705_v57, 4  ;;  %v6711_v27 = vshll.u32 %v17311_v29, 16  ;;  %v6716_v15 = vshrl.u32 %v17313_v7, 16 }
 0x44e   : > { %v6698_v19 = vor.u32 %v6697_v11, %v6694_v54  ;;  %13283 = vmatmul.mubr.bf16.gmra.mrb[16].mxu1 %v11983_v35  ;;  %v6680_v49 = vsel %vm14696_vm6, %v6675_v40, %v6679_v12  ;;  %v6719_v23 = vshll.u32 %v17313_v7, 16  ;;  %v6725_v16 = vshll.u32 %v17319_v39, 16  ;;  %v17344_v54 = vld [vmem:[#allocation3 + $0xa4] sm:$0x1] }
 0x44f   : > { %v6690_v51 = vsel %vm14696_vm6, %v6685_v6, %v6689_v63  ;;  %v6708_v50 = vor.u32 %v6707_v25, %v6703_v38  ;;  %v6713_v45 = vrot.slane %v6711_v27, 5  ;;  %v6718_v3 = vrot.slane %v6716_v15, 4  ;;  %19531 = vst [vmem:[#allocation26_spill] sm:$0xff] %v17344_v54 }
 0x450   : > { %v11984_v21 = vcombine.low %v6680_v49, %v6690_v51  ;;  %v6699_v44 = vrot.slane %v6698_v19, 4  ;;  %v6721_v24 = vrot.slane %v6719_v23, 5  ;;  %v6727_v9 = vrot.slane %v6725_v16, 5  ;;  %v17349_v19 = vld [vmem:[#allocation3 + $0xa8] sm:$0xf] }
 0x451   : > { %v6729_v31 = vshrl.u32 %v17319_v39, 16  ;;  %v6709_v63 = vrot.slane %v6708_v50, 4  ;;  %v6735_v32 = vshll.u32 %v17325_v1, 16  ;;  %v6740_v11 = vshrl.u32 %v17327_v52, 16  ;;  %v17374_v1 = vld [vmem:[#allocation3 + $0xbc] sm:$0x1] }
 0x452   : > { %13286 = vmatprep.mubr.bf16.mxu1 %v11984_v21  ;;  %v6704_v12 = vsel %vm14696_vm6, %v6699_v44, %v6703_v38  ;;  %v6722_v57 = vor.u32 %v6721_v24, %v6718_v3  ;;  %v6743_v40 = vshll.u32 %v17327_v52, 16  ;;  %v6749_v6 = vshll.u32 %v17338_v17, 16  ;;  %v17354_v21 = vld [vmem:[#allocation3 + $0xac] sm:$0xf] }
 0x453   : > { %v6731_v35 = vrot.slane %v6729_v31, 4  ;;  %v6714_v25 = vsel %vm14696_vm6, %v6709_v63, %v6713_v45  ;;  %v6737_v27 = vrot.slane %v6735_v32, 5  ;;  %v6742_v38 = vrot.slane %v6740_v11, 4  ;;  %v17360_v32 = vld [vmem:[#allocation3 + $0xb0] sm:$0x1] }
 0x454   : > { %v6753_v15 = vshrl.u32 %v17338_v17, 16  ;;  %v11985_v49 = vcombine.low %v6704_v12, %v6714_v25  ;;  %v6723_v51 = vrot.slane %v6722_v57, 4  ;;  %v6745_v16 = vrot.slane %v6743_v40, 5  ;;  %19532 = vst [vmem:[#allocation9_spill] sm:$0xff] %v17360_v32 }
 0x455   : > { %v6732_v23 = vor.u32 %v6731_v35, %v6727_v9  ;;  %v6751_v44 = vrot.slane %v6749_v6, 5  ;;  %v6759_v3 = vshll.u32 %v17344_v54, 16  ;;  %v6764_v24 = vshrl.u32 %v17349_v19, 16  ;;  %v17364_v6 = vld [vmem:[#allocation3 + $0xb4] sm:$0xf] }
 0x456   : > { %v6755_v50 = vrot.slane %v6753_v15, 4  ;;  %13287 = vmatmul.mubr.bf16.gmra.mrb[20].mxu1 %v11985_v49  ;;  %v6728_v45 = vsel %vm14696_vm6, %v6723_v51, %v6727_v9  ;;  %v6746_v63 = vor.u32 %v6745_v16, %v6742_v38  ;;  %v6767_v12 = vshll.u32 %v17349_v19, 16  ;;  %v17369_v51 = vld [vmem:[#allocation3 + $0xb8] sm:$0xf] }
 0x457   : > { %v6733_v31 = vrot.slane %v6732_v23, 4  ;;  %v6761_v57 = vrot.slane %v6759_v3, 5  ;;  %v6766_v35 = vrot.slane %v6764_v24, 4  ;;  %v6773_v40 = vshll.u32 %v17354_v21, 16 }
 0x458   : > { %v6756_v11 = vor.u32 %v6755_v50, %v6751_v44  ;;  %v6747_v15 = vrot.slane %v6746_v63, 4  ;;  %v6769_v49 = vrot.slane %v6767_v12, 5  ;;  %v6777_v9 = vshrl.u32 %v17354_v21, 16 }
 0x459   : > { %v6738_v25 = vsel %vm14696_vm6, %v6733_v31, %v6737_v27  ;;  %v6775_v16 = vrot.slane %v6773_v40, 5  ;;  %v6783_v50 = vshll.u32 %v17360_v32, 16  ;;  %v6788_v27 = vshrl.u32 %v17364_v6, 16 }
 0x45a   : > { %v11986_v38 = vcombine.low %v6728_v45, %v6738_v25  ;;  %v6757_v23 = vrot.slane %v6756_v11, 4  ;;  %v6752_v3 = vsel %vm14696_vm6, %v6747_v15, %v6751_v44  ;;  %v6770_v24 = vor.u32 %v6769_v49, %v6766_v35 }
 0x45b   : > { %v6779_v54 = vrot.slane %v6777_v9, 4  ;;  %v6791_v63 = vshll.u32 %v17364_v6, 16  ;;  %v6797_v45 = vshll.u32 %v17369_v51, 16  ;;  %v6790_v25 = vrot.slane %v6788_v27, 4 }
 0x45c   : > { %13290 = vmatprep.mubr.bf16.mxu1 %v11986_v38  ;;  %v6762_v31 = vsel %vm14696_vm6, %v6757_v23, %v6761_v57  ;;  %v6771_v11 = vrot.slane %v6770_v24, 4  ;;  %v6801_v35 = vshrl.u32 %v17369_v51, 16  ;;  %v6807_v15 = vshll.u32 %v17374_v1, 16 }
 0x45d   : > { %v11987_v12 = vcombine.low %v6752_v3, %v6762_v31  ;;  %v6780_v40 = vor.u32 %v6779_v54, %v6775_v16  ;;  %v6793_v32 = vrot.slane %v6791_v63, 5  ;;  %v6799_v44 = vrot.slane %v6797_v45, 5 }
 0x45e   : > { %v6776_v49 = vsel %vm14696_vm6, %v6771_v11, %v6775_v16  ;;  %v6785_v57 = vrot.slane %v6783_v50, 5  ;;  %v6803_v23 = vrot.slane %v6801_v35, 4  ;;  %v6809_v29 = vrot.slane %v6807_v15, 5  ;;  %v7412_v35 = vld [vmem:[#allocation3 + $0x48] sm:$0xe] }
 0x45f   : > { %13291 = vmatmul.mubr.bf16.gmra.mrb[24].mxu1 %v11987_v12  ;;  %v6781_v9 = vrot.slane %v6780_v40, 4  ;;  %v6794_v38 = vor.u32 %v6793_v32, %v6790_v25  ;;  %v12001_v54 = vcombine.low %v17156_v5, %v17160_v2  ;;  %v12002_v24 = vcombine.low %v17170_v20, %v17175_v18  ;;  %v7418_v32 = vld [vmem:[#allocation3 + $0x90] sm:$0xe] }
 0x460   : > { %v6804_v16 = vor.u32 %v6803_v23, %v6799_v44  ;;  %v17417_v23 = vld [vmem:[#allocation3 + $0x4] sm:$0xf]  ;;  %v7491_v12 = vrot.slane %v17192_v34, 5  ;;  %v12028_v45 = vrot.slane %v7412_v35, 9 }
 0x461   : > { %v6786_v3 = vsel %vm14696_vm6, %v6781_v9, %v6785_v57  ;;  %v6795_v63 = vrot.slane %v6794_v38, 4  ;;  %v7411_v9 = vld [vmem:[#allocation3 + $0x3c] sm:$0xe]  ;;  %v11999_v57 = vcombine.low %v17140_v60, %v17111_v59  ;;  %v7413_v59 = vld [vmem:[#allocation3 + $0x54] sm:$0xe] }
 0x462   : > { %v11988_v31 = vcombine.low %v6776_v49, %v6786_v3  ;;  %v6805_v25 = vrot.slane %v6804_v16, 4  ;;  %v7410_v16 = vld [vmem:[#allocation3 + $0x30] sm:$0xe]  ;;  %v7477_v49 = vrot.slane %v17160_v2, 5  ;;  %v12029_v50 = vrot.slane %v7413_v59, 9 }
 0x463   : > { %v6800_v40 = vsel %vm14696_vm6, %v6795_v63, %v6799_v44  ;;  %v14479_v44 = vld [vmem:[#allocation3] sm:$0xf] }
 0x464   : > { %13294 = vmatprep.mubr.bf16.mxu1 %v11988_v31  ;;  %v6810_v38 = vsel %vm14696_vm6, %v6805_v25, %v6809_v29  ;;  %v11998_v3 = vcombine.low %v14479_v44, %v17417_v23  ;;  %v7409_v31 = vld [vmem:[#allocation3 + $0x24] sm:$0xe]  ;;  %v12000_v29 = vcombine.low %v17142_v43, %v17151_v46  ;;  %v12026_v25 = vrot.slane %v7410_v16, 9  ;;  %v7414_v16 = vld [vmem:[#allocation3 + $0x60] sm:$0xe] }
 0x465   : > { %v11989_v63 = vcombine.low %v6800_v40, %v6810_v38  ;;  %v12025_v15 = vrot.slane %v7409_v31, 9  ;;  %v7479_v40 = vrot.slane %v7477_v49, 4  ;;  %v7480_v38 = vrot.slane %v17164_v22, 5  ;;  %v14344_v22 = vld [vmem:[%s19269_s2 + $0x88] sm:$0xff]  }
 0x466   : > { %v7484_v31 = vrot.slane %v17175_v18, 5  ;;  %v7494_v46 = vrot.slane %v17203_v14, 5  ;;  %v12030_v59 = vrot.slane %v7414_v16, 9  ;;  %v7519_v16 = vrot.slane %v17268_v55, 5 }
 0x467   : > { %13295 = vmatmul.mubr.bf16.gmra.mrb[28].mxu1 %v11989_v63  ;;  %v17427_v44 = vsel %vm15076_vm13, %v12025_v15, %v7477_v49  ;;  %v12027_v63 = vrot.slane %v7411_v9, 9  ;;  %v17435_v60 = vsel %vm15076_vm13, %v7479_v40, %v7480_v38  ;;  %v7498_v15 = vrot.slane %v17213_v61, 5 }
 0x468   : > { %13314 = vmatprep.mubr.bf16.mxu1 %v11998_v3  ;;  %v7487_v3 = vrot.slane %v17182_v41, 5  ;;  %v7486_v43 = vrot.slane %v7484_v31, 4  ;;  %v17446_v35 = vsel %vm15076_vm13, %v12026_v25, %v7484_v31  ;;  %v7493_v9 = vrot.slane %v7491_v12, 4  ;;  %v14350_v41 = vld [vmem:[%s19269_s2 + $0x98] sm:$0xff]  }
 0x469   : > { %v17450_v49 = vsel %vm15076_vm13, %v12027_v63, %v7491_v12  ;;  %v7500_v40 = vrot.slane %v7498_v15, 4  ;;  %v7501_v38 = vrot.slane %v17221_v47, 5  ;;  %v17465_v12 = vsel %vm15076_vm13, %v12028_v45, %v7498_v15  ;;  %v14347_v47 = vld [vmem:[%s19269_s2 + $0x90] sm:$0xff]  }
 0x46a   : > { %v17454_v14 = vsel %vm15076_vm13, %v7486_v43, %v7487_v3  ;;  %v17461_v25 = vsel %vm15076_vm13, %v7493_v9, %v7494_v46  ;;  %v7505_v31 = vrot.slane %v17230_v56, 5  ;;  %v7415_v3 = vld [vmem:[#allocation3 + $0x6c] sm:$0xe]  ;;  %v7512_v45 = vrot.slane %v17248_v10, 5  ;;  %v7416_v43 = vld [vmem:[#allocation3 + $0x78] sm:$0xe] }
 0x46b   : > { %v17476_v63 = vsel %vm15076_vm13, %v7500_v40, %v7501_v38  ;;  %v7508_v15 = vrot.slane %v17239_v58, 5  ;;  %v7417_v9 = vld [vmem:[#allocation3 + $0x84] sm:$0xe]  ;;  %v7515_v40 = vrot.slane %v17257_v26, 5  ;;  %v12031_v38 = vrot.slane %v7415_v3, 9 }
 0x46c   : > { %v7507_v46 = vrot.slane %v7505_v31, 4  ;;  %v12032_v58 = vrot.slane %v7416_v43, 9  ;;  %v7521_v27 = vrot.slane %v7519_v16, 4  ;;  %v7419_v26 = vld [vmem:[#allocation3 + $0x9c] sm:$0xe] }
 0x46f   : > { %13315 = vmatmul.mubr.bf16.vlgmr.msra.gmra.mrb[0].mxu1 %v11999_v57  ;;  %v7514_v57 = vrot.slane %v7512_v45, 4 }
 0x470   : > { %13318 = vmatprep.mubr.bf16.mxu1 %v12000_v29  ;;  %13347 = vmatpush3.bf16.msra.mxu1 %v17308_v28  ;;  %v17483_v28 = vsel %vm15076_vm13, %v12029_v50, %v7505_v31  ;;  %v17493_v29 = vsel %vm15076_vm13, %v7507_v46, %v7508_v15  ;;  %v17497_v50 = vsel %vm15076_vm13, %v12030_v59, %v7512_v45  ;;  %v7526_v31 = vrot.slane %v17281_v36, 5 }
 0x471   : > { %13348 = vmatprep.subr.bf16.mxu1 %v14344_v22  ;;  %v17504_v3 = vsel %vm15076_vm13, %v7514_v57, %v7515_v40  ;;  %v7522_v46 = vrot.slane %v17275_v33, 5  ;;  %v17511_v45 = vsel %vm15076_vm13, %v12031_v38, %v7519_v16  ;;  %v12033_v33 = vrot.slane %v7417_v9, 9 }
 0x472   : > { %v7528_v43 = vrot.slane %v7526_v31, 4  ;;  %v17520_v57 = vsel %vm15076_vm13, %v12032_v58, %v7526_v31  ;;  %v7533_v40 = vrot.slane %v17298_v13, 5  ;;  %v12034_v16 = vrot.slane %v7418_v32, 9  ;;  %v7420_v58 = vld [vmem:[#allocation3 + $0xa8] sm:$0xe]  ;;  %v19534_v31 = vld [vmem:[#allocation15_spill] sm:$0xff] }
 0x473   : > { %v17516_v15 = vsel %vm15076_vm13, %v7521_v27, %v7522_v46  ;;  %v7540_v9 = vrot.slane %v17319_v39, 5  ;;  %v7536_v46 = vrot.slane %v19534_v31, 5  ;;  %v12035_v27 = vrot.slane %v7419_v26, 9 }
 0x474   : > { %13349 = vmatpush3.bf16.msra.mxu1 %v14344_v22  ;;  %v7529_v22 = vrot.slane %v17288_v48, 5  ;;  %v14353_v48 = vld [vmem:[%s19269_s2 + $0xa0] sm:$0xff]   ;;  %v17543_v2 = vsel %vm15076_vm13, %v12033_v33, %v7533_v40  ;;  %v7547_v59 = vrot.slane %v17338_v17, 5  ;;  %v7421_v33 = vld [vmem:[#allocation3 + $0xb4] sm:$0xe] }
 0x475   : > { %13350 = vmatprep.subr.bf16.mxu1 %v14347_v47  ;;  %v7542_v32 = vrot.slane %v7540_v9, 4  ;;  %v17554_v18 = vsel %vm15076_vm13, %v12034_v16, %v7540_v9  ;;  %v19537_v9 = vld [vmem:[#allocation9_spill] sm:$0xff] }
 0x476   : > { %v17533_v38 = vsel %vm15076_vm13, %v7528_v43, %v7529_v22  ;;  %v19535_v43 = vld [vmem:[#allocation25_spill] sm:$0xff]  ;;  %v7549_v31 = vrot.slane %v7547_v59, 4 }
 0x477   : > { %13319 = vmatmul.mubr.bf16.gmra.mrb[4].mxu1 %v12001_v54  ;;  %v7535_v54 = vrot.slane %v7533_v40, 4  ;;  %v7543_v22 = vrot.slane %v19535_v43, 5  ;;  %v19536_v43 = vld [vmem:[#allocation26_spill] sm:$0xff]  ;;  %v17572_v40 = vsel %vm15076_vm13, %v12035_v27, %v7547_v59  ;;  %v19538_v59 = vcombine.low %v17190_v37, %v17192_v34 }
 0x478   : > { %13322 = vmatprep.mubr.bf16.mxu1 %v12002_v24  ;;  %13351 = vmatpush3.bf16.msra.mxu1 %v14347_v47  ;;  %v12036_v24 = vrot.slane %v7420_v58, 9  ;;  %v7554_v47 = vrot.slane %v17354_v21, 5  ;;  %v7550_v5 = vrot.slane %v19536_v43, 5  ;;  %v7557_v58 = vrot.slane %v19537_v9, 5  ;;  %v8314_v43 = vld [vmem:[#allocation3 + $0xac] sm:$0xf] }
 0x479   : > { %13352 = vmatprep.subr.bf16.mxu1 %v14350_v41  ;;  %v17550_v20 = vsel %vm15076_vm13, %v7535_v54, %v7536_v46  ;;  %v17561_v26 = vsel %vm15076_vm13, %v7542_v32, %v7543_v22  ;;  %v14356_v46 = vld [vmem:[%s19269_s2 + $0xa8] sm:$0xff]   ;;  %v7561_v22 = vrot.slane %v17369_v51, 5 }
 0x47a   : > { %v7556_v16 = vrot.slane %v7554_v47, 4  ;;  %v17576_v32 = vsel %vm15076_vm13, %v7549_v31, %v7550_v5  ;;  %v17583_v9 = vsel %vm15076_vm13, %v12036_v24, %v7554_v47  ;;  %v19539_v31 = vcombine.low %v17211_v8, %v17213_v61  ;;  %v14359_v24 = vld [vmem:[%s19269_s2 + $0xb0] sm:$0xff]   ;;  %v14362_v8 = vld [vmem:[%s19269_s2 + $0xb8] sm:$0xff]   ;;  %v14363_v47 = vld [vmem:[%s19269_s2 + $0xc0] sm:$0xff]  }
 0x47b   : > { %v7563_v5 = vrot.slane %v7561_v22, 4  ;;  %v19540_v61 = vcombine.low %v17228_v0, %v17230_v56  ;;  %v19543_v0 = vcombine.low %v17277_v42, %v17281_v36  ;;  %v19544_v56 = vcombine.low %v17295_v62, %v17298_v13  ;;  %v14482_v13 = vld [vmem:[#allocation3 + $0x10] sm:$0xf] }
 0x47c   : > { %13353 = vmatpush3.bf16.msra.mxu1 %v14350_v41  ;;  %v12037_v41 = vrot.slane %v7421_v33, 9  ;;  %v17587_v54 = vsel %vm15076_vm13, %v7556_v16, %v7557_v58  ;;  %v7564_v33 = vrot.slane %v17374_v1, 5  ;;  %v19542_v16 = vcombine.low %v17263_v4, %v17268_v55  ;;  %v7406_v58 = vld [vmem:[#allocation3] sm:$0xe]  ;;  %v8309_v1 = vld [vmem:[#allocation3 + $0x98] sm:$0x1] }
 0x47d   : > { %13354 = vmatprep.subr.bf16.mxu1 %v14353_v48  ;;  %v19546_v55 = vcombine.low %v17327_v52, %v17338_v17  ;;  %v19547_v42 = vcombine.low %v17349_v19, %v17354_v21  ;;  %v19548_v52 = vcombine.low %v17364_v6, %v17369_v51  ;;  %v14484_v19 = vld [vmem:[#allocation3 + $0x14] sm:$0x1] }
 0x47e   : > { %v17603_v37 = vsel %vm15076_vm13, %v12037_v41, %v7561_v22  ;;  %v17607_v34 = vsel %vm15076_vm13, %v7563_v5, %v7564_v33  ;;  %v12022_v22 = vrot.slane %v7406_v58, 9  ;;  %v7407_v5 = vld [vmem:[#allocation3 + $0xc] sm:$0xe]  ;;  %v7466_v21 = vrot.slane %v14484_v19, 5  ;;  %v14364_v51 = vld [vmem:[%s19269_s2 + $0xc8] sm:$0xff]   ;;  %v14365_v58 = vld [vmem:[%s19269_s2 + $0xd0] sm:$0xff]  }
 0x47f   : > { %13323 = vmatmul.mubr.bf16.gmra.mrb[8].mxu1 %v19538_v59 }
 0x480   : > { %13326 = vmatprep.mubr.bf16.mxu1 %v19539_v31  ;;  %13355 = vmatpush3.bf16.msra.mxu1 %v14353_v48  ;;  %v19541_v48 = vcombine.low %v17246_v30, %v17248_v10  ;;  %v19545_v30 = vcombine.low %v17313_v7, %v17319_v39  ;;  %v7456_v10 = vrot.slane %v17417_v23, 5  ;;  %v7463_v7 = vrot.slane %v14482_v13, 5  ;;  %v14483_v39 = vld [vmem:[#allocation3 + $0x1c] sm:$0xf]  ;;  %v7408_v31 = vld [vmem:[#allocation3 + $0x18] sm:$0xe] }
 0x481   : > { %13356 = vmatprep.subr.bf16.mxu1 %v14356_v46  ;;  %v7470_v23 = vrot.slane %v14483_v39, 5  ;;  %v17699_v13 = vld [vmem:[#allocation3 + $0x4c] sm:$0xf]  ;;  %v19553_v39 = vcombine.low %v17483_v28, %v17493_v29 }
 0x482   : > { %v7458_v4 = vrot.slane %v7456_v10, 4  ;;  %v7457_v36 = vsel %vm15076_vm13, %v12022_v22, %v7456_v10  ;;  %v7465_v33 = vrot.slane %v7463_v7, 4  ;;  %v19550_v22 = vcombine.low %v17446_v35, %v17454_v14  ;;  %v14369_v35 = vld [vmem:[%s19269_s2 + $0xf0] sm:$0xff]   ;;  %v17687_v14 = vld [vmem:[#allocation3 + $0x28] sm:$0xf] }
 0x483   : > { %v7472_v17 = vrot.slane %v7470_v23, 4  ;;  %v17718_v29 = vld [vmem:[%s19269_s2 + $0x100] sm:$0xff]  }
 0x484   : > { %13357 = vmatpush3.bf16.msra.mxu1 %v14356_v46  ;;  %v14481_v46 = vld [vmem:[#allocation3 + $0x8] sm:$0x1] }
 0x485   : > { %13358 = vmatprep.subr.bf16.mxu1 %v14359_v24  ;;  %v7459_v41 = vrot.slane %v14481_v46, 5  ;;  %v14366_v46 = vld [vmem:[%s19269_s2 + $0xd8] sm:$0xff]  }
 0x487   : > { %13327 = vmatmul.mubr.bf16.gmra.mrb[12].mxu1 %v19540_v61  ;;  %v7460_v62 = vsel %vm15076_vm13, %v7458_v4, %v7459_v41  ;;  %v14485_v61 = vld [vmem:[#allocation3 + $0x20] sm:$0x1]  ;;  %v19549_v41 = vcombine.low %v17427_v44, %v17435_v60  ;;  %v14368_v4 = vld [vmem:[%s19269_s2 + $0xe8] sm:$0xff]   ;;  %v19551_v44 = vcombine.low %v17450_v49, %v17461_v25  ;;  %v19552_v60 = vcombine.low %v17465_v12, %v17476_v63 }
 0x488   : > { %13330 = vmatprep.mubr.bf16.mxu1 %v19541_v48  ;;  %13359 = vmatpush3.bf16.msra.mxu1 %v14359_v24  ;;  %v12054_v59 = vcombine.low %v7457_v36, %v7460_v62  ;;  %v12023_v24 = vrot.slane %v7407_v5, 9  ;;  %v7473_v48 = vrot.slane %v14485_v61, 5  ;;  %v17691_v36 = vld [vmem:[#allocation3 + $0x34] sm:$0xf]  ;;  %v14370_v49 = vld [vmem:[%s19269_s2 + $0xf8] sm:$0xff]   ;;  %v9108_v12 = vrot.slane %v17687_v14, 5 }
 0x489   : > { %13360 = vmatprep.subr.bf16.mxu1 %v14362_v8  ;;  %v9031_v63 = vld [vmem:[#allocation3 + $0x30] sm:$0xe]  ;;  %v17697_v62 = vld [vmem:[#allocation3 + $0x40] sm:$0xf]  ;;  %v9115_v19 = vrot.slane %v17691_v36, 5 }
 0x48a   : > { %v9110_v5 = vrot.slane %v9108_v12, 4  ;;  %v17729_v61 = vld [vmem:[#allocation3 + $0x50] sm:$0x1] }
 0x48c   : > { %13361 = vmatpush3.bf16.msra.mxu1 %v14362_v8  ;;  %v12024_v8 = vrot.slane %v7408_v31, 9  ;;  %v19554_v31 = vcombine.low %v17497_v50, %v17504_v3 }
 0x48d   : > { %13394 = vmatprep.subr.bf16.mxu1 %v14363_v47 }
 0x48e   : > { %v7471_v6 = vsel %vm15076_vm13, %v12024_v8, %v7470_v23  ;;  %v17704_v23 = vld [vmem:[#allocation3 + $0x38] sm:$0x1]  ;;  %v9034_v8 = vld [vmem:[#allocation3 + $0x54] sm:$0xe] }
 0x48f   : > { %13331 = vmatmul.mubr.bf16.gmra.mrb[16].mxu1 %v19542_v16  ;;  %v7467_v16 = vsel %vm15076_vm13, %v7465_v33, %v7466_v21  ;;  %v9033_v21 = vld [vmem:[#allocation3 + $0x48] sm:$0xe] }
 0x490   : > { %13334 = vmatprep.mubr.bf16.mxu1 %v19543_v0  ;;  %v7474_v0 = vsel %vm15076_vm13, %v7472_v17, %v7473_v48  ;;  %v12161_v17 = vrot.slane %v9031_v63, 9  ;;  %v17763_v63 = vld [vmem:[#allocation3 + $0x68] sm:$0x1] }
 0x491   : > { %v12056_v10 = vcombine.low %v7471_v6, %v7474_v0  ;;  %v9117_v0 = vrot.slane %v9115_v19, 4 }
 0x497   : > { %13335 = vmatmul.mubr.bf16.gmra.mrb[20].mxu1 %v19544_v56  ;;  %v7464_v56 = vsel %vm15076_vm13, %v12023_v24, %v7463_v7  ;;  %v9032_v7 = vld [vmem:[#allocation3 + $0x3c] sm:$0xe]  ;;  %v9122_v24 = vrot.slane %v17697_v62, 5 }
 0x498   : > { %13338 = vmatprep.mubr.bf16.mxu1 %v19545_v30  ;;  %v12055_v30 = vcombine.low %v7464_v56, %v7467_v16  ;;  %v12162_v3 = vrot.slane %v9032_v7, 9  ;;  %v17735_v16 = vsel %vm15076_vm13, %v12161_v17, %v9115_v19  ;;  %v9118_v56 = vrot.slane %v17704_v23, 5  ;;  %v17765_v7 = vld [vmem:[#allocation3 + $0x74] sm:$0x1]  ;;  %v17777_v19 = vld [vmem:[#allocation3 + $0x7c] sm:$0xf] }
 0x499   : > { %19555 = vst [vmem:[#allocation10_spill] sm:$0xff] %v17735_v16  ;;  %v9124_v6 = vrot.slane %v9122_v24, 4  ;;  %v19560_v17 = vcombine.low %v17511_v45, %v17516_v15  ;;  %v17791_v45 = vld [vmem:[#allocation3 + $0x88] sm:$0xf]  ;;  %v9039_v15 = vld [vmem:[#allocation3 + $0x90] sm:$0xe] }
 0x49f   : > { %13339 = vmatmul.mubr.bf16.gmra.mrb[24].mxu1 %v19546_v55  ;;  %v9030_v55 = vld [vmem:[#allocation3 + $0x24] sm:$0xe] }
 0x4a0   : > { %13342 = vmatprep.mubr.bf16.mxu1 %v19547_v42  ;;  %v17689_v42 = vld [vmem:[#allocation3 + $0x2c] sm:$0x1]  ;;  %v12160_v25 = vrot.slane %v9030_v55, 9 }
 0x4a1   : > { %v9111_v33 = vrot.slane %v17689_v42, 5 }
 0x4a2   : > { %v17722_v28 = vsel %vm15076_vm13, %v12160_v25, %v9108_v12  ;;  %v9132_v25 = vrot.slane %v17729_v61, 5  ;;  %v9036_v12 = vld [vmem:[#allocation3 + $0x6c] sm:$0xe] }
 0x4a3   : > { %v17726_v50 = vsel %vm15076_vm13, %v9110_v5, %v9111_v33 }
 0x4a7   : > { %13343 = vmatmul.mubr.bf16.gmra.mrb[28].mxu1 %v19548_v52  ;;  %v17712_v52 = vld [vmem:[#allocation3 + $0x44] sm:$0x1] }
 0x4a8   : > { %13362 = vmatprep.mubr.bf16.mxu1 %v12054_v59  ;;  %v17706_v59 = vld [vmem:[#allocation3 + $0x58] sm:$0xf] }
 0x4af   : > { %13363 = vmatmul.mubr.bf16.vlgmr.msra.gmra.mrb[0].mxu1 %v12055_v30  ;;  %v17738_v30 = vld [vmem:[#allocation3 + $0x5c] sm:$0x1] }
 0x4b0   : > { %13366 = vmatprep.mubr.bf16.mxu1 %v12056_v10  ;;  %13395 = vmatpush3.bf16.msra.mxu1 %v14363_v47  ;;  %v14367_v47 = vld [vmem:[%s19269_s2 + $0xe0] sm:$0xff]   ;;  %v12163_v10 = vrot.slane %v9033_v21, 9 }
 0x4b1   : > { %13396 = vmatprep.subr.bf16.mxu1 %v14364_v51 }
 0x4b4   : > { %13397 = vmatpush3.bf16.msra.mxu1 %v14364_v51  ;;  %v9125_v51 = vrot.slane %v17712_v52, 5 }
 0x4b5   : > { %13398 = vmatprep.subr.bf16.mxu1 %v14365_v58 }
 0x4b6   : > { %v17760_v55 = vsel %vm15076_vm13, %v9124_v6, %v9125_v51  ;;  %v12166_v51 = vrot.slane %v9036_v12, 9  ;;  %v9153_v12 = vrot.slane %v17765_v7, 5 }
 0x4b7   : > { %13367 = vmatmul.mubr.bf16.gmra.mrb[4].mxu1 %v19549_v41  ;;  %v17746_v41 = vsel %vm15076_vm13, %v9117_v0, %v9118_v56  ;;  %19558 = vst [vmem:[#allocation13_spill] sm:$0xff] %v17760_v55  ;;  %v9037_v0 = vld [vmem:[#allocation3 + $0x78] sm:$0xe]  ;;  %v19563_v56 = vcombine.low %v17520_v57, %v17533_v38 }
 0x4b8   : > { %13370 = vmatprep.mubr.bf16.mxu1 %v19550_v22  ;;  %13399 = vmatpush3.bf16.msra.mxu1 %v14365_v58  ;;  %v9129_v58 = vrot.slane %v17699_v13, 5  ;;  %19556 = vst [vmem:[#allocation11_spill] sm:$0xff] %v17746_v41  ;;  %v17750_v22 = vsel %vm15076_vm13, %v12162_v3, %v9122_v24  ;;  %v9933_v41 = vld [vmem:[#allocation3 + $0x68] sm:$0x1] }
 0x4b9   : > { %13400 = vmatprep.subr.bf16.mxu1 %v14366_v46  ;;  %19557 = vst [vmem:[#allocation12_spill] sm:$0xff] %v17750_v22 }
 0x4ba   : > { %v17771_v5 = vsel %vm15076_vm13, %v12163_v10, %v9129_v58 }
 0x4bb   : > { %19559 = vst [vmem:[#allocation14_spill] sm:$0xff] %v17771_v5 }
 0x4bc   : > { %13401 = vmatpush3.bf16.msra.mxu1 %v14366_v46  ;;  %v17742_v46 = vld [vmem:[#allocation3 + $0x64] sm:$0xf] }
 0x4bd   : > { %13402 = vmatprep.subr.bf16.mxu1 %v14367_v47 }
 0x4bf   : > { %13371 = vmatmul.mubr.bf16.gmra.mrb[8].mxu1 %v19551_v44  ;;  %v9035_v44 = vld [vmem:[#allocation3 + $0x60] sm:$0xe] }
 0x4c0   : > { %13374 = vmatprep.mubr.bf16.mxu1 %v19552_v60  ;;  %13403 = vmatpush3.bf16.msra.mxu1 %v14367_v47  ;;  %v12164_v47 = vrot.slane %v9034_v8, 9  ;;  %v17754_v60 = vld [vmem:[#allocation3 + $0x70] sm:$0xf]  ;;  %v12165_v24 = vrot.slane %v9035_v44, 9  ;;  %v9143_v8 = vrot.slane %v17742_v46, 5  ;;  %v9146_v44 = vrot.slane %v17763_v63, 5 }
 0x4c1   : > { %13404 = vmatprep.subr.bf16.mxu1 %v14368_v4  ;;  %v9150_v10 = vrot.slane %v17754_v60, 5 }
 0x4c2   : > { %v17806_v57 = vsel %vm15076_vm13, %v12165_v24, %v9143_v8  ;;  %v9145_v38 = vrot.slane %v9143_v8, 4 }
 0x4c3   : > { %19565 = vst [vmem:[#allocation19_spill] sm:$0xff] %v17806_v57  ;;  %v17821_v24 = vsel %vm15076_vm13, %v12166_v51, %v9150_v10  ;;  %v8312_v51 = vld [vmem:[#allocation3 + $0xa4] sm:$0x1] }
 0x4c4   : > { %13405 = vmatpush3.bf16.msra.mxu1 %v14368_v4  ;;  %v9136_v4 = vrot.slane %v17706_v59, 5  ;;  %19567 = vst [vmem:[#allocation22_spill] sm:$0xff] %v17821_v24  ;;  %v8315_v24 = vld [vmem:[#allocation3 + $0xb0] sm:$0x1] }
 0x4c5   : > { %13406 = vmatprep.subr.bf16.mxu1 %v14369_v35 }
 0x4c6   : > { %v9138_v33 = vrot.slane %v9136_v4, 4  ;;  %v17785_v3 = vsel %vm15076_vm13, %v12164_v47, %v9136_v4  ;;  %v17800_v47 = vld [vmem:[#allocation3 + $0x80] sm:$0x1]  ;;  %v9164_v4 = vrot.slane %v17791_v45, 5 }
 0x4c7   : > { %13375 = vmatmul.mubr.bf16.gmra.mrb[12].mxu1 %v19553_v39  ;;  %19562 = vst [vmem:[#allocation17_spill] sm:$0xff] %v17785_v3  ;;  %v17824_v39 = vld [vmem:[#allocation3 + $0xa0] sm:$0xf] }
 0x4c8   : > { %13378 = vmatprep.mubr.bf16.mxu1 %v19554_v31  ;;  %13407 = vmatpush3.bf16.msra.mxu1 %v14369_v35  ;;  %v9139_v31 = vrot.slane %v17738_v30, 5  ;;  %v9166_v27 = vrot.slane %v9164_v4, 4 }
 0x4c9   : > { %13408 = vmatprep.subr.bf16.mxu1 %v14370_v49 }
 0x4ca   : > { %v17797_v6 = vsel %vm15076_vm13, %v9138_v33, %v9139_v31  ;;  %v12167_v33 = vrot.slane %v9037_v0, 9  ;;  %v9157_v31 = vrot.slane %v17777_v19, 5 }
 0x4cb   : > { %19564 = vst [vmem:[#allocation18_spill] sm:$0xff] %v17797_v6  ;;  %v8320_v6 = vld [vmem:[#allocation3 + $0xc4] sm:$0xf] }
 0x4cc   : > { %13409 = vmatpush3.bf16.msra.mxu1 %v14370_v49  ;;  %v9131_v49 = vrot.slane %v9129_v58, 4  ;;  %v9038_v58 = vld [vmem:[#allocation3 + $0x84] sm:$0xe]  ;;  %v9159_v48 = vrot.slane %v9157_v31, 4 }
 0x4cd   : > { %13442 = vmatprep.subr.bf16.mxu1 %v17718_v29  ;;  %v12168_v8 = vrot.slane %v9038_v58, 9  ;;  %v17837_v58 = vsel %vm15076_vm13, %v12167_v33, %v9157_v31  ;;  %v19572_v33 = vcombine.low %v17543_v2, %v17550_v20  ;;  %v8317_v31 = vld [vmem:[#allocation3 + $0xb8] sm:$0xf] }
 0x4ce   : > { %v17781_v21 = vsel %vm15076_vm13, %v9131_v49, %v9132_v25  ;;  %v17809_v49 = vld [vmem:[#allocation3 + $0x8c] sm:$0x1]  ;;  %v9152_v25 = vrot.slane %v9150_v10, 4  ;;  %19569 = vst [vmem:[#allocation24_spill] sm:$0xff] %v17837_v58  ;;  %v9041_v10 = vld [vmem:[#allocation3 + $0xa8] sm:$0xe] }
 0x4cf   : > { %13379 = vmatmul.mubr.bf16.gmra.mrb[16].mxu1 %v19560_v17  ;;  %19561 = vst [vmem:[#allocation16_spill] sm:$0xff] %v17781_v21  ;;  %v17813_v17 = vld [vmem:[#allocation3 + $0x94] sm:$0xf]  ;;  %v9167_v0 = vrot.slane %v17809_v49, 5  ;;  %v9185_v58 = vrot.slane %v8314_v43, 5  ;;  %v9192_v2 = vrot.slane %v8317_v31, 5 }
 0x4d0   : > { %13382 = vmatprep.mubr.bf16.mxu1 %v19563_v56  ;;  %v17817_v56 = vsel %vm15076_vm13, %v9145_v38, %v9146_v44  ;;  %v17830_v35 = vsel %vm15076_vm13, %v9152_v25, %v9153_v12  ;;  %v9160_v38 = vrot.slane %v17800_v47, 5  ;;  %v9040_v44 = vld [vmem:[#allocation3 + $0x9c] sm:$0xe]  ;;  %v17846_v12 = vsel %vm15076_vm13, %v12168_v8, %v9164_v4  ;;  %v9042_v8 = vld [vmem:[#allocation3 + $0xb4] sm:$0xe] }
 0x4d1   : > { %19566 = vst [vmem:[#allocation21_spill] sm:$0xff] %v17817_v56  ;;  %19568 = vst [vmem:[#allocation23_spill] sm:$0xff] %v17830_v35  ;;  %v12169_v56 = vrot.slane %v9039_v15, 9  ;;  %v9171_v57 = vrot.slane %v17813_v17, 5  ;;  %v9178_v4 = vrot.slane %v17824_v39, 5  ;;  %v19574_v15 = vcombine.low %v17554_v18, %v17561_v26 }
 0x4d2   : > { %v17842_v25 = vsel %vm15076_vm13, %v9159_v48, %v9160_v38  ;;  %19571 = vst [vmem:[#allocation28_spill] sm:$0xff] %v17846_v12  ;;  %v17856_v48 = vsel %vm15076_vm13, %v9166_v27, %v9167_v0  ;;  %v12170_v38 = vrot.slane %v9040_v44, 9  ;;  %v9174_v35 = vrot.slane %v8309_v1, 5  ;;  %v8318_v27 = vld [vmem:[#allocation3 + $0xbc] sm:$0x1] }
 0x4d3   : > { %19570 = vst [vmem:[#allocation27_spill] sm:$0xff] %v17842_v25  ;;  %19573 = vst [vmem:[#allocation29_spill] sm:$0xff] %v17856_v48  ;;  %v17866_v20 = vsel %vm15076_vm13, %v12169_v56, %v9171_v57  ;;  %v9180_v0 = vrot.slane %v9178_v4, 4  ;;  %v9181_v44 = vrot.slane %v8312_v51, 5  ;;  %v12171_v25 = vrot.slane %v9041_v10, 9 }
 0x4d4   : > { %19575 = vst [vmem:[#allocation30_spill] sm:$0xff] %v17866_v20  ;;  %v17874_v26 = vsel %vm15076_vm13, %v12170_v38, %v9178_v4  ;;  %v9043_v56 = vld [vmem:[#allocation3 + $0xc0] sm:$0xe]  ;;  %v9187_v43 = vrot.slane %v9185_v58, 4  ;;  %v9188_v51 = vrot.slane %v8315_v24, 5  ;;  %v9195_v48 = vrot.slane %v8318_v27, 5 }
 0x4d5   : > { %19577 = vst [vmem:[#allocation7_spill] sm:$0xff] %v17874_v26  ;;  %v8321_v10 = vld [vmem:[#allocation3 + $0xc8] sm:$0x1]  ;;  %v17886_v38 = vsel %vm15076_vm13, %v12171_v25, %v9185_v58  ;;  %v12173_v4 = vrot.slane %v9043_v56, 9  ;;  %v19583_v58 = vcombine.low %v17572_v40, %v17576_v32  ;;  %v19584_v56 = vcombine.low %v17583_v9, %v17587_v54  ;;  %v14371_v32 = vld [vmem:[#allocation3 + $0xc] sm:$0xff]  }
 0x4d6   : > { %19579 = vst [vmem:[#allocation20_spill] sm:$0xff] %v17886_v38  ;;  %v17890_v31 = vsel %vm15076_vm13, %v9187_v43, %v9188_v51  ;;  %v14372_v43 = vld [vmem:[#allocation3 + $0x18] sm:$0xff]   ;;  %v14376_v54 = vld [vmem:[%s19269_s2 + $0x108] sm:$0xff]   ;;  %v14374_v9 = vld [vmem:[#allocation3 + $0x24] sm:$0xff]  }
 0x4d7   : > { %13383 = vmatmul.mubr.bf16.gmra.mrb[20].mxu1 %v19572_v33  ;;  %v9173_v33 = vrot.slane %v9171_v57, 4  ;;  %v17880_v57 = vsel %vm15076_vm13, %v9180_v0, %v9181_v44  ;;  %19580 = vst [vmem:[#allocation4_spill] sm:$0xff] %v17890_v31  ;;  %v8274_v51 = vld [vmem:[#allocation3 + $0xc] sm:$0xf]  ;;  %v8286_v1 = vld [vmem:[#allocation3 + $0x3c] sm:$0xf] }
 0x4d8   : > { %13386 = vmatprep.mubr.bf16.mxu1 %v19574_v15  ;;  %v12172_v15 = vrot.slane %v9042_v8, 9  ;;  %19578 = vst [vmem:[#allocation6_spill] sm:$0xff] %v17880_v57  ;;  %v9199_v8 = vrot.slane %v8320_v6, 5  ;;  %v9202_v6 = vrot.slane %v8321_v10, 5  ;;  %v14379_v10 = vld [vmem:[%s19269_s2 + $0x110] sm:$0xff]   ;;  %v8404_v31 = vshll.u32 %v17691_v36, 16 }
 0x4d9   : > { %v17870_v18 = vsel %vm15076_vm13, %v9173_v33, %v9174_v35  ;;  %v9194_v33 = vrot.slane %v9192_v2, 4  ;;  %v14378_v35 = vld [vmem:[#allocation3 + $0x48] sm:$0xff]  }
 0x4da   : > { %19576 = vst [vmem:[#allocation5_spill] sm:$0xff] %v17870_v18  ;;  %v17896_v24 = vsel %vm15076_vm13, %v12172_v15, %v9192_v2  ;;  %v9201_v44 = vrot.slane %v9199_v8, 4  ;;  %v17912_v2 = vsel %vm15076_vm13, %v12173_v4, %v9199_v8  ;;  %v19587_v15 = vcombine.low %v17603_v37, %v17607_v34  ;;  %v8275_v34 = vld [vmem:[#allocation3 + $0x10] sm:$0xf]  ;;  %v14382_v8 = vld [vmem:[%s19269_s2 + $0x118] sm:$0xff]  }
 0x4db   : > { %19581 = vst [vmem:[#allocation8_spill] sm:$0xff] %v17896_v24  ;;  %v17900_v27 = vsel %vm15076_vm13, %v9194_v33, %v9195_v48  ;;  %19585 = vst [vmem:[#allocation25_spill] sm:$0xff] %v17912_v2  ;;  %v8323_v33 = vshrl.u32 %v8274_v51, 16  ;;  %v8326_v37 = vshll.u32 %v8274_v51, 16  ;;  %v14375_v4 = vld [vmem:[#allocation3 + $0x30] sm:$0xff]  }
 0x4dc   : > { %19582 = vst [vmem:[#allocation15_spill] sm:$0xff] %v17900_v27  ;;  %v17916_v48 = vsel %vm15076_vm13, %v9201_v44, %v9202_v6  ;;  %v14377_v44 = vld [vmem:[#allocation3 + $0x3c] sm:$0xff]   ;;  %v8289_v57 = vld [vmem:[#allocation3 + $0x48] sm:$0xf] }
 0x4dd   : > { %19586 = vst [vmem:[#allocation26_spill] sm:$0xff] %v17916_v48  ;;  %v8325_v6 = vrot.slane %v8323_v33, 4  ;;  %v17936_v51 = vld [vmem:[#allocation3 + $0x1c] sm:$0xf]  ;;  %v17940_v33 = vld [vmem:[#allocation3 + $0x20] sm:$0x1] }
 0x4de   : > { %v8443_v3 = vshrl.u32 %v8289_v57, 16  ;;  %v8446_v21 = vshll.u32 %v8289_v57, 16  ;;  %v17995_v57 = vld [vmem:[%s19269_s2 + $0x140] sm:$0xff]  }
 0x4df   : > { %13387 = vmatmul.mubr.bf16.gmra.mrb[24].mxu1 %v19583_v58  ;;  %v8277_v58 = vld [vmem:[#allocation3 + $0x18] sm:$0xf] }
 0x4e0   : > { %13390 = vmatprep.mubr.bf16.mxu1 %v19584_v56  ;;  %v8328_v56 = vrot.slane %v8326_v37, 5 }
 0x4e2   : > { %v8329_v25 = vor.u32 %v8328_v56, %v8325_v6  ;;  %v14380_v6 = vld [vmem:[#allocation3 + $0x54] sm:$0xff]  }
 0x4e7   : > { %13391 = vmatmul.mubr.bf16.gmra.mrb[28].mxu1 %v19587_v15  ;;  %v8336_v15 = vshrl.u32 %v8275_v34, 16 }
 0x4e8   : > { %13410 = vmatprep.mubr.bf16.mxu1 %v14371_v32  ;;  %v8332_v32 = vshll.u32 %v8275_v34, 16 }
 0x4ea   : > { %v17938_v0 = vrot.slane %v8332_v32, 5  ;;  %v8283_v32 = vld [vmem:[#allocation3 + $0x30] sm:$0xf] }
 0x4ef   : > { %13411 = vmatmul.mubr.bf16.vlgmr.msra.gmra.mrb[0].mxu1 %v14372_v43  ;;  %v8347_v43 = vshrl.u32 %v8277_v58, 16 }
 0x4f0   : > { %13414 = vmatprep.mubr.bf16.mxu1 %v14374_v9  ;;  %13443 = vmatpush3.bf16.msra.mxu1 %v17718_v29  ;;  %v8276_v29 = vld [vmem:[#allocation3 + $0x14] sm:$0x1]  ;;  %v8350_v9 = vshll.u32 %v8277_v58, 16  ;;  %v8360_v58 = vshrl.u32 %v17936_v51, 16 }
 0x4f1   : > { %13444 = vmatprep.subr.bf16.mxu1 %v14376_v54  ;;  %v8342_v40 = vshll.u32 %v8276_v29, 16  ;;  %v8349_v37 = vrot.slane %v8347_v43, 4  ;;  %v14388_v29 = vld [vmem:[%s19269_s2 + $0x128] sm:$0xff]   ;;  %v8366_v43 = vshll.u32 %v17940_v33, 16  ;;  %v8398_v33 = vshll.u32 %v8283_v32, 16 }
 0x4f2   : > { %v8352_v34 = vrot.slane %v8350_v9, 5  ;;  %v8362_v27 = vrot.slane %v8360_v58, 4 }
 0x4f3   : > { %v17947_v56 = vrot.slane %v8342_v40, 5  ;;  %v8384_v40 = vshrl.u32 %v17687_v14, 16  ;;  %v8400_v20 = vrot.slane %v8398_v33, 5 }
 0x4f4   : > { %13445 = vmatpush3.bf16.msra.mxu1 %v14376_v54  ;;  %v14385_v54 = vld [vmem:[%s19269_s2 + $0x120] sm:$0xff]   ;;  %v8353_v48 = vor.u32 %v8352_v34, %v8349_v37  ;;  %v8419_v37 = vshrl.u32 %v8286_v1, 16  ;;  %v8422_v34 = vshll.u32 %v8286_v1, 16  ;;  %v14381_v1 = vld [vmem:[#allocation3 + $0x60] sm:$0xff]  }
 0x4f5   : > { %13446 = vmatprep.subr.bf16.mxu1 %v14379_v10  ;;  %v8386_v26 = vrot.slane %v8384_v40, 4  ;;  %v8368_v40 = vrot.slane %v8366_v43, 5  ;;  %v8292_v43 = vld [vmem:[#allocation3 + $0x54] sm:$0xf] }
 0x4f6   : > { %v8421_v12 = vrot.slane %v8419_v37, 4 }
 0x4f7   : > { %13415 = vmatmul.mubr.bf16.gmra.mrb[4].mxu1 %v14375_v4  ;;  %v8338_v4 = vrot.slane %v8336_v15, 4  ;;  %v17949_v15 = vrot.slane %v8329_v25, 4  ;;  %v8380_v25 = vshll.u32 %v17687_v14, 16  ;;  %v17970_v14 = vrot.slane %v8353_v48, 4 }
 0x4f8   : > { %13418 = vmatprep.mubr.bf16.mxu1 %v14377_v44  ;;  %13447 = vmatpush3.bf16.msra.mxu1 %v14379_v10  ;;  %v8356_v10 = vshll.u32 %v17936_v51, 16  ;;  %v8280_v44 = vld [vmem:[#allocation3 + $0x24] sm:$0xf] }
 0x4f9   : > { %13448 = vmatprep.subr.bf16.mxu1 %v14382_v8  ;;  %v8371_v9 = vshrl.u32 %v8280_v44, 16  ;;  %v8374_v24 = vshll.u32 %v8280_v44, 16  ;;  %v8428_v44 = vshll.u32 %v17697_v62, 16 }
 0x4fa   : > { %v17953_v2 = vrot.slane %v8356_v10, 5  ;;  %v14394_v10 = vld [vmem:[%s19269_s2 + $0x138] sm:$0xff]  }
 0x4fb   : > { %v8373_v38 = vrot.slane %v8371_v9, 4 }
 0x4fc   : > { %13449 = vmatpush3.bf16.msra.mxu1 %v14382_v8  ;;  %v8339_v8 = vor.u32 %v8338_v4, %v17938_v0  ;;  %v8395_v4 = vshrl.u32 %v8283_v32, 16  ;;  %v8363_v32 = vor.u32 %v8362_v27, %v17953_v2  ;;  %v8424_v27 = vrot.slane %v8422_v34, 5 }
 0x4fd   : > { %13450 = vmatprep.subr.bf16.mxu1 %v14385_v54  ;;  %v8359_v33 = vsel %vm14696_vm6, %v17970_v14, %v17953_v2  ;;  %v8448_v14 = vrot.slane %v8446_v21, 5 }
 0x4fe   : > { %v17966_v58 = vrot.slane %v8339_v8, 4  ;;  %v17976_v8 = vrot.slane %v8380_v25, 5  ;;  %v8397_v18 = vrot.slane %v8395_v4, 4  ;;  %v8456_v4 = vshrl.u32 %v17699_v13, 16 }
 0x4ff   : > { %13419 = vmatmul.mubr.bf16.gmra.mrb[8].mxu1 %v14378_v35  ;;  %v14391_v35 = vld [vmem:[%s19269_s2 + $0x130] sm:$0xff]  }
 0x500   : > { %13422 = vmatprep.mubr.bf16.mxu1 %v14380_v6  ;;  %13451 = vmatpush3.bf16.msra.mxu1 %v14385_v54  ;;  %v8408_v54 = vshrl.u32 %v17691_v36, 16  ;;  %v8432_v6 = vshrl.u32 %v17697_v62, 16  ;;  %v8376_v36 = vrot.slane %v8374_v24, 5  ;;  %v14383_v62 = vld [vmem:[#allocation3 + $0x6c] sm:$0xff]   ;;  %v17980_v24 = vrot.slane %v8428_v44, 5 }
 0x501   : > { %13452 = vmatprep.subr.bf16.mxu1 %v14388_v29  ;;  %v8345_v25 = vsel %vm14696_vm6, %v17966_v58, %v17947_v56  ;;  %v8390_v56 = vshll.u32 %v17689_v42, 16  ;;  %v8387_v37 = vor.u32 %v8386_v26, %v17976_v8  ;;  %v8401_v34 = vor.u32 %v8400_v20, %v8397_v18  ;;  %v14384_v42 = vld [vmem:[#allocation3 + $0x78] sm:$0xff]  }
 0x502   : > { %v8410_v48 = vrot.slane %v8408_v54, 4  ;;  %v8434_v9 = vrot.slane %v8432_v6, 4  ;;  %v8364_v54 = vrot.slane %v8363_v32, 4  ;;  %v8414_v58 = vshll.u32 %v17704_v23, 16 }
 0x503   : > { %v8425_v44 = vor.u32 %v8424_v27, %v8421_v12  ;;  %v8445_v6 = vrot.slane %v8443_v3, 4  ;;  %v8392_v18 = vrot.slane %v8390_v56, 5  ;;  %v8476_v23 = vshll.u32 %v17706_v59, 16 }
 0x504   : > { %13453 = vmatpush3.bf16.msra.mxu1 %v14388_v29  ;;  %v17978_v29 = vrot.slane %v8404_v31, 5  ;;  %v8452_v31 = vshll.u32 %v17699_v13, 16  ;;  %v8435_v2 = vor.u32 %v8434_v9, %v17980_v24  ;;  %v8369_v20 = vsel %vm14696_vm6, %v8364_v54, %v8368_v40 }
 0x505   : > { %13454 = vmatprep.subr.bf16.mxu1 %v14391_v35  ;;  %v8480_v12 = vshrl.u32 %v17706_v59, 16  ;;  %v8388_v21 = vrot.slane %v8387_v37, 4  ;;  %v8416_v26 = vrot.slane %v8414_v58, 5  ;;  %v8402_v27 = vrot.slane %v8401_v34, 4 }
 0x506   : > { %v8411_v13 = vor.u32 %v8410_v48, %v17978_v29  ;;  %v18002_v32 = vrot.slane %v8452_v31, 5  ;;  %v8295_v48 = vld [vmem:[#allocation3 + $0x60] sm:$0xf]  ;;  %v8426_v31 = vrot.slane %v8425_v44, 4  ;;  %v8449_v40 = vor.u32 %v8448_v14, %v8445_v6 }
 0x507   : > { %13423 = vmatmul.mubr.bf16.gmra.mrb[12].mxu1 %v14381_v1  ;;  %v8458_v1 = vrot.slane %v8456_v4, 4  ;;  %v8436_v4 = vrot.slane %v8435_v2, 4  ;;  %v18011_v5 = vrot.slane %v8476_v23, 5  ;;  %v8482_v59 = vrot.slane %v8480_v12, 4 }
 0x508   : > { %13426 = vmatprep.mubr.bf16.mxu1 %v14383_v62  ;;  %13455 = vmatpush3.bf16.msra.mxu1 %v14391_v35  ;;  %v8377_v35 = vor.u32 %v8376_v36, %v8373_v38  ;;  %v8467_v38 = vshrl.u32 %v8292_v43, 16  ;;  %v8470_v36 = vshll.u32 %v8292_v43, 16  ;;  %v14386_v62 = vld [vmem:[#allocation3 + $0x84] sm:$0xff]   ;;  %v8412_v9 = vrot.slane %v8411_v13, 4 }
 0x509   : > { %13456 = vmatprep.subr.bf16.mxu1 %v14394_v10  ;;  %v8459_v54 = vor.u32 %v8458_v1, %v18002_v32  ;;  %v8494_v37 = vshll.u32 %v8295_v48, 16  ;;  %v18020_v13 = vcombine.low %v8359_v33, %v8369_v20  ;;  %v8393_v2 = vsel %vm14696_vm6, %v8388_v21, %v8392_v18  ;;  %v14389_v20 = vld [vmem:[#allocation3 + $0x9c] sm:$0xff]  }
 0x50a   : > { %v8378_v3 = vrot.slane %v8377_v35, 4  ;;  %v8469_v56 = vrot.slane %v8467_v38, 4  ;;  %v8472_v43 = vrot.slane %v8470_v36, 5  ;;  %v8491_v35 = vshrl.u32 %v8295_v48, 16  ;;  %v14387_v38 = vld [vmem:[#allocation3 + $0x90] sm:$0xff]  }
 0x50b   : > { %v8407_v6 = vsel %vm14696_vm6, %v8402_v27, %v17978_v29  ;;  %v8417_v14 = vsel %vm14696_vm6, %v8412_v9, %v8416_v26  ;;  %v18038_v33 = vrot.slane %v8449_v40, 4  ;;  %v18040_v36 = vrot.slane %v8459_v54, 4  ;;  %v8301_v9 = vld [vmem:[#allocation3 + $0x78] sm:$0xf]  ;;  %v18068_v54 = vld [vmem:[#allocation3 + $0x1c] sm:$0xf] }
 0x50c   : > { %13457 = vmatpush3.bf16.msra.mxu1 %v14394_v10  ;;  %v8438_v10 = vshll.u32 %v17712_v52, 16  ;;  %v19588_v52 = vsel %vm14696_vm6, %v17949_v15, %v17938_v0  ;;  %v8383_v58 = vsel %vm14696_vm6, %v8378_v3, %v17976_v8  ;;  %v8462_v0 = vshll.u32 %v17729_v61, 16  ;;  %v8298_v15 = vld [vmem:[#allocation3 + $0x6c] sm:$0xf]  ;;  %19589 = vst [vmem:[#allocation9_spill] sm:$0xff] %v18068_v54 }
 0x50d   : > { %13490 = vmatprep.subr.bf16.mxu1 %v17995_v57  ;;  %v18018_v34 = vcombine.low %v19588_v52, %v8345_v25  ;;  %v8431_v25 = vsel %vm14696_vm6, %v8426_v31, %v17980_v24  ;;  %v8473_v1 = vor.u32 %v8472_v43, %v8469_v56  ;;  %v8483_v29 = vor.u32 %v8482_v59, %v18011_v5  ;;  %v10670_v31 = vld [vmem:[#allocation3 + $0x3c] sm:$0xe] }
 0x50e   : > { %v8440_v44 = vrot.slane %v8438_v10, 5  ;;  %v8500_v61 = vshll.u32 %v17742_v46, 16  ;;  %v8504_v18 = vshrl.u32 %v17742_v46, 16  ;;  %v8515_v23 = vshrl.u32 %v8298_v15, 16 }
 0x50f   : > { %13427 = vmatmul.mubr.bf16.gmra.mrb[16].mxu1 %v14384_v42  ;;  %v8493_v42 = vrot.slane %v8491_v35, 4  ;;  %v8518_v24 = vshll.u32 %v8298_v15, 16  ;;  %v18045_v12 = vcombine.low %v8383_v58, %v8393_v2  ;;  %v18047_v3 = vcombine.low %v8407_v6, %v8417_v14  ;;  %v18078_v35 = vld [vmem:[#allocation3 + $0x20] sm:$0x1]  ;;  %v18083_v6 = vld [vmem:[#allocation3 + $0x28] sm:$0xf] }
 0x510   : > { %13430 = vmatprep.mubr.bf16.mxu1 %v14386_v62  ;;  %v8441_v8 = vsel %vm14696_vm6, %v8436_v4, %v8440_v44  ;;  %v8496_v62 = vrot.slane %v8494_v37, 5  ;;  %v18049_v21 = vrot.slane %v8462_v0, 5  ;;  %v8486_v26 = vshll.u32 %v17738_v30, 16  ;;  %19590 = vst [vmem:[#allocation31_spill] sm:$0xff] %v18078_v35  ;;  %v10667_v37 = vld [vmem:[#allocation3 + $0x18] sm:$0xe] }
 0x511   : > { %v18052_v10 = vcombine.low %v8431_v25, %v8441_v8  ;;  %v18054_v48 = vrot.slane %v8473_v1, 4  ;;  %v8524_v27 = vshll.u32 %v17754_v60, 16  ;;  %v8528_v46 = vshrl.u32 %v17754_v60, 16  ;;  %19591 = vst [vmem:[#allocation32_spill] sm:$0xff] %v18083_v6  ;;  %v14390_v14 = vld [vmem:[#allocation3 + $0xa8] sm:$0xff]  }
 0x512   : > { %v18066_v4 = vrot.slane %v8483_v29, 4  ;;  %v8497_v40 = vor.u32 %v8496_v62, %v8493_v42  ;;  %v18070_v56 = vrot.slane %v8500_v61, 5  ;;  %v18072_v43 = vrot.slane %v8504_v18, 4  ;;  %v18094_v1 = vld [vmem:[#allocation3 + $0x34] sm:$0xf] }
 0x513   : > { %v18074_v60 = vrot.slane %v8515_v23, 4  ;;  %v18076_v59 = vrot.slane %v8518_v24, 5  ;;  %v18080_v52 = vrot.slane %v8486_v26, 5  ;;  %v8539_v44 = vshrl.u32 %v8301_v9, 16  ;;  %19592 = vst [vmem:[#allocation33_spill] sm:$0xff] %v18094_v1 }
 0x514   : > { %v8542_v2 = vshll.u32 %v8301_v9, 16  ;;  %v18089_v15 = vrot.slane %v8524_v27, 5  ;;  %v18091_v25 = vrot.slane %v8528_v46, 4  ;;  %v8548_v8 = vshll.u32 %v17777_v19, 16  ;;  %v18102_v62 = vld [vmem:[#allocation3 + $0x2c] sm:$0x1] }
 0x515   : > { %v18100_v42 = vrot.slane %v8497_v40, 4  ;;  %19593 = vst [vmem:[#allocation34_spill] sm:$0xff] %v18102_v62  ;;  %v10733_v61 = vrot.slane %v18068_v54, 5  ;;  %v10668_v18 = vld [vmem:[#allocation3 + $0x24] sm:$0xe]  ;;  %v8552_v27 = vshrl.u32 %v17777_v19, 16 }
 0x516   : > { %v18111_v46 = vld [vmem:[#allocation3 + $0x38] sm:$0x1]  ;;  %v10669_v9 = vld [vmem:[#allocation3 + $0x30] sm:$0xe]  ;;  %v18113_v40 = vrot.slane %v8539_v44, 4  ;;  %v10736_v29 = vrot.slane %v18078_v35, 5 }
 0x517   : > { %13431 = vmatmul.mubr.bf16.gmra.mrb[20].mxu1 %v14387_v38  ;;  %v14392_v38 = vld [vmem:[#allocation3 + $0xb4] sm:$0xff]   ;;  %19594 = vst [vmem:[#allocation35_spill] sm:$0xff] %v18111_v46  ;;  %v18117_v58 = vld [vmem:[#allocation3 + $0x40] sm:$0xf]  ;;  %v10735_v0 = vrot.slane %v10733_v61, 4  ;;  %v18122_v26 = vrot.slane %v8548_v8, 5 }
 0x518   : > { %13434 = vmatprep.mubr.bf16.mxu1 %v14389_v20  ;;  %v12294_v20 = vrot.slane %v10667_v37, 9  ;;  %v18115_v37 = vrot.slane %v8542_v2, 5  ;;  %19595 = vst [vmem:[#allocation36_spill] sm:$0xff] %v18117_v58  ;;  %v12295_v19 = vrot.slane %v10668_v18, 9  ;;  %v10740_v23 = vrot.slane %v18083_v6, 5 }
 0x519   : > { %v18127_v44 = vld [vmem:[#allocation3 + $0x4c] sm:$0xf]  ;;  %v12296_v30 = vrot.slane %v10669_v9, 9  ;;  %v10747_v8 = vrot.slane %v18094_v1, 5  ;;  %v10671_v24 = vld [vmem:[#allocation3 + $0x48] sm:$0xe] }
 0x51a   : > { %19597 = vst [vmem:[#allocation38_spill] sm:$0xff] %v18127_v44  ;;  %v18131_v2 = vsel %vm15076_vm13, %v12294_v20, %v10733_v61  ;;  %v18138_v18 = vrot.slane %v8552_v27, 4  ;;  %v18140_v35 = vld [vmem:[#allocation3 + $0x50] sm:$0x1]  ;;  %v10742_v54 = vrot.slane %v10740_v23, 4  ;;  %v10743_v55 = vrot.slane %v18102_v62, 5 }
 0x51b   : > { %19598 = vst [vmem:[#allocation39_spill] sm:$0xff] %v18131_v2  ;;  %19600 = vst [vmem:[#allocation41_spill] sm:$0xff] %v18140_v35  ;;  %v18147_v61 = vld [vmem:[#allocation3 + $0x58] sm:$0xf]  ;;  %v12297_v9 = vrot.slane %v10670_v31, 9  ;;  %v18156_v22 = vsel %vm15076_vm13, %v12295_v19, %v10740_v23  ;;  %v10754_v20 = vrot.slane %v18117_v58, 5 }
 0x51c   : > { %19601 = vst [vmem:[#allocation42_spill] sm:$0xff] %v18147_v61  ;;  %v18150_v1 = vld [vmem:[#allocation3 + $0x5c] sm:$0x1]  ;;  %v18152_v27 = vld [vmem:[#allocation3 + $0x64] sm:$0xf]  ;;  %19603 = vst [vmem:[#allocation44_spill] sm:$0xff] %v18156_v22  ;;  %v18160_v6 = vsel %vm15076_vm13, %v10742_v54, %v10743_v55 }
 0x51d   : > { %19602 = vst [vmem:[#allocation43_spill] sm:$0xff] %v18152_v27  ;;  %19604 = vst [vmem:[#allocation45_spill] sm:$0xff] %v18160_v6  ;;  %v10672_v2 = vld [vmem:[#allocation3 + $0x54] sm:$0xe]  ;;  %v14393_v62 = vld [vmem:[#allocation3 + $0xc0] sm:$0xff]   ;;  %v10761_v55 = vrot.slane %v18127_v44, 5 }
 0x51e   : > { %v10673_v54 = vld [vmem:[#allocation3 + $0x60] sm:$0xe]  ;;  %v18174_v19 = vld [vmem:[#allocation3 + $0x70] sm:$0xf]  ;;  %v10756_v58 = vrot.slane %v10754_v20, 4  ;;  %v10764_v31 = vrot.slane %v18140_v35, 5 }
 0x51f   : > { %13435 = vmatmul.mubr.bf16.gmra.mrb[24].mxu1 %v14390_v14  ;;  %v18125_v14 = vld [vmem:[#allocation3 + $0x44] sm:$0x1]  ;;  %v10674_v6 = vld [vmem:[#allocation3 + $0x6c] sm:$0xe]  ;;  %v9936_v22 = vld [vmem:[#allocation3 + $0x74] sm:$0x1] }
 0x520   : > { %13438 = vmatprep.mubr.bf16.mxu1 %v14392_v38  ;;  %19596 = vst [vmem:[#allocation37_spill] sm:$0xff] %v18125_v14  ;;  %v18135_v38 = vsel %vm15076_vm13, %v10735_v0, %v10736_v29  ;;  %v10749_v0 = vrot.slane %v10747_v8, 4  ;;  %v10750_v29 = vrot.slane %v18111_v46, 5  ;;  %v18167_v46 = vsel %vm15076_vm13, %v12296_v30, %v10747_v8 }
 0x521   : > { %19599 = vst [vmem:[#allocation40_spill] sm:$0xff] %v18135_v38  ;;  %v12298_v38 = vrot.slane %v10671_v24, 9  ;;  %19605 = vst [vmem:[#allocation46_spill] sm:$0xff] %v18167_v46  ;;  %v10757_v16 = vrot.slane %v18125_v14, 5  ;;  %v18182_v30 = vsel %vm15076_vm13, %v12297_v9, %v10754_v20  ;;  %v10763_v8 = vrot.slane %v10761_v55, 4 }
 0x522   : > { %v18171_v23 = vsel %vm15076_vm13, %v10749_v0, %v10750_v29  ;;  %19607 = vst [vmem:[#allocation48_spill] sm:$0xff] %v18182_v30  ;;  %v12299_v0 = vrot.slane %v10672_v2, 9  ;;  %v10768_v29 = vrot.slane %v18147_v61, 5  ;;  %v10775_v20 = vrot.slane %v18152_v27, 5  ;;  %v10675_v9 = vld [vmem:[#allocation3 + $0x78] sm:$0xe] }
 0x523   : > { %19606 = vst [vmem:[#allocation47_spill] sm:$0xff] %v18171_v23  ;;  %v18188_v24 = vsel %vm15076_vm13, %v10756_v58, %v10757_v16  ;;  %v18192_v23 = vsel %vm15076_vm13, %v12298_v38, %v10761_v55  ;;  %v9938_v46 = vld [vmem:[#allocation3 + $0x7c] sm:$0xf]  ;;  %v9939_v2 = vld [vmem:[#allocation3 + $0x80] sm:$0x1]  ;;  %v10771_v16 = vrot.slane %v18150_v1, 5 }
 0x524   : > { %19608 = vst [vmem:[#allocation49_spill] sm:$0xff] %v18188_v24  ;;  %19609 = vst [vmem:[#allocation50_spill] sm:$0xff] %v18192_v23  ;;  %v10770_v14 = vrot.slane %v10768_v29, 4  ;;  %v9941_v58 = vld [vmem:[#allocation3 + $0x88] sm:$0xf]  ;;  %v10777_v55 = vrot.slane %v10775_v20, 4  ;;  %v18206_v44 = vsel %vm15076_vm13, %v12299_v0, %v10768_v29 }
 0x525   : > { %v12301_v27 = vrot.slane %v10674_v6, 9  ;;  %v9942_v61 = vld [vmem:[#allocation3 + $0x8c] sm:$0x1]  ;;  %19611 = vst [vmem:[#allocation52_spill] sm:$0xff] %v18206_v44  ;;  %v10676_v24 = vld [vmem:[#allocation3 + $0x84] sm:$0xe] }
 0x526   : > { %v18210_v35 = vsel %vm15076_vm13, %v10770_v14, %v10771_v16  ;;  %v9944_v30 = vld [vmem:[#allocation3 + $0x94] sm:$0xf]  ;;  %v10789_v0 = vrot.slane %v9938_v46, 5  ;;  %v10677_v29 = vld [vmem:[#allocation3 + $0x90] sm:$0xe]  ;;  %v10785_v38 = vrot.slane %v9936_v22, 5 }
 0x527   : > { %13439 = vmatmul.mubr.bf16.gmra.mrb[28].mxu1 %v14393_v62  ;;  %v12300_v62 = vrot.slane %v10673_v54, 9  ;;  %v10778_v54 = vrot.slane %v9933_v41, 5  ;;  %19612 = vst [vmem:[#allocation53_spill] sm:$0xff] %v18210_v35  ;;  %v14396_v14 = vld [vmem:[%s19269_s2 + $0x148] sm:$0xff]   ;;  %v10792_v35 = vrot.slane %v9939_v2, 5  ;;  %v12304_v22 = vrot.slane %v10677_v29, 9 }
 0x528   : > { %13458 = vmatprep.mubr.bf16.mxu1 %v18018_v34  ;;  %v18199_v34 = vsel %vm15076_vm13, %v10763_v8, %v10764_v31  ;;  %v10782_v31 = vrot.slane %v18174_v19, 5  ;;  %v12302_v8 = vrot.slane %v10675_v9, 9  ;;  %v9945_v9 = vld [vmem:[#allocation3 + $0x98] sm:$0x1]  ;;  %v10678_v46 = vld [vmem:[#allocation3 + $0x9c] sm:$0xe] }
 0x529   : > { %19610 = vst [vmem:[#allocation51_spill] sm:$0xff] %v18199_v34  ;;  %v18217_v41 = vsel %vm15076_vm13, %v12300_v62, %v10775_v20  ;;  %v18221_v6 = vsel %vm15076_vm13, %v10777_v55, %v10778_v54  ;;  %v10791_v20 = vrot.slane %v10789_v0, 4  ;;  %v12303_v55 = vrot.slane %v10676_v24, 9  ;;  %v9947_v44 = vld [vmem:[#allocation3 + $0xa0] sm:$0xf] }
 0x52a   : > { %19613 = vst [vmem:[#allocation54_spill] sm:$0xff] %v18217_v41  ;;  %19614 = vst [vmem:[#allocation55_spill] sm:$0xff] %v18221_v6  ;;  %v10784_v34 = vrot.slane %v10782_v31, 4  ;;  %v18230_v62 = vsel %vm15076_vm13, %v12301_v27, %v10782_v31  ;;  %v10796_v54 = vrot.slane %v9941_v58, 5  ;;  %v18239_v16 = vsel %vm15076_vm13, %v12302_v8, %v10789_v0  ;;  %v10679_v6 = vld [vmem:[#allocation3 + $0xa8] sm:$0xe] }
 0x52b   : > { %19615 = vst [vmem:[#allocation56_spill] sm:$0xff] %v18230_v62  ;;  %v10803_v2 = vrot.slane %v9944_v30, 5  ;;  %v9948_v27 = vld [vmem:[#allocation3 + $0xa4] sm:$0x1]  ;;  %v9950_v24 = vld [vmem:[#allocation3 + $0xac] sm:$0xf] }
 0x52c   : > { %v18235_v23 = vsel %vm15076_vm13, %v10784_v34, %v10785_v38  ;;  %v18247_v34 = vsel %vm15076_vm13, %v10791_v20, %v10792_v35  ;;  %v10798_v58 = vrot.slane %v10796_v54, 4  ;;  %v10799_v38 = vrot.slane %v9942_v61, 5  ;;  %v14397_v30 = vld [vmem:[%s19269_s2 + $0x150] sm:$0xff]   ;;  %v9951_v31 = vld [vmem:[#allocation3 + $0xb0] sm:$0x1]  ;;  %v19693_v53 = vld [vmem:[#allocation50_spill] sm:$0xff] }
 0x52d   : > { %19616 = vst [vmem:[#allocation57_spill] sm:$0xff] %v18235_v23  ;;  %19617 = vst [vmem:[#allocation58_spill] sm:$0xff] %v18247_v34  ;;  %v10806_v8 = vrot.slane %v9945_v9, 5  ;;  %v12305_v0 = vrot.slane %v10678_v46, 9  ;;  %v9953_v29 = vld [vmem:[#allocation3 + $0xb8] sm:$0xf]  ;;  %v18268_v9 = vsel %vm15076_vm13, %v12304_v22, %v10803_v2 }
 0x52e   : > { %v18260_v35 = vsel %vm15076_vm13, %v10798_v58, %v10799_v38  ;;  %v10810_v61 = vrot.slane %v9947_v44, 5  ;;  %v12306_v20 = vrot.slane %v10679_v6, 9  ;;  %v10680_v23 = vld [vmem:[#allocation3 + $0xb4] sm:$0xe]  ;;  %v18262_v62 = vld [vmem:[#allocation3 + $0x84] sm:$0xf] }
 0x52f   : > { %13459 = vmatmul.mubr.bf16.vlgmr.msra.gmra.mrb[0].mxu1 %v18020_v13  ;;  %v18256_v13 = vsel %vm15076_vm13, %v12303_v55, %v10796_v54  ;;  %v9956_v41 = vld [vmem:[#allocation3 + $0xc4] sm:$0xf]  ;;  %v10817_v54 = vrot.slane %v9950_v24, 5  ;;  %v10681_v46 = vld [vmem:[#allocation3 + $0xc0] sm:$0xe]  ;;  %v10813_v38 = vrot.slane %v9948_v27, 5 }
 0x530   : > { %13462 = vmatprep.mubr.bf16.mxu1 %v18045_v12  ;;  %13491 = vmatpush3.bf16.msra.mxu1 %v17995_v57  ;;  %v10805_v12 = vrot.slane %v10803_v2, 4  ;;  %v9954_v44 = vld [vmem:[#allocation3 + $0xbc] sm:$0x1]  ;;  %v10812_v58 = vrot.slane %v10810_v61, 4  ;;  %v10820_v34 = vrot.slane %v9951_v31, 5  ;;  %v14398_v22 = vld [vmem:[%s19269_s2 + $0x158] sm:$0xff]  }
 0x531   : > { %13492 = vmatprep.subr.bf16.mxu1 %v14396_v14  ;;  %v9957_v2 = vld [vmem:[#allocation3 + $0xc8] sm:$0x1]  ;;  %v10819_v24 = vrot.slane %v10817_v54, 4  ;;  %v18289_v27 = vsel %vm15076_vm13, %v12306_v20, %v10817_v54  ;;  %v12308_v31 = vrot.slane %v10681_v46, 9  ;;  %v10831_v6 = vrot.slane %v9956_v41, 5 }
 0x532   : > { %v18272_v55 = vsel %vm15076_vm13, %v10805_v12, %v10806_v8  ;;  %v18281_v12 = vsel %vm15076_vm13, %v12305_v0, %v10810_v61  ;;  %v12307_v8 = vrot.slane %v10680_v23, 9  ;;  %v18285_v57 = vsel %vm15076_vm13, %v10812_v58, %v10813_v38 }
 0x533   : > { %19618 = vst [vmem:[#allocation59_spill] sm:$0xff] %v18272_v55  ;;  %v12337_v55 = vcombine.low %v18281_v12, %v18285_v57  ;;  %v18296_v0 = vsel %vm15076_vm13, %v10819_v24, %v10820_v34  ;;  %v8563_v61 = vshrl.u32 %v18262_v62, 16  ;;  %v10833_v41 = vrot.slane %v10831_v6, 4 }
 0x534   : > { %13493 = vmatpush3.bf16.msra.mxu1 %v14396_v14  ;;  %v10824_v14 = vrot.slane %v9953_v29, 5  ;;  %v10827_v29 = vrot.slane %v9954_v44, 5  ;;  %v12338_v20 = vcombine.low %v18289_v27, %v18296_v0  ;;  %v10834_v54 = vrot.slane %v9957_v2, 5 }
 0x535   : > { %13494 = vmatprep.subr.bf16.mxu1 %v14397_v30  ;;  %v8566_v34 = vshll.u32 %v18262_v62, 16  ;;  %v8572_v46 = vshll.u32 %v17791_v45, 16  ;;  %v8576_v44 = vshrl.u32 %v17791_v45, 16  ;;  %v18320_v38 = vsel %vm15076_vm13, %v12308_v31, %v10831_v6 }
 0x536   : > { %v10826_v23 = vrot.slane %v10824_v14, 4  ;;  %v18324_v62 = vsel %vm15076_vm13, %v10833_v41, %v10834_v54  ;;  %v19619_v2 = vsel %vm14696_vm6, %v18040_v36, %v18049_v21  ;;  %v19620_v45 = vsel %vm14696_vm6, %v18038_v33, %v18002_v32  ;;  %v8307_v41 = vld [vmem:[#allocation3 + $0x90] sm:$0xf] }
 0x537   : > { %13463 = vmatmul.mubr.bf16.gmra.mrb[4].mxu1 %v18047_v3  ;;  %v14399_v3 = vld [vmem:[%s19269_s2 + $0x160] sm:$0xff]   ;;  %v12139_v24 = vcombine.low %v19620_v45, %v19619_v2  ;;  %v12340_v31 = vcombine.low %v18320_v38, %v18324_v62  ;;  %v19622_v36 = vsel %vm14696_vm6, %v18066_v4, %v18080_v52  ;;  %v19623_v32 = vsel %vm14696_vm6, %v18054_v48, %v18011_v5  ;;  %v8310_v4 = vld [vmem:[#allocation3 + $0x9c] sm:$0xf] }
 0x538   : > { %13466 = vmatprep.mubr.bf16.mxu1 %v18052_v10  ;;  %13495 = vmatpush3.bf16.msra.mxu1 %v14397_v30  ;;  %v18309_v10 = vsel %vm15076_vm13, %v12307_v8, %v10824_v14  ;;  %v18313_v30 = vsel %vm15076_vm13, %v10826_v23, %v10827_v29  ;;  %v19621_v8 = vor.u32 %v18072_v43, %v18070_v56  ;;  %v19624_v43 = vshll.u32 %v17763_v63, 16 }
 0x539   : > { %13496 = vmatprep.subr.bf16.mxu1 %v14398_v22  ;;  %v12339_v58 = vcombine.low %v18309_v10, %v18313_v30  ;;  %v8555_v14 = vor.u32 %v18138_v18, %v18122_v26  ;;  %v12140_v33 = vcombine.low %v19623_v32, %v19622_v36  ;;  %v8503_v21 = vsel %vm14696_vm6, %v18100_v42, %v18070_v56 }
 0x53a   : > { %v8508_v6 = vrot.slane %v19621_v8, 4  ;;  %v8512_v18 = vrot.slane %v19624_v43, 5  ;;  %v19625_v23 = vshll.u32 %v17765_v7, 16  ;;  %v19626_v52 = vor.u32 %v18076_v59, %v18074_v60  ;;  %v14400_v7 = vld [vmem:[%s19269_s2 + $0x168] sm:$0xff]  }
 0x53b   : > { %v19627_v5 = vor.u32 %v18091_v25, %v18089_v15  ;;  %v19628_v56 = vor.u32 %v18115_v37, %v18113_v40  ;;  %v8558_v63 = vshll.u32 %v17800_v47, 16  ;;  %v8568_v2 = vrot.slane %v8566_v34, 5 }
 0x53c   : > { %v8536_v29 = vrot.slane %v19625_v23, 5  ;;  %13497 = vmatpush3.bf16.msra.mxu1 %v14398_v22  ;;  %v8522_v54 = vrot.slane %v19626_v52, 4  ;;  %v8565_v22 = vrot.slane %v8563_v61, 4  ;;  %v18374_v45 = vrot.slane %v8572_v46, 5 }
 0x53d   : > { %v8532_v48 = vrot.slane %v19627_v5, 4  ;;  %v8546_v42 = vrot.slane %v19628_v56, 4  ;;  %13498 = vmatprep.subr.bf16.mxu1 %v14399_v3  ;;  %v8578_v60 = vrot.slane %v8576_v44, 4  ;;  %v8513_v59 = vsel %vm14696_vm6, %v8508_v6, %v8512_v18  ;;  %v14402_v5 = vld [vmem:[%s19269_s2 + $0x178] sm:$0xff]  }
 0x53e   : > { %v8556_v25 = vrot.slane %v8555_v14, 4  ;;  %v8587_v8 = vshrl.u32 %v8307_v41, 16  ;;  %v8590_v40 = vshll.u32 %v8307_v41, 16  ;;  %v8596_v47 = vshll.u32 %v17813_v17, 16 }
 0x53f   : > { %13467 = vmatmul.mubr.bf16.gmra.mrb[8].mxu1 %v12139_v24  ;;  %v8600_v37 = vshrl.u32 %v17813_v17, 16  ;;  %v8611_v36 = vshrl.u32 %v8310_v4, 16  ;;  %v8614_v32 = vshll.u32 %v8310_v4, 16  ;;  %v8527_v61 = vsel %vm14696_vm6, %v8522_v54, %v18089_v15  ;;  %v8313_v54 = vld [vmem:[#allocation3 + $0xa8] sm:$0xf] }
 0x540   : > { %13470 = vmatprep.mubr.bf16.mxu1 %v12140_v33  ;;  %13499 = vmatpush3.bf16.msra.mxu1 %v14399_v3  ;;  %v8560_v34 = vrot.slane %v8558_v63, 5  ;;  %v8620_v46 = vshll.u32 %v17824_v39, 16  ;;  %v8624_v44 = vshrl.u32 %v17824_v39, 16  ;;  %v14401_v3 = vld [vmem:[%s19269_s2 + $0x170] sm:$0xff]   ;;  %v8537_v24 = vsel %vm14696_vm6, %v8532_v48, %v8536_v29 }
 0x541   : > { %13500 = vmatprep.subr.bf16.mxu1 %v14400_v7  ;;  %v8551_v17 = vsel %vm14696_vm6, %v8546_v42, %v18122_v26  ;;  %v8569_v6 = vor.u32 %v8568_v2, %v8565_v22  ;;  %v8579_v15 = vor.u32 %v8578_v60, %v18374_v45  ;;  %v8582_v33 = vshll.u32 %v17809_v49, 16  ;;  %v8316_v60 = vld [vmem:[#allocation3 + $0xb4] sm:$0xf] }
 0x542   : > { %v8561_v14 = vsel %vm14696_vm6, %v8556_v25, %v8560_v34  ;;  %v8589_v39 = vrot.slane %v8587_v8, 4  ;;  %v8592_v43 = vrot.slane %v8590_v40, 5  ;;  %v18397_v18 = vrot.slane %v8596_v47, 5  ;;  %v14486_v8 = vld [vmem:[#allocation3 + $0xac] sm:$0xf] }
 0x543   : > { %v8602_v23 = vrot.slane %v8600_v37, 4  ;;  %v8613_v41 = vrot.slane %v8611_v36, 4  ;;  %v8616_v4 = vrot.slane %v8614_v32, 5  ;;  %v12141_v29 = vcombine.low %v8503_v21, %v8513_v59  ;;  %v18409_v37 = vld [vmem:[%s19269_s2 + $0x180] sm:$0xff]  }
 0x544   : > { %13501 = vmatpush3.bf16.msra.mxu1 %v14400_v7  ;;  %v18399_v52 = vrot.slane %v8620_v46, 5  ;;  %v8626_v26 = vrot.slane %v8624_v44, 4  ;;  %v12142_v48 = vcombine.low %v8527_v61, %v8537_v24  ;;  %v8570_v49 = vrot.slane %v8569_v6, 4  ;;  %v14487_v61 = vld [vmem:[#allocation3 + $0x98] sm:$0x1] }
 0x545   : > { %13502 = vmatprep.subr.bf16.mxu1 %v14401_v3  ;;  %v8580_v56 = vrot.slane %v8579_v15, 4  ;;  %v12143_v42 = vcombine.low %v8551_v17, %v8561_v14  ;;  %v8584_v63 = vrot.slane %v8582_v33, 5  ;;  %v8593_v22 = vor.u32 %v8592_v43, %v8589_v39  ;;  %v14488_v46 = vld [vmem:[#allocation3 + $0xa4] sm:$0x1]  ;;  %v14489_v17 = vld [vmem:[#allocation3 + $0xb8] sm:$0xf] }
 0x546   : > { %v8603_v7 = vor.u32 %v8602_v23, %v18397_v18  ;;  %v8617_v21 = vor.u32 %v8616_v4, %v8613_v41  ;;  %v8635_v2 = vshrl.u32 %v8313_v54, 16  ;;  %v8627_v59 = vor.u32 %v8626_v26, %v18399_v52 }
 0x547   : > { %13471 = vmatmul.mubr.bf16.gmra.mrb[12].mxu1 %v12141_v29  ;;  %v8638_v25 = vshll.u32 %v8313_v54, 16  ;;  %v8644_v40 = vshll.u32 %v14486_v8, 16  ;;  %v8648_v47 = vshrl.u32 %v14486_v8, 16  ;;  %v8575_v36 = vsel %vm14696_vm6, %v8570_v49, %v18374_v45  ;;  %v14490_v8 = vld [vmem:[#allocation3 + $0xc4] sm:$0xf] }
 0x548   : > { %13474 = vmatprep.mubr.bf16.mxu1 %v12142_v48  ;;  %13503 = vmatpush3.bf16.msra.mxu1 %v14401_v3  ;;  %v8585_v32 = vsel %vm14696_vm6, %v8580_v56, %v8584_v63  ;;  %v8606_v34 = vshll.u32 %v14487_v61, 16  ;;  %v8630_v44 = vshll.u32 %v14488_v46, 16  ;;  %v8659_v3 = vshrl.u32 %v8316_v60, 16  ;;  %v14491_v61 = vld [vmem:[#allocation3 + $0xb0] sm:$0x1] }
 0x549   : > { %13504 = vmatprep.subr.bf16.mxu1 %v14402_v5  ;;  %v8662_v24 = vshll.u32 %v8316_v60, 16  ;;  %v8668_v6 = vshll.u32 %v14489_v17, 16  ;;  %v8672_v15 = vshrl.u32 %v14489_v17, 16  ;;  %v8594_v14 = vrot.slane %v8593_v22, 4  ;;  %v8319_v60 = vld [vmem:[#allocation3 + $0xc0] sm:$0xf] }
 0x54a   : > { %v8604_v33 = vrot.slane %v8603_v7, 4  ;;  %v8618_v39 = vrot.slane %v8617_v21, 4  ;;  %v8637_v43 = vrot.slane %v8635_v2, 4  ;;  %v8628_v23 = vrot.slane %v8627_v59, 4 }
 0x54b   : > { %v8640_v41 = vrot.slane %v8638_v25, 5  ;;  %v8646_v45 = vrot.slane %v8644_v40, 5  ;;  %v8650_v4 = vrot.slane %v8648_v47, 4  ;;  %v12144_v29 = vcombine.low %v8575_v36, %v8585_v32 }
 0x54c   : > { %13505 = vmatpush3.bf16.msra.mxu1 %v14402_v5  ;;  %v8608_v26 = vrot.slane %v8606_v34, 5  ;;  %v8632_v54 = vrot.slane %v8630_v44, 5  ;;  %v8661_v48 = vrot.slane %v8659_v3, 4  ;;  %v8664_v49 = vrot.slane %v8662_v24, 5  ;;  %v14492_v24 = vld [vmem:[#allocation3 + $0xbc] sm:$0x1] }
 0x54d   : > { %13538 = vmatprep.subr.bf16.mxu1 %v18409_v37  ;;  %v8670_v56 = vrot.slane %v8668_v6, 5  ;;  %v8674_v63 = vrot.slane %v8672_v15, 4  ;;  %v8599_v5 = vsel %vm14696_vm6, %v8594_v14, %v18397_v18  ;;  %v8623_v7 = vsel %vm14696_vm6, %v8618_v39, %v18399_v52 }
 0x54e   : > { %v8609_v22 = vsel %vm14696_vm6, %v8604_v33, %v8608_v26  ;;  %v8641_v21 = vor.u32 %v8640_v41, %v8637_v43  ;;  %v8651_v2 = vor.u32 %v8650_v4, %v8646_v45  ;;  %v8683_v59 = vshrl.u32 %v8319_v60, 16 }
 0x54f   : > { %13475 = vmatmul.mubr.bf16.gmra.mrb[16].mxu1 %v12143_v42  ;;  %v8633_v42 = vsel %vm14696_vm6, %v8628_v23, %v8632_v54  ;;  %v8686_v25 = vshll.u32 %v8319_v60, 16  ;;  %v8692_v40 = vshll.u32 %v14490_v8, 16  ;;  %v8696_v47 = vshrl.u32 %v14490_v8, 16  ;;  %v14494_v60 = vld [vmem:[#allocation3 + $0xc8] sm:$0x1] }
 0x550   : > { %13478 = vmatprep.mubr.bf16.mxu1 %v12144_v29  ;;  %v8665_v36 = vor.u32 %v8664_v49, %v8661_v48  ;;  %v8675_v32 = vor.u32 %v8674_v63, %v8670_v56  ;;  %v12145_v18 = vcombine.low %v8599_v5, %v8609_v22  ;;  %v8654_v34 = vshll.u32 %v14491_v61, 16  ;;  %v14493_v49 = vld [vmem:[#allocation3 + $0x10] sm:$0xf]  ;;  %v14495_v8 = vld [vmem:[#allocation3 + $0x14] sm:$0x1] }
 0x551   : > { %v12146_v46 = vcombine.low %v8623_v7, %v8633_v42  ;;  %v8642_v44 = vrot.slane %v8641_v21, 4  ;;  %v8652_v3 = vrot.slane %v8651_v2, 4  ;;  %v8678_v52 = vshll.u32 %v14492_v24, 16  ;;  %v14496_v24 = vld [vmem:[#allocation3 + $0x20] sm:$0x1] }
 0x552   : > { %v8685_v17 = vrot.slane %v8683_v59, 4  ;;  %v8688_v6 = vrot.slane %v8686_v25, 5  ;;  %v8694_v15 = vrot.slane %v8692_v40, 5  ;;  %v8698_v14 = vrot.slane %v8696_v47, 4 }
 0x553   : > { %v8666_v33 = vrot.slane %v8665_v36, 4  ;;  %v8676_v39 = vrot.slane %v8675_v32, 4  ;;  %v8656_v43 = vrot.slane %v8654_v34, 5  ;;  %v8680_v23 = vrot.slane %v8678_v52, 5  ;;  %v9029_v34 = vld [vmem:[#allocation3 + $0x18] sm:$0xe] }
 0x554   : > { %v8647_v41 = vsel %vm14696_vm6, %v8642_v44, %v8646_v45  ;;  %v8689_v29 = vor.u32 %v8688_v6, %v8685_v17  ;;  %v8699_v26 = vor.u32 %v8698_v14, %v8694_v15  ;;  %v9094_v63 = vrot.slane %v14493_v49, 5  ;;  %v9028_v45 = vld [vmem:[#allocation3 + $0xc] sm:$0xe]  ;;  %v19639_v49 = vld [vmem:[#allocation17_spill] sm:$0xff] }
 0x555   : > { %v8657_v4 = vsel %vm14696_vm6, %v8652_v3, %v8656_v43  ;;  %v8671_v54 = vsel %vm14696_vm6, %v8666_v33, %v8670_v56  ;;  %v8681_v48 = vsel %vm14696_vm6, %v8676_v39, %v8680_v23  ;;  %v8702_v5 = vshll.u32 %v14494_v60, 16  ;;  %v14405_v33 = vld [vmem:[%s19269_s2 + $0x190] sm:$0xff]   ;;  %v14406_v39 = vld [vmem:[%s19269_s2 + $0x198] sm:$0xff]   ;;  %v19630_v43 = vld [vmem:[#allocation10_spill] sm:$0xff] }
 0x556   : > { %v12147_v22 = vcombine.low %v8647_v41, %v8657_v4  ;;  %v12148_v7 = vcombine.low %v8671_v54, %v8681_v48  ;;  %v8690_v42 = vrot.slane %v8689_v29, 4  ;;  %v8700_v21 = vrot.slane %v8699_v26, 4  ;;  %v19631_v23 = vld [vmem:[#allocation11_spill] sm:$0xff]  ;;  %v19633_v4 = vld [vmem:[#allocation12_spill] sm:$0xff]  ;;  %v19636_v26 = vld [vmem:[#allocation14_spill] sm:$0xff] }
 0x557   : > { %13479 = vmatmul.mubr.bf16.gmra.mrb[20].mxu1 %v12145_v18  ;;  %v9096_v2 = vrot.slane %v9094_v63, 4  ;;  %v8704_v59 = vrot.slane %v8702_v5, 5  ;;  %v12158_v25 = vrot.slane %v9028_v45, 9  ;;  %v9097_v40 = vrot.slane %v14495_v8, 5  ;;  %v14408_v29 = vld [vmem:[%s19269_s2 + $0x1a8] sm:$0xff]   ;;  %v19637_v54 = vld [vmem:[#allocation16_spill] sm:$0xff] }
 0x558   : > { %13482 = vmatprep.mubr.bf16.mxu1 %v12146_v46  ;;  %v8695_v56 = vsel %vm14696_vm6, %v8690_v42, %v8694_v15  ;;  %v9101_v36 = vrot.slane %v17936_v51, 5  ;;  %v12159_v3 = vrot.slane %v9029_v34, 9  ;;  %v9104_v52 = vrot.slane %v14496_v24, 5  ;;  %v14404_v15 = vld [vmem:[%s19269_s2 + $0x188] sm:$0xff]   ;;  %v14409_v5 = vld [vmem:[%s19269_s2 + $0x1b0] sm:$0xff]   ;;  %v19643_v42 = vld [vmem:[#allocation21_spill] sm:$0xff] }
 0x559   : > { %v8705_v47 = vsel %vm14696_vm6, %v8700_v21, %v8704_v59  ;;  %v9098_v32 = vsel %vm15076_vm13, %v9096_v2, %v9097_v40  ;;  %v9095_v61 = vsel %vm15076_vm13, %v12158_v25, %v9094_v63  ;;  %v19629_v14 = vcombine.low %v17722_v28, %v17726_v50  ;;  %v19634_v28 = vld [vmem:[#allocation13_spill] sm:$0xff]  ;;  %v19640_v63 = vld [vmem:[#allocation18_spill] sm:$0xff]  ;;  %v19646_v2 = vld [vmem:[#allocation23_spill] sm:$0xff] }
 0x55a   : > { %v12149_v18 = vcombine.low %v8695_v56, %v8705_v47  ;;  %v12190_v46 = vcombine.low %v9095_v61, %v9098_v32  ;;  %v9103_v44 = vrot.slane %v9101_v36, 4  ;;  %v9102_v51 = vsel %vm15076_vm13, %v12159_v3, %v9101_v36  ;;  %v19645_v45 = vld [vmem:[#allocation22_spill] sm:$0xff]  ;;  %v19648_v8 = vld [vmem:[#allocation24_spill] sm:$0xff]  ;;  %v19649_v40 = vld [vmem:[#allocation27_spill] sm:$0xff] }
 0x55b   : > { %v19632_v41 = vcombine.low %v19630_v43, %v19631_v23  ;;  %v19635_v50 = vcombine.low %v19633_v4, %v19634_v28  ;;  %v19638_v48 = vcombine.low %v19636_v26, %v19637_v54  ;;  %v19641_v60 = vcombine.low %v19639_v49, %v19640_v63  ;;  %v14413_v25 = vld [vmem:[%s19269_s2 + $0x1c0] sm:$0xff]   ;;  %v19651_v47 = vld [vmem:[#allocation28_spill] sm:$0xff]  ;;  %v19652_v36 = vld [vmem:[#allocation29_spill] sm:$0xff] }
 0x55c   : > { %v9105_v17 = vsel %vm15076_vm13, %v9103_v44, %v9104_v52  ;;  %v19647_v59 = vcombine.low %v19645_v45, %v19646_v2  ;;  %v19650_v56 = vcombine.low %v19648_v8, %v19649_v40  ;;  %v19653_v32 = vcombine.low %v19651_v47, %v19652_v36  ;;  %v19655_v61 = vld [vmem:[#allocation5_spill] sm:$0xff]  ;;  %v19658_v44 = vld [vmem:[#allocation6_spill] sm:$0xff]  ;;  %v19660_v24 = vld [vmem:[#allocation20_spill] sm:$0xff] }
 0x55d   : > { %v12191_v6 = vcombine.low %v9102_v51, %v9105_v17  ;;  %v19661_v52 = vld [vmem:[#allocation4_spill] sm:$0xff]  ;;  %v14412_v23 = vld [vmem:[#allocation3 + $0x24] sm:$0xff]   ;;  %v14414_v4 = vld [vmem:[#allocation3 + $0x30] sm:$0xff]  }
 0x55e   : > { %v19662_v17 = vcombine.low %v19660_v24, %v19661_v52  ;;  %v19663_v51 = vld [vmem:[#allocation8_spill] sm:$0xff]  ;;  %v14425_v26 = vld [vmem:[%s19269_s2 + $0x1e0] sm:$0xff]   ;;  %v14420_v49 = vld [vmem:[#allocation3 + $0x60] sm:$0xff]  }
 0x55f   : > { %13483 = vmatmul.mubr.bf16.gmra.mrb[24].mxu1 %v12147_v22  ;;  %v14410_v22 = vld [vmem:[%s19269_s2 + $0x1b8] sm:$0xff]   ;;  %v14419_v28 = vld [vmem:[%s19269_s2 + $0x1d0] sm:$0xff]  }
 0x560   : > { %13486 = vmatprep.mubr.bf16.mxu1 %v12148_v7  ;;  %v19642_v7 = vld [vmem:[#allocation19_spill] sm:$0xff]  ;;  %v14431_v63 = vld [vmem:[%s19269_s2 + $0x1f0] sm:$0xff]   ;;  %v19669_v2 = vld [vmem:[#allocation9_spill] sm:$0xff] }
 0x561   : > { %v19644_v21 = vcombine.low %v19642_v7, %v19643_v42  ;;  %v14418_v54 = vld [vmem:[#allocation3 + $0x54] sm:$0xff]   ;;  %v18539_v42 = vld [vmem:[%s19269_s2 + $0x200] sm:$0xff]   ;;  %v9916_v8 = vld [vmem:[#allocation3 + $0x24] sm:$0xf] }
 0x562   : > { %v9913_v7 = vld [vmem:[#allocation3 + $0x18] sm:$0xf]  ;;  %v14424_v40 = vld [vmem:[#allocation3 + $0x84] sm:$0xff]  }
 0x563   : > { %v9965_v45 = vshll.u32 %v9913_v7, 16 }
 0x565   : > { %v9967_v36 = vrot.slane %v9965_v45, 5 }
 0x567   : > { %13487 = vmatmul.mubr.bf16.gmra.mrb[28].mxu1 %v12149_v18  ;;  %v19654_v18 = vld [vmem:[#allocation30_spill] sm:$0xff] }
 0x568   : > { %13506 = vmatprep.mubr.bf16.mxu1 %v12190_v46  ;;  %v19656_v34 = vcombine.low %v19654_v18, %v19655_v61  ;;  %v19657_v46 = vld [vmem:[#allocation7_spill] sm:$0xff]  ;;  %v9986_v61 = vshrl.u32 %v9916_v8, 16 }
 0x569   : > { %v19659_v3 = vcombine.low %v19657_v46, %v19658_v44  ;;  %v19670_v46 = vld [vmem:[#allocation32_spill] sm:$0xff] }
 0x56a   : > { %v9995_v44 = vshll.u32 %v19670_v46, 16 }
 0x56f   : > { %13507 = vmatmul.mubr.bf16.vlgmr.msra.gmra.mrb[0].mxu1 %v12191_v6  ;;  %v19664_v6 = vld [vmem:[#allocation15_spill] sm:$0xff] }
 0x570   : > { %13510 = vmatprep.mubr.bf16.mxu1 %v19629_v14  ;;  %13539 = vmatpush3.bf16.msra.mxu1 %v18409_v37  ;;  %v14407_v37 = vld [vmem:[%s19269_s2 + $0x1a0] sm:$0xff]   ;;  %v14411_v14 = vld [vmem:[#allocation3 + $0x18] sm:$0xff]  }
 0x571   : > { %13540 = vmatprep.subr.bf16.mxu1 %v14404_v15 }
 0x574   : > { %13541 = vmatpush3.bf16.msra.mxu1 %v14404_v15  ;;  %v19665_v15 = vcombine.low %v19663_v51, %v19664_v6  ;;  %v9919_v6 = vld [vmem:[#allocation3 + $0x30] sm:$0xf] }
 0x575   : > { %13542 = vmatprep.subr.bf16.mxu1 %v14405_v33 }
 0x577   : > { %13511 = vmatmul.mubr.bf16.gmra.mrb[4].mxu1 %v19632_v41  ;;  %v14416_v41 = vld [vmem:[%s19269_s2 + $0x1c8] sm:$0xff]  }
 0x578   : > { %13514 = vmatprep.mubr.bf16.mxu1 %v19635_v50  ;;  %13543 = vmatpush3.bf16.msra.mxu1 %v14405_v33  ;;  %v19666_v33 = vld [vmem:[#allocation25_spill] sm:$0xff] }
 0x579   : > { %13544 = vmatprep.subr.bf16.mxu1 %v14406_v39  ;;  %v14415_v50 = vld [vmem:[#allocation3 + $0x3c] sm:$0xff]  }
 0x57c   : > { %13545 = vmatpush3.bf16.msra.mxu1 %v14406_v39  ;;  %v19667_v39 = vld [vmem:[#allocation26_spill] sm:$0xff] }
 0x57d   : > { %13546 = vmatprep.subr.bf16.mxu1 %v14407_v37  ;;  %v19668_v43 = vcombine.low %v19666_v33, %v19667_v39  ;;  %v14427_v33 = vld [vmem:[#allocation3 + $0x9c] sm:$0xff]   ;;  %v19671_v39 = vld [vmem:[#allocation31_spill] sm:$0xff] }
 0x57f   : > { %13515 = vmatmul.mubr.bf16.gmra.mrb[8].mxu1 %v19638_v48  ;;  %v14428_v48 = vld [vmem:[%s19269_s2 + $0x1e8] sm:$0xff]  }
 0x580   : > { %13518 = vmatprep.mubr.bf16.mxu1 %v19641_v60  ;;  %13547 = vmatpush3.bf16.msra.mxu1 %v14407_v37  ;;  %v14422_v37 = vld [vmem:[%s19269_s2 + $0x1d8] sm:$0xff]   ;;  %v14421_v60 = vld [vmem:[#allocation3 + $0x6c] sm:$0xff]  }
 0x581   : > { %13548 = vmatprep.subr.bf16.mxu1 %v14408_v29 }
 0x584   : > { %13549 = vmatpush3.bf16.msra.mxu1 %v14408_v29  ;;  %v14417_v29 = vld [vmem:[#allocation3 + $0x48] sm:$0xff]  }
 0x585   : > { %13550 = vmatprep.subr.bf16.mxu1 %v14409_v5 }
 0x587   : > { %13519 = vmatmul.mubr.bf16.gmra.mrb[12].mxu1 %v19644_v21  ;;  %v9962_v21 = vshrl.u32 %v9913_v7, 16 }
 0x588   : > { %13522 = vmatprep.mubr.bf16.mxu1 %v19647_v59  ;;  %13551 = vmatpush3.bf16.msra.mxu1 %v14409_v5  ;;  %v14434_v5 = vld [vmem:[%s19269_s2 + $0x1f8] sm:$0xff]   ;;  %v9971_v59 = vshll.u32 %v19669_v2, 16 }
 0x589   : > { %13552 = vmatprep.subr.bf16.mxu1 %v14410_v22  ;;  %v9964_v47 = vrot.slane %v9962_v21, 4 }
 0x58b   : > { %v9968_v24 = vor.u32 %v9967_v36, %v9964_v47  ;;  %v14430_v36 = vld [vmem:[#allocation3 + $0xb4] sm:$0xff]  }
 0x58c   : > { %13553 = vmatpush3.bf16.msra.mxu1 %v14410_v22  ;;  %v14423_v22 = vld [vmem:[#allocation3 + $0x78] sm:$0xff]  }
 0x58d   : > { %13586 = vmatprep.subr.bf16.mxu1 %v14413_v25 }
 0x58f   : > { %13523 = vmatmul.mubr.bf16.gmra.mrb[16].mxu1 %v19650_v56  ;;  %v14426_v56 = vld [vmem:[#allocation3 + $0x90] sm:$0xff]  }
 0x590   : > { %13526 = vmatprep.mubr.bf16.mxu1 %v19653_v32  ;;  %v9973_v32 = vrot.slane %v9971_v59, 5 }
 0x597   : > { %13527 = vmatmul.mubr.bf16.gmra.mrb[20].mxu1 %v19656_v34  ;;  %v9989_v34 = vshll.u32 %v9916_v8, 16 }
 0x598   : > { %13530 = vmatprep.mubr.bf16.mxu1 %v19659_v3  ;;  %v9999_v3 = vshrl.u32 %v19670_v46, 16  ;;  %v19675_v46 = vld [vmem:[#allocation36_spill] sm:$0xff] }
 0x599   : > { %v9991_v51 = vrot.slane %v9989_v34, 5 }
 0x59f   : > { %13531 = vmatmul.mubr.bf16.gmra.mrb[24].mxu1 %v19662_v17  ;;  %v9988_v17 = vrot.slane %v9986_v61, 4 }
 0x5a0   : > { %13534 = vmatprep.mubr.bf16.mxu1 %v19665_v15  ;;  %v18546_v15 = vrot.slane %v9995_v44, 5  ;;  %v10043_v44 = vshll.u32 %v19675_v46, 16 }
 0x5a7   : > { %13535 = vmatmul.mubr.bf16.gmra.mrb[28].mxu1 %v19668_v43  ;;  %v9981_v43 = vshll.u32 %v19671_v39, 16 }
 0x5a8   : > { %13554 = vmatprep.mubr.bf16.mxu1 %v14411_v14  ;;  %v10001_v14 = vrot.slane %v9999_v3, 4  ;;  %v14432_v3 = vld [vmem:[#allocation3 + $0xc0] sm:$0xff]  }
 0x5af   : > { %13555 = vmatmul.mubr.bf16.vlgmr.msra.gmra.mrb[0].mxu1 %v14412_v23  ;;  %v14429_v23 = vld [vmem:[#allocation3 + $0xa8] sm:$0xff]  }
 0x5b0   : > { %13558 = vmatprep.mubr.bf16.mxu1 %v14414_v4  ;;  %13587 = vmatpush3.bf16.msra.mxu1 %v14413_v25  ;;  %v9975_v25 = vshrl.u32 %v19669_v2, 16  ;;  %v10010_v4 = vshrl.u32 %v9919_v6, 16 }
 0x5b1   : > { %13588 = vmatprep.subr.bf16.mxu1 %v14416_v41 }
 0x5b2   : > { %v9977_v18 = vrot.slane %v9975_v25, 4  ;;  %v10012_v7 = vrot.slane %v10010_v4, 4  ;;  %v9925_v25 = vld [vmem:[#allocation3 + $0x48] sm:$0xf] }
 0x5b4   : > { %13589 = vmatpush3.bf16.msra.mxu1 %v14416_v41  ;;  %v9978_v52 = vor.u32 %v9977_v18, %v9973_v32  ;;  %v9969_v41 = vrot.slane %v9968_v24, 4  ;;  %v19674_v18 = vld [vmem:[#allocation35_spill] sm:$0xff] }
 0x5b5   : > { %13590 = vmatprep.subr.bf16.mxu1 %v14419_v28  ;;  %v10029_v61 = vshll.u32 %v19674_v18, 16 }
 0x5b7   : > { %13559 = vmatmul.mubr.bf16.gmra.mrb[4].mxu1 %v14415_v50  ;;  %v9992_v50 = vor.u32 %v9991_v51, %v9988_v17  ;;  %v10061_v17 = vshll.u32 %v9925_v25, 16  ;;  %v19676_v51 = vld [vmem:[#allocation38_spill] sm:$0xff] }
 0x5b8   : > { %13562 = vmatprep.mubr.bf16.mxu1 %v14417_v29  ;;  %13591 = vmatpush3.bf16.msra.mxu1 %v14419_v28  ;;  %v9979_v28 = vrot.slane %v9978_v52, 4  ;;  %v10002_v29 = vor.u32 %v10001_v14, %v18546_v15  ;;  %v10058_v52 = vshrl.u32 %v9925_v25, 16  ;;  %v10031_v25 = vrot.slane %v10029_v61, 5 }
 0x5b9   : > { %13592 = vmatprep.subr.bf16.mxu1 %v14422_v37  ;;  %v9993_v45 = vrot.slane %v9992_v50, 4  ;;  %v9928_v50 = vld [vmem:[#allocation3 + $0x54] sm:$0xf] }
 0x5ba   : > { %v10003_v8 = vrot.slane %v10002_v29, 4 }
 0x5bb   : > { %v9998_v14 = vsel %vm14696_vm6, %v9993_v45, %v18546_v15  ;;  %v10082_v45 = vshrl.u32 %v9928_v50, 16 }
 0x5bc   : > { %13593 = vmatpush3.bf16.msra.mxu1 %v14422_v37  ;;  %v10013_v37 = vshll.u32 %v9919_v6, 16  ;;  %v10067_v6 = vshll.u32 %v19676_v51, 16 }
 0x5bd   : > { %13594 = vmatprep.subr.bf16.mxu1 %v14425_v26 }
 0x5be   : > { %v10015_v2 = vrot.slane %v10013_v37, 5  ;;  %v10682_v37 = vld [vmem:[#allocation3 + $0xcc] sm:$0xe] }
 0x5bf   : > { %13563 = vmatmul.mubr.bf16.gmra.mrb[8].mxu1 %v14418_v54 }
 0x5c0   : > { %13566 = vmatprep.mubr.bf16.mxu1 %v14420_v49  ;;  %13595 = vmatpush3.bf16.msra.mxu1 %v14425_v26  ;;  %v19672_v26 = vld [vmem:[#allocation34_spill] sm:$0xff] }
 0x5c1   : > { %13596 = vmatprep.subr.bf16.mxu1 %v14428_v48  ;;  %v10005_v54 = vshll.u32 %v19672_v26, 16 }
 0x5c4   : > { %13597 = vmatpush3.bf16.msra.mxu1 %v14428_v48  ;;  %v19673_v48 = vld [vmem:[#allocation33_spill] sm:$0xff] }
 0x5c5   : > { %13598 = vmatprep.subr.bf16.mxu1 %v14431_v63  ;;  %v10019_v49 = vshll.u32 %v19673_v48, 16 }
 0x5c7   : > { %13567 = vmatmul.mubr.bf16.gmra.mrb[12].mxu1 %v14421_v60  ;;  %v9922_v60 = vld [vmem:[#allocation3 + $0x3c] sm:$0xf] }
 0x5c8   : > { %13570 = vmatprep.mubr.bf16.mxu1 %v14423_v22  ;;  %13599 = vmatpush3.bf16.msra.mxu1 %v14431_v63  ;;  %v10023_v63 = vshrl.u32 %v19673_v48, 16  ;;  %v9974_v22 = vsel %vm14696_vm6, %v9969_v41, %v9973_v32  ;;  %v10034_v59 = vshrl.u32 %v9922_v60, 16  ;;  %v10037_v34 = vshll.u32 %v9922_v60, 16  ;;  %v18569_v41 = vld [vmem:[#allocation3 + $0xd4] sm:$0x1] }
 0x5c9   : > { %13600 = vmatprep.subr.bf16.mxu1 %v14434_v5  ;;  %v10047_v32 = vshrl.u32 %v19675_v46, 16  ;;  %v10841_v15 = vrot.slane %v18569_v41, 5  ;;  %v10063_v60 = vrot.slane %v10061_v17, 5  ;;  %v19678_v46 = vld [vmem:[#allocation37_spill] sm:$0xff] }
 0x5ca   : > { %v10025_v47 = vrot.slane %v10023_v63, 4  ;;  %v10036_v39 = vrot.slane %v10034_v59, 4  ;;  %v10039_v26 = vrot.slane %v10037_v34, 5  ;;  %v10060_v63 = vrot.slane %v10058_v52, 4 }
 0x5cb   : > { %v10049_v48 = vrot.slane %v10047_v32, 4  ;;  %v9931_v32 = vld [vmem:[#allocation3 + $0x60] sm:$0xf] }
 0x5cc   : > { %13601 = vmatpush3.bf16.msra.mxu1 %v14434_v5  ;;  %v9983_v5 = vrot.slane %v9981_v43, 5  ;;  %v10071_v43 = vshrl.u32 %v19676_v51, 16  ;;  %v10040_v17 = vor.u32 %v10039_v26, %v10036_v39  ;;  %v19679_v51 = vld [vmem:[#allocation41_spill] sm:$0xff] }
 0x5cd   : > { %13634 = vmatprep.subr.bf16.mxu1 %v18539_v42 }
 0x5ce   : > { %v9984_v21 = vsel %vm14696_vm6, %v9979_v28, %v9983_v5  ;;  %v18578_v5 = vrot.slane %v10067_v6, 5  ;;  %v10077_v6 = vshll.u32 %v19679_v51, 16  ;;  %v9937_v51 = vld [vmem:[#allocation3 + $0x78] sm:$0xf] }
 0x5cf   : > { %13571 = vmatmul.mubr.bf16.gmra.mrb[16].mxu1 %v14424_v40  ;;  %v10007_v40 = vrot.slane %v10005_v54, 5  ;;  %v12270_v24 = vcombine.low %v9974_v22, %v9984_v21  ;;  %v18576_v54 = vrot.slane %v10043_v44, 5  ;;  %v10073_v21 = vrot.slane %v10071_v43, 4 }
 0x5d0   : > { %13574 = vmatprep.mubr.bf16.mxu1 %v14426_v56  ;;  %v18557_v56 = vrot.slane %v10019_v49, 5  ;;  %v12309_v49 = vrot.slane %v10682_v37, 9  ;;  %v10053_v44 = vshll.u32 %v19678_v46, 16  ;;  %v10064_v43 = vor.u32 %v10063_v60, %v10060_v63 }
 0x5d1   : > { %v10008_v4 = vsel %vm14696_vm6, %v10003_v8, %v10007_v40  ;;  %v19677_v8 = vld [vmem:[#allocation42_spill] sm:$0xff]  ;;  %v10050_v61 = vor.u32 %v10049_v48, %v18576_v54  ;;  %v10074_v11 = vor.u32 %v10073_v21, %v18578_v5  ;;  %v10041_v60 = vrot.slane %v10040_v17, 4 }
 0x5d2   : > { %v10026_v28 = vor.u32 %v10025_v47, %v18557_v56  ;;  %v10091_v40 = vshll.u32 %v19677_v8, 16  ;;  %v10095_v47 = vshrl.u32 %v19677_v8, 16  ;;  %v12271_v18 = vcombine.low %v9998_v14, %v10008_v4 }
 0x5d3   : > { %v10106_v4 = vshrl.u32 %v9931_v32, 16  ;;  %v10075_v21 = vrot.slane %v10074_v11, 4 }
 0x5d4   : > { %v10027_v52 = vrot.slane %v10026_v28, 4  ;;  %v18596_v14 = vrot.slane %v10091_v40, 5  ;;  %v10055_v28 = vrot.slane %v10053_v44, 5 }
 0x5d6   : > { %v10032_v63 = vsel %vm14696_vm6, %v10027_v52, %v10031_v25 }
 0x5d7   : > { %13575 = vmatmul.mubr.bf16.gmra.mrb[20].mxu1 %v14427_v33  ;;  %v10016_v33 = vor.u32 %v10015_v2, %v10012_v7  ;;  %v14433_v7 = vld [vmem:[#allocation3 + $0xcc] sm:$0xff]   ;;  %v10085_v2 = vshll.u32 %v9928_v50, 16  ;;  %v10084_v50 = vrot.slane %v10082_v45, 4 }
 0x5d8   : > { %13578 = vmatprep.mubr.bf16.mxu1 %v14429_v23  ;;  %v18567_v23 = vld [vmem:[#allocation3 + $0xd0] sm:$0xf] }
 0x5d9   : > { %v10838_v29 = vrot.slane %v18567_v23, 5  ;;  %v10017_v34 = vrot.slane %v10016_v33, 4  ;;  %v10087_v37 = vrot.slane %v10085_v2, 5  ;;  %v10097_v33 = vrot.slane %v10095_v47, 4 }
 0x5da   : > { %v10101_v2 = vshll.u32 %v18150_v1, 16  ;;  %v10046_v1 = vsel %vm14696_vm6, %v10041_v60, %v18576_v54 }
 0x5db   : > { %v10840_v22 = vrot.slane %v10838_v29, 4  ;;  %v18582_v59 = vsel %vm15076_vm13, %v12309_v49, %v10838_v29  ;;  %v10109_v29 = vshll.u32 %v9931_v32, 16  ;;  %v10022_v39 = vsel %vm14696_vm6, %v10017_v34, %v18557_v56  ;;  %v9934_v49 = vld [vmem:[#allocation3 + $0x6c] sm:$0xf]  ;;  %v14436_v34 = vld [vmem:[%s19269_s2 + $0x208] sm:$0xff]  }
 0x5dc   : > { %v10088_v45 = vor.u32 %v10087_v37, %v10084_v50  ;;  %v10098_v8 = vor.u32 %v10097_v33, %v18596_v14  ;;  %v10108_v56 = vrot.slane %v10106_v4, 4  ;;  %v10130_v47 = vshrl.u32 %v9934_v49, 16 }
 0x5dd   : > { %v10111_v40 = vrot.slane %v10109_v29, 5  ;;  %v10133_v44 = vshll.u32 %v9934_v49, 16  ;;  %v10139_v32 = vshll.u32 %v18174_v19, 16  ;;  %v12272_v52 = vcombine.low %v10022_v39, %v10032_v63 }
 0x5de   : > { %v18624_v11 = vrot.slane %v10088_v45, 4  ;;  %v18626_v50 = vrot.slane %v10101_v2, 5  ;;  %v18629_v54 = vrot.slane %v10098_v8, 4  ;;  %v9940_v45 = vld [vmem:[#allocation3 + $0x84] sm:$0xf] }
 0x5df   : > { %13579 = vmatmul.mubr.bf16.gmra.mrb[24].mxu1 %v14430_v36  ;;  %v18588_v36 = vsel %vm15076_vm13, %v10840_v22, %v10841_v15  ;;  %v19680_v15 = vld [vmem:[#allocation43_spill] sm:$0xff]  ;;  %v10079_v22 = vrot.slane %v10077_v6, 5  ;;  %v10112_v37 = vor.u32 %v10111_v40, %v10108_v56  ;;  %v10135_v29 = vrot.slane %v10133_v44, 5 }
 0x5e0   : > { %13582 = vmatprep.mubr.bf16.mxu1 %v14432_v3  ;;  %v12341_v3 = vcombine.low %v18582_v59, %v18588_v36  ;;  %v10115_v26 = vshll.u32 %v19680_v15, 16  ;;  %v10119_v48 = vshrl.u32 %v19680_v15, 16  ;;  %v18635_v39 = vrot.slane %v10139_v32, 5  ;;  %v14499_v56 = vld [vmem:[#allocation3 + $0x74] sm:$0x1] }
 0x5e1   : > { %v10149_v40 = vshll.u32 %v14499_v56, 16  ;;  %v9946_v56 = vld [vmem:[#allocation3 + $0x9c] sm:$0xf] }
 0x5e2   : > { %v18610_v46 = vrot.slane %v10115_v26, 5  ;;  %v10121_v25 = vrot.slane %v10119_v48, 4  ;;  %v10157_v26 = vshll.u32 %v9937_v51, 16 }
 0x5e4   : > { %v10122_v4 = vor.u32 %v10121_v25, %v18610_v46  ;;  %v9943_v25 = vld [vmem:[#allocation3 + $0x90] sm:$0xf]  ;;  %v10159_v44 = vrot.slane %v10157_v26, 5  ;;  %v14502_v26 = vld [vmem:[#allocation3 + $0x80] sm:$0x1] }
 0x5e6   : > { %v10123_v2 = vrot.slane %v10122_v4, 4  ;;  %v10151_v4 = vrot.slane %v10149_v40, 5  ;;  %v14440_v40 = vld [vmem:[%s19269_s2 + $0x228] sm:$0xff]  }
 0x5e7   : > { %13583 = vmatmul.mubr.bf16.gmra.mrb[28].mxu1 %v14433_v7  ;;  %v10065_v7 = vrot.slane %v10064_v43, 4  ;;  %v10080_v43 = vsel %vm14696_vm6, %v10075_v21, %v10079_v22  ;;  %v10104_v22 = vsel %vm14696_vm6, %v18629_v54, %v18626_v50  ;;  %v14501_v50 = vld [vmem:[#allocation3 + $0x94] sm:$0xf] }
 0x5e8   : > { %13602 = vmatprep.mubr.bf16.mxu1 %v12270_v24  ;;  %v10051_v24 = vrot.slane %v10050_v61, 4  ;;  %v10143_v61 = vshrl.u32 %v18174_v19, 16  ;;  %v14497_v19 = vld [vmem:[#allocation3 + $0x68] sm:$0x1]  ;;  %v10211_v54 = vshll.u32 %v14501_v50, 16 }
 0x5e9   : > { %v10070_v6 = vsel %vm14696_vm6, %v10065_v7, %v18578_v5  ;;  %v10125_v33 = vshll.u32 %v14497_v19, 16  ;;  %v14437_v5 = vld [vmem:[%s19269_s2 + $0x210] sm:$0xff]   ;;  %v10113_v7 = vrot.slane %v10112_v37, 4  ;;  %v10215_v37 = vshrl.u32 %v14501_v50, 16 }
 0x5ea   : > { %v10056_v17 = vsel %vm14696_vm6, %v10051_v24, %v10055_v28  ;;  %v10154_v28 = vshrl.u32 %v9937_v51, 16  ;;  %v10145_v15 = vrot.slane %v10143_v61, 4  ;;  %v12274_v60 = vcombine.low %v10070_v6, %v10080_v43  ;;  %v14500_v61 = vld [vmem:[#allocation3 + $0x88] sm:$0xf] }
 0x5eb   : > { %v12273_v63 = vcombine.low %v10046_v1, %v10056_v17  ;;  %v10094_v24 = vsel %vm14696_vm6, %v18624_v11, %v18596_v14  ;;  %v10127_v21 = vrot.slane %v10125_v33, 5  ;;  %v10178_v1 = vshrl.u32 %v9940_v45, 16 }
 0x5ec   : > { %v10146_v14 = vor.u32 %v10145_v15, %v18635_v39  ;;  %v10181_v17 = vshll.u32 %v9940_v45, 16  ;;  %v10187_v51 = vshll.u32 %v14500_v61, 16  ;;  %v10191_v6 = vshrl.u32 %v14500_v61, 16 }
 0x5ed   : > { %v10202_v43 = vshrl.u32 %v9943_v25, 16  ;;  %v10205_v11 = vshll.u32 %v9943_v25, 16  ;;  %v10118_v19 = vsel %vm14696_vm6, %v10113_v7, %v18610_v46  ;;  %v10128_v33 = vsel %vm14696_vm6, %v10123_v2, %v10127_v21 }
 0x5ee   : > { %v10193_v46 = vrot.slane %v10191_v6, 4  ;;  %v18662_v21 = vrot.slane %v10211_v54, 5  ;;  %v10217_v45 = vrot.slane %v10215_v37, 4  ;;  %v12275_v2 = vcombine.low %v10094_v24, %v10104_v22 }
 0x5ef   : > { %13603 = vmatmul.mubr.bf16.vlgmr.msra.gmra.mrb[0].mxu1 %v12271_v18  ;;  %v10132_v18 = vrot.slane %v10130_v47, 4  ;;  %v14438_v47 = vld [vmem:[%s19269_s2 + $0x218] sm:$0xff]   ;;  %v10207_v7 = vrot.slane %v10205_v11, 5  ;;  %v10226_v6 = vshrl.u32 %v9946_v56, 16 }
 0x5f0   : > { %13606 = vmatprep.mubr.bf16.mxu1 %v12272_v52  ;;  %13635 = vmatpush3.bf16.msra.mxu1 %v18539_v42  ;;  %v14498_v42 = vld [vmem:[#allocation3 + $0x7c] sm:$0xf] }
 0x5f1   : > { %13636 = vmatprep.subr.bf16.mxu1 %v14436_v34  ;;  %v10163_v48 = vshll.u32 %v14498_v42, 16  ;;  %v10167_v49 = vshrl.u32 %v14498_v42, 16  ;;  %v10136_v8 = vor.u32 %v10135_v29, %v10132_v18  ;;  %v14439_v29 = vld [vmem:[%s19269_s2 + $0x220] sm:$0xff]   ;;  %v10173_v42 = vshll.u32 %v14502_v26, 16 }
 0x5f3   : > { %v18649_v32 = vrot.slane %v10163_v48, 5  ;;  %v10169_v52 = vrot.slane %v10167_v49, 4  ;;  %v10137_v18 = vrot.slane %v10136_v8, 4  ;;  %v10180_v48 = vrot.slane %v10178_v1, 4  ;;  %v14503_v1 = vld [vmem:[#allocation3 + $0x8c] sm:$0x1] }
 0x5f4   : > { %13637 = vmatpush3.bf16.msra.mxu1 %v14436_v34  ;;  %v10156_v34 = vrot.slane %v10154_v28, 4  ;;  %v10183_v49 = vrot.slane %v10181_v17, 5  ;;  %v12276_v8 = vcombine.low %v10118_v19, %v10128_v33  ;;  %v10197_v17 = vshll.u32 %v14503_v1, 16  ;;  %v14441_v19 = vld [vmem:[%s19269_s2 + $0x230] sm:$0xff]  }
 0x5f5   : > { %13638 = vmatprep.subr.bf16.mxu1 %v14437_v5  ;;  %v10170_v15 = vor.u32 %v10169_v52, %v18649_v32 }
 0x5f6   : > { %v10160_v28 = vor.u32 %v10159_v44, %v10156_v34  ;;  %v10142_v34 = vsel %vm14696_vm6, %v10137_v18, %v18635_v39  ;;  %v9949_v44 = vld [vmem:[#allocation3 + $0xa8] sm:$0xf]  ;;  %v10184_v24 = vor.u32 %v10183_v49, %v10180_v48  ;;  %v10229_v39 = vshll.u32 %v9946_v56, 16  ;;  %v14442_v56 = vld [vmem:[%s19269_s2 + $0x238] sm:$0xff]  }
 0x5f7   : > { %13607 = vmatmul.mubr.bf16.gmra.mrb[4].mxu1 %v12273_v63  ;;  %v18660_v63 = vrot.slane %v10187_v51, 5  ;;  %v10171_v52 = vrot.slane %v10170_v15, 4  ;;  %v10218_v51 = vor.u32 %v10217_v45, %v18662_v21  ;;  %v10250_v54 = vshrl.u32 %v9949_v44, 16 }
 0x5f8   : > { %13610 = vmatprep.mubr.bf16.mxu1 %v12274_v60  ;;  %13639 = vmatpush3.bf16.msra.mxu1 %v14437_v5  ;;  %v10147_v5 = vrot.slane %v10146_v14, 4  ;;  %v10204_v60 = vrot.slane %v10202_v43, 4  ;;  %v10161_v25 = vrot.slane %v10160_v28, 4  ;;  %v10175_v14 = vrot.slane %v10173_v42, 5  ;;  %v14504_v43 = vld [vmem:[#allocation3 + $0xa0] sm:$0xf] }
 0x5f9   : > { %13640 = vmatprep.subr.bf16.mxu1 %v14438_v47  ;;  %v10194_v22 = vor.u32 %v10193_v46, %v18660_v63  ;;  %v10235_v11 = vshll.u32 %v14504_v43, 16  ;;  %v10239_v50 = vshrl.u32 %v14504_v43, 16  ;;  %v10253_v37 = vshll.u32 %v9949_v44, 16  ;;  %v14506_v42 = vld [vmem:[#allocation3 + $0x98] sm:$0x1] }
 0x5fa   : > { %v10208_v61 = vor.u32 %v10207_v7, %v10204_v60  ;;  %v10166_v18 = vsel %vm14696_vm6, %v10161_v25, %v18649_v32  ;;  %v10176_v28 = vsel %vm14696_vm6, %v10171_v52, %v10175_v14  ;;  %v10185_v15 = vrot.slane %v10184_v24, 4  ;;  %v9952_v44 = vld [vmem:[#allocation3 + $0xb4] sm:$0xf] }
 0x5fb   : > { %v10195_v26 = vrot.slane %v10194_v22, 4  ;;  %v10221_v48 = vshll.u32 %v14506_v42, 16  ;;  %v10219_v46 = vrot.slane %v10218_v51, 4  ;;  %v10228_v60 = vrot.slane %v10226_v6, 4  ;;  %v9955_v51 = vld [vmem:[#allocation3 + $0xc0] sm:$0xf] }
 0x5fc   : > { %13641 = vmatpush3.bf16.msra.mxu1 %v14438_v47  ;;  %v10152_v47 = vsel %vm14696_vm6, %v10147_v5, %v10151_v4  ;;  %v14505_v4 = vld [vmem:[#allocation3 + $0xac] sm:$0xf]  ;;  %v10209_v49 = vrot.slane %v10208_v61, 4  ;;  %v10231_v7 = vrot.slane %v10229_v39, 5  ;;  %v18682_v45 = vrot.slane %v10235_v11, 5 }
 0x5fd   : > { %13642 = vmatprep.subr.bf16.mxu1 %v14439_v29  ;;  %v12277_v33 = vcombine.low %v10142_v34, %v10152_v47  ;;  %v10259_v5 = vshll.u32 %v14505_v4, 16  ;;  %v10255_v32 = vrot.slane %v10253_v37, 5  ;;  %v12278_v34 = vcombine.low %v10166_v18, %v10176_v28 }
 0x5fe   : > { %v10199_v47 = vrot.slane %v10197_v17, 5  ;;  %v10223_v52 = vrot.slane %v10221_v48, 5  ;;  %v10214_v22 = vsel %vm14696_vm6, %v10209_v49, %v18662_v21  ;;  %v10232_v1 = vor.u32 %v10231_v7, %v10228_v60  ;;  %v14507_v17 = vld [vmem:[#allocation3 + $0xa4] sm:$0x1]  ;;  %v14510_v49 = vld [vmem:[#allocation3 + $0xb0] sm:$0x1] }
 0x5ff   : > { %13611 = vmatmul.mubr.bf16.gmra.mrb[8].mxu1 %v12275_v2  ;;  %v10241_v2 = vrot.slane %v10239_v50, 4  ;;  %v18687_v25 = vrot.slane %v10259_v5, 5  ;;  %v10245_v61 = vshll.u32 %v14507_v17, 16  ;;  %v10274_v43 = vshrl.u32 %v9952_v44, 16  ;;  %v9958_v7 = vld [vmem:[#allocation3 + $0xcc] sm:$0xf] }
 0x600   : > { %13614 = vmatprep.mubr.bf16.mxu1 %v12276_v8  ;;  %13643 = vmatpush3.bf16.msra.mxu1 %v14439_v29  ;;  %v10263_v29 = vshrl.u32 %v14505_v4, 16  ;;  %v10252_v8 = vrot.slane %v10250_v54, 4  ;;  %v10200_v24 = vsel %vm14696_vm6, %v10195_v26, %v10199_v47  ;;  %v10224_v6 = vsel %vm14696_vm6, %v10219_v46, %v10223_v52  ;;  %v14508_v54 = vld [vmem:[#allocation3 + $0xb8] sm:$0xf]  ;;  %v14509_v4 = vld [vmem:[#allocation3 + $0xc4] sm:$0xf] }
 0x601   : > { %13644 = vmatprep.subr.bf16.mxu1 %v14440_v40  ;;  %v10242_v39 = vor.u32 %v10241_v2, %v18682_v45  ;;  %v10277_v50 = vshll.u32 %v9952_v44, 16  ;;  %v10283_v37 = vshll.u32 %v14508_v54, 16  ;;  %v10298_v21 = vshrl.u32 %v9955_v51, 16 }
 0x602   : > { %v10265_v14 = vrot.slane %v10263_v29, 4  ;;  %v10301_v18 = vshll.u32 %v9955_v51, 16  ;;  %v10307_v5 = vshll.u32 %v14509_v4, 16  ;;  %v10311_v29 = vshrl.u32 %v14509_v4, 16 }
 0x603   : > { %v12280_v28 = vcombine.low %v10214_v22, %v10224_v6  ;;  %v10247_v26 = vrot.slane %v10245_v61, 5  ;;  %v10243_v42 = vrot.slane %v10242_v39, 4  ;;  %v10269_v46 = vshll.u32 %v14510_v49, 16  ;;  %v14511_v39 = vld [vmem:[#allocation3 + $0xbc] sm:$0x1] }
 0x604   : > { %13645 = vmatpush3.bf16.msra.mxu1 %v14440_v40  ;;  %v10190_v40 = vsel %vm14696_vm6, %v10185_v15, %v18660_v63  ;;  %v10256_v63 = vor.u32 %v10255_v32, %v10252_v8  ;;  %v10266_v11 = vor.u32 %v10265_v14, %v18687_v25  ;;  %v10233_v15 = vrot.slane %v10232_v1, 4 }
 0x605   : > { %13646 = vmatprep.subr.bf16.mxu1 %v14441_v19  ;;  %v10276_v60 = vrot.slane %v10274_v43, 4  ;;  %v10279_v8 = vrot.slane %v10277_v50, 5  ;;  %v10285_v32 = vrot.slane %v10283_v37, 5  ;;  %v10300_v47 = vrot.slane %v10298_v21, 4 }
 0x606   : > { %v10257_v48 = vrot.slane %v10256_v63, 4  ;;  %v10267_v2 = vrot.slane %v10266_v11, 4  ;;  %v10303_v14 = vrot.slane %v10301_v18, 5  ;;  %v10309_v44 = vrot.slane %v10307_v5, 5  ;;  %v14512_v18 = vld [vmem:[#allocation3 + $0xc8] sm:$0x1] }
 0x607   : > { %13615 = vmatmul.mubr.bf16.gmra.mrb[12].mxu1 %v12277_v33  ;;  %v10287_v33 = vshrl.u32 %v14508_v54, 16  ;;  %v10313_v52 = vrot.slane %v10311_v29, 4  ;;  %v10335_v22 = vshrl.u32 %v18567_v23, 16  ;;  %v10238_v1 = vsel %vm14696_vm6, %v10233_v15, %v18682_v45 }
 0x608   : > { %13618 = vmatprep.mubr.bf16.mxu1 %v12278_v34  ;;  %13647 = vmatpush3.bf16.msra.mxu1 %v14441_v19  ;;  %v12279_v19 = vcombine.low %v10190_v40, %v10200_v24  ;;  %v10322_v40 = vshrl.u32 %v9958_v7, 16  ;;  %v10325_v24 = vshll.u32 %v9958_v7, 16  ;;  %v10271_v17 = vrot.slane %v10269_v46, 5 }
 0x609   : > { %13648 = vmatprep.subr.bf16.mxu1 %v14442_v56  ;;  %v10289_v34 = vrot.slane %v10287_v33, 4  ;;  %v10248_v61 = vsel %vm14696_vm6, %v10243_v42, %v10247_v26  ;;  %v10280_v51 = vor.u32 %v10279_v8, %v10276_v60  ;;  %v10293_v63 = vshll.u32 %v14511_v39, 16  ;;  %v19690_v39 = vld [vmem:[#allocation48_spill] sm:$0xff] }
 0x60a   : > { %v10262_v43 = vsel %vm14696_vm6, %v10257_v48, %v18687_v25  ;;  %v10272_v11 = vsel %vm14696_vm6, %v10267_v2, %v10271_v17  ;;  %v10314_v50 = vor.u32 %v10313_v52, %v10309_v44  ;;  %v10324_v54 = vrot.slane %v10322_v40, 4 }
 0x60b   : > { %v10290_v6 = vor.u32 %v10289_v34, %v10285_v32  ;;  %v10327_v37 = vrot.slane %v10325_v24, 5  ;;  %v10337_v33 = vrot.slane %v10335_v22, 4  ;;  %v12281_v21 = vcombine.low %v10238_v1, %v10248_v61  ;;  %v19681_v24 = vld [vmem:[#allocation39_spill] sm:$0xff]  ;;  %v19684_v22 = vld [vmem:[#allocation44_spill] sm:$0xff]  ;;  %v19685_v1 = vld [vmem:[#allocation45_spill] sm:$0xff] }
 0x60c   : > { %13649 = vmatpush3.bf16.msra.mxu1 %v14442_v56  ;;  %v10331_v56 = vshll.u32 %v18567_v23, 16  ;;  %v10304_v23 = vor.u32 %v10303_v14, %v10300_v47  ;;  %v10317_v4 = vshll.u32 %v14512_v18, 16  ;;  %v12282_v5 = vcombine.low %v10262_v43, %v10272_v11  ;;  %v19687_v61 = vld [vmem:[#allocation46_spill] sm:$0xff]  ;;  %v19694_v11 = vld [vmem:[#allocation51_spill] sm:$0xff]  ;;  %v19702_v18 = vld [vmem:[#allocation56_spill] sm:$0xff] }
 0x60d   : > { %v10281_v29 = vrot.slane %v10280_v51, 4  ;;  %v10315_v15 = vrot.slane %v10314_v50, 4  ;;  %v10295_v25 = vrot.slane %v10293_v63, 5  ;;  %v10328_v26 = vor.u32 %v10327_v37, %v10324_v54  ;;  %v19688_v51 = vld [vmem:[#allocation47_spill] sm:$0xff]  ;;  %v19691_v63 = vld [vmem:[#allocation49_spill] sm:$0xff]  ;;  %v19696_v50 = vld [vmem:[#allocation52_spill] sm:$0xff] }
 0x60e   : > { %v10333_v45 = vrot.slane %v10331_v56, 5  ;;  %v10341_v48 = vshll.u32 %v18569_v41, 16  ;;  %v10319_v49 = vrot.slane %v10317_v4, 5  ;;  %v19686_v17 = vcombine.low %v19684_v22, %v19685_v1  ;;  %v19697_v54 = vld [vmem:[#allocation53_spill] sm:$0xff] }
 0x60f   : > { %13619 = vmatmul.mubr.bf16.gmra.mrb[16].mxu1 %v12279_v19  ;;  %v10291_v19 = vrot.slane %v10290_v6, 4  ;;  %v10286_v46 = vsel %vm14696_vm6, %v10281_v29, %v10285_v32  ;;  %v10329_v8 = vrot.slane %v10328_v26, 4  ;;  %v19689_v6 = vcombine.low %v19687_v61, %v19688_v51  ;;  %v19703_v4 = vld [vmem:[#allocation57_spill] sm:$0xff]  ;;  %v19705_v29 = vld [vmem:[#allocation58_spill] sm:$0xff] }
 0x610   : > { %13622 = vmatprep.mubr.bf16.mxu1 %v12280_v28  ;;  %v10305_v28 = vrot.slane %v10304_v23, 4  ;;  %v10338_v42 = vor.u32 %v10337_v33, %v10333_v45  ;;  %v10320_v2 = vsel %vm14696_vm6, %v10315_v15, %v10319_v49  ;;  %v10343_v47 = vrot.slane %v10341_v48, 5  ;;  %v19700_v33 = vld [vmem:[#allocation55_spill] sm:$0xff] }
 0x611   : > { %v10296_v60 = vsel %vm14696_vm6, %v10291_v19, %v10295_v25  ;;  %v10334_v41 = vsel %vm14696_vm6, %v10329_v8, %v10333_v45  ;;  %v19692_v43 = vcombine.low %v19690_v39, %v19691_v63  ;;  %v19695_v23 = vcombine.low %v19693_v53, %v19694_v11  ;;  %v19699_v45 = vld [vmem:[#allocation54_spill] sm:$0xff]  ;;  %v19708_v15 = vld [vmem:[#allocation59_spill] sm:$0xff] }
 0x612   : > { %v10310_v7 = vsel %vm14696_vm6, %v10305_v28, %v10309_v44  ;;  %v10339_v34 = vrot.slane %v10338_v42, 4  ;;  %v12283_v14 = vcombine.low %v10286_v46, %v10296_v60  ;;  %v19682_v44 = vld [vmem:[#allocation40_spill] sm:$0xff]  ;;  %v19698_v37 = vcombine.low %v19696_v50, %v19697_v54 }
 0x613   : > { %v12284_v52 = vcombine.low %v10310_v7, %v10320_v2  ;;  %v19683_v56 = vcombine.low %v19681_v24, %v19682_v44  ;;  %v19706_v19 = vcombine.low %v18239_v16, %v19705_v29  ;;  %v19707_v28 = vcombine.low %v18256_v13, %v18260_v35 }
 0x614   : > { %v10344_v32 = vsel %vm14696_vm6, %v10339_v34, %v10343_v47  ;;  %v19709_v25 = vcombine.low %v18268_v9, %v19708_v15 }
 0x615   : > { %v12285_v40 = vcombine.low %v10334_v41, %v10344_v32 }
 0x617   : > { %13623 = vmatmul.mubr.bf16.gmra.mrb[20].mxu1 %v12281_v21  ;;  %v19701_v21 = vcombine.low %v19699_v45, %v19700_v33 }
 0x618   : > { %13626 = vmatprep.mubr.bf16.mxu1 %v12282_v5  ;;  %v19704_v5 = vcombine.low %v19702_v18, %v19703_v4 }
 0x61f   : > { %13627 = vmatmul.mubr.bf16.gmra.mrb[24].mxu1 %v12283_v14 }
 0x620   : > { %13630 = vmatprep.mubr.bf16.mxu1 %v12284_v52 }
 0x627   : > { %13631 = vmatmul.mubr.bf16.gmra.mrb[28].mxu1 %v12285_v40 }
 0x628   : > { %13650 = vmatprep.mubr.bf16.mxu1 %v19683_v56 }
 0x62f   : > { %13651 = vmatmul.mubr.bf16.vlgmr.msra.gmra.mrb[0].mxu1 %v19686_v17 }
 0x630   : > { %13654 = vmatprep.mubr.bf16.mxu1 %v19689_v6 }
 0x637   : > { %13655 = vmatmul.mubr.bf16.gmra.mrb[4].mxu1 %v19692_v43 }
 0x638   : > { %13658 = vmatprep.mubr.bf16.mxu1 %v19695_v23 }
 0x63f   : > { %13659 = vmatmul.mubr.bf16.gmra.mrb[8].mxu1 %v19698_v37 }
 0x640   : > { %13662 = vmatprep.mubr.bf16.mxu1 %v19701_v21 }
 0x647   : > { %13663 = vmatmul.mubr.bf16.gmra.mrb[12].mxu1 %v19704_v5 }
 0x648   : > { %13666 = vmatprep.mubr.bf16.mxu1 %v19706_v19 }
 0x64f   : > { %13667 = vmatmul.mubr.bf16.gmra.mrb[16].mxu1 %v19707_v28 }
 0x650   : > { %13670 = vmatprep.mubr.bf16.mxu1 %v19709_v25 }
 0x657   : > { %13671 = vmatmul.mubr.bf16.gmra.mrb[20].mxu1 %v12337_v55 }
 0x658   : > { %13674 = vmatprep.mubr.bf16.mxu1 %v12338_v20 }
 0x65f   : > { %13675 = vmatmul.mubr.bf16.gmra.mrb[24].mxu1 %v12339_v58 }
 0x660   : > { %13678 = vmatprep.mubr.bf16.mxu1 %v12340_v31 }
 0x667   : > { %13679 = vmatmul.mubr.bf16.gmra.mrb[28].mxu1 %v12341_v3 }
 0x702   : > { %v18774_v16 = vpop.f32.mrb[0].mxu1 }
 0x703   : > { %v18776_v13 = vpop.f32.mrb[1].mxu1  ;;  %v11205_v27 = vmul.f32 %v18774_v16, %v18774_v16 }
 0x704   : > { %v18778_v57 = vpop.f32.mrb[2].mxu1  ;;  %v11203_v9 = vmul.f32 %v18776_v13, %v18776_v13 }
 0x705   : > { %v18780_v35 = vpop.f32.mrb[3].mxu1  ;;  %v11206_v10 = vmul.f32 %v18778_v57, %v18778_v57 }
 0x706   : > { %v11165_v55 = vadd.f32 %v18780_v35, %v18776_v13  ;;  %v11204_v12 = vmul.f32 %v18780_v35, %v18780_v35 }
 0x708   : > { %v11166_v0 = vadd.f32 %v18774_v16, %v11165_v55  ;;  %v11235_v20 = vadd.f32 %v11204_v12, %v11203_v9 }
 0x70a   : > { %v11236_v30 = vadd.f32 %v11235_v20, %v11205_v27  ;;  %v18793_v58 = vpop.f32.mrb[4].mxu1  ;;  %v11167_v38 = vadd.f32 %v18778_v57, %v11166_v0 }
 0x70b   : > { %v18796_v62 = vpop.f32.mrb[5].mxu1  ;;  %v11209_v46 = vmul.f32 %v18793_v58, %v18793_v58 }
 0x70c   : > { %v11168_v31 = vadd.f32 %v11167_v38, %v18796_v62  ;;  %v11207_v59 = vmul.f32 %v18796_v62, %v18796_v62  ;;  %v11237_v36 = vadd.f32 %v11236_v30, %v11206_v10  ;;  %v18801_v3 = vpop.f32.mrb[6].mxu1 }
 0x70d   : > { %v18803_v26 = vpop.f32.mrb[7].mxu1  ;;  %v11210_v2 = vmul.f32 %v18801_v3, %v18801_v3 }
 0x70e   : > { %v11238_v42 = vadd.f32 %v11237_v36, %v11207_v59  ;;  %v11169_v48 = vadd.f32 %v11168_v31, %v18803_v26  ;;  %v11208_v49 = vmul.f32 %v18803_v26, %v18803_v26 }
 0x710   : > { %v11170_v60 = vadd.f32 %v18793_v58, %v11169_v48  ;;  %v11239_v7 = vadd.f32 %v11238_v42, %v11208_v49 }
 0x712   : > { %v11240_v8 = vadd.f32 %v11239_v7, %v11209_v46  ;;  %v18813_v34 = vpop.f32.mrb[8].mxu1  ;;  %v11171_v47 = vadd.f32 %v18801_v3, %v11170_v60 }
 0x713   : > { %v18816_v14 = vpop.f32.mrb[9].mxu1  ;;  %v11213_v1 = vmul.f32 %v18813_v34, %v18813_v34 }
 0x714   : > { %v11172_v52 = vadd.f32 %v11171_v47, %v18816_v14  ;;  %v11211_v41 = vmul.f32 %v18816_v14, %v18816_v14  ;;  %v11241_v32 = vadd.f32 %v11240_v8, %v11210_v2  ;;  %v18821_v40 = vpop.f32.mrb[10].mxu1 }
 0x715   : > { %v18823_v24 = vpop.f32.mrb[11].mxu1  ;;  %v11214_v51 = vmul.f32 %v18821_v40, %v18821_v40 }
 0x716   : > { %v11242_v44 = vadd.f32 %v11241_v32, %v11211_v41  ;;  %v11173_v56 = vadd.f32 %v11172_v52, %v18823_v24  ;;  %v11212_v22 = vmul.f32 %v18823_v24, %v18823_v24 }
 0x718   : > { %v11174_v17 = vadd.f32 %v18813_v34, %v11173_v56  ;;  %v11243_v61 = vadd.f32 %v11242_v44, %v11212_v22 }
 0x71a   : > { %v11244_v6 = vadd.f32 %v11243_v61, %v11213_v1  ;;  %v18833_v39 = vpop.f32.mrb[12].mxu1  ;;  %v11175_v63 = vadd.f32 %v18821_v40, %v11174_v17 }
 0x71b   : > { %v18836_v43 = vpop.f32.mrb[13].mxu1  ;;  %v11217_v21 = vmul.f32 %v18833_v39, %v18833_v39 }
 0x71c   : > { %v11176_v53 = vadd.f32 %v11175_v63, %v18836_v43  ;;  %v11215_v11 = vmul.f32 %v18836_v43, %v18836_v43  ;;  %v11245_v23 = vadd.f32 %v11244_v6, %v11214_v51  ;;  %v18841_v50 = vpop.f32.mrb[14].mxu1 }
 0x71d   : > { %v18843_v54 = vpop.f32.mrb[15].mxu1  ;;  %v11218_v5 = vmul.f32 %v18841_v50, %v18841_v50 }
 0x71e   : > { %v11246_v37 = vadd.f32 %v11245_v23, %v11215_v11  ;;  %v11177_v45 = vadd.f32 %v11176_v53, %v18843_v54  ;;  %v11216_v33 = vmul.f32 %v18843_v54, %v18843_v54 }
 0x720   : > { %v11178_v18 = vadd.f32 %v18833_v39, %v11177_v45  ;;  %v11247_v4 = vadd.f32 %v11246_v37, %v11216_v33 }
 0x722   : > { %v11248_v29 = vadd.f32 %v11247_v4, %v11217_v21  ;;  %v18853_v19 = vpop.f32.mrb[16].mxu1  ;;  %v11179_v28 = vadd.f32 %v18841_v50, %v11178_v18 }
 0x723   : > { %v18856_v15 = vpop.f32.mrb[17].mxu1  ;;  %v11221_v30 = vmul.f32 %v18853_v19, %v18853_v19 }
 0x724   : > { %v11180_v25 = vadd.f32 %v11179_v28, %v18856_v15  ;;  %v11219_v9 = vmul.f32 %v18856_v15, %v18856_v15  ;;  %v11249_v55 = vadd.f32 %v11248_v29, %v11218_v5  ;;  %v18861_v12 = vpop.f32.mrb[18].mxu1 }
 0x725   : > { %v18863_v27 = vpop.f32.mrb[19].mxu1  ;;  %v11222_v59 = vmul.f32 %v18861_v12, %v18861_v12 }
 0x726   : > { %v11250_v0 = vadd.f32 %v11249_v55, %v11219_v9  ;;  %v11181_v20 = vadd.f32 %v11180_v25, %v18863_v27  ;;  %v11220_v10 = vmul.f32 %v18863_v27, %v18863_v27 }
 0x728   : > { %v11182_v38 = vadd.f32 %v18853_v19, %v11181_v20  ;;  %v11251_v31 = vadd.f32 %v11250_v0, %v11220_v10 }
 0x72a   : > { %v11252_v36 = vadd.f32 %v11251_v31, %v11221_v30  ;;  %v18873_v42 = vpop.f32.mrb[20].mxu1  ;;  %v11183_v48 = vadd.f32 %v18861_v12, %v11182_v38 }
 0x72b   : > { %v18876_v49 = vpop.f32.mrb[21].mxu1  ;;  %v11225_v32 = vmul.f32 %v18873_v42, %v18873_v42 }
 0x72c   : > { %v11184_v46 = vadd.f32 %v11183_v48, %v18876_v49  ;;  %v11223_v60 = vmul.f32 %v18876_v49, %v18876_v49  ;;  %v11253_v7 = vadd.f32 %v11252_v36, %v11222_v59  ;;  %v18881_v2 = vpop.f32.mrb[22].mxu1 }
 0x72d   : > { %v18883_v8 = vpop.f32.mrb[23].mxu1  ;;  %v11226_v22 = vmul.f32 %v18881_v2, %v18881_v2 }
 0x72e   : > { %v11254_v47 = vadd.f32 %v11253_v7, %v11223_v60  ;;  %v11185_v52 = vadd.f32 %v11184_v46, %v18883_v8  ;;  %v11224_v41 = vmul.f32 %v18883_v8, %v18883_v8 }
 0x730   : > { %v11186_v44 = vadd.f32 %v18873_v42, %v11185_v52  ;;  %v11255_v56 = vadd.f32 %v11254_v47, %v11224_v41 }
 0x732   : > { %v11256_v1 = vadd.f32 %v11255_v56, %v11225_v32  ;;  %v18893_v17 = vpop.f32.mrb[24].mxu1  ;;  %v11187_v61 = vadd.f32 %v18881_v2, %v11186_v44 }
 0x733   : > { %v18896_v51 = vpop.f32.mrb[25].mxu1  ;;  %v11229_v21 = vmul.f32 %v18893_v17, %v18893_v17 }
 0x734   : > { %v11188_v6 = vadd.f32 %v11187_v61, %v18896_v51  ;;  %v11227_v63 = vmul.f32 %v18896_v51, %v18896_v51  ;;  %v11257_v53 = vadd.f32 %v11256_v1, %v11226_v22  ;;  %v18901_v11 = vpop.f32.mrb[26].mxu1 }
 0x735   : > { %v18903_v23 = vpop.f32.mrb[27].mxu1  ;;  %v11230_v5 = vmul.f32 %v18901_v11, %v18901_v11 }
 0x736   : > { %v11258_v37 = vadd.f32 %v11257_v53, %v11227_v63  ;;  %v11189_v45 = vadd.f32 %v11188_v6, %v18903_v23  ;;  %v11228_v33 = vmul.f32 %v18903_v23, %v18903_v23 }
 0x738   : > { %v11190_v18 = vadd.f32 %v18893_v17, %v11189_v45  ;;  %v11259_v4 = vadd.f32 %v11258_v37, %v11228_v33 }
 0x73a   : > { %v11260_v29 = vadd.f32 %v11259_v4, %v11229_v21  ;;  %v18913_v28 = vpop.f32.mrb[28].mxu1  ;;  %v11191_v25 = vadd.f32 %v18901_v11, %v11190_v18 }
 0x73b   : > { %v18916_v9 = vpop.f32.mrb[29].mxu1  ;;  %v11233_v36 = vmul.f32 %v18913_v28, %v18913_v28 }
 0x73c   : > { %v11192_v55 = vadd.f32 %v11191_v25, %v18916_v9  ;;  %v11231_v0 = vmul.f32 %v18916_v9, %v18916_v9  ;;  %v11261_v20 = vadd.f32 %v11260_v29, %v11230_v5  ;;  %v18921_v10 = vpop.f32.mrb[30].mxu1 }
 0x73d   : > { %v18923_v30 = vpop.f32.mrb[31].mxu1  ;;  %v11234_v60 = vmul.f32 %v18921_v10, %v18921_v10 }
 0x73e   : > { %v11262_v38 = vadd.f32 %v11261_v20, %v11231_v0  ;;  %v11193_v31 = vadd.f32 %v11192_v55, %v18923_v30  ;;  %v11232_v59 = vmul.f32 %v18923_v30, %v18923_v30 }
 0x740   : > { %v11194_v48 = vadd.f32 %v18913_v28, %v11193_v31  ;;  %v11263_v46 = vadd.f32 %v11262_v38, %v11232_v59 }
 0x742   : > { %v11195_v7 = vadd.f32 %v18921_v10, %v11194_v48  ;;  %v11264_v47 = vadd.f32 %v11263_v46, %v11233_v36 }
 0x744   : > { %v11196_v52 = vrot.slane %v11195_v7, 4  ;;  %v11265_v41 = vadd.f32 %v11264_v47, %v11234_v60 }
 0x746   : > { %v11197_v32 = vadd.f32 %v11196_v52, %v11195_v7  ;;  %v11266_v44 = vrot.slane %v11265_v41, 4 }
 0x748   : > { %v11198_v56 = vrot.slane %v11197_v32, 2  ;;  %v11267_v22 = vadd.f32 %v11266_v44, %v11265_v41 }
 0x74a   : > { %v11199_v1 = vadd.f32 %v11198_v56, %v11197_v32  ;;  %v11268_v61 = vrot.slane %v11267_v22, 2 }
 0x74c   : > { %v11200_v6 = vrot.slane %v11199_v1, 1  ;;  %v11269_v63 = vadd.f32 %v11268_v61, %v11267_v22 }
 0x74e   : > { %v11201_v53 = vadd.f32 %v11200_v6, %v11199_v1  ;;  %v11270_v37 = vrot.slane %v11269_v63, 1 }
 0x750   : > { %v18934_v45 = vmul.f32 0.00390625, %v11201_v53  ;;  %v11271_v33 = vadd.f32 %v11270_v37, %v11269_v63 }
 0x752   : > { %v11272_v21 = vmul.f32 0.00390625, %v11271_v33  ;;  %v11273_v18 = vmul.f32 %v18934_v45, %v18934_v45  ;;  %v11276_v4 = vsub.f32 %v18776_v13, %v18934_v45  ;;  %v11277_v5 = vsub.f32 %v18780_v35, %v18934_v45 }
 0x753   : > { %v11278_v29 = vsub.f32 %v18774_v16, %v18934_v45  ;;  %v11279_v25 = vsub.f32 %v18778_v57, %v18934_v45  ;;  %v11280_v55 = vsub.f32 %v18796_v62, %v18934_v45  ;;  %v11281_v0 = vsub.f32 %v18803_v26, %v18934_v45 }
 0x754   : > { %v11274_v20 = vsub.f32 %v11272_v21, %v11273_v18  ;;  %v11282_v38 = vsub.f32 %v18793_v58, %v18934_v45  ;;  %v11283_v13 = vsub.f32 %v18801_v3, %v18934_v45  ;;  %v11284_v35 = vsub.f32 %v18816_v14, %v18934_v45 }
 0x755   : > { %v11285_v16 = vsub.f32 %v18823_v24, %v18934_v45  ;;  %v11286_v57 = vsub.f32 %v18813_v34, %v18934_v45  ;;  %v11287_v62 = vsub.f32 %v18821_v40, %v18934_v45  ;;  %v11288_v26 = vsub.f32 %v18836_v43, %v18934_v45 }
 0x756   : > { %v11275_v31 = vmax.f32 %v11274_v20, 0.0  ;;  %v11289_v58 = vsub.f32 %v18843_v54, %v18934_v45  ;;  %v11290_v3 = vsub.f32 %v18833_v39, %v18934_v45  ;;  %v11291_v14 = vsub.f32 %v18841_v50, %v18934_v45 }
 0x757   : > { %v11292_v24 = vsub.f32 %v18856_v15, %v18934_v45  ;;  %v11293_v34 = vsub.f32 %v18863_v27, %v18934_v45  ;;  %v11294_v40 = vsub.f32 %v18853_v19, %v18934_v45  ;;  %v11295_v43 = vsub.f32 %v18861_v12, %v18934_v45 }
 0x758   : > { %v11296_v54 = vsub.f32 %v18876_v49, %v18934_v45  ;;  %v11297_v39 = vsub.f32 %v18883_v8, %v18934_v45  ;;  %v11298_v50 = vsub.f32 %v18873_v42, %v18934_v45  ;;  %v11299_v15 = vsub.f32 %v18881_v2, %v18934_v45 }
 0x759   : > { %v11300_v27 = vsub.f32 %v18896_v51, %v18934_v45  ;;  %v11301_v19 = vsub.f32 %v18903_v23, %v18934_v45  ;;  %v11302_v12 = vsub.f32 %v18893_v17, %v18934_v45  ;;  %v11303_v49 = vsub.f32 %v18901_v11, %v18934_v45 }
 0x75a   : > { %v11304_v8 = vsub.f32 %v18916_v9, %v18934_v45  ;;  %v11305_v42 = vsub.f32 %v18923_v30, %v18934_v45  ;;  %v11306_v2 = vsub.f32 %v18913_v28, %v18934_v45  ;;  %v11307_v51 = vsub.f32 %v18921_v10, %v18934_v45 }
 0x75b   : > { %v11308_v59 = vadd.f32 1e-05, %v11275_v31 }
 0x75d   : > { %14445 = vrsqrt.f32 %v11308_v59 }
 0x767   : > { %v14446_v23 = vpop.eup %14445 }
 0x768   : > { %v19002_v36 = vmul.f32 %v14446_v23, %v11276_v4  ;;  %v19004_v17 = vmul.f32 %v14446_v23, %v11277_v5  ;;  %v19006_v11 = vmul.f32 %v14446_v23, %v11278_v29  ;;  %v19008_v48 = vmul.f32 %v14446_v23, %v11279_v25 }
 0x769   : > { %v19010_v9 = vmul.f32 %v14446_v23, %v11280_v55  ;;  %v19012_v30 = vmul.f32 %v14446_v23, %v11281_v0  ;;  %v19014_v46 = vmul.f32 %v14446_v23, %v11282_v38  ;;  %v19016_v28 = vmul.f32 %v14446_v23, %v11283_v13 }
 0x76a   : > { %v19018_v10 = vmul.f32 %v14446_v23, %v11284_v35  ;;  %v19020_v60 = vmul.f32 %v14446_v23, %v11285_v16  ;;  %v19022_v7 = vmul.f32 %v14446_v23, %v11286_v57  ;;  %v19024_v47 = vmul.f32 %v14446_v23, %v11287_v62 }
 0x76b   : > { %v19026_v52 = vmul.f32 %v14446_v23, %v11288_v26  ;;  %v19028_v41 = vmul.f32 %v14446_v23, %v11289_v58  ;;  %v19030_v32 = vmul.f32 %v14446_v23, %v11290_v3  ;;  %v19032_v44 = vmul.f32 %v14446_v23, %v11291_v14 }
 0x76c   : > { %v19034_v56 = vmul.f32 %v14446_v23, %v11292_v24  ;;  %v19036_v22 = vmul.f32 %v14446_v23, %v11293_v34  ;;  %v19038_v1 = vmul.f32 %v14446_v23, %v11294_v40  ;;  %v19040_v61 = vmul.f32 %v14446_v23, %v11295_v43 }
 0x76d   : > { %v19042_v6 = vmul.f32 %v14446_v23, %v11296_v54  ;;  %v19044_v63 = vmul.f32 %v14446_v23, %v11297_v39  ;;  %v19046_v53 = vmul.f32 %v14446_v23, %v11298_v50  ;;  %v19048_v37 = vmul.f32 %v14446_v23, %v11299_v15 }
 0x76e   : > { %v19050_v45 = vmul.f32 %v14446_v23, %v11300_v27  ;;  %v19052_v33 = vmul.f32 %v14446_v23, %v11301_v19  ;;  %v19054_v21 = vmul.f32 %v14446_v23, %v11302_v12  ;;  %v19056_v18 = vmul.f32 %v14446_v23, %v11303_v49 }
 0x76f   : > { %v19058_v4 = vmul.f32 %v14446_v23, %v11304_v8  ;;  %v19060_v5 = vmul.f32 %v14446_v23, %v11305_v42  ;;  %v19062_v29 = vmul.f32 %v14446_v23, %v11306_v2  ;;  %v19064_v25 = vmul.f32 %v14446_v23, %v11307_v51 }
 0x770   : > { %vm11342_vm6 = vcmp.ge.f32.partialorder %v19002_v36, 0.0  ;;  %vm11343_vm8 = vcmp.ge.f32.partialorder %v19004_v17, 0.0  ;;  %vm11344_vm9 = vcmp.ge.f32.partialorder %v19006_v11, 0.0  ;;  %vm11345_vm10 = vcmp.ge.f32.partialorder %v19008_v48, 0.0 }
 0x771   : > { %vm11346_vm13 = vcmp.ge.f32.partialorder %v19010_v9, 0.0  ;;  %vm11347_vm1 = vcmp.ge.f32.partialorder %v19012_v30, 0.0  ;;  %vm11348_vm3 = vcmp.ge.f32.partialorder %v19014_v46, 0.0  ;;  %vm11349_vm0 = vcmp.ge.f32.partialorder %v19016_v28, 0.0 }
 0x772   : > { %vm11350_vm7 = vcmp.ge.f32.partialorder %v19018_v10, 0.0  ;;  %v11374_v55 = vmul.f32 0.2, %v19002_v36  ;;  %v11375_v0 = vmul.f32 0.2, %v19004_v17  ;;  %vm11357_vm5 = vcmp.ge.f32.partialorder %v19032_v44, 0.0 }
 0x773   : > { %v11376_v20 = vmul.f32 0.2, %v19006_v11  ;;  %vm11358_vm11 = vcmp.ge.f32.partialorder %v19034_v56, 0.0  ;;  %v11377_v38 = vmul.f32 0.2, %v19008_v48  ;;  %vm11363_vm4 = vcmp.ge.f32.partialorder %v19044_v63, 0.0 }
 0x774   : > { %v11378_v13 = vmul.f32 0.2, %v19010_v9  ;;  %v11379_v35 = vmul.f32 0.2, %v19012_v30  ;;  %v11380_v16 = vmul.f32 0.2, %v19014_v46  ;;  %v11406_v26 = vsel %vm11342_vm6, %v19002_v36, %v11374_v55 }
 0x775   : > { %v11381_v57 = vmul.f32 0.2, %v19016_v28  ;;  %v11382_v62 = vmul.f32 0.2, %v19018_v10  ;;  %vm11364_vm12 = vcmp.ge.f32.partialorder %v19046_v53, 0.0  ;;  %v11407_v14 = vsel %vm11343_vm8, %v19004_v17, %v11375_v0  ;;  %11438 = vst [vmem:[%s19080_s9] sm:$0xff] %v11406_v26 }
 0x776   : > { %v11383_v31 = vmul.f32 0.2, %v19020_v60  ;;  %v11384_v58 = vmul.f32 0.2, %v19022_v7  ;;  %v11385_v3 = vmul.f32 0.2, %v19024_v47  ;;  %v11408_v43 = vsel %vm11344_vm9, %v19006_v11, %v11376_v20 }
 0x777   : > { %vm11368_vm6 = vcmp.ge.f32.partialorder %v19054_v21, 0.0  ;;  %vm11370_vm15 = vcmp.ge.f32.partialorder %v19058_v4, 0.0  ;;  %vm11371_vm14 = vcmp.ge.f32.partialorder %v19060_v5, 0.0  ;;  %v11386_v24 = vmul.f32 0.2, %v19026_v52  ;;  %11439 = vst [vmem:[%s19080_s9 + $0x8] sm:$0xff] %v11407_v14 }
 0x778   : > { %v11387_v34 = vmul.f32 0.2, %v19028_v41  ;;  %v11388_v40 = vmul.f32 0.2, %v19030_v32  ;;  %vm11372_vm8 = vcmp.ge.f32.partialorder %v19062_v29, 0.0  ;;  %vm11373_vm2 = vcmp.ge.f32.partialorder %v19064_v25, 0.0 }
 0x779   : > { %v11389_v54 = vmul.f32 0.2, %v19032_v44  ;;  %v11390_v39 = vmul.f32 0.2, %v19034_v56  ;;  %v11391_v50 = vmul.f32 0.2, %v19036_v22  ;;  %v11409_v15 = vsel %vm11345_vm10, %v19008_v48, %v11377_v38 }
 0x77a   : > { %11440 = vst [vmem:[%s19080_s9 + $0x10] sm:$0xff] %v11408_v43  ;;  %v11392_v27 = vmul.f32 0.2, %v19038_v1  ;;  %v11393_v19 = vmul.f32 0.2, %v19040_v61  ;;  %v11410_v49 = vsel %vm11346_vm13, %v19010_v9, %v11378_v13  ;;  %11441 = vst [vmem:[%s19080_s9 + $0x18] sm:$0xff] %v11409_v15  ;;  %v11411_v51 = vsel %vm11347_vm1, %v19012_v30, %v11379_v35 }
 0x77b   : > { %v11394_v12 = vmul.f32 0.2, %v19042_v6  ;;  %v11395_v8 = vmul.f32 0.2, %v19044_v63  ;;  %v11396_v42 = vmul.f32 0.2, %v19046_v53  ;;  %v11412_v17 = vsel %vm11348_vm3, %v19014_v46, %v11380_v16 }
 0x77c   : > { %v11397_v2 = vmul.f32 0.2, %v19048_v37  ;;  %11442 = vst [vmem:[%s19080_s9 + $0x20] sm:$0xff] %v11410_v49  ;;  %v11398_v59 = vmul.f32 0.2, %v19050_v45  ;;  %11443 = vst [vmem:[%s19080_s9 + $0x28] sm:$0xff] %v11411_v51  ;;  %v11413_v30 = vsel %vm11349_vm0, %v19016_v28, %v11381_v57  ;;  %v11414_v0 = vsel %vm11350_vm7, %v19018_v10, %v11382_v62 }
 0x77d   : > { %v11399_v23 = vmul.f32 0.2, %v19052_v33  ;;  %v11400_v36 = vmul.f32 0.2, %v19054_v21  ;;  %v11401_v11 = vmul.f32 0.2, %v19056_v18 }
 0x77e   : > { %v11402_v48 = vmul.f32 0.2, %v19058_v4  ;;  %v11403_v9 = vmul.f32 0.2, %v19060_v5  ;;  %11444 = vst [vmem:[%s19080_s9 + $0x30] sm:$0xff] %v11412_v17  ;;  %vm19710_vm9 = vcmp.ge.f32.partialorder %v19020_v60, 0.0 }
 0x77f   : > { %v11404_v55 = vmul.f32 0.2, %v19062_v29  ;;  %v11405_v46 = vmul.f32 0.2, %v19064_v25  ;;  %v11415_v20 = vsel %vm19710_vm9, %v19020_v60, %v11383_v31  ;;  %11445 = vst [vmem:[%s19080_s9 + $0x38] sm:$0xff] %v11413_v30  ;;  %vm19711_vm10 = vcmp.ge.f32.partialorder %v19022_v7, 0.0 }
 0x780   : > { %v11416_v28 = vsel %vm19711_vm10, %v19022_v7, %v11384_v58  ;;  %vm19712_vm13 = vcmp.ge.f32.partialorder %v19024_v47, 0.0  ;;  %vm19713_vm1 = vcmp.ge.f32.partialorder %v19026_v52, 0.0  ;;  %vm19714_vm3 = vcmp.ge.f32.partialorder %v19028_v41, 0.0  ;;  %11446 = vst [vmem:[%s19080_s9 + $0x40] sm:$0xff] %v11414_v0  ;;  %11447 = vst [vmem:[%s19080_s9 + $0x48] sm:$0xff] %v11415_v20 }
 0x781   : > { %v11417_v38 = vsel %vm19712_vm13, %v19024_v47, %v11385_v3  ;;  %v11418_v13 = vsel %vm19713_vm1, %v19026_v52, %v11386_v24  ;;  %v11419_v10 = vsel %vm19714_vm3, %v19028_v41, %v11387_v34  ;;  %vm19715_vm0 = vcmp.ge.f32.partialorder %v19030_v32, 0.0  ;;  %11448 = vst [vmem:[%s19080_s9 + $0x50] sm:$0xff] %v11416_v28 }
 0x782   : > { %v11420_v60 = vsel %vm19715_vm0, %v19030_v32, %v11388_v40  ;;  %v11421_v7 = vsel %vm11357_vm5, %v19032_v44, %v11389_v54  ;;  %v11422_v47 = vsel %vm11358_vm11, %v19034_v56, %v11390_v39  ;;  %vm19716_vm7 = vcmp.ge.f32.partialorder %v19036_v22, 0.0  ;;  %11449 = vst [vmem:[%s19080_s9 + $0x58] sm:$0xff] %v11417_v38  ;;  %11450 = vst [vmem:[%s19080_s9 + $0x60] sm:$0xff] %v11418_v13 }
 0x783   : > { %v11423_v52 = vsel %vm19716_vm7, %v19036_v22, %v11391_v50  ;;  %11451 = vst [vmem:[%s19080_s9 + $0x68] sm:$0xff] %v11419_v10  ;;  %vm19717_vm9 = vcmp.ge.f32.partialorder %v19038_v1, 0.0  ;;  %vm19718_vm5 = vcmp.ge.f32.partialorder %v19040_v61, 0.0  ;;  %vm19719_vm11 = vcmp.ge.f32.partialorder %v19042_v6, 0.0  ;;  %11452 = vst [vmem:[%s19080_s9 + $0x70] sm:$0xff] %v11420_v60 }
 0x784   : > { %v11424_v41 = vsel %vm19717_vm9, %v19038_v1, %v11392_v27  ;;  %v11425_v32 = vsel %vm19718_vm5, %v19040_v61, %v11393_v19  ;;  %v11426_v44 = vsel %vm19719_vm11, %v19042_v6, %v11394_v12  ;;  %v11427_v56 = vsel %vm11363_vm4, %v19044_v63, %v11395_v8  ;;  %11453 = vst [vmem:[%s19080_s9 + $0x78] sm:$0xff] %v11421_v7 }
 0x785   : > { %11454 = vst [vmem:[%s19080_s9 + $0x80] sm:$0xff] %v11422_v47  ;;  %11455 = vst [vmem:[%s19080_s9 + $0x88] sm:$0xff] %v11423_v52  ;;  %v11428_v22 = vsel %vm11364_vm12, %v19046_v53, %v11396_v42  ;;  %vm19720_vm10 = vcmp.ge.f32.partialorder %v19048_v37, 0.0  ;;  %vm19721_vm13 = vcmp.ge.f32.partialorder %v19050_v45, 0.0  ;;  %vm19722_vm4 = vcmp.ge.f32.partialorder %v19052_v33, 0.0 }
 0x786   : > { %v11429_v1 = vsel %vm19720_vm10, %v19048_v37, %v11397_v2  ;;  %v11430_v61 = vsel %vm19721_vm13, %v19050_v45, %v11398_v59  ;;  %v11431_v6 = vsel %vm19722_vm4, %v19052_v33, %v11399_v23  ;;  %11456 = vst [vmem:[%s19080_s9 + $0x90] sm:$0xff] %v11424_v41  ;;  %11457 = vst [vmem:[%s19080_s9 + $0x98] sm:$0xff] %v11425_v32  ;;  %vm19723_vm12 = vcmp.ge.f32.partialorder %v19056_v18, 0.0 }
 0x787   : > { %11458 = vst [vmem:[%s19080_s9 + $0xa0] sm:$0xff] %v11426_v44  ;;  %11459 = vst [vmem:[%s19080_s9 + $0xa8] sm:$0xff] %v11427_v56  ;;  %v11432_v63 = vsel %vm11368_vm6, %v19054_v21, %v11400_v36  ;;  %v11433_v53 = vsel %vm19723_vm12, %v19056_v18, %v11401_v11  ;;  %v11434_v37 = vsel %vm11370_vm15, %v19058_v4, %v11402_v48 }
 0x788   : > { %v11435_v45 = vsel %vm11371_vm14, %v19060_v5, %v11403_v9  ;;  %11460 = vst [vmem:[%s19080_s9 + $0xb0] sm:$0xff] %v11428_v22  ;;  %11461 = vst [vmem:[%s19080_s9 + $0xb8] sm:$0xff] %v11429_v1  ;;  %v11436_v33 = vsel %vm11372_vm8, %v19062_v29, %v11404_v55  ;;  %v11437_v21 = vsel %vm11373_vm2, %v19064_v25, %v11405_v46 }
 0x789   : > { %11462 = vst [vmem:[%s19080_s9 + $0xc0] sm:$0xff] %v11430_v61  ;;  %11463 = vst [vmem:[%s19080_s9 + $0xc8] sm:$0xff] %v11431_v6 }
 0x78a   : > { %11464 = vst [vmem:[%s19080_s9 + $0xd0] sm:$0xff] %v11432_v63  ;;  %11465 = vst [vmem:[%s19080_s9 + $0xd8] sm:$0xff] %v11433_v53 }
 0x78b   : > { %11466 = vst [vmem:[%s19080_s9 + $0xe0] sm:$0xff] %v11434_v37  ;;  %11467 = vst [vmem:[%s19080_s9 + $0xe8] sm:$0xff] %v11435_v45 }
 0x78c   : > { %11468 = vst [vmem:[%s19080_s9 + $0xf0] sm:$0xff] %v11436_v33  ;;  %11469 = vst [vmem:[%s19080_s9 + $0xf8] sm:$0xff] %v11437_v21 }
 0x78d PF: > { %s13_s12 = sadd.s32 1, %s14519_s12  }
 0x78e   : > { %p10_p4 = scmp.ge.s32.totalorder %s13_s12, 4  }
 0x790   :  { %12 = sbr.rel (!%p10_p4) target bundleno = 1 (0x1), region = 82 }

</bundles_post_ra>
